<compile_context>
chip_gen: v7x
topology: tpu7x:2x2x1
jax: 0.10.0
libtpu: 0.0.40
codegen_flags: <defaults>
</compile_context>

<pallas_src>
import functools

import jax
import jax.numpy as jnp
from jax import lax
from jax.experimental import pallas as pl
from jax.experimental.pallas import tpu as pltpu

LEAKY_SLOPE = 0.1
BN_EPS = 1e-5
LANE = 128
VMEM_LIMIT = 32 * 1024 * 1024


def _round_up(x, m):
    return (x + m - 1) // m * m


# ----------------------------------------------------------------------------
# Kernel 1: fused conv_for_P5 (512->256, 1x1) + Upsample's BasicConv
#           (256->128, 1x1).  Single full-K matmuls; BN scale pre-folded into
#           the bf16 weights; bias + LeakyReLU epilogue.  Two outputs.
# ----------------------------------------------------------------------------
def _p5_up_kernel(x_ref, wp_ref, bp_ref, wu_ref, bu_ref, p5_ref, up_ref):
    p5 = jnp.dot(x_ref[...], wp_ref[...],
                 preferred_element_type=jnp.float32) + bp_ref[...]
    p5 = jnp.maximum(p5, LEAKY_SLOPE * p5)          # LeakyReLU(0.1)
    p5b = p5.astype(p5_ref.dtype)
    p5_ref[...] = p5b
    up = jnp.dot(p5b, wu_ref[...],
                 preferred_element_type=jnp.float32) + bu_ref[...]
    up = jnp.maximum(up, LEAKY_SLOPE * up)
    up_ref[...] = up.astype(up_ref.dtype)


def conv_p5_and_upsample_branch(feat2_nhwc, p5_p, up_p):
    """Returns (P5 (N,H,W,256) bf16, up (N,H,W,128) bf16)."""
    n, h, w, c = feat2_nhwc.shape
    m = n * h * w
    x2d = feat2_nhwc.reshape(m, c).astype(jnp.bfloat16)

    tm = min(256, _round_up(m, 16))
    c_p5 = p5_p["w"].shape[1]
    c_up = up_p["w"].shape[1]

    p5, up = pl.pallas_call(
        _p5_up_kernel,
        out_shape=(jax.ShapeDtypeStruct((m, c_p5), jnp.bfloat16),
                   jax.ShapeDtypeStruct((m, c_up), jnp.bfloat16)),
        grid=(pl.cdiv(m, tm),),
        in_specs=[
            pl.BlockSpec((tm, c), lambda i: (i, 0)),
            pl.BlockSpec((c, c_p5), lambda i: (0, 0)),
            pl.BlockSpec((1, c_p5), lambda i: (0, 0)),
            pl.BlockSpec((c_p5, c_up), lambda i: (0, 0)),
            pl.BlockSpec((1, c_up), lambda i: (0, 0)),
        ],
        out_specs=(pl.BlockSpec((tm, c_p5), lambda i: (i, 0)),
                   pl.BlockSpec((tm, c_up), lambda i: (i, 0))),
        compiler_params=pltpu.CompilerParams(
            dimension_semantics=("parallel",),
            vmem_limit_bytes=VMEM_LIMIT),
    )(x2d, p5_p["w"], p5_p["b"], up_p["w"], up_p["b"])
    return p5.reshape(n, h, w, c_p5), up.reshape(n, h, w, c_up)


# ----------------------------------------------------------------------------
# Kernel 2: fused yolo_head = BasicConv(cin, cmid, 3) + Conv2d(cmid, cout, 1)
#   In-kernel im2col: input(s) are per-image flat (H+3)*(W+2) row blocks of a
#   spatially padded image; each of the 9 taps is a static row-offset slice.
#   Supports multiple channel-split sources (fused concat for the P4 path).
# ----------------------------------------------------------------------------
def _make_head_kernel(n_src, taps, lout):
    def kernel(*refs):
        x_refs = refs[:n_src]
        w_refs = refs[n_src:2 * n_src]
        b1_ref, w2_ref, b2_ref, o_ref = refs[2 * n_src:]
        acc = None
        for s in range(n_src):
            for t, off in enumerate(taps):
                xs = x_refs[s][0, off:off + lout, :]
                d = jnp.dot(xs, w_refs[s][t],
                            preferred_element_type=jnp.float32)
                acc = d if acc is None else acc + d
        y = acc + b1_ref[...]
        y = jnp.maximum(y, LEAKY_SLOPE * y)          # LeakyReLU(0.1)
        out = jnp.dot(y.astype(w2_ref.dtype), w2_ref[...],
                      preferred_element_type=jnp.float32) + b2_ref[...]
        o_ref[0] = out.astype(o_ref.dtype)
    return kernel


def conv3x3_head_fused(sources, w9_list, b1, w2p, b2p, n_out):
    """3x3 conv (stride 1, pad 1) over the channel-concat of `sources`, with
    folded BN + LeakyReLU, then 1x1 head conv + bias.  Returns (N,H,W,n_out).
    sources: list of bf16 NHWC arrays with identical (N,H,W);
    w9_list: per-source folded weights of shape (9, C_s, cmid) bf16."""
    n, h, w, _ = sources[0].shape
    wp2 = w + 2
    lp = (h + 3) * wp2          # padded flat rows per image
    lout = h * wp2              # computed output rows per image (incl. 2 wrap cols)
    cmid = w2p.shape[0]
    n_pad = w2p.shape[1]
    taps = [di * wp2 + dj for di in range(3) for dj in range(3)]

    flats = []
    for s in sources:
        xp = jnp.pad(s, ((0, 0), (1, 2), (1, 1), (0, 0)))
        flats.append(xp.reshape(n, lp, s.shape[-1]).astype(jnp.bfloat16))

    n_src = len(sources)
    kernel = _make_head_kernel(n_src, taps, lout)

    in_specs = (
        [pl.BlockSpec((1, lp, f.shape[-1]), lambda i: (i, 0, 0)) for f in flats]
        + [pl.BlockSpec(w9.shape, lambda i: (0, 0, 0)) for w9 in w9_list]
        + [pl.BlockSpec((1, cmid), lambda i: (0, 0)),
           pl.BlockSpec((cmid, n_pad), lambda i: (0, 0)),
           pl.BlockSpec((1, n_pad), lambda i: (0, 0))])

    out = pl.pallas_call(
        kernel,
        out_shape=jax.ShapeDtypeStruct((n, lout, n_pad), jnp.float32),
        grid=(n,),
        in_specs=in_specs,
        out_specs=pl.BlockSpec((1, lout, n_pad), lambda i: (i, 0, 0)),
        compiler_params=pltpu.CompilerParams(
            dimension_semantics=("parallel",),
            vmem_limit_bytes=VMEM_LIMIT),
    )(*flats, *w9_list, b1, w2p, b2p)

    # Drop the 2 wrap-around columns per row and the lane padding.
    return out.reshape(n, h, wp2, n_pad)[:, :, :w, :n_out]


def upsample_nearest2x(x):
    """nn.Upsample(scale_factor=2, mode='nearest') on NHWC."""
    return jnp.repeat(jnp.repeat(x, 2, axis=1), 2, axis=2)


# ----------------------------------------------------------------------------
# Deterministic parameter init (shapes from the module __init__); BN folding.
# ----------------------------------------------------------------------------
def make_basic_conv_params(key, cin, cout, ksize, split=None):
    kw_, kg, kb, km, kv = jax.random.split(key, 5)
    w = 0.05 * jax.random.normal(kw_, (cout, cin, ksize, ksize), jnp.float32)
    gamma = 1.0 + 0.1 * jax.random.normal(kg, (cout,), jnp.float32)
    beta = 0.1 * jax.random.normal(kb, (cout,), jnp.float32)
    mean = 0.1 * jax.random.normal(km, (cout,), jnp.float32)
    var = 0.5 + jnp.abs(jax.random.normal(kv, (cout,), jnp.float32))

    scale = gamma / jnp.sqrt(var + BN_EPS)
    bn_bias = beta - mean * scale
    # PyTorch (Cout,Cin,kh,kw) -> (kh,kw,Cin,Cout); fold BN scale into weights.
    wt = jnp.transpose(w, (2, 3, 1, 0)) * scale
    p = dict(w4d=w, scale=scale, bn_bias=bn_bias, ksize=ksize,
             b=bn_bias.reshape(1, cout).astype(jnp.float32))
    if ksize == 1:
        p["w"] = wt.reshape(cin, cout).astype(jnp.bfloat16)
    else:
        w9 = wt.reshape(ksize * ksize, cin, cout).astype(jnp.bfloat16)
        p["w9"] = w9
        if split is not None:                         # per-source channel splits
            p["w9_split"] = [w9[:, a:b, :] for (a, b) in split]
    return p


def make_head_out_params(key, cin, cout):
    kw_, kb = jax.random.split(key)
    w = 0.05 * jax.random.normal(kw_, (cout, cin, 1, 1), jnp.float32)
    b = 0.1 * jax.random.normal(kb, (cout,), jnp.float32)
    w2d = jnp.transpose(w, (2, 3, 1, 0)).reshape(cin, cout)
    n_pad = _round_up(cout, LANE)                     # lane-dense head output
    w2p = jnp.pad(w2d, ((0, 0), (0, n_pad - cout))).astype(jnp.bfloat16)
    b2p = jnp.pad(b, (0, n_pad - cout)).reshape(1, n_pad).astype(jnp.float32)
    return dict(w2p=w2p, b2p=b2p, n_out=cout, w2d=w2d, b=b)


def init_yolo_body(key, anchors_mask, num_classes):
    keys = jax.random.split(key, 6)
    out0_ch = len(anchors_mask[0]) * (5 + num_classes)
    out1_ch = len(anchors_mask[1]) * (5 + num_classes)
    return dict(
        conv_for_P5=make_basic_conv_params(keys[0], 512, 256, 1),
        headP5_conv=make_basic_conv_params(keys[1], 256, 512, 3),
        headP5_out=make_head_out_params(keys[2], 512, out0_ch),
        upsample_conv=make_basic_conv_params(keys[3], 256, 128, 1),
        headP4_conv=make_basic_conv_params(keys[4], 384, 256, 3,
                                           split=[(0, 128), (128, 384)]),
        headP4_out=make_head_out_params(keys[5], 256, out1_ch),
    )


# ----------------------------------------------------------------------------
# YoloBody.forward (phi=0 -> no attention blocks)
# ----------------------------------------------------------------------------
def yolo_body_forward(params, feat1_nchw, feat2_nchw):
    feat1 = jnp.transpose(feat1_nchw, (0, 2, 3, 1)).astype(jnp.bfloat16)
    feat2 = jnp.transpose(feat2_nchw, (0, 2, 3, 1)).astype(jnp.bfloat16)

    # conv_for_P5 (512->256) + Upsample's conv (256->128), one kernel.
    P5, up = conv_p5_and_upsample_branch(
        feat2, params["conv_for_P5"], params["upsample_conv"])

    # yolo_headP5: BasicConv(256,512,3) + Conv2d(512,21,1), one kernel.
    h5, o5 = params["headP5_conv"], params["headP5_out"]
    out0 = conv3x3_head_fused([P5], [h5["w9"]], h5["b"],
                              o5["w2p"], o5["b2p"], o5["n_out"])

    # nearest-2x upsample (XLA); the cat([P5_up, feat1]) is fused into headP4.
    P5_up = upsample_nearest2x(up)

    # yolo_headP4: BasicConv(384,256,3) + Conv2d(256,21,1), one kernel,
    # consuming both concat sources directly.
    h4, o4 = params["headP4_conv"], params["headP4_out"]
    out1 = conv3x3_head_fused([P5_up, feat1], h4["w9_split"], h4["b"],
                              o4["w2p"], o4["b2p"], o4["n_out"])

    return (jnp.transpose(out0, (0, 3, 1, 2)),
            jnp.transpose(out1, (0, 3, 1, 2)))


# ----------------------------------------------------------------------------
# Pure-JAX f32 reference (for a loose numerical sanity check)
# ----------------------------------------------------------------------------
def _ref_basic_conv(x, p):
    w_hwio = jnp.transpose(p["w4d"], (2, 3, 1, 0))
    pad = p["ksize"] // 2
    y = lax.conv_general_dilated(
        x, w_hwio, window_strides=(1, 1), padding=((pad, pad), (pad, pad)),
        dimension_numbers=("NHWC", "HWIO", "NHWC"),
        precision=lax.Precision.HIGHEST)
    y = y * p["scale"] + p["bn_bias"]
    return jnp.where(y > 0, y, LEAKY_SLOPE * y)


def _ref_head_out(x, p):
    return jnp.einsum("nhwc,co->nhwo", x, p["w2d"],
                      precision=lax.Precision.HIGHEST) + p["b"]


def yolo_body_reference(params, feat1_nchw, feat2_nchw):
    feat1 = jnp.transpose(feat1_nchw, (0, 2, 3, 1))
    feat2 = jnp.transpose(feat2_nchw, (0, 2, 3, 1))
    P5 = _ref_basic_conv(feat2, params["conv_for_P5"])
    out0 = _ref_head_out(_ref_basic_conv(P5, params["headP5_conv"]),
                         params["headP5_out"])
    P5_up = upsample_nearest2x(_ref_basic_conv(P5, params["upsample_conv"]))
    P4 = jnp.concatenate([P5_up, feat1], axis=-1)
    out1 = _ref_head_out(_ref_basic_conv(P4, params["headP4_conv"]),
                         params["headP4_out"])
    return (jnp.transpose(out0, (0, 3, 1, 2)),
            jnp.transpose(out1, (0, 3, 1, 2)))


# ----------------------------------------------------------------------------
if __name__ == "__main__":
    anchors_mask = [[3, 4, 5], [1, 2, 3]]
    num_classes = 2

    root = jax.random.PRNGKey(0)
    kp, k1, k2 = jax.random.split(root, 3)
    params = init_yolo_body(kp, anchors_mask, num_classes)

    # Small backbone feature maps (NCHW): feat1 is 2x spatial of feat2.
    feat1 = jax.random.normal(k1, (2, 256, 8, 8), jnp.float32)
    feat2 = jax.random.normal(k2, (2, 512, 4, 4), jnp.float32)

    fwd = jax.jit(functools.partial(yolo_body_forward, params))
    out0, out1 = fwd(feat1, feat2)
    jax.block_until_ready((out0, out1))

    assert out0.shape == (2, 3 * (5 + num_classes), 4, 4), out0.shape
    assert out1.shape == (2, 3 * (5 + num_classes), 8, 8), out1.shape
    assert bool(jnp.isfinite(out0).all()) and bool(jnp.isfinite(out1).all())

    # Loose tolerance: kernels use bf16 MXU operands with f32 accumulation.
    ref0, ref1 = jax.jit(functools.partial(yolo_body_reference, params))(feat1, feat2)
    assert bool(jnp.allclose(out0, ref0, atol=2e-1, rtol=5e-2)), \
        float(jnp.max(jnp.abs(out0 - ref0)))
    assert bool(jnp.allclose(out1, ref1, atol=2e-1, rtol=5e-2)), \
        float(jnp.max(jnp.abs(out1 - ref1)))

    print("KERNEL_OK")
</pallas_src>

<mosaic_0001>
module attributes {stable_mosaic.version = 11 : i64} {
  func.func @_p5_up_kernel(%arg0: i32, %arg1: memref<32x512xbf16, #tpu.memory_space<vmem>>, %arg2: memref<512x256xbf16, #tpu.memory_space<vmem>>, %arg3: memref<1x256xf32, #tpu.memory_space<vmem>>, %arg4: memref<256x128xbf16, #tpu.memory_space<vmem>>, %arg5: memref<1x128xf32, #tpu.memory_space<vmem>>, %arg6: memref<32x256xbf16, #tpu.memory_space<vmem>>, %arg7: memref<32x128xbf16, #tpu.memory_space<vmem>>) attributes {dimension_semantics = [#tpu.dimension_semantics<parallel>], iteration_bounds = array<i64: 1>, scalar_prefetch = 0 : i64, scratch_operands = 0 : i64, tpu.core_type = #tpu.core_type<tc>, window_params = [{transform_indices = @transform_0, window_bounds = array<i64: 32, 512>}, {pipeline_mode = #tpu.pipeline_mode<synchronous>, transform_indices = @transform_1, window_bounds = array<i64: 512, 256>}, {pipeline_mode = #tpu.pipeline_mode<synchronous>, transform_indices = @transform_2, window_bounds = array<i64: 1, 256>}, {pipeline_mode = #tpu.pipeline_mode<synchronous>, transform_indices = @transform_3, window_bounds = array<i64: 256, 128>}, {pipeline_mode = #tpu.pipeline_mode<synchronous>, transform_indices = @transform_4, window_bounds = array<i64: 1, 128>}, {transform_indices = @transform_5, window_bounds = array<i64: 32, 256>}, {transform_indices = @transform_6, window_bounds = array<i64: 32, 128>}]} {
    %c0 = arith.constant 0 : index
    %c0_0 = arith.constant 0 : index
    %0 = vector.load %arg1[%c0, %c0_0] : memref<32x512xbf16, #tpu.memory_space<vmem>>, vector<32x512xbf16>
    %c0_1 = arith.constant 0 : index
    %c0_2 = arith.constant 0 : index
    %1 = vector.load %arg2[%c0_1, %c0_2] : memref<512x256xbf16, #tpu.memory_space<vmem>>, vector<512x256xbf16>
    %cst = arith.constant dense<0.000000e+00> : vector<32x256xf32>
    %2 = tpu.matmul %0, %1, %cst {dimension_numbers = #tpu.dot_dimension_numbers<[1], [0], [0], [1], [0, 0, 1, 1], [], []>} : vector<32x512xbf16>, vector<512x256xbf16>, vector<32x256xf32> -> vector<32x256xf32>
    %c0_3 = arith.constant 0 : index
    %c0_4 = arith.constant 0 : index
    %3 = vector.load %arg3[%c0_3, %c0_4] : memref<1x256xf32, #tpu.memory_space<vmem>>, vector<1x256xf32>
    %4 = vector.broadcast %3 : vector<1x256xf32> to vector<32x256xf32>
    %5 = arith.addf %2, %4 : vector<32x256xf32>
    %cst_5 = arith.constant 1.000000e-01 : f32
    %6 = vector.broadcast %cst_5 : f32 to vector<32x256xf32>
    %7 = arith.mulf %6, %5 : vector<32x256xf32>
    %8 = arith.maximumf %5, %7 : vector<32x256xf32>
    %9 = arith.truncf %8 : vector<32x256xf32> to vector<32x256xbf16>
    %c0_6 = arith.constant 0 : index
    %c0_7 = arith.constant 0 : index
    %10 = vector.load %arg6[%c0_6, %c0_7] : memref<32x256xbf16, #tpu.memory_space<vmem>>, vector<32x256xbf16>
    tpu.vector_store %arg6[%c0_6, %c0_7], %9 {strides = array<i32>} : memref<32x256xbf16, #tpu.memory_space<vmem>>, vector<32x256xbf16>,
    %c0_8 = arith.constant 0 : index
    %c0_9 = arith.constant 0 : index
    %11 = vector.load %arg4[%c0_8, %c0_9] : memref<256x128xbf16, #tpu.memory_space<vmem>>, vector<256x128xbf16>
    %cst_10 = arith.constant dense<0.000000e+00> : vector<32x128xf32>
    %12 = tpu.matmul %9, %11, %cst_10 {dimension_numbers = #tpu.dot_dimension_numbers<[1], [0], [0], [1], [0, 0, 1, 1], [], []>} : vector<32x256xbf16>, vector<256x128xbf16>, vector<32x128xf32> -> vector<32x128xf32>
    %c0_11 = arith.constant 0 : index
    %c0_12 = arith.constant 0 : index
    %13 = vector.load %arg5[%c0_11, %c0_12] : memref<1x128xf32, #tpu.memory_space<vmem>>, vector<1x128xf32>
    %14 = vector.broadcast %13 : vector<1x128xf32> to vector<32x128xf32>
    %15 = arith.addf %12, %14 : vector<32x128xf32>
    %cst_13 = arith.constant 1.000000e-01 : f32
    %16 = vector.broadcast %cst_13 : f32 to vector<32x128xf32>
    %17 = arith.mulf %16, %15 : vector<32x128xf32>
    %18 = arith.maximumf %15, %17 : vector<32x128xf32>
    %19 = arith.truncf %18 : vector<32x128xf32> to vector<32x128xbf16>
    %c0_14 = arith.constant 0 : index
    %c0_15 = arith.constant 0 : index
    %20 = vector.load %arg7[%c0_14, %c0_15] : memref<32x128xbf16, #tpu.memory_space<vmem>>, vector<32x128xbf16>
    tpu.vector_store %arg7[%c0_14, %c0_15], %19 {strides = array<i32>} : memref<32x128xbf16, #tpu.memory_space<vmem>>, vector<32x128xbf16>,
    return
  }
  func.func @transform_0(%arg0: i32) -> (i32, i32) {
    %c0_i32 = arith.constant 0 : i32
    %c0_i32_0 = arith.constant 0 : i32
    return %arg0, %c0_i32 : i32, i32
  }
  func.func @transform_1(%arg0: i32) -> (i32, i32) {
    %c0_i32 = arith.constant 0 : i32
    %c0_i32_0 = arith.constant 0 : i32
    %c0_i32_1 = arith.constant 0 : i32
    return %c0_i32, %c0_i32_0 : i32, i32
  }
  func.func @transform_2(%arg0: i32) -> (i32, i32) {
    %c0_i32 = arith.constant 0 : i32
    %c0_i32_0 = arith.constant 0 : i32
    %c0_i32_1 = arith.constant 0 : i32
    return %c0_i32, %c0_i32_0 : i32, i32
  }
  func.func @transform_3(%arg0: i32) -> (i32, i32) {
    %c0_i32 = arith.constant 0 : i32
    %c0_i32_0 = arith.constant 0 : i32
    %c0_i32_1 = arith.constant 0 : i32
    return %c0_i32, %c0_i32_0 : i32, i32
  }
  func.func @transform_4(%arg0: i32) -> (i32, i32) {
    %c0_i32 = arith.constant 0 : i32
    %c0_i32_0 = arith.constant 0 : i32
    %c0_i32_1 = arith.constant 0 : i32
    return %c0_i32, %c0_i32_0 : i32, i32
  }
  func.func @transform_5(%arg0: i32) -> (i32, i32) {
    %c0_i32 = arith.constant 0 : i32
    %c0_i32_0 = arith.constant 0 : i32
    return %arg0, %c0_i32 : i32, i32
  }
  func.func @transform_6(%arg0: i32) -> (i32, i32) {
    %c0_i32 = arith.constant 0 : i32
    %c0_i32_0 = arith.constant 0 : i32
    return %arg0, %c0_i32 : i32, i32
  }
}

module attributes {stable_mosaic.version = 11 : i64} {
  func.func @kernel(%arg0: i32, %arg1: memref<1x42x256xbf16, #tpu.memory_space<vmem>>, %arg2: memref<9x256x512xbf16, #tpu.memory_space<vmem>>, %arg3: memref<1x512xf32, #tpu.memory_space<vmem>>, %arg4: memref<512x128xbf16, #tpu.memory_space<vmem>>, %arg5: memref<1x128xf32, #tpu.memory_space<vmem>>, %arg6: memref<1x24x128xf32, #tpu.memory_space<vmem>>) attributes {dimension_semantics = [#tpu.dimension_semantics<parallel>], iteration_bounds = array<i64: 2>, scalar_prefetch = 0 : i64, scratch_operands = 0 : i64, tpu.core_type = #tpu.core_type<tc>, window_params = [{transform_indices = @transform_0, window_bounds = array<i64: 1, 42, 256>}, {pipeline_mode = #tpu.pipeline_mode<synchronous>, transform_indices = @transform_1, window_bounds = array<i64: 9, 256, 512>}, {pipeline_mode = #tpu.pipeline_mode<synchronous>, transform_indices = @transform_2, window_bounds = array<i64: 1, 512>}, {pipeline_mode = #tpu.pipeline_mode<synchronous>, transform_indices = @transform_3, window_bounds = array<i64: 512, 128>}, {pipeline_mode = #tpu.pipeline_mode<synchronous>, transform_indices = @transform_4, window_bounds = array<i64: 1, 128>}, {transform_indices = @transform_5, window_bounds = array<i64: 1, 24, 128>}]} {
    %c0 = arith.constant 0 : index
    %c0_0 = arith.constant 0 : index
    %c0_1 = arith.constant 0 : index
    %0 = vector.load %arg1[%c0, %c0_0, %c0_1] : memref<1x42x256xbf16, #tpu.memory_space<vmem>>, vector<1x24x256xbf16>
    %1 = vector.shape_cast %0 : vector<1x24x256xbf16> to vector<24x256xbf16>
    %c0_2 = arith.constant 0 : index
    %c0_3 = arith.constant 0 : index
    %c0_4 = arith.constant 0 : index
    %2 = vector.load %arg2[%c0_2, %c0_3, %c0_4] : memref<9x256x512xbf16, #tpu.memory_space<vmem>>, vector<1x256x512xbf16>
    %3 = vector.shape_cast %2 : vector<1x256x512xbf16> to vector<256x512xbf16>
    %cst = arith.constant dense<0.000000e+00> : vector<24x512xf32>
    %4 = tpu.matmul %1, %3, %cst {dimension_numbers = #tpu.dot_dimension_numbers<[1], [0], [0], [1], [0, 0, 1, 1], [], []>} : vector<24x256xbf16>, vector<256x512xbf16>, vector<24x512xf32> -> vector<24x512xf32>
    %c0_5 = arith.constant 0 : index
    %c1 = arith.constant 1 : index
    %c0_6 = arith.constant 0 : index
    %5 = vector.load %arg1[%c0_5, %c1, %c0_6] : memref<1x42x256xbf16, #tpu.memory_space<vmem>>, vector<1x24x256xbf16>
    %6 = vector.shape_cast %5 : vector<1x24x256xbf16> to vector<24x256xbf16>
    %c1_7 = arith.constant 1 : index
    %c0_8 = arith.constant 0 : index
    %c0_9 = arith.constant 0 : index
    %7 = vector.load %arg2[%c1_7, %c0_8, %c0_9] : memref<9x256x512xbf16, #tpu.memory_space<vmem>>, vector<1x256x512xbf16>
    %8 = vector.shape_cast %7 : vector<1x256x512xbf16> to vector<256x512xbf16>
    %cst_10 = arith.constant dense<0.000000e+00> : vector<24x512xf32>
    %9 = tpu.matmul %6, %8, %cst_10 {dimension_numbers = #tpu.dot_dimension_numbers<[1], [0], [0], [1], [0, 0, 1, 1], [], []>} : vector<24x256xbf16>, vector<256x512xbf16>, vector<24x512xf32> -> vector<24x512xf32>
    %10 = arith.addf %4, %9 : vector<24x512xf32>
    %c0_11 = arith.constant 0 : index
    %c2 = arith.constant 2 : index
    %c0_12 = arith.constant 0 : index
    %11 = vector.load %arg1[%c0_11, %c2, %c0_12] : memref<1x42x256xbf16, #tpu.memory_space<vmem>>, vector<1x24x256xbf16>
    %12 = vector.shape_cast %11 : vector<1x24x256xbf16> to vector<24x256xbf16>
    %c2_13 = arith.constant 2 : index
    %c0_14 = arith.constant 0 : index
    %c0_15 = arith.constant 0 : index
    %13 = vector.load %arg2[%c2_13, %c0_14, %c0_15] : memref<9x256x512xbf16, #tpu.memory_space<vmem>>, vector<1x256x512xbf16>
    %14 = vector.shape_cast %13 : vector<1x256x512xbf16> to vector<256x512xbf16>
    %cst_16 = arith.constant dense<0.000000e+00> : vector<24x512xf32>
    %15 = tpu.matmul %12, %14, %cst_16 {dimension_numbers = #tpu.dot_dimension_numbers<[1], [0], [0], [1], [0, 0, 1, 1], [], []>} : vector<24x256xbf16>, vector<256x512xbf16>, vector<24x512xf32> -> vector<24x512xf32>
    %16 = arith.addf %10, %15 : vector<24x512xf32>
    %c0_17 = arith.constant 0 : index
    %c6 = arith.constant 6 : index
    %c0_18 = arith.constant 0 : index
    %17 = vector.load %arg1[%c0_17, %c6, %c0_18] : memref<1x42x256xbf16, #tpu.memory_space<vmem>>, vector<1x24x256xbf16>
    %18 = vector.shape_cast %17 : vector<1x24x256xbf16> to vector<24x256xbf16>
    %c3 = arith.constant 3 : index
    %c0_19 = arith.constant 0 : index
    %c0_20 = arith.constant 0 : index
    %19 = vector.load %arg2[%c3, %c0_19, %c0_20] : memref<9x256x512xbf16, #tpu.memory_space<vmem>>, vector<1x256x512xbf16>
    %20 = vector.shape_cast %19 : vector<1x256x512xbf16> to vector<256x512xbf16>
    %cst_21 = arith.constant dense<0.000000e+00> : vector<24x512xf32>
    %21 = tpu.matmul %18, %20, %cst_21 {dimension_numbers = #tpu.dot_dimension_numbers<[1], [0], [0], [1], [0, 0, 1, 1], [], []>} : vector<24x256xbf16>, vector<256x512xbf16>, vector<24x512xf32> -> vector<24x512xf32>
    %22 = arith.addf %16, %21 : vector<24x512xf32>
    %c0_22 = arith.constant 0 : index
    %c7 = arith.constant 7 : index
    %c0_23 = arith.constant 0 : index
    %23 = vector.load %arg1[%c0_22, %c7, %c0_23] : memref<1x42x256xbf16, #tpu.memory_space<vmem>>, vector<1x24x256xbf16>
    %24 = vector.shape_cast %23 : vector<1x24x256xbf16> to vector<24x256xbf16>
    %c4 = arith.constant 4 : index
    %c0_24 = arith.constant 0 : index
    %c0_25 = arith.constant 0 : index
    %25 = vector.load %arg2[%c4, %c0_24, %c0_25] : memref<9x256x512xbf16, #tpu.memory_space<vmem>>, vector<1x256x512xbf16>
    %26 = vector.shape_cast %25 : vector<1x256x512xbf16> to vector<256x512xbf16>
    %cst_26 = arith.constant dense<0.000000e+00> : vector<24x512xf32>
    %27 = tpu.matmul %24, %26, %cst_26 {dimension_numbers = #tpu.dot_dimension_numbers<[1], [0], [0], [1], [0, 0, 1, 1], [], []>} : vector<24x256xbf16>, vector<256x512xbf16>, vector<24x512xf32> -> vector<24x512xf32>
    %28 = arith.addf %22, %27 : vector<24x512xf32>
    %c0_27 = arith.constant 0 : index
    %c8 = arith.constant 8 : index
    %c0_28 = arith.constant 0 : index
    %29 = vector.load %arg1[%c0_27, %c8, %c0_28] : memref<1x42x256xbf16, #tpu.memory_space<vmem>>, vector<1x24x256xbf16>
    %30 = vector.shape_cast %29 : vector<1x24x256xbf16> to vector<24x256xbf16>
    %c5 = arith.constant 5 : index
    %c0_29 = arith.constant 0 : index
    %c0_30 = arith.constant 0 : index
    %31 = vector.load %arg2[%c5, %c0_29, %c0_30] : memref<9x256x512xbf16, #tpu.memory_space<vmem>>, vector<1x256x512xbf16>
    %32 = vector.shape_cast %31 : vector<1x256x512xbf16> to vector<256x512xbf16>
    %cst_31 = arith.constant dense<0.000000e+00> : vector<24x512xf32>
    %33 = tpu.matmul %30, %32, %cst_31 {dimension_numbers = #tpu.dot_dimension_numbers<[1], [0], [0], [1], [0, 0, 1, 1], [], []>} : vector<24x256xbf16>, vector<256x512xbf16>, vector<24x512xf32> -> vector<24x512xf32>
    %34 = arith.addf %28, %33 : vector<24x512xf32>
    %c0_32 = arith.constant 0 : index
    %c12 = arith.constant 12 : index
    %c0_33 = arith.constant 0 : index
    %35 = vector.load %arg1[%c0_32, %c12, %c0_33] : memref<1x42x256xbf16, #tpu.memory_space<vmem>>, vector<1x24x256xbf16>
    %36 = vector.shape_cast %35 : vector<1x24x256xbf16> to vector<24x256xbf16>
    %c6_34 = arith.constant 6 : index
    %c0_35 = arith.constant 0 : index
    %c0_36 = arith.constant 0 : index
    %37 = vector.load %arg2[%c6_34, %c0_35, %c0_36] : memref<9x256x512xbf16, #tpu.memory_space<vmem>>, vector<1x256x512xbf16>
    %38 = vector.shape_cast %37 : vector<1x256x512xbf16> to vector<256x512xbf16>
    %cst_37 = arith.constant dense<0.000000e+00> : vector<24x512xf32>
    %39 = tpu.matmul %36, %38, %cst_37 {dimension_numbers = #tpu.dot_dimension_numbers<[1], [0], [0], [1], [0, 0, 1, 1], [], []>} : vector<24x256xbf16>, vector<256x512xbf16>, vector<24x512xf32> -> vector<24x512xf32>
    %40 = arith.addf %34, %39 : vector<24x512xf32>
    %c0_38 = arith.constant 0 : index
    %c13 = arith.constant 13 : index
    %c0_39 = arith.constant 0 : index
    %41 = vector.load %arg1[%c0_38, %c13, %c0_39] : memref<1x42x256xbf16, #tpu.memory_space<vmem>>, vector<1x24x256xbf16>
    %42 = vector.shape_cast %41 : vector<1x24x256xbf16> to vector<24x256xbf16>
    %c7_40 = arith.constant 7 : index
    %c0_41 = arith.constant 0 : index
    %c0_42 = arith.constant 0 : index
    %43 = vector.load %arg2[%c7_40, %c0_41, %c0_42] : memref<9x256x512xbf16, #tpu.memory_space<vmem>>, vector<1x256x512xbf16>
    %44 = vector.shape_cast %43 : vector<1x256x512xbf16> to vector<256x512xbf16>
    %cst_43 = arith.constant dense<0.000000e+00> : vector<24x512xf32>
    %45 = tpu.matmul %42, %44, %cst_43 {dimension_numbers = #tpu.dot_dimension_numbers<[1], [0], [0], [1], [0, 0, 1, 1], [], []>} : vector<24x256xbf16>, vector<256x512xbf16>, vector<24x512xf32> -> vector<24x512xf32>
    %46 = arith.addf %40, %45 : vector<24x512xf32>
    %c0_44 = arith.constant 0 : index
    %c14 = arith.constant 14 : index
    %c0_45 = arith.constant 0 : index
    %47 = vector.load %arg1[%c0_44, %c14, %c0_45] : memref<1x42x256xbf16, #tpu.memory_space<vmem>>, vector<1x24x256xbf16>
    %48 = vector.shape_cast %47 : vector<1x24x256xbf16> to vector<24x256xbf16>
    %c8_46 = arith.constant 8 : index
    %c0_47 = arith.constant 0 : index
    %c0_48 = arith.constant 0 : index
    %49 = vector.load %arg2[%c8_46, %c0_47, %c0_48] : memref<9x256x512xbf16, #tpu.memory_space<vmem>>, vector<1x256x512xbf16>
    %50 = vector.shape_cast %49 : vector<1x256x512xbf16> to vector<256x512xbf16>
    %cst_49 = arith.constant dense<0.000000e+00> : vector<24x512xf32>
    %51 = tpu.matmul %48, %50, %cst_49 {dimension_numbers = #tpu.dot_dimension_numbers<[1], [0], [0], [1], [0, 0, 1, 1], [], []>} : vector<24x256xbf16>, vector<256x512xbf16>, vector<24x512xf32> -> vector<24x512xf32>
    %52 = arith.addf %46, %51 : vector<24x512xf32>
    %c0_50 = arith.constant 0 : index
    %c0_51 = arith.constant 0 : index
    %53 = vector.load %arg3[%c0_50, %c0_51] : memref<1x512xf32, #tpu.memory_space<vmem>>, vector<1x512xf32>
    %54 = vector.broadcast %53 : vector<1x512xf32> to vector<24x512xf32>
    %55 = arith.addf %52, %54 : vector<24x512xf32>
    %cst_52 = arith.constant 1.000000e-01 : f32
    %56 = vector.broadcast %cst_52 : f32 to vector<24x512xf32>
    %57 = arith.mulf %56, %55 : vector<24x512xf32>
    %58 = arith.maximumf %55, %57 : vector<24x512xf32>
    %59 = arith.truncf %58 : vector<24x512xf32> to vector<24x512xbf16>
    %c0_53 = arith.constant 0 : index
    %c0_54 = arith.constant 0 : index
    %60 = vector.load %arg4[%c0_53, %c0_54] : memref<512x128xbf16, #tpu.memory_space<vmem>>, vector<512x128xbf16>
    %cst_55 = arith.constant dense<0.000000e+00> : vector<24x128xf32>
    %61 = tpu.matmul %59, %60, %cst_55 {dimension_numbers = #tpu.dot_dimension_numbers<[1], [0], [0], [1], [0, 0, 1, 1], [], []>} : vector<24x512xbf16>, vector<512x128xbf16>, vector<24x128xf32> -> vector<24x128xf32>
    %c0_56 = arith.constant 0 : index
    %c0_57 = arith.constant 0 : index
    %62 = vector.load %arg5[%c0_56, %c0_57] : memref<1x128xf32, #tpu.memory_space<vmem>>, vector<1x128xf32>
    %63 = vector.broadcast %62 : vector<1x128xf32> to vector<24x128xf32>
    %64 = arith.addf %61, %63 : vector<24x128xf32>
    %c0_58 = arith.constant 0 : index
    %c0_59 = arith.constant 0 : index
    %c0_60 = arith.constant 0 : index
    %65 = vector.load %arg6[%c0_58, %c0_59, %c0_60] : memref<1x24x128xf32, #tpu.memory_space<vmem>>, vector<1x24x128xf32>
    %66 = vector.shape_cast %65 : vector<1x24x128xf32> to vector<24x128xf32>
    %67 = vector.shape_cast %64 : vector<24x128xf32> to vector<1x24x128xf32>
    tpu.vector_store %arg6[%c0_58, %c0_59, %c0_60], %67 {strides = array<i32>} : memref<1x24x128xf32, #tpu.memory_space<vmem>>, vector<1x24x128xf32>,
    return
  }
  func.func @transform_0(%arg0: i32) -> (i32, i32, i32) {
    %c0_i32 = arith.constant 0 : i32
    %c0_i32_0 = arith.constant 0 : i32
    %c0_i32_1 = arith.constant 0 : i32
    return %arg0, %c0_i32, %c0_i32_0 : i32, i32, i32
  }
  func.func @transform_1(%arg0: i32) -> (i32, i32, i32) {
    %c0_i32 = arith.constant 0 : i32
    %c0_i32_0 = arith.constant 0 : i32
    %c0_i32_1 = arith.constant 0 : i32
    %c0_i32_2 = arith.constant 0 : i32
    return %c0_i32, %c0_i32_0, %c0_i32_1 : i32, i32, i32
  }
  func.func @transform_2(%arg0: i32) -> (i32, i32) {
    %c0_i32 = arith.constant 0 : i32
    %c0_i32_0 = arith.constant 0 : i32
    %c0_i32_1 = arith.constant 0 : i32
    return %c0_i32, %c0_i32_0 : i32, i32
  }
  func.func @transform_3(%arg0: i32) -> (i32, i32) {
    %c0_i32 = arith.constant 0 : i32
    %c0_i32_0 = arith.constant 0 : i32
    %c0_i32_1 = arith.constant 0 : i32
    return %c0_i32, %c0_i32_0 : i32, i32
  }
  func.func @transform_4(%arg0: i32) -> (i32, i32) {
    %c0_i32 = arith.constant 0 : i32
    %c0_i32_0 = arith.constant 0 : i32
    %c0_i32_1 = arith.constant 0 : i32
    return %c0_i32, %c0_i32_0 : i32, i32
  }
  func.func @transform_5(%arg0: i32) -> (i32, i32, i32) {
    %c0_i32 = arith.constant 0 : i32
    %c0_i32_0 = arith.constant 0 : i32
    %c0_i32_1 = arith.constant 0 : i32
    return %arg0, %c0_i32, %c0_i32_0 : i32, i32, i32
  }
}

module attributes {stable_mosaic.version = 11 : i64} {
  func.func @kernel(%arg0: i32, %arg1: memref<1x110x128xbf16, #tpu.memory_space<vmem>>, %arg2: memref<1x110x256xbf16, #tpu.memory_space<vmem>>, %arg3: memref<9x128x256xbf16, #tpu.memory_space<vmem>>, %arg4: memref<9x256x256xbf16, #tpu.memory_space<vmem>>, %arg5: memref<1x256xf32, #tpu.memory_space<vmem>>, %arg6: memref<256x128xbf16, #tpu.memory_space<vmem>>, %arg7: memref<1x128xf32, #tpu.memory_space<vmem>>, %arg8: memref<1x80x128xf32, #tpu.memory_space<vmem>>) attributes {dimension_semantics = [#tpu.dimension_semantics<parallel>], iteration_bounds = array<i64: 2>, scalar_prefetch = 0 : i64, scratch_operands = 0 : i64, tpu.core_type = #tpu.core_type<tc>, window_params = [{transform_indices = @transform_0, window_bounds = array<i64: 1, 110, 128>}, {transform_indices = @transform_1, window_bounds = array<i64: 1, 110, 256>}, {pipeline_mode = #tpu.pipeline_mode<synchronous>, transform_indices = @transform_2, window_bounds = array<i64: 9, 128, 256>}, {pipeline_mode = #tpu.pipeline_mode<synchronous>, transform_indices = @transform_3, window_bounds = array<i64: 9, 256, 256>}, {pipeline_mode = #tpu.pipeline_mode<synchronous>, transform_indices = @transform_4, window_bounds = array<i64: 1, 256>}, {pipeline_mode = #tpu.pipeline_mode<synchronous>, transform_indices = @transform_5, window_bounds = array<i64: 256, 128>}, {pipeline_mode = #tpu.pipeline_mode<synchronous>, transform_indices = @transform_6, window_bounds = array<i64: 1, 128>}, {transform_indices = @transform_7, window_bounds = array<i64: 1, 80, 128>}]} {
    %c0 = arith.constant 0 : index
    %c0_0 = arith.constant 0 : index
    %c0_1 = arith.constant 0 : index
    %0 = vector.load %arg1[%c0, %c0_0, %c0_1] : memref<1x110x128xbf16, #tpu.memory_space<vmem>>, vector<1x80x128xbf16>
    %1 = vector.shape_cast %0 : vector<1x80x128xbf16> to vector<80x128xbf16>
    %c0_2 = arith.constant 0 : index
    %c0_3 = arith.constant 0 : index
    %c0_4 = arith.constant 0 : index
    %2 = vector.load %arg3[%c0_2, %c0_3, %c0_4] : memref<9x128x256xbf16, #tpu.memory_space<vmem>>, vector<1x128x256xbf16>
    %3 = vector.shape_cast %2 : vector<1x128x256xbf16> to vector<128x256xbf16>
    %cst = arith.constant dense<0.000000e+00> : vector<80x256xf32>
    %4 = tpu.matmul %1, %3, %cst {dimension_numbers = #tpu.dot_dimension_numbers<[1], [0], [0], [1], [0, 0, 1, 1], [], []>} : vector<80x128xbf16>, vector<128x256xbf16>, vector<80x256xf32> -> vector<80x256xf32>
    %c0_5 = arith.constant 0 : index
    %c1 = arith.constant 1 : index
    %c0_6 = arith.constant 0 : index
    %5 = vector.load %arg1[%c0_5, %c1, %c0_6] : memref<1x110x128xbf16, #tpu.memory_space<vmem>>, vector<1x80x128xbf16>
    %6 = vector.shape_cast %5 : vector<1x80x128xbf16> to vector<80x128xbf16>
    %c1_7 = arith.constant 1 : index
    %c0_8 = arith.constant 0 : index
    %c0_9 = arith.constant 0 : index
    %7 = vector.load %arg3[%c1_7, %c0_8, %c0_9] : memref<9x128x256xbf16, #tpu.memory_space<vmem>>, vector<1x128x256xbf16>
    %8 = vector.shape_cast %7 : vector<1x128x256xbf16> to vector<128x256xbf16>
    %cst_10 = arith.constant dense<0.000000e+00> : vector<80x256xf32>
    %9 = tpu.matmul %6, %8, %cst_10 {dimension_numbers = #tpu.dot_dimension_numbers<[1], [0], [0], [1], [0, 0, 1, 1], [], []>} : vector<80x128xbf16>, vector<128x256xbf16>, vector<80x256xf32> -> vector<80x256xf32>
    %10 = arith.addf %4, %9 : vector<80x256xf32>
    %c0_11 = arith.constant 0 : index
    %c2 = arith.constant 2 : index
    %c0_12 = arith.constant 0 : index
    %11 = vector.load %arg1[%c0_11, %c2, %c0_12] : memref<1x110x128xbf16, #tpu.memory_space<vmem>>, vector<1x80x128xbf16>
    %12 = vector.shape_cast %11 : vector<1x80x128xbf16> to vector<80x128xbf16>
    %c2_13 = arith.constant 2 : index
    %c0_14 = arith.constant 0 : index
    %c0_15 = arith.constant 0 : index
    %13 = vector.load %arg3[%c2_13, %c0_14, %c0_15] : memref<9x128x256xbf16, #tpu.memory_space<vmem>>, vector<1x128x256xbf16>
    %14 = vector.shape_cast %13 : vector<1x128x256xbf16> to vector<128x256xbf16>
    %cst_16 = arith.constant dense<0.000000e+00> : vector<80x256xf32>
    %15 = tpu.matmul %12, %14, %cst_16 {dimension_numbers = #tpu.dot_dimension_numbers<[1], [0], [0], [1], [0, 0, 1, 1], [], []>} : vector<80x128xbf16>, vector<128x256xbf16>, vector<80x256xf32> -> vector<80x256xf32>
    %16 = arith.addf %10, %15 : vector<80x256xf32>
    %c0_17 = arith.constant 0 : index
    %c10 = arith.constant 10 : index
    %c0_18 = arith.constant 0 : index
    %17 = vector.load %arg1[%c0_17, %c10, %c0_18] : memref<1x110x128xbf16, #tpu.memory_space<vmem>>, vector<1x80x128xbf16>
    %18 = vector.shape_cast %17 : vector<1x80x128xbf16> to vector<80x128xbf16>
    %c3 = arith.constant 3 : index
    %c0_19 = arith.constant 0 : index
    %c0_20 = arith.constant 0 : index
    %19 = vector.load %arg3[%c3, %c0_19, %c0_20] : memref<9x128x256xbf16, #tpu.memory_space<vmem>>, vector<1x128x256xbf16>
    %20 = vector.shape_cast %19 : vector<1x128x256xbf16> to vector<128x256xbf16>
    %cst_21 = arith.constant dense<0.000000e+00> : vector<80x256xf32>
    %21 = tpu.matmul %18, %20, %cst_21 {dimension_numbers = #tpu.dot_dimension_numbers<[1], [0], [0], [1], [0, 0, 1, 1], [], []>} : vector<80x128xbf16>, vector<128x256xbf16>, vector<80x256xf32> -> vector<80x256xf32>
    %22 = arith.addf %16, %21 : vector<80x256xf32>
    %c0_22 = arith.constant 0 : index
    %c11 = arith.constant 11 : index
    %c0_23 = arith.constant 0 : index
    %23 = vector.load %arg1[%c0_22, %c11, %c0_23] : memref<1x110x128xbf16, #tpu.memory_space<vmem>>, vector<1x80x128xbf16>
    %24 = vector.shape_cast %23 : vector<1x80x128xbf16> to vector<80x128xbf16>
    %c4 = arith.constant 4 : index
    %c0_24 = arith.constant 0 : index
    %c0_25 = arith.constant 0 : index
    %25 = vector.load %arg3[%c4, %c0_24, %c0_25] : memref<9x128x256xbf16, #tpu.memory_space<vmem>>, vector<1x128x256xbf16>
    %26 = vector.shape_cast %25 : vector<1x128x256xbf16> to vector<128x256xbf16>
    %cst_26 = arith.constant dense<0.000000e+00> : vector<80x256xf32>
    %27 = tpu.matmul %24, %26, %cst_26 {dimension_numbers = #tpu.dot_dimension_numbers<[1], [0], [0], [1], [0, 0, 1, 1], [], []>} : vector<80x128xbf16>, vector<128x256xbf16>, vector<80x256xf32> -> vector<80x256xf32>
    %28 = arith.addf %22, %27 : vector<80x256xf32>
    %c0_27 = arith.constant 0 : index
    %c12 = arith.constant 12 : index
    %c0_28 = arith.constant 0 : index
    %29 = vector.load %arg1[%c0_27, %c12, %c0_28] : memref<1x110x128xbf16, #tpu.memory_space<vmem>>, vector<1x80x128xbf16>
    %30 = vector.shape_cast %29 : vector<1x80x128xbf16> to vector<80x128xbf16>
    %c5 = arith.constant 5 : index
    %c0_29 = arith.constant 0 : index
    %c0_30 = arith.constant 0 : index
    %31 = vector.load %arg3[%c5, %c0_29, %c0_30] : memref<9x128x256xbf16, #tpu.memory_space<vmem>>, vector<1x128x256xbf16>
    %32 = vector.shape_cast %31 : vector<1x128x256xbf16> to vector<128x256xbf16>
    %cst_31 = arith.constant dense<0.000000e+00> : vector<80x256xf32>
    %33 = tpu.matmul %30, %32, %cst_31 {dimension_numbers = #tpu.dot_dimension_numbers<[1], [0], [0], [1], [0, 0, 1, 1], [], []>} : vector<80x128xbf16>, vector<128x256xbf16>, vector<80x256xf32> -> vector<80x256xf32>
    %34 = arith.addf %28, %33 : vector<80x256xf32>
    %c0_32 = arith.constant 0 : index
    %c20 = arith.constant 20 : index
    %c0_33 = arith.constant 0 : index
    %35 = vector.load %arg1[%c0_32, %c20, %c0_33] : memref<1x110x128xbf16, #tpu.memory_space<vmem>>, vector<1x80x128xbf16>
    %36 = vector.shape_cast %35 : vector<1x80x128xbf16> to vector<80x128xbf16>
    %c6 = arith.constant 6 : index
    %c0_34 = arith.constant 0 : index
    %c0_35 = arith.constant 0 : index
    %37 = vector.load %arg3[%c6, %c0_34, %c0_35] : memref<9x128x256xbf16, #tpu.memory_space<vmem>>, vector<1x128x256xbf16>
    %38 = vector.shape_cast %37 : vector<1x128x256xbf16> to vector<128x256xbf16>
    %cst_36 = arith.constant dense<0.000000e+00> : vector<80x256xf32>
    %39 = tpu.matmul %36, %38, %cst_36 {dimension_numbers = #tpu.dot_dimension_numbers<[1], [0], [0], [1], [0, 0, 1, 1], [], []>} : vector<80x128xbf16>, vector<128x256xbf16>, vector<80x256xf32> -> vector<80x256xf32>
    %40 = arith.addf %34, %39 : vector<80x256xf32>
    %c0_37 = arith.constant 0 : index
    %c21 = arith.constant 21 : index
    %c0_38 = arith.constant 0 : index
    %41 = vector.load %arg1[%c0_37, %c21, %c0_38] : memref<1x110x128xbf16, #tpu.memory_space<vmem>>, vector<1x80x128xbf16>
    %42 = vector.shape_cast %41 : vector<1x80x128xbf16> to vector<80x128xbf16>
    %c7 = arith.constant 7 : index
    %c0_39 = arith.constant 0 : index
    %c0_40 = arith.constant 0 : index
    %43 = vector.load %arg3[%c7, %c0_39, %c0_40] : memref<9x128x256xbf16, #tpu.memory_space<vmem>>, vector<1x128x256xbf16>
    %44 = vector.shape_cast %43 : vector<1x128x256xbf16> to vector<128x256xbf16>
    %cst_41 = arith.constant dense<0.000000e+00> : vector<80x256xf32>
    %45 = tpu.matmul %42, %44, %cst_41 {dimension_numbers = #tpu.dot_dimension_numbers<[1], [0], [0], [1], [0, 0, 1, 1], [], []>} : vector<80x128xbf16>, vector<128x256xbf16>, vector<80x256xf32> -> vector<80x256xf32>
    %46 = arith.addf %40, %45 : vector<80x256xf32>
    %c0_42 = arith.constant 0 : index
    %c22 = arith.constant 22 : index
    %c0_43 = arith.constant 0 : index
    %47 = vector.load %arg1[%c0_42, %c22, %c0_43] : memref<1x110x128xbf16, #tpu.memory_space<vmem>>, vector<1x80x128xbf16>
    %48 = vector.shape_cast %47 : vector<1x80x128xbf16> to vector<80x128xbf16>
    %c8 = arith.constant 8 : index
    %c0_44 = arith.constant 0 : index
    %c0_45 = arith.constant 0 : index
    %49 = vector.load %arg3[%c8, %c0_44, %c0_45] : memref<9x128x256xbf16, #tpu.memory_space<vmem>>, vector<1x128x256xbf16>
    %50 = vector.shape_cast %49 : vector<1x128x256xbf16> to vector<128x256xbf16>
    %cst_46 = arith.constant dense<0.000000e+00> : vector<80x256xf32>
    %51 = tpu.matmul %48, %50, %cst_46 {dimension_numbers = #tpu.dot_dimension_numbers<[1], [0], [0], [1], [0, 0, 1, 1], [], []>} : vector<80x128xbf16>, vector<128x256xbf16>, vector<80x256xf32> -> vector<80x256xf32>
    %52 = arith.addf %46, %51 : vector<80x256xf32>
    %c0_47 = arith.constant 0 : index
    %c0_48 = arith.constant 0 : index
    %c0_49 = arith.constant 0 : index
    %53 = vector.load %arg2[%c0_47, %c0_48, %c0_49] : memref<1x110x256xbf16, #tpu.memory_space<vmem>>, vector<1x80x256xbf16>
    %54 = vector.shape_cast %53 : vector<1x80x256xbf16> to vector<80x256xbf16>
    %c0_50 = arith.constant 0 : index
    %c0_51 = arith.constant 0 : index
    %c0_52 = arith.constant 0 : index
    %55 = vector.load %arg4[%c0_50, %c0_51, %c0_52] : memref<9x256x256xbf16, #tpu.memory_space<vmem>>, vector<1x256x256xbf16>
    %56 = vector.shape_cast %55 : vector<1x256x256xbf16> to vector<256x256xbf16>
    %cst_53 = arith.constant dense<0.000000e+00> : vector<80x256xf32>
    %57 = tpu.matmul %54, %56, %cst_53 {dimension_numbers = #tpu.dot_dimension_numbers<[1], [0], [0], [1], [0, 0, 1, 1], [], []>} : vector<80x256xbf16>, vector<256x256xbf16>, vector<80x256xf32> -> vector<80x256xf32>
    %58 = arith.addf %52, %57 : vector<80x256xf32>
    %c0_54 = arith.constant 0 : index
    %c1_55 = arith.constant 1 : index
    %c0_56 = arith.constant 0 : index
    %59 = vector.load %arg2[%c0_54, %c1_55, %c0_56] : memref<1x110x256xbf16, #tpu.memory_space<vmem>>, vector<1x80x256xbf16>
    %60 = vector.shape_cast %59 : vector<1x80x256xbf16> to vector<80x256xbf16>
    %c1_57 = arith.constant 1 : index
    %c0_58 = arith.constant 0 : index
    %c0_59 = arith.constant 0 : index
    %61 = vector.load %arg4[%c1_57, %c0_58, %c0_59] : memref<9x256x256xbf16, #tpu.memory_space<vmem>>, vector<1x256x256xbf16>
    %62 = vector.shape_cast %61 : vector<1x256x256xbf16> to vector<256x256xbf16>
    %cst_60 = arith.constant dense<0.000000e+00> : vector<80x256xf32>
    %63 = tpu.matmul %60, %62, %cst_60 {dimension_numbers = #tpu.dot_dimension_numbers<[1], [0], [0], [1], [0, 0, 1, 1], [], []>} : vector<80x256xbf16>, vector<256x256xbf16>, vector<80x256xf32> -> vector<80x256xf32>
    %64 = arith.addf %58, %63 : vector<80x256xf32>
    %c0_61 = arith.constant 0 : index
    %c2_62 = arith.constant 2 : index
    %c0_63 = arith.constant 0 : index
    %65 = vector.load %arg2[%c0_61, %c2_62, %c0_63] : memref<1x110x256xbf16, #tpu.memory_space<vmem>>, vector<1x80x256xbf16>
    %66 = vector.shape_cast %65 : vector<1x80x256xbf16> to vector<80x256xbf16>
    %c2_64 = arith.constant 2 : index
    %c0_65 = arith.constant 0 : index
    %c0_66 = arith.constant 0 : index
    %67 = vector.load %arg4[%c2_64, %c0_65, %c0_66] : memref<9x256x256xbf16, #tpu.memory_space<vmem>>, vector<1x256x256xbf16>
    %68 = vector.shape_cast %67 : vector<1x256x256xbf16> to vector<256x256xbf16>
    %cst_67 = arith.constant dense<0.000000e+00> : vector<80x256xf32>
    %69 = tpu.matmul %66, %68, %cst_67 {dimension_numbers = #tpu.dot_dimension_numbers<[1], [0], [0], [1], [0, 0, 1, 1], [], []>} : vector<80x256xbf16>, vector<256x256xbf16>, vector<80x256xf32> -> vector<80x256xf32>
    %70 = arith.addf %64, %69 : vector<80x256xf32>
    %c0_68 = arith.constant 0 : index
    %c10_69 = arith.constant 10 : index
    %c0_70 = arith.constant 0 : index
    %71 = vector.load %arg2[%c0_68, %c10_69, %c0_70] : memref<1x110x256xbf16, #tpu.memory_space<vmem>>, vector<1x80x256xbf16>
    %72 = vector.shape_cast %71 : vector<1x80x256xbf16> to vector<80x256xbf16>
    %c3_71 = arith.constant 3 : index
    %c0_72 = arith.constant 0 : index
    %c0_73 = arith.constant 0 : index
    %73 = vector.load %arg4[%c3_71, %c0_72, %c0_73] : memref<9x256x256xbf16, #tpu.memory_space<vmem>>, vector<1x256x256xbf16>
    %74 = vector.shape_cast %73 : vector<1x256x256xbf16> to vector<256x256xbf16>
    %cst_74 = arith.constant dense<0.000000e+00> : vector<80x256xf32>
    %75 = tpu.matmul %72, %74, %cst_74 {dimension_numbers = #tpu.dot_dimension_numbers<[1], [0], [0], [1], [0, 0, 1, 1], [], []>} : vector<80x256xbf16>, vector<256x256xbf16>, vector<80x256xf32> -> vector<80x256xf32>
    %76 = arith.addf %70, %75 : vector<80x256xf32>
    %c0_75 = arith.constant 0 : index
    %c11_76 = arith.constant 11 : index
    %c0_77 = arith.constant 0 : index
    %77 = vector.load %arg2[%c0_75, %c11_76, %c0_77] : memref<1x110x256xbf16, #tpu.memory_space<vmem>>, vector<1x80x256xbf16>
    %78 = vector.shape_cast %77 : vector<1x80x256xbf16> to vector<80x256xbf16>
    %c4_78 = arith.constant 4 : index
    %c0_79 = arith.constant 0 : index
    %c0_80 = arith.constant 0 : index
    %79 = vector.load %arg4[%c4_78, %c0_79, %c0_80] : memref<9x256x256xbf16, #tpu.memory_space<vmem>>, vector<1x256x256xbf16>
    %80 = vector.shape_cast %79 : vector<1x256x256xbf16> to vector<256x256xbf16>
    %cst_81 = arith.constant dense<0.000000e+00> : vector<80x256xf32>
    %81 = tpu.matmul %78, %80, %cst_81 {dimension_numbers = #tpu.dot_dimension_numbers<[1], [0], [0], [1], [0, 0, 1, 1], [], []>} : vector<80x256xbf16>, vector<256x256xbf16>, vector<80x256xf32> -> vector<80x256xf32>
    %82 = arith.addf %76, %81 : vector<80x256xf32>
    %c0_82 = arith.constant 0 : index
    %c12_83 = arith.constant 12 : index
    %c0_84 = arith.constant 0 : index
    %83 = vector.load %arg2[%c0_82, %c12_83, %c0_84] : memref<1x110x256xbf16, #tpu.memory_space<vmem>>, vector<1x80x256xbf16>
    %84 = vector.shape_cast %83 : vector<1x80x256xbf16> to vector<80x256xbf16>
    %c5_85 = arith.constant 5 : index
    %c0_86 = arith.constant 0 : index
    %c0_87 = arith.constant 0 : index
    %85 = vector.load %arg4[%c5_85, %c0_86, %c0_87] : memref<9x256x256xbf16, #tpu.memory_space<vmem>>, vector<1x256x256xbf16>
    %86 = vector.shape_cast %85 : vector<1x256x256xbf16> to vector<256x256xbf16>
    %cst_88 = arith.constant dense<0.000000e+00> : vector<80x256xf32>
    %87 = tpu.matmul %84, %86, %cst_88 {dimension_numbers = #tpu.dot_dimension_numbers<[1], [0], [0], [1], [0, 0, 1, 1], [], []>} : vector<80x256xbf16>, vector<256x256xbf16>, vector<80x256xf32> -> vector<80x256xf32>
    %88 = arith.addf %82, %87 : vector<80x256xf32>
    %c0_89 = arith.constant 0 : index
    %c20_90 = arith.constant 20 : index
    %c0_91 = arith.constant 0 : index
    %89 = vector.load %arg2[%c0_89, %c20_90, %c0_91] : memref<1x110x256xbf16, #tpu.memory_space<vmem>>, vector<1x80x256xbf16>
    %90 = vector.shape_cast %89 : vector<1x80x256xbf16> to vector<80x256xbf16>
    %c6_92 = arith.constant 6 : index
    %c0_93 = arith.constant 0 : index
    %c0_94 = arith.constant 0 : index
    %91 = vector.load %arg4[%c6_92, %c0_93, %c0_94] : memref<9x256x256xbf16, #tpu.memory_space<vmem>>, vector<1x256x256xbf16>
    %92 = vector.shape_cast %91 : vector<1x256x256xbf16> to vector<256x256xbf16>
    %cst_95 = arith.constant dense<0.000000e+00> : vector<80x256xf32>
    %93 = tpu.matmul %90, %92, %cst_95 {dimension_numbers = #tpu.dot_dimension_numbers<[1], [0], [0], [1], [0, 0, 1, 1], [], []>} : vector<80x256xbf16>, vector<256x256xbf16>, vector<80x256xf32> -> vector<80x256xf32>
    %94 = arith.addf %88, %93 : vector<80x256xf32>
    %c0_96 = arith.constant 0 : index
    %c21_97 = arith.constant 21 : index
    %c0_98 = arith.constant 0 : index
    %95 = vector.load %arg2[%c0_96, %c21_97, %c0_98] : memref<1x110x256xbf16, #tpu.memory_space<vmem>>, vector<1x80x256xbf16>
    %96 = vector.shape_cast %95 : vector<1x80x256xbf16> to vector<80x256xbf16>
    %c7_99 = arith.constant 7 : index
    %c0_100 = arith.constant 0 : index
    %c0_101 = arith.constant 0 : index
    %97 = vector.load %arg4[%c7_99, %c0_100, %c0_101] : memref<9x256x256xbf16, #tpu.memory_space<vmem>>, vector<1x256x256xbf16>
    %98 = vector.shape_cast %97 : vector<1x256x256xbf16> to vector<256x256xbf16>
    %cst_102 = arith.constant dense<0.000000e+00> : vector<80x256xf32>
    %99 = tpu.matmul %96, %98, %cst_102 {dimension_numbers = #tpu.dot_dimension_numbers<[1], [0], [0], [1], [0, 0, 1, 1], [], []>} : vector<80x256xbf16>, vector<256x256xbf16>, vector<80x256xf32> -> vector<80x256xf32>
    %100 = arith.addf %94, %99 : vector<80x256xf32>
    %c0_103 = arith.constant 0 : index
    %c22_104 = arith.constant 22 : index
    %c0_105 = arith.constant 0 : index
    %101 = vector.load %arg2[%c0_103, %c22_104, %c0_105] : memref<1x110x256xbf16, #tpu.memory_space<vmem>>, vector<1x80x256xbf16>
    %102 = vector.shape_cast %101 : vector<1x80x256xbf16> to vector<80x256xbf16>
    %c8_106 = arith.constant 8 : index
    %c0_107 = arith.constant 0 : index
    %c0_108 = arith.constant 0 : index
    %103 = vector.load %arg4[%c8_106, %c0_107, %c0_108] : memref<9x256x256xbf16, #tpu.memory_space<vmem>>, vector<1x256x256xbf16>
    %104 = vector.shape_cast %103 : vector<1x256x256xbf16> to vector<256x256xbf16>
    %cst_109 = arith.constant dense<0.000000e+00> : vector<80x256xf32>
    %105 = tpu.matmul %102, %104, %cst_109 {dimension_numbers = #tpu.dot_dimension_numbers<[1], [0], [0], [1], [0, 0, 1, 1], [], []>} : vector<80x256xbf16>, vector<256x256xbf16>, vector<80x256xf32> -> vector<80x256xf32>
    %106 = arith.addf %100, %105 : vector<80x256xf32>
    %c0_110 = arith.constant 0 : index
    %c0_111 = arith.constant 0 : index
    %107 = vector.load %arg5[%c0_110, %c0_111] : memref<1x256xf32, #tpu.memory_space<vmem>>, vector<1x256xf32>
    %108 = vector.broadcast %107 : vector<1x256xf32> to vector<80x256xf32>
    %109 = arith.addf %106, %108 : vector<80x256xf32>
    %cst_112 = arith.constant 1.000000e-01 : f32
    %110 = vector.broadcast %cst_112 : f32 to vector<80x256xf32>
    %111 = arith.mulf %110, %109 : vector<80x256xf32>
    %112 = arith.maximumf %109, %111 : vector<80x256xf32>
    %113 = arith.truncf %112 : vector<80x256xf32> to vector<80x256xbf16>
    %c0_113 = arith.constant 0 : index
    %c0_114 = arith.constant 0 : index
    %114 = vector.load %arg6[%c0_113, %c0_114] : memref<256x128xbf16, #tpu.memory_space<vmem>>, vector<256x128xbf16>
    %cst_115 = arith.constant dense<0.000000e+00> : vector<80x128xf32>
    %115 = tpu.matmul %113, %114, %cst_115 {dimension_numbers = #tpu.dot_dimension_numbers<[1], [0], [0], [1], [0, 0, 1, 1], [], []>} : vector<80x256xbf16>, vector<256x128xbf16>, vector<80x128xf32> -> vector<80x128xf32>
    %c0_116 = arith.constant 0 : index
    %c0_117 = arith.constant 0 : index
    %116 = vector.load %arg7[%c0_116, %c0_117] : memref<1x128xf32, #tpu.memory_space<vmem>>, vector<1x128xf32>
    %117 = vector.broadcast %116 : vector<1x128xf32> to vector<80x128xf32>
    %118 = arith.addf %115, %117 : vector<80x128xf32>
    %c0_118 = arith.constant 0 : index
    %c0_119 = arith.constant 0 : index
    %c0_120 = arith.constant 0 : index
    %119 = vector.load %arg8[%c0_118, %c0_119, %c0_120] : memref<1x80x128xf32, #tpu.memory_space<vmem>>, vector<1x80x128xf32>
    %120 = vector.shape_cast %119 : vector<1x80x128xf32> to vector<80x128xf32>
    %121 = vector.shape_cast %118 : vector<80x128xf32> to vector<1x80x128xf32>
    tpu.vector_store %arg8[%c0_118, %c0_119, %c0_120], %121 {strides = array<i32>} : memref<1x80x128xf32, #tpu.memory_space<vmem>>, vector<1x80x128xf32>,
    return
  }
  func.func @transform_0(%arg0: i32) -> (i32, i32, i32) {
    %c0_i32 = arith.constant 0 : i32
    %c0_i32_0 = arith.constant 0 : i32
    %c0_i32_1 = arith.constant 0 : i32
    return %arg0, %c0_i32, %c0_i32_0 : i32, i32, i32
  }
  func.func @transform_1(%arg0: i32) -> (i32, i32, i32) {
    %c0_i32 = arith.constant 0 : i32
    %c0_i32_0 = arith.constant 0 : i32
    %c0_i32_1 = arith.constant 0 : i32
    return %arg0, %c0_i32, %c0_i32_0 : i32, i32, i32
  }
  func.func @transform_2(%arg0: i32) -> (i32, i32, i32) {
    %c0_i32 = arith.constant 0 : i32
    %c0_i32_0 = arith.constant 0 : i32
    %c0_i32_1 = arith.constant 0 : i32
    %c0_i32_2 = arith.constant 0 : i32
    return %c0_i32, %c0_i32_0, %c0_i32_1 : i32, i32, i32
  }
  func.func @transform_3(%arg0: i32) -> (i32, i32, i32) {
    %c0_i32 = arith.constant 0 : i32
    %c0_i32_0 = arith.constant 0 : i32
    %c0_i32_1 = arith.constant 0 : i32
    %c0_i32_2 = arith.constant 0 : i32
    return %c0_i32, %c0_i32_0, %c0_i32_1 : i32, i32, i32
  }
  func.func @transform_4(%arg0: i32) -> (i32, i32) {
    %c0_i32 = arith.constant 0 : i32
    %c0_i32_0 = arith.constant 0 : i32
    %c0_i32_1 = arith.constant 0 : i32
    return %c0_i32, %c0_i32_0 : i32, i32
  }
  func.func @transform_5(%arg0: i32) -> (i32, i32) {
    %c0_i32 = arith.constant 0 : i32
    %c0_i32_0 = arith.constant 0 : i32
    %c0_i32_1 = arith.constant 0 : i32
    return %c0_i32, %c0_i32_0 : i32, i32
  }
  func.func @transform_6(%arg0: i32) -> (i32, i32) {
    %c0_i32 = arith.constant 0 : i32
    %c0_i32_0 = arith.constant 0 : i32
    %c0_i32_1 = arith.constant 0 : i32
    return %c0_i32, %c0_i32_0 : i32, i32
  }
  func.func @transform_7(%arg0: i32) -> (i32, i32, i32) {
    %c0_i32 = arith.constant 0 : i32
    %c0_i32_0 = arith.constant 0 : i32
    %c0_i32_1 = arith.constant 0 : i32
    return %arg0, %c0_i32, %c0_i32_0 : i32, i32, i32
  }
}

</mosaic_0001>

<bundles_post_ra>
// kernel: yolo_body_forward.3
= control target key start
LH: loop header
LB: loop body
LE: loop exit
PB: predicated region body
PF: predicated region fallthrough
CT: control target
= control target key end

     0   :  { %12 = vsyncpa [#allocation3], 0  ;;  %s1561_s0 = inlined_call_operand.vmem [shape: bf16[32,512], index: 0, kind: input, shape index: {}]   ;;  %s1562_s1 = inlined_call_operand.vmem [shape: bf16[512,256], index: 1, kind: input, shape index: {}]   ;;  %s1563_s2 = inlined_call_operand.hbm [shape: f32[1,256], index: 2, kind: input, shape index: {}]   ;;  %s1564_s3 = inlined_call_operand.hbm [shape: bf16[256,128], index: 3, kind: input, shape index: {}]   ;;  %s1565_s4 = inlined_call_operand.hbm [shape: f32[1,128], index: 4, kind: input, shape index: {}]   ;;  %s1566_s5 = inlined_call_operand.vmem [shape: bf16[32,256], index: 5, kind: output, shape index: {0}]   ;;  %s1567_s6 = inlined_call_operand.vmem [shape: bf16[32,128], index: 6, kind: output, shape index: {1}]  }
   0x1   :  { %13 = vsyncpa [#allocation5], 0  ;;  %s1251_s21 = smov [#allocation4]   ;;  %s1181_s25 = scalar_lea.hbm %s1564_s3, 2048 }
   0x2   :  { %s33_s22 = sshll.u32 %s1251_s21, 4  ;;  %p1182_p0 = scmp.ne.s32.totalorder %s1564_s3, %s1181_s25  ;;  %s34_s22 = int_to_ptr.vmem [resolvable:$true] %s33_s22 }
   0x3   :  { %p1185_p1 = scmp.lt.u32.totalorder %s1181_s25, %s1564_s3 }
   0x5   :  { %p1187_p2 = pnand %p1185_p1, %p1182_p0 }
   0x7   :  { %1190 = shalt.err (!%p1187_p2)
}
   0x8   :  { %s1191_s30 = scalar_lea.vmem %s34_s22, 2048  ;;  %p1196_p4 = scmp.lt.s32.totalorder %s34_s22, %s34_s22 }
   0x9   :  { %p1192_p3 = scmp.ne.s32.totalorder %s34_s22, %s1191_s30  ;;  %p1197_p5 = scmp.lt.s32.totalorder %s1191_s30, %s1191_s30 }
   0xb   :  { %p1198_p6 = por %p1197_p5, %p1196_p4 }
   0xd   :  { %p1199_p7 = pnand %p1198_p6, %p1192_p3 }
   0xf   :  { %1202 = shalt.err (!%p1199_p7)
}
  0x10   :  { %s1252_s7 = smov 64   ;;  %s1253_s8 = smov 4  }
  0x11   :  { %39 = dma.hbm_to_vmem [thread:$0]  %s1564_s3, 2048, %s34_s22, [#allocation5], %s1252_s7, %s1252_s7, %s1253_s8  }
  0x12   :  { %s1254_s11 = smov [#allocation2]   ;;  %s1255_s13 = smov [#allocation6]  }
  0x13   :  { %s24_s12 = sshll.u32 %s1254_s11, 4  ;;  %s46_s14 = sshll.u32 %s1255_s13, 4  ;;  %s25_s12 = int_to_ptr.vmem [resolvable:$true] %s24_s12  ;;  %s47_s14 = int_to_ptr.vmem [resolvable:$true] %s46_s14 }
  0x14   :  { %s1203_s17 = scalar_lea.hbm %s1563_s2, 32 }
  0x15   :  { %p1204_p8 = scmp.ne.s32.totalorder %s1563_s2, %s1203_s17  ;;  %p1207_p9 = scmp.lt.u32.totalorder %s1203_s17, %s1563_s2 }
  0x17   :  { %p1209_p10 = pnand %p1207_p9, %p1204_p8 }
  0x19   :  { %1212 = shalt.err (!%p1209_p10)
}
  0x1a   :  { %s1213_s3 = scalar_lea.vmem %s25_s12, 32  ;;  %p1218_p12 = scmp.lt.s32.totalorder %s25_s12, %s25_s12 }
  0x1b   :  { %p1214_p11 = scmp.ne.s32.totalorder %s25_s12, %s1213_s3  ;;  %p1219_p13 = scmp.lt.s32.totalorder %s1213_s3, %s1213_s3 }
  0x1d   :  { %p1220_p0 = por %p1219_p13, %p1218_p12 }
  0x1f   :  { %p1221_p1 = pnand %p1220_p0, %p1214_p11 }
  0x21   :  { %1224 = shalt.err (!%p1221_p1)
}
  0x22   :  { %27 = dma.hbm_to_vmem [thread:$0]  %s1563_s2, 32, %s25_s12, [#allocation3]  }
  0x23   :  { %s1225_s26 = scalar_lea.hbm %s1565_s4, 16 }
  0x24   :  { %p1226_p2 = scmp.ne.s32.totalorder %s1565_s4, %s1225_s26  ;;  %p1229_p3 = scmp.lt.u32.totalorder %s1225_s26, %s1565_s4 }
  0x26   :  { %p1231_p4 = pnand %p1229_p3, %p1226_p2 }
  0x28   :  { %1234 = shalt.err (!%p1231_p4)
}
  0x29   :  { %s1235_s7 = scalar_lea.vmem %s47_s14, 16  ;;  %s1239_s8 = scalar_lea.vmem %s47_s14, 32 }
  0x2a   :  { %p1236_p5 = scmp.ne.s32.totalorder %s47_s14, %s1235_s7  ;;  %p1240_p6 = scmp.lt.s32.totalorder %s47_s14, %s47_s14 }
  0x2b   :  { %p1241_p7 = scmp.lt.s32.totalorder %s1239_s8, %s1235_s7 }
  0x2d   :  { %p1242_p8 = por %p1241_p7, %p1240_p6 }
  0x2f   :  { %p1243_p9 = pnand %p1242_p8, %p1236_p5 }
  0x31   :  { %1246 = shalt.err (!%p1243_p9)
}
  0x32   :  { %49 = dma.hbm_to_vmem [thread:$0]  %s1565_s4, 16, %s47_s14, [#allocation5]  }
  0x33   :  { %1247 = dma.done.wait [#allocation3], 32  }
  0x34   :  { %1248 = vsyncadd [#allocation3], 4294967264 }
  0x35   :  { %1249 = dma.done.wait [#allocation5], 2064  }
  0x36   :  { %1250 = vsyncadd [#allocation5], 4294965232  ;;  %v1057_v0 = vld [vmem:[%s1562_s1 + $0x4] ss:$8 sps:$4 sm:$0xff]   ;;  %v1061_v2 = vld [vmem:[%s1562_s1] ss:$8 sps:$4 sm:$0xff]  }
  0x37   :  { %v1059_v1 = vld [vmem:[%s1562_s1 + $0x104] ss:$8 sps:$4 sm:$0xff]   ;;  %504 = vmatprep.subr.bf16.mxu1 %v1057_v0  ;;  %v1062_v3 = vld [vmem:[%s1562_s1 + $0x100] ss:$8 sps:$4 sm:$0xff]   ;;  %v1063_v4 = vld [vmem:[%s1562_s1 + $0x14] ss:$8 sps:$4 sm:$0xff]  }
  0x38   :  { %557 = vmatprep.subr.bf16.mxu0 %v1059_v1  ;;  %505 = vmatpush1.bf16.msra.mxu1 %v1061_v2  ;;  %v1065_v5 = vld [vmem:[%s1562_s1 + $0x114] ss:$8 sps:$4 sm:$0xff]   ;;  %v1067_v6 = vld [vmem:[%s1562_s1 + $0x10] ss:$8 sps:$4 sm:$0xff]   ;;  %v1069_v8 = vld [vmem:[%s1562_s1 + $0x24] ss:$8 sps:$4 sm:$0xff]  }
  0x39   :  { %558 = vmatpush1.bf16.msra.mxu0 %v1062_v3  ;;  %506 = vmatprep.subr.bf16.mxu1 %v1063_v4  ;;  %v1068_v7 = vld [vmem:[%s1562_s1 + $0x110] ss:$8 sps:$4 sm:$0xff]   ;;  %v1071_v9 = vld [vmem:[%s1562_s1 + $0x124] ss:$8 sps:$4 sm:$0xff]   ;;  %v1073_v10 = vld [vmem:[%s1562_s1 + $0x20] ss:$8 sps:$4 sm:$0xff]  }
  0x3a   :  { %559 = vmatprep.subr.bf16.mxu0 %v1065_v5  ;;  %v1074_v11 = vld [vmem:[%s1562_s1 + $0x120] ss:$8 sps:$4 sm:$0xff]   ;;  %v1075_v12 = vld [vmem:[%s1562_s1 + $0x34] ss:$8 sps:$4 sm:$0xff]   ;;  %v1079_v14 = vld [vmem:[%s1562_s1 + $0x30] ss:$8 sps:$4 sm:$0xff]  }
  0x3b   :  { %v1077_v13 = vld [vmem:[%s1562_s1 + $0x134] ss:$8 sps:$4 sm:$0xff]   ;;  %v1080_v15 = vld [vmem:[%s1562_s1 + $0x130] ss:$8 sps:$4 sm:$0xff]   ;;  %v1081_v16 = vld [vmem:[%s1562_s1 + $0x44] ss:$8 sps:$4 sm:$0xff]  }
  0x3c   :  { %507 = vmatpush1.bf16.msra.mxu1 %v1067_v6  ;;  %v1083_v17 = vld [vmem:[%s1562_s1 + $0x144] ss:$8 sps:$4 sm:$0xff]   ;;  %v1085_v18 = vld [vmem:[%s1562_s1 + $0x40] ss:$8 sps:$4 sm:$0xff]   ;;  %v1087_v20 = vld [vmem:[%s1562_s1 + $0x54] ss:$8 sps:$4 sm:$0xff]  }
  0x3d   :  { %560 = vmatpush1.bf16.msra.mxu0 %v1068_v7  ;;  %508 = vmatprep.subr.bf16.mxu1 %v1069_v8  ;;  %v1086_v19 = vld [vmem:[%s1562_s1 + $0x140] ss:$8 sps:$4 sm:$0xff]   ;;  %v1089_v21 = vld [vmem:[%s1562_s1 + $0x154] ss:$8 sps:$4 sm:$0xff]   ;;  %v1091_v22 = vld [vmem:[%s1562_s1 + $0x50] ss:$8 sps:$4 sm:$0xff]  }
  0x3e   :  { %561 = vmatprep.subr.bf16.mxu0 %v1071_v9  ;;  %v1092_v23 = vld [vmem:[%s1562_s1 + $0x150] ss:$8 sps:$4 sm:$0xff]   ;;  %v1093_v24 = vld [vmem:[%s1562_s1 + $0x64] ss:$8 sps:$4 sm:$0xff]   ;;  %v1097_v26 = vld [vmem:[%s1562_s1 + $0x60] ss:$8 sps:$4 sm:$0xff]  }
  0x3f   :  { %v1095_v25 = vld [vmem:[%s1562_s1 + $0x164] ss:$8 sps:$4 sm:$0xff]   ;;  %v1098_v27 = vld [vmem:[%s1562_s1 + $0x160] ss:$8 sps:$4 sm:$0xff]   ;;  %v1099_v28 = vld [vmem:[%s1562_s1 + $0x74] ss:$8 sps:$4 sm:$0xff]  }
  0x40   :  { %509 = vmatpush1.bf16.msra.mxu1 %v1073_v10  ;;  %v1101_v29 = vld [vmem:[%s1562_s1 + $0x174] ss:$8 sps:$4 sm:$0xff]   ;;  %v1103_v30 = vld [vmem:[%s1562_s1 + $0x70] ss:$8 sps:$4 sm:$0xff]   ;;  %v1105_v32 = vld [vmem:[%s1562_s1 + $0x84] ss:$8 sps:$4 sm:$0xff]  }
  0x41   :  { %562 = vmatpush1.bf16.msra.mxu0 %v1074_v11  ;;  %510 = vmatprep.subr.bf16.mxu1 %v1075_v12  ;;  %v1104_v31 = vld [vmem:[%s1562_s1 + $0x170] ss:$8 sps:$4 sm:$0xff]   ;;  %v1107_v33 = vld [vmem:[%s1562_s1 + $0x184] ss:$8 sps:$4 sm:$0xff]   ;;  %v1109_v34 = vld [vmem:[%s1562_s1 + $0x80] ss:$8 sps:$4 sm:$0xff]  }
  0x42   :  { %563 = vmatprep.subr.bf16.mxu0 %v1077_v13  ;;  %v1110_v35 = vld [vmem:[%s1562_s1 + $0x180] ss:$8 sps:$4 sm:$0xff]   ;;  %v1111_v36 = vld [vmem:[%s1562_s1 + $0x94] ss:$8 sps:$4 sm:$0xff]   ;;  %v1115_v38 = vld [vmem:[%s1562_s1 + $0x90] ss:$8 sps:$4 sm:$0xff]  }
  0x43   :  { %v1113_v37 = vld [vmem:[%s1562_s1 + $0x194] ss:$8 sps:$4 sm:$0xff]   ;;  %v1116_v39 = vld [vmem:[%s1562_s1 + $0x190] ss:$8 sps:$4 sm:$0xff]   ;;  %v1117_v40 = vld [vmem:[%s1562_s1 + $0xa4] ss:$8 sps:$4 sm:$0xff]  }
  0x44   :  { %511 = vmatpush1.bf16.msra.mxu1 %v1079_v14  ;;  %v1119_v41 = vld [vmem:[%s1562_s1 + $0x1a4] ss:$8 sps:$4 sm:$0xff]   ;;  %v1121_v42 = vld [vmem:[%s1562_s1 + $0xa0] ss:$8 sps:$4 sm:$0xff]   ;;  %v1123_v44 = vld [vmem:[%s1562_s1 + $0xb4] ss:$8 sps:$4 sm:$0xff]  }
  0x45   :  { %564 = vmatpush1.bf16.msra.mxu0 %v1080_v15  ;;  %512 = vmatprep.subr.bf16.mxu1 %v1081_v16  ;;  %v1122_v43 = vld [vmem:[%s1562_s1 + $0x1a0] ss:$8 sps:$4 sm:$0xff]   ;;  %v1125_v45 = vld [vmem:[%s1562_s1 + $0x1b4] ss:$8 sps:$4 sm:$0xff]   ;;  %v1127_v46 = vld [vmem:[%s1562_s1 + $0xb0] ss:$8 sps:$4 sm:$0xff]  }
  0x46   :  { %565 = vmatprep.subr.bf16.mxu0 %v1083_v17  ;;  %v1128_v47 = vld [vmem:[%s1562_s1 + $0x1b0] ss:$8 sps:$4 sm:$0xff]   ;;  %v1129_v48 = vld [vmem:[%s1562_s1 + $0xc4] ss:$8 sps:$4 sm:$0xff]   ;;  %v1133_v52 = vld [vmem:[%s1562_s1 + $0xc0] ss:$8 sps:$4 sm:$0xff]  }
  0x47   :  { %v1155_v49 = vld [vmem:[%s1561_s0 + $0x4] ss:$16 sps:$4 sm:$0xff]   ;;  %v1158_v51 = vld [vmem:[%s1561_s0 + $0xc] ss:$16 sps:$4 sm:$0xff]   ;;  %v1134_v53 = vld [vmem:[%s1562_s1 + $0x1c0] ss:$8 sps:$4 sm:$0xff]  }
  0x48   :  { %513 = vmatpush1.bf16.msra.mxu1 %v1085_v18  ;;  %v1131_v50 = vld [vmem:[%s1562_s1 + $0x1c4] ss:$8 sps:$4 sm:$0xff]   ;;  %536 = vmatprep.mubr.bf16.mxu1 %v1155_v49  ;;  %v1135_v54 = vld [vmem:[%s1562_s1 + $0xd4] ss:$8 sps:$4 sm:$0xff]   ;;  %v1139_v56 = vld [vmem:[%s1562_s1 + $0xd0] ss:$8 sps:$4 sm:$0xff]  }
  0x49   :  { %566 = vmatpush1.bf16.msra.mxu0 %v1086_v19  ;;  %514 = vmatprep.subr.bf16.mxu1 %v1087_v20  ;;  %v1137_v55 = vld [vmem:[%s1562_s1 + $0x1d4] ss:$8 sps:$4 sm:$0xff]   ;;  %v1140_v57 = vld [vmem:[%s1562_s1 + $0x1d0] ss:$8 sps:$4 sm:$0xff]   ;;  %v1141_v58 = vld [vmem:[%s1562_s1 + $0xe4] ss:$8 sps:$4 sm:$0xff]  }
  0x4a   :  { %567 = vmatprep.subr.bf16.mxu0 %v1089_v21  ;;  %589 = vmatprep.mubr.bf16.mxu0 %v1158_v51  ;;  %v1143_v59 = vld [vmem:[%s1562_s1 + $0x1e4] ss:$8 sps:$4 sm:$0xff]   ;;  %v1145_v60 = vld [vmem:[%s1562_s1 + $0xe0] ss:$8 sps:$4 sm:$0xff]   ;;  %v1147_v62 = vld [vmem:[%s1562_s1 + $0xf4] ss:$8 sps:$4 sm:$0xff]  }
  0x4b   :  { %v1146_v61 = vld [vmem:[%s1562_s1 + $0x1e0] ss:$8 sps:$4 sm:$0xff]   ;;  %v1149_v63 = vld [vmem:[%s1562_s1 + $0x1f4] ss:$8 sps:$4 sm:$0xff]   ;;  %v1151_v0 = vld [vmem:[%s1562_s1 + $0xf0] ss:$8 sps:$4 sm:$0xff]  }
  0x4c   :  { %515 = vmatpush1.bf16.msra.mxu1 %v1091_v22  ;;  %v1152_v1 = vld [vmem:[%s1562_s1 + $0x1f0] ss:$8 sps:$4 sm:$0xff]   ;;  %v1165_v2 = vld [vmem:[#allocation4 + $0x40] sm:$0xff]   ;;  %v1161_v6 = vld [vmem:[%s1561_s0 + $0x2c] ss:$16 sps:$4 sm:$0xff]  }
  0x4d   :  { %568 = vmatpush1.bf16.msra.mxu0 %v1092_v23  ;;  %516 = vmatprep.subr.bf16.mxu1 %v1093_v24  ;;  %v1153_v3 = vld [vmem:[%s1561_s0] ss:$16 sps:$4 sm:$0xff]   ;;  %v1156_v4 = vld [vmem:[%s1561_s0 + $0x8] ss:$16 sps:$4 sm:$0xff]   ;;  %v1159_v5 = vld [vmem:[%s1561_s0 + $0x24] ss:$16 sps:$4 sm:$0xff]   ;;  %v134_v24 = vlaneseq }
  0x4e   :  { %569 = vmatprep.subr.bf16.mxu0 %v1095_v25  ;;  %v1166_v7 = vld [vmem:[#allocation4] sm:$0xff]   ;;  %v1167_v8 = vld [vmem:[#allocation4 + $0x48] sm:$0xff]   ;;  %v1169_v10 = vld [vmem:[#allocation4 + $0x50] sm:$0xff]  }
  0x4f   :  { %v1168_v9 = vld [vmem:[#allocation4 + $0x8] sm:$0xff]   ;;  %v1170_v13 = vld [vmem:[#allocation4 + $0x10] sm:$0xff]   ;;  %v1171_v14 = vld [vmem:[#allocation4 + $0x58] sm:$0xff]   ;;  %v135_v25 = vshrl.u32 %v134_v24, 7 }
  0x50   :  { %517 = vmatpush1.bf16.msra.mxu1 %v1097_v26  ;;  %v1163_v11 = vld [vmem:[%s1561_s0 + $0x20] ss:$16 sps:$4 sm:$0xff]   ;;  %v1164_v12 = vld [vmem:[%s1561_s0 + $0x28] ss:$16 sps:$4 sm:$0xff]  }
  0x51   :  { %570 = vmatpush1.bf16.msra.mxu0 %v1098_v27  ;;  %518 = vmatprep.subr.bf16.mxu1 %v1099_v28  ;;  %v1172_v15 = vld [vmem:[#allocation4 + $0x18] sm:$0xff]   ;;  %v1173_v16 = vld [vmem:[#allocation4 + $0x60] sm:$0xff]   ;;  %v1175_v18 = vld [vmem:[#allocation4 + $0x68] sm:$0xff]   ;;  %v136_v26 = vsub.s32 0, %v135_v25  ;;  %v140_v28 = vsub.s32 1, %v135_v25 }
  0x52   :  { %571 = vmatprep.subr.bf16.mxu0 %v1101_v29  ;;  %v1174_v17 = vld [vmem:[#allocation4 + $0x20] sm:$0xff]   ;;  %v1176_v19 = vld [vmem:[#allocation4 + $0x28] sm:$0xff]   ;;  %v1177_v20 = vld [vmem:[#allocation4 + $0x70] sm:$0xff]  }
  0x53   :  { %v1178_v21 = vld [vmem:[#allocation4 + $0x30] sm:$0xff]   ;;  %v1179_v22 = vld [vmem:[#allocation4 + $0x78] sm:$0xff]   ;;  %v952_v24 = vld [vmem:[#allocation6] ss:$0 sm:$0xff] }
  0x54   :  { %519 = vmatpush1.bf16.msra.mxu1 %v1103_v30  ;;  %v1180_v23 = vld [vmem:[#allocation4 + $0x38] sm:$0xff]  }
  0x55   :  { %572 = vmatpush1.bf16.msra.mxu0 %v1104_v31  ;;  %520 = vmatprep.subr.bf16.mxu1 %v1105_v32  ;;  %v132_v27 = vld [vmem:[#allocation2] sm:$0x3] }
  0x56   :  { %573 = vmatprep.subr.bf16.mxu0 %v1107_v33  ;;  %v137_v29 = vrot.slane %v132_v27, %v136_v26  ;;  %v141_v30 = vrot.slane %v132_v27, %v140_v28 }
  0x58   :  { %521 = vmatpush1.bf16.msra.mxu1 %v1109_v34 }
  0x59   :  { %574 = vmatpush1.bf16.msra.mxu0 %v1110_v35  ;;  %522 = vmatprep.subr.bf16.mxu1 %v1111_v36 }
  0x5a   :  { %575 = vmatprep.subr.bf16.mxu0 %v1113_v37 }
  0x5c   :  { %523 = vmatpush1.bf16.msra.mxu1 %v1115_v38 }
  0x5d   :  { %576 = vmatpush1.bf16.msra.mxu0 %v1116_v39  ;;  %524 = vmatprep.subr.bf16.mxu1 %v1117_v40 }
  0x5e   :  { %577 = vmatprep.subr.bf16.mxu0 %v1119_v41 }
  0x60   :  { %525 = vmatpush1.bf16.msra.mxu1 %v1121_v42 }
  0x61   :  { %578 = vmatpush1.bf16.msra.mxu0 %v1122_v43  ;;  %526 = vmatprep.subr.bf16.mxu1 %v1123_v44 }
  0x62   :  { %579 = vmatprep.subr.bf16.mxu0 %v1125_v45 }
  0x64   :  { %527 = vmatpush1.bf16.msra.mxu1 %v1127_v46 }
  0x65   :  { %580 = vmatpush1.bf16.msra.mxu0 %v1128_v47  ;;  %528 = vmatprep.subr.bf16.mxu1 %v1129_v48 }
  0x66   :  { %581 = vmatprep.subr.bf16.mxu0 %v1131_v50 }
  0x68   :  { %529 = vmatpush1.bf16.msra.mxu1 %v1133_v52 }
  0x69   :  { %582 = vmatpush1.bf16.msra.mxu0 %v1134_v53  ;;  %530 = vmatprep.subr.bf16.mxu1 %v1135_v54 }
  0x6a   :  { %583 = vmatprep.subr.bf16.mxu0 %v1137_v55 }
  0x6c   :  { %531 = vmatpush1.bf16.msra.mxu1 %v1139_v56 }
  0x6d   :  { %584 = vmatpush1.bf16.msra.mxu0 %v1140_v57  ;;  %532 = vmatprep.subr.bf16.mxu1 %v1141_v58 }
  0x6e   :  { %585 = vmatprep.subr.bf16.mxu0 %v1143_v59 }
  0x70   :  { %533 = vmatpush1.bf16.msra.mxu1 %v1145_v60 }
  0x71   :  { %586 = vmatpush1.bf16.msra.mxu0 %v1146_v61  ;;  %534 = vmatprep.subr.bf16.mxu1 %v1147_v62 }
  0x72   :  { %587 = vmatprep.subr.bf16.mxu0 %v1149_v63 }
  0x74   :  { %535 = vmatpush1.bf16.msra.mxu1 %v1151_v0 }
  0x75   :  { %588 = vmatpush1.bf16.msra.mxu0 %v1152_v1  ;;  %1020 = vmatprep.subr.bf16.mxu1 %v1165_v2 }
  0x76   :  { %992 = vmatprep.subr.bf16.mxu0 %v1165_v2 }
  0x77   :  { %537 = vmatmul.mubr.bf16.vlgmr.msra.gmra.mrb[0].mxu1 %v1153_v3 }
  0x78   :  { %590 = vmatmul.mubr.bf16.vlgmr.msra.gmra.mrb[0].mxu0 %v1156_v4  ;;  %546 = vmatprep.mubr.bf16.mxu1 %v1159_v5 }
  0x79   :  { %599 = vmatprep.mubr.bf16.mxu0 %v1161_v6  ;;  %993 = vmatpush3.bf16.msra.mxu0 %v1166_v7 }
  0x7a   :  { %1028 = vmatpush3.bf16.msra.mxu1 %v1166_v7  ;;  %994 = vmatprep.subr.bf16.mxu0 %v1167_v8 }
  0x7b   :  { %1021 = vmatprep.subr.bf16.mxu1 %v1167_v8 }
  0x7d   :  { %995 = vmatpush3.bf16.msra.mxu0 %v1168_v9 }
  0x7e   :  { %1029 = vmatpush3.bf16.msra.mxu1 %v1168_v9  ;;  %996 = vmatprep.subr.bf16.mxu0 %v1169_v10 }
  0x7f   :  { %1022 = vmatprep.subr.bf16.mxu1 %v1169_v10  ;;  %547 = vmatmul.mubr.bf16.gmra.mrb[4].mxu1 %v1163_v11 }
  0x80   :  { %600 = vmatmul.mubr.bf16.gmra.mrb[4].mxu0 %v1164_v12 }
  0x81   :  { %997 = vmatpush3.bf16.msra.mxu0 %v1170_v13 }
  0x82   :  { %1030 = vmatpush3.bf16.msra.mxu1 %v1170_v13  ;;  %998 = vmatprep.subr.bf16.mxu0 %v1171_v14 }
  0x83   :  { %1023 = vmatprep.subr.bf16.mxu1 %v1171_v14 }
  0x85   :  { %999 = vmatpush3.bf16.msra.mxu0 %v1172_v15 }
  0x86   :  { %1031 = vmatpush3.bf16.msra.mxu1 %v1172_v15  ;;  %1000 = vmatprep.subr.bf16.mxu0 %v1173_v16 }
  0x87   :  { %1024 = vmatprep.subr.bf16.mxu1 %v1173_v16 }
  0x89   :  { %1001 = vmatpush3.bf16.msra.mxu0 %v1174_v17 }
  0x8a   :  { %1032 = vmatpush3.bf16.msra.mxu1 %v1174_v17  ;;  %1002 = vmatprep.subr.bf16.mxu0 %v1175_v18 }
  0x8b   :  { %1025 = vmatprep.subr.bf16.mxu1 %v1175_v18 }
  0x8d   :  { %1003 = vmatpush3.bf16.msra.mxu0 %v1176_v19 }
  0x8e   :  { %1033 = vmatpush3.bf16.msra.mxu1 %v1176_v19  ;;  %1004 = vmatprep.subr.bf16.mxu0 %v1177_v20 }
  0x8f   :  { %1026 = vmatprep.subr.bf16.mxu1 %v1177_v20 }
  0x91   :  { %1005 = vmatpush3.bf16.msra.mxu0 %v1178_v21 }
  0x92   :  { %1034 = vmatpush3.bf16.msra.mxu1 %v1178_v21  ;;  %1006 = vmatprep.subr.bf16.mxu0 %v1179_v22 }
  0x93   :  { %1027 = vmatprep.subr.bf16.mxu1 %v1179_v22 }
  0x95   :  { %1007 = vmatpush3.bf16.msra.mxu0 %v1180_v23 }
  0x96   :  { %1035 = vmatpush3.bf16.msra.mxu1 %v1180_v23 }
 0x14a   :  { %v538_v31 = vpop.f32.mrb[0].mxu1 }
 0x14b   :  { %v591_v32 = vpop.f32.mrb[0].mxu0  ;;  %v539_v33 = vadd.f32 %v538_v31, %v137_v29  ;;  %v540_v34 = vpop.f32.mrb[1].mxu1 }
 0x14c   :  { %v593_v35 = vpop.f32.mrb[1].mxu0  ;;  %v541_v36 = vadd.f32 %v540_v34, %v141_v30  ;;  %v542_v37 = vpop.f32.mrb[2].mxu1 }
 0x14d   :  { %v595_v38 = vpop.f32.mrb[2].mxu0  ;;  %v592_v39 = vadd.f32 %v591_v32, %v539_v33  ;;  %v543_v40 = vadd.f32 %v542_v37, %v137_v29  ;;  %v544_v41 = vpop.f32.mrb[3].mxu1 }
 0x14e   :  { %v597_v42 = vpop.f32.mrb[3].mxu0  ;;  %v594_v43 = vadd.f32 %v593_v35, %v541_v36  ;;  %v545_v44 = vadd.f32 %v544_v41, %v141_v30 }
 0x14f   :  { %v610_v45 = vmul.f32 0.1, %v592_v39  ;;  %v596_v46 = vadd.f32 %v595_v38, %v543_v40 }
 0x150   :  { %v611_v47 = vmul.f32 0.1, %v594_v43  ;;  %v598_v48 = vadd.f32 %v597_v42, %v545_v44 }
 0x151   :  { %v618_v49 = vmax.f32 %v592_v39, %v610_v45  ;;  %v612_v50 = vmul.f32 0.1, %v596_v46 }
 0x152   :  { %v619_v51 = vmax.f32 %v594_v43, %v611_v47  ;;  %v613_v52 = vmul.f32 0.1, %v598_v48  ;;  %v548_v53 = vpop.f32.mrb[4].mxu1 }
 0x153   :  { %v601_v54 = vpop.f32.mrb[4].mxu0  ;;  %v620_v55 = vmax.f32 %v596_v46, %v612_v50  ;;  %v549_v56 = vadd.f32 %v548_v53, %v137_v29  ;;  %v550_v57 = vpop.f32.mrb[5].mxu1 }
 0x154   :  { %v603_v58 = vpop.f32.mrb[5].mxu0  ;;  %v973_v59 = vpack.c.bf16 %v619_v51, %v618_v49  ;;  %v621_v60 = vmax.f32 %v598_v48, %v613_v52  ;;  %v551_v61 = vadd.f32 %v550_v57, %v141_v30  ;;  %v552_v62 = vpop.f32.mrb[6].mxu1 }
 0x155   :  { %v605_v63 = vpop.f32.mrb[6].mxu0  ;;  %v626_v0 = vpack.c.bf16 %v620_v55, %v618_v49  ;;  %v602_v1 = vadd.f32 %v601_v54, %v549_v56  ;;  %v553_v2 = vadd.f32 %v552_v62, %v137_v29  ;;  %v554_v3 = vpop.f32.mrb[7].mxu1 }
 0x156   :  { %v607_v4 = vpop.f32.mrb[7].mxu0  ;;  %650 = vst [vmem:[%s1566_s5] sm:$0xff] %v973_v59  ;;  %v974_v5 = vpack.c.bf16 %v621_v60, %v620_v55  ;;  %v604_v6 = vadd.f32 %v603_v58, %v551_v61  ;;  %v555_v7 = vadd.f32 %v554_v3, %v141_v30  ;;  %v627_v8 = vpack.c.bf16 %v621_v60, %v619_v51 }
 0x157   :  { %v614_v9 = vmul.f32 0.1, %v602_v1  ;;  %v606_v10 = vadd.f32 %v605_v63, %v553_v2 }
 0x158   :  { %651 = vst [vmem:[%s1566_s5 + $0x8] sm:$0xff] %v974_v5  ;;  %v615_v11 = vmul.f32 0.1, %v604_v6  ;;  %v608_v12 = vadd.f32 %v607_v4, %v555_v7  ;;  %821 = vmatprep.mubr.bf16.mxu0 %v627_v8 }
 0x159   :  { %v622_v13 = vmax.f32 %v602_v1, %v614_v9  ;;  %v616_v14 = vmul.f32 0.1, %v606_v10  ;;  %822 = vmatmul.mubr.bf16.vlgmr.msra.gmra.mrb[8].mxu0 %v626_v0 }
 0x15a   :  { %v623_v15 = vmax.f32 %v604_v6, %v615_v11  ;;  %v617_v16 = vmul.f32 0.1, %v608_v12 }
 0x15b   :  { %v624_v17 = vmax.f32 %v606_v10, %v616_v14 }
 0x15c   :  { %v975_v18 = vpack.c.bf16 %v623_v15, %v622_v13  ;;  %v625_v19 = vmax.f32 %v608_v12, %v617_v16 }
 0x15d   :  { %v628_v20 = vpack.c.bf16 %v624_v17, %v622_v13 }
 0x15e   :  { %652 = vst [vmem:[%s1566_s5 + $0x10] sm:$0xff] %v975_v18  ;;  %v976_v21 = vpack.c.bf16 %v625_v19, %v624_v17  ;;  %v629_v22 = vpack.c.bf16 %v625_v19, %v623_v15 }
 0x160   :  { %653 = vst [vmem:[%s1566_s5 + $0x18] sm:$0xff] %v976_v21  ;;  %829 = vmatprep.mubr.bf16.mxu1 %v629_v22 }
 0x161   :  { %830 = vmatmul.mubr.bf16.vlgmr.msra.gmra.mrb[8].mxu1 %v628_v20 }
 0x22c   :  { %v1008_v23 = vpop.f32.mrb[8].mxu0 }
 0x22d   :  { %v1009_v25 = vpop.f32.mrb[9].mxu0 }
 0x22e   :  { %v1010_v26 = vadd.f32 %v1009_v25, %v1008_v23  ;;  %v1011_v27 = vpop.f32.mrb[10].mxu0 }
 0x22f   :  { %v1012_v28 = vpop.f32.mrb[11].mxu0 }
 0x230   :  { %v824_v29 = vadd.f32 %v1010_v26, %v952_v24  ;;  %v1013_v30 = vadd.f32 %v1012_v28, %v1011_v27 }
 0x232   :  { %v838_v31 = vmul.f32 0.1, %v824_v29  ;;  %v827_v32 = vadd.f32 %v1013_v30, %v952_v24 }
 0x234   :  { %v839_v33 = vmul.f32 0.1, %v827_v32  ;;  %v1014_v34 = vpop.f32.mrb[8].mxu1  ;;  %v842_v36 = vmax.f32 %v824_v29, %v838_v31 }
 0x235   :  { %v1015_v35 = vpop.f32.mrb[9].mxu1 }
 0x236   :  { %v843_v37 = vmax.f32 %v827_v32, %v839_v33  ;;  %v1016_v38 = vadd.f32 %v1015_v35, %v1014_v34  ;;  %v1017_v39 = vpop.f32.mrb[10].mxu1 }
 0x237   :  { %v1018_v40 = vpop.f32.mrb[11].mxu1 }
 0x238   :  { %v984_v41 = vpack.c.bf16 %v843_v37, %v842_v36  ;;  %v832_v42 = vadd.f32 %v1016_v38, %v952_v24  ;;  %v1019_v43 = vadd.f32 %v1018_v40, %v1017_v39 }
 0x23a   :  { %985 = vst [vmem:[%s1567_s6] sm:$0xff] %v984_v41   ;;  %v840_v44 = vmul.f32 0.1, %v832_v42  ;;  %v835_v45 = vadd.f32 %v1019_v43, %v952_v24 }
 0x23c   :  { %v841_v46 = vmul.f32 0.1, %v835_v45  ;;  %v844_v47 = vmax.f32 %v832_v42, %v840_v44 }
 0x23e   :  { %v845_v48 = vmax.f32 %v835_v45, %v841_v46 }
 0x240   :  { %v989_v49 = vpack.c.bf16 %v845_v48, %v844_v47 }
 0x242   :  { %991 = vst [vmem:[%s1567_s6 + $0x8] sm:$0xff] %v989_v49  }
 0x243   :  { %874 = vsyncpa [#allocation3], 1 }
 0x244   :  { %875 = vsyncpa [#allocation5], 1 }

// kernel: yolo_body_forward.4
= control target key start
LH: loop header
LB: loop body
LE: loop exit
PB: predicated region body
PF: predicated region fallthrough
CT: control target
= control target key end

     0   :  { %s7673_s18 = smov 0   ;;  %s9796_s0 = inlined_call_operand.vmem [shape: bf16[2,42,256], index: 0, kind: input, shape index: {}]   ;;  %s9797_s1 = inlined_call_operand.vmem [shape: bf16[9,256,512], index: 1, kind: input, shape index: {}]   ;;  %s9798_s2 = inlined_call_operand.vmem [shape: f32[1,512], index: 2, kind: input, shape index: {}]   ;;  %s9799_s3 = inlined_call_operand.vmem [shape: bf16[512,128], index: 3, kind: input, shape index: {}]   ;;  %s9800_s4 = inlined_call_operand.vmem [shape: f32[1,128], index: 4, kind: input, shape index: {}]   ;;  %s9801_s5 = inlined_call_operand.vmem [shape: f32[2,24,128], index: 5, kind: output, shape index: {}]  }
   0x1 LB: > { %s5421_s19 = sadd.s32 4294967295, %s7641_s18   ;;  %p5425_p0 = scmp.ge.s32.totalorder %s7641_s18, 1  ;;  %s7641_s18 = sphi %s7673_s18, %s15_s18  }
   0x2   : > { %p187_p1 = scmp.lt.s32.totalorder %s7641_s18, 3 }
   0x4   : > { %p188_p2 = pnand %p5425_p0, %p187_p1 }
   0x5   : > { %v6707_v0 = vld [vmem:[%s9797_s1 + $0x204] ss:$16 sps:$4 sm:$0xff] (!%p188_p2)   ;;  %v6709_v1 = vld [vmem:[%s9797_s1 + $0x20c] ss:$16 sps:$4 sm:$0xff] (!%p188_p2)   ;;  %v6711_v2 = vld [vmem:[%s9797_s1 + $0x200] ss:$16 sps:$4 sm:$0xff] (!%p188_p2)  }
   0x6   : > { %191 = sbr.rel (%p188_p2) target bundleno = 1034 (0x40a), region = 40  ;;  %730 = vmatprep.subr.bf16.mxu0 (!%p188_p2), %v6707_v0  ;;  %v6712_v3 = vld [vmem:[%s9797_s1 + $0x208] ss:$16 sps:$4 sm:$0xff] (!%p188_p2)   ;;  %781 = vmatprep.subr.bf16.mxu1 (!%p188_p2), %v6709_v1  ;;  %v6713_v4 = vld [vmem:[%s9797_s1 + $0x224] ss:$16 sps:$4 sm:$0xff] (!%p188_p2)   ;;  %p215_p3 = scmp.lt.s32.totalorder (!%p188_p2), %s5421_s19, 1 }
   0x7   : > { %731 = vmatpush1.bf16.msra.mxu0 (!%p188_p2), %v6711_v2  ;;  %782 = vmatpush1.bf16.msra.mxu1 (!%p188_p2), %v6712_v3  ;;  %v6715_v5 = vld [vmem:[%s9797_s1 + $0x22c] ss:$16 sps:$4 sm:$0xff] (!%p188_p2)   ;;  %v6717_v6 = vld [vmem:[%s9797_s1 + $0x220] ss:$16 sps:$4 sm:$0xff] (!%p188_p2)   ;;  %v6718_v7 = vld [vmem:[%s9797_s1 + $0x228] ss:$16 sps:$4 sm:$0xff] (!%p188_p2)  }
   0x8   : > { %732 = vmatprep.subr.bf16.mxu0 (!%p188_p2), %v6713_v4  ;;  %783 = vmatprep.subr.bf16.mxu1 (!%p188_p2), %v6715_v5  ;;  %v6719_v8 = vld [vmem:[%s9797_s1 + $0x244] ss:$16 sps:$4 sm:$0xff] (!%p188_p2)   ;;  %v6721_v9 = vld [vmem:[%s9797_s1 + $0x24c] ss:$16 sps:$4 sm:$0xff] (!%p188_p2)   ;;  %v6723_v10 = vld [vmem:[%s9797_s1 + $0x240] ss:$16 sps:$4 sm:$0xff] (!%p188_p2)  }
   0x9   : > { %v6724_v11 = vld [vmem:[%s9797_s1 + $0x248] ss:$16 sps:$4 sm:$0xff] (!%p188_p2)   ;;  %v6725_v12 = vld [vmem:[%s9797_s1 + $0x264] ss:$16 sps:$4 sm:$0xff] (!%p188_p2)   ;;  %v6727_v13 = vld [vmem:[%s9797_s1 + $0x26c] ss:$16 sps:$4 sm:$0xff] (!%p188_p2)  }
   0xa   : > { %v6729_v14 = vld [vmem:[%s9797_s1 + $0x260] ss:$16 sps:$4 sm:$0xff] (!%p188_p2)   ;;  %v6730_v15 = vld [vmem:[%s9797_s1 + $0x268] ss:$16 sps:$4 sm:$0xff] (!%p188_p2)   ;;  %v6731_v16 = vld [vmem:[%s9797_s1 + $0x284] ss:$16 sps:$4 sm:$0xff] (!%p188_p2)  }
   0xb   : > { %733 = vmatpush1.bf16.msra.mxu0 (!%p188_p2), %v6717_v6  ;;  %784 = vmatpush1.bf16.msra.mxu1 (!%p188_p2), %v6718_v7  ;;  %v6733_v17 = vld [vmem:[%s9797_s1 + $0x28c] ss:$16 sps:$4 sm:$0xff] (!%p188_p2)   ;;  %v6735_v18 = vld [vmem:[%s9797_s1 + $0x280] ss:$16 sps:$4 sm:$0xff] (!%p188_p2)   ;;  %v6736_v19 = vld [vmem:[%s9797_s1 + $0x288] ss:$16 sps:$4 sm:$0xff] (!%p188_p2)  }
   0xc   : > { %734 = vmatprep.subr.bf16.mxu0 (!%p188_p2), %v6719_v8  ;;  %785 = vmatprep.subr.bf16.mxu1 (!%p188_p2), %v6721_v9  ;;  %v6737_v20 = vld [vmem:[%s9797_s1 + $0x2a4] ss:$16 sps:$4 sm:$0xff] (!%p188_p2)   ;;  %v6739_v21 = vld [vmem:[%s9797_s1 + $0x2ac] ss:$16 sps:$4 sm:$0xff] (!%p188_p2)   ;;  %v6741_v22 = vld [vmem:[%s9797_s1 + $0x2a0] ss:$16 sps:$4 sm:$0xff] (!%p188_p2)  }
   0xd   : > { %v6742_v23 = vld [vmem:[%s9797_s1 + $0x2a8] ss:$16 sps:$4 sm:$0xff]   ;;  %v6743_v24 = vld [vmem:[%s9797_s1 + $0x2c4] ss:$16 sps:$4 sm:$0xff]   ;;  %v6745_v25 = vld [vmem:[%s9797_s1 + $0x2cc] ss:$16 sps:$4 sm:$0xff]  }
   0xe   : > { %v6747_v26 = vld [vmem:[%s9797_s1 + $0x2c0] ss:$16 sps:$4 sm:$0xff]   ;;  %v6748_v27 = vld [vmem:[%s9797_s1 + $0x2c8] ss:$16 sps:$4 sm:$0xff]   ;;  %v6749_v28 = vld [vmem:[%s9797_s1 + $0x2e4] ss:$16 sps:$4 sm:$0xff]  }
   0xf   : > { %735 = vmatpush1.bf16.msra.mxu0 %v6723_v10  ;;  %786 = vmatpush1.bf16.msra.mxu1 %v6724_v11  ;;  %v6751_v29 = vld [vmem:[%s9797_s1 + $0x2ec] ss:$16 sps:$4 sm:$0xff]   ;;  %v6753_v30 = vld [vmem:[%s9797_s1 + $0x2e0] ss:$16 sps:$4 sm:$0xff]   ;;  %v6754_v31 = vld [vmem:[%s9797_s1 + $0x2e8] ss:$16 sps:$4 sm:$0xff]  }
  0x10   : > { %736 = vmatprep.subr.bf16.mxu0 %v6725_v12  ;;  %787 = vmatprep.subr.bf16.mxu1 %v6727_v13  ;;  %v6755_v32 = vld [vmem:[%s9797_s1 + $0x304] ss:$16 sps:$4 sm:$0xff]   ;;  %v6757_v33 = vld [vmem:[%s9797_s1 + $0x30c] ss:$16 sps:$4 sm:$0xff]   ;;  %v6759_v34 = vld [vmem:[%s9797_s1 + $0x300] ss:$16 sps:$4 sm:$0xff]  }
  0x11   : > { %v6760_v35 = vld [vmem:[%s9797_s1 + $0x308] ss:$16 sps:$4 sm:$0xff]   ;;  %s9803_s19 = smov (!%p215_p3, %s5421_s19), 1  ;;  %v6761_v36 = vld [vmem:[%s9797_s1 + $0x324] ss:$16 sps:$4 sm:$0xff]   ;;  %vm1331_vm1 = vcmask 1046528  }
  0x12   : > { %v6763_v37 = vld [vmem:[%s9797_s1 + $0x32c] ss:$16 sps:$4 sm:$0xff]   ;;  %v6765_v38 = vld [vmem:[%s9797_s1 + $0x320] ss:$16 sps:$4 sm:$0xff]   ;;  %s6697_s29 = smul.u32 48, %s9803_s19  ;;  %vm1853_vm2 = vcmask 1044480  }
  0x13   : > { %737 = vmatpush1.bf16.msra.mxu0 %v6729_v14  ;;  %788 = vmatpush1.bf16.msra.mxu1 %v6730_v15  ;;  %v6766_v39 = vld [vmem:[%s9797_s1 + $0x328] ss:$16 sps:$4 sm:$0xff]   ;;  %v6767_v40 = vld [vmem:[%s9797_s1 + $0x344] ss:$16 sps:$4 sm:$0xff]   ;;  %v6769_v41 = vld [vmem:[%s9797_s1 + $0x34c] ss:$16 sps:$4 sm:$0xff]  }
  0x14   : > { %738 = vmatprep.subr.bf16.mxu0 %v6731_v16  ;;  %789 = vmatprep.subr.bf16.mxu1 %v6733_v17  ;;  %v6771_v42 = vld [vmem:[%s9797_s1 + $0x340] ss:$16 sps:$4 sm:$0xff]   ;;  %v6772_v43 = vld [vmem:[%s9797_s1 + $0x348] ss:$16 sps:$4 sm:$0xff]   ;;  %s7823_s17 = scalar_lea.vmem %s9796_s0, %s6697_s29  ;;  %v6773_v44 = vld [vmem:[%s9797_s1 + $0x364] ss:$16 sps:$4 sm:$0xff]  }
  0x15   : > { %v6775_v45 = vld [vmem:[%s9797_s1 + $0x36c] ss:$16 sps:$4 sm:$0xff]   ;;  %v6777_v46 = vld [vmem:[%s9797_s1 + $0x360] ss:$16 sps:$4 sm:$0xff]   ;;  %v6778_v47 = vld [vmem:[%s9797_s1 + $0x368] ss:$16 sps:$4 sm:$0xff]  }
  0x16   : > { %v226_v48 = vld [vmem:[%s7823_s17] sm:$0xff]  ;;  %v7839_v49 = vld [vmem:[%s7823_s17 + $0x8] sm:$0xff]  ;;  %v7842_v50 = vld [vmem:[%s7823_s17 + $0x10] sm:$0xff]  ;;  %vm375_vm0 = vsmask.f32 7424  ;;  %vm3434_vm4 = vcmask 1045504  }
  0x17   : > { %739 = vmatpush1.bf16.msra.mxu0 %v6735_v18  ;;  %790 = vmatpush1.bf16.msra.mxu1 %v6736_v19  ;;  %v293_v51 = vld [vmem:[%s7823_s17 + $0x18] sm:$0x11]  ;;  %v6779_v52 = vld [vmem:[%s9797_s1 + $0x384] ss:$16 sps:$4 sm:$0xff]   ;;  %v7849_v53 = vcombine.high %v226_v48, %v7839_v49  ;;  %v6783_v59 = vld [vmem:[%s9797_s1 + $0x380] ss:$16 sps:$4 sm:$0xff]   ;;  %v7870_v0 = vcombine.low %v226_v48, %v7839_v49 }
  0x18   : > { %740 = vmatprep.subr.bf16.mxu0 %v6737_v20  ;;  %791 = vmatprep.subr.bf16.mxu1 %v6739_v21  ;;  %v7852_v54 = vcombine.high %v7842_v50, %v293_v51  ;;  %v6781_v55 = vld [vmem:[%s9797_s1 + $0x38c] ss:$16 sps:$4 sm:$0xff]   ;;  %v6784_v60 = vld [vmem:[%s9797_s1 + $0x388] ss:$16 sps:$4 sm:$0xff]   ;;  %v6785_v61 = vld [vmem:[%s9797_s1 + $0x3a4] ss:$16 sps:$4 sm:$0xff]   ;;  %v7886_v7 = vcombine.low %v7842_v50, %v293_v51 }
  0x19   : > { %v389_v56 = vshrl.u32 %v7849_v53, 16  ;;  %v391_v57 = vshll.u32 %v7849_v53, 16  ;;  %v6787_v1 = vld [vmem:[%s9797_s1 + $0x3ac] ss:$16 sps:$4 sm:$0xff]   ;;  %v6789_v3 = vld [vmem:[%s9797_s1 + $0x3a0] ss:$16 sps:$4 sm:$0xff]  }
  0x1a   : > { %v396_v58 = vshll.u32 %v7852_v54, 16  ;;  %v6790_v4 = vld [vmem:[%s9797_s1 + $0x3a8] ss:$16 sps:$4 sm:$0xff]   ;;  %v6791_v5 = vld [vmem:[%s9797_s1 + $0x3c4] ss:$16 sps:$4 sm:$0xff]   ;;  %v379_v8 = vshll.u32 %v7870_v0, 16 }
  0x1b   : > { %741 = vmatpush1.bf16.msra.mxu0 %v6741_v22  ;;  %792 = vmatpush1.bf16.msra.mxu1 %v6742_v23  ;;  %v393_v62 = vrot.slane %v391_v57, 1  ;;  %v6793_v9 = vld [vmem:[%s9797_s1 + $0x3cc] ss:$16 sps:$4 sm:$0xff]   ;;  %v6795_v10 = vld [vmem:[%s9797_s1 + $0x3c0] ss:$16 sps:$4 sm:$0xff]   ;;  %v377_v13 = vshrl.u32 %v7870_v0, 16 }
  0x1c   : > { %742 = vmatprep.subr.bf16.mxu0 %v6743_v24  ;;  %793 = vmatprep.subr.bf16.mxu1 %v6745_v25  ;;  %v398_v63 = vrot.slane %v396_v58, 1  ;;  %v6796_v11 = vld [vmem:[%s9797_s1 + $0x3c8] ss:$16 sps:$4 sm:$0xff]   ;;  %v6797_v12 = vld [vmem:[%s9797_s1 + $0x3e4] ss:$16 sps:$4 sm:$0xff]   ;;  %v381_v14 = vrot.slane %v379_v8, 1 }
  0x1d   : > { %v394_v2 = vor.u32 %v393_v62, %v389_v56  ;;  %v384_v15 = vshll.u32 %v7886_v7, 16  ;;  %v6799_v16 = vld [vmem:[%s9797_s1 + $0x3ec] ss:$16 sps:$4 sm:$0xff]   ;;  %v6801_v17 = vld [vmem:[%s9797_s1 + $0x3e0] ss:$16 sps:$4 sm:$0xff]   ;;  %v403_v23 = vshrl.u32 %v7852_v54, 16 }
  0x1e   : > { %v6802_v18 = vld [vmem:[%s9797_s1 + $0x3e8] ss:$16 sps:$4 sm:$0xff]   ;;  %v6807_v19 = vld [vmem:[%s9797_s1 + $0x4] ss:$16 sps:$4 sm:$0xff]   ;;  %v382_v20 = vor.u32 %v381_v14, %v377_v13  ;;  %v6810_v22 = vld [vmem:[%s9797_s1 + $0xc] ss:$16 sps:$4 sm:$0xff]  }
  0x1f   : > { %743 = vmatpush1.bf16.msra.mxu0 %v6747_v26  ;;  %794 = vmatpush1.bf16.msra.mxu1 %v6748_v27  ;;  %v399_v6 = vsel %vm375_vm0, %v394_v2, %v398_v63  ;;  %v386_v21 = vrot.slane %v384_v15, 1  ;;  %v6805_v24 = vld [vmem:[%s9797_s1] ss:$16 sps:$4 sm:$0xff]   ;;  %v6808_v25 = vld [vmem:[%s9797_s1 + $0x8] ss:$16 sps:$4 sm:$0xff]  }
  0x20   : > { %744 = vmatprep.subr.bf16.mxu0 %v6749_v28  ;;  %795 = vmatprep.subr.bf16.mxu1 %v6751_v29  ;;  %v6815_v27 = vld [vmem:[%s9797_s1 + $0x24] ss:$16 sps:$4 sm:$0xff]   ;;  %v6818_v28 = vld [vmem:[%s9797_s1 + $0x2c] ss:$16 sps:$4 sm:$0xff]   ;;  %v405_v29 = vor.u32 %v403_v23, %v398_v63  ;;  %v6837_v48 = vld [vmem:[%s9797_s1 + $0xa0] ss:$16 sps:$4 sm:$0xff]  }
  0x21   : > { %762 = vmatprep.mubr.bf16.mxu0 %v399_v6  ;;  %813 = vmatprep.mubr.bf16.mxu1 %v399_v6  ;;  %v387_v26 = vsel %vm375_vm0, %v382_v20, %v386_v21  ;;  %v6840_v51 = vld [vmem:[%s9797_s1 + $0xa8] ss:$16 sps:$4 sm:$0xff]   ;;  %v6851_v57 = vld [vmem:[%s9797_s1 + $0xe4] ss:$16 sps:$4 sm:$0xff]   ;;  %v6854_v58 = vld [vmem:[%s9797_s1 + $0xec] ss:$16 sps:$4 sm:$0xff]  }
  0x22   : > { %v6846_v56 = vld [vmem:[%s9797_s1 + $0xc8] ss:$16 sps:$4 sm:$0xff]   ;;  %v6860_v62 = vld [vmem:[%s9797_s1 + $0x10c] ss:$16 sps:$4 sm:$0xff]   ;;  %v6855_v63 = vld [vmem:[%s9797_s1 + $0x100] ss:$16 sps:$4 sm:$0xff]  }
  0x23   : > { %745 = vmatpush1.bf16.msra.mxu0 %v6753_v30  ;;  %796 = vmatpush1.bf16.msra.mxu1 %v6754_v31  ;;  %v6813_v30 = vld [vmem:[%s9797_s1 + $0x20] ss:$16 sps:$4 sm:$0xff]   ;;  %v400_v31 = vshrl.u32 %v7886_v7, 16  ;;  %v6863_v2 = vld [vmem:[%s9797_s1 + $0x124] ss:$16 sps:$4 sm:$0xff]  }
  0x24   : > { %746 = vmatprep.subr.bf16.mxu0 %v6755_v32  ;;  %797 = vmatprep.subr.bf16.mxu1 %v6757_v33  ;;  %v6816_v32 = vld [vmem:[%s9797_s1 + $0x28] ss:$16 sps:$4 sm:$0xff]   ;;  %v6821_v33 = vld [vmem:[%s9797_s1 + $0x44] ss:$16 sps:$4 sm:$0xff]   ;;  %v6872_v8 = vld [vmem:[%s9797_s1 + $0x14c] ss:$16 sps:$4 sm:$0xff]  }
  0x25   : > { %v6869_v6 = vld [vmem:[%s9797_s1 + $0x144] ss:$16 sps:$4 sm:$0xff]   ;;  %v6873_v13 = vld [vmem:[%s9797_s1 + $0x160] ss:$16 sps:$4 sm:$0xff]   ;;  %v6876_v14 = vld [vmem:[%s9797_s1 + $0x168] ss:$16 sps:$4 sm:$0xff]  }
  0x26   : > { %v6881_v15 = vld [vmem:[%s9797_s1 + $0x184] ss:$16 sps:$4 sm:$0xff]   ;;  %v6890_v20 = vld [vmem:[%s9797_s1 + $0x1ac] ss:$16 sps:$4 sm:$0xff]   ;;  %vm2369_vm3 = vsmask.f32 4352 }
  0x27   : > { %747 = vmatpush1.bf16.msra.mxu0 %v6759_v34  ;;  %798 = vmatpush1.bf16.msra.mxu1 %v6760_v35  ;;  %v6824_v34 = vld [vmem:[%s9797_s1 + $0x4c] ss:$16 sps:$4 sm:$0xff]   ;;  %v6819_v35 = vld [vmem:[%s9797_s1 + $0x40] ss:$16 sps:$4 sm:$0xff]   ;;  %v6893_v23 = vld [vmem:[%s9797_s1 + $0x1c4] ss:$16 sps:$4 sm:$0xff]  }
  0x28   : > { %748 = vmatprep.subr.bf16.mxu0 %v6761_v36  ;;  %799 = vmatprep.subr.bf16.mxu1 %v6763_v37  ;;  %v402_v36 = vor.u32 %v400_v31, %v386_v21  ;;  %v6822_v37 = vld [vmem:[%s9797_s1 + $0x48] ss:$16 sps:$4 sm:$0xff]   ;;  %v6885_v21 = vld [vmem:[%s9797_s1 + $0x1a0] ss:$16 sps:$4 sm:$0xff]   ;;  %v6905_v31 = vld [vmem:[%s9797_s1 + $0x404] ss:$16 sps:$4 sm:$0xff]  }
  0x29   : > { %vm3950_vm5 = vsmask.f32 5376 }
  0x2b   : > { %749 = vmatpush1.bf16.msra.mxu0 %v6765_v38  ;;  %800 = vmatpush1.bf16.msra.mxu1 %v6766_v39  ;;  %v6827_v38 = vld [vmem:[%s9797_s1 + $0x64] ss:$16 sps:$4 sm:$0xff]   ;;  %v6830_v39 = vld [vmem:[%s9797_s1 + $0x6c] ss:$16 sps:$4 sm:$0xff]  }
  0x2c   : > { %750 = vmatprep.subr.bf16.mxu0 %v6767_v40  ;;  %801 = vmatprep.subr.bf16.mxu1 %v6769_v41  ;;  %v6825_v40 = vld [vmem:[%s9797_s1 + $0x60] ss:$16 sps:$4 sm:$0xff]   ;;  %v6828_v41 = vld [vmem:[%s9797_s1 + $0x68] ss:$16 sps:$4 sm:$0xff]  }
  0x2f   : > { %751 = vmatpush1.bf16.msra.mxu0 %v6771_v42  ;;  %802 = vmatpush1.bf16.msra.mxu1 %v6772_v43  ;;  %v6833_v42 = vld [vmem:[%s9797_s1 + $0x84] ss:$16 sps:$4 sm:$0xff]   ;;  %v6836_v43 = vld [vmem:[%s9797_s1 + $0x8c] ss:$16 sps:$4 sm:$0xff]  }
  0x30   : > { %752 = vmatprep.subr.bf16.mxu0 %v6773_v44  ;;  %803 = vmatprep.subr.bf16.mxu1 %v6775_v45  ;;  %v6831_v44 = vld [vmem:[%s9797_s1 + $0x80] ss:$16 sps:$4 sm:$0xff]   ;;  %v6834_v45 = vld [vmem:[%s9797_s1 + $0x88] ss:$16 sps:$4 sm:$0xff]  }
  0x33   : > { %753 = vmatpush1.bf16.msra.mxu0 %v6777_v46  ;;  %804 = vmatpush1.bf16.msra.mxu1 %v6778_v47  ;;  %v6839_v46 = vld [vmem:[%s9797_s1 + $0xa4] ss:$16 sps:$4 sm:$0xff]   ;;  %v6842_v47 = vld [vmem:[%s9797_s1 + $0xac] ss:$16 sps:$4 sm:$0xff]  }
  0x34   : > { %754 = vmatprep.subr.bf16.mxu0 %v6779_v52  ;;  %805 = vmatprep.subr.bf16.mxu1 %v6781_v55  ;;  %v6845_v52 = vld [vmem:[%s9797_s1 + $0xc4] ss:$16 sps:$4 sm:$0xff]   ;;  %v6843_v55 = vld [vmem:[%s9797_s1 + $0xc0] ss:$16 sps:$4 sm:$0xff]  }
  0x37   : > { %755 = vmatpush1.bf16.msra.mxu0 %v6783_v59  ;;  %806 = vmatpush1.bf16.msra.mxu1 %v6784_v60  ;;  %v6849_v59 = vld [vmem:[%s9797_s1 + $0xe0] ss:$16 sps:$4 sm:$0xff]   ;;  %v6852_v60 = vld [vmem:[%s9797_s1 + $0xe8] ss:$16 sps:$4 sm:$0xff]  }
  0x38   : > { %756 = vmatprep.subr.bf16.mxu0 %v6785_v61  ;;  %807 = vmatprep.subr.bf16.mxu1 %v6787_v1  ;;  %v6857_v61 = vld [vmem:[%s9797_s1 + $0x104] ss:$16 sps:$4 sm:$0xff]   ;;  %v6858_v1 = vld [vmem:[%s9797_s1 + $0x108] ss:$16 sps:$4 sm:$0xff]  }
  0x3b   : > { %757 = vmatpush1.bf16.msra.mxu0 %v6789_v3  ;;  %808 = vmatpush1.bf16.msra.mxu1 %v6790_v4  ;;  %v6866_v3 = vld [vmem:[%s9797_s1 + $0x12c] ss:$16 sps:$4 sm:$0xff]   ;;  %v6861_v4 = vld [vmem:[%s9797_s1 + $0x120] ss:$16 sps:$4 sm:$0xff]  }
  0x3c   : > { %758 = vmatprep.subr.bf16.mxu0 %v6791_v5  ;;  %809 = vmatprep.subr.bf16.mxu1 %v6793_v9  ;;  %v6864_v5 = vld [vmem:[%s9797_s1 + $0x128] ss:$16 sps:$4 sm:$0xff]   ;;  %v6867_v9 = vld [vmem:[%s9797_s1 + $0x140] ss:$16 sps:$4 sm:$0xff]  }
  0x3f   : > { %759 = vmatpush1.bf16.msra.mxu0 %v6795_v10  ;;  %810 = vmatpush1.bf16.msra.mxu1 %v6796_v11  ;;  %v6870_v10 = vld [vmem:[%s9797_s1 + $0x148] ss:$16 sps:$4 sm:$0xff]   ;;  %v6875_v11 = vld [vmem:[%s9797_s1 + $0x164] ss:$16 sps:$4 sm:$0xff]  }
  0x40   : > { %760 = vmatprep.subr.bf16.mxu0 %v6797_v12  ;;  %811 = vmatprep.subr.bf16.mxu1 %v6799_v16  ;;  %v6878_v12 = vld [vmem:[%s9797_s1 + $0x16c] ss:$16 sps:$4 sm:$0xff]  }
  0x41   : > { %v6884_v16 = vld [vmem:[%s9797_s1 + $0x18c] ss:$16 sps:$4 sm:$0xff]  }
  0x43   : > { %761 = vmatpush1.bf16.msra.mxu0 %v6801_v17  ;;  %812 = vmatpush1.bf16.msra.mxu1 %v6802_v18  ;;  %v6879_v17 = vld [vmem:[%s9797_s1 + $0x180] ss:$16 sps:$4 sm:$0xff]   ;;  %v6882_v18 = vld [vmem:[%s9797_s1 + $0x188] ss:$16 sps:$4 sm:$0xff]  }
  0x44   : > { %1158 = vmatprep.subr.bf16.mxu0 %v6807_v19  ;;  %1209 = vmatprep.subr.bf16.mxu1 %v6810_v22  ;;  %v6887_v19 = vld [vmem:[%s9797_s1 + $0x1a4] ss:$16 sps:$4 sm:$0xff]   ;;  %v6888_v22 = vld [vmem:[%s9797_s1 + $0x1a8] ss:$16 sps:$4 sm:$0xff]  }
  0x46   : > { %763 = vmatmul.mubr.bf16.vlgmr.msra.gmra.mrb[0].mxu0 %v387_v26  ;;  %814 = vmatmul.mubr.bf16.vlgmr.msra.gmra.mrb[0].mxu1 %v387_v26  ;;  %v6894_v26 = vld [vmem:[%s9797_s1 + $0x1c8] ss:$16 sps:$4 sm:$0xff]  }
  0x47   : > { %1159 = vmatpush1.bf16.msra.mxu0 %v6805_v24  ;;  %1210 = vmatpush1.bf16.msra.mxu1 %v6808_v25  ;;  %v6896_v24 = vld [vmem:[%s9797_s1 + $0x1cc] ss:$16 sps:$4 sm:$0xff]   ;;  %v6891_v25 = vld [vmem:[%s9797_s1 + $0x1c0] ss:$16 sps:$4 sm:$0xff]  }
  0x48   : > { %1160 = vmatprep.subr.bf16.mxu0 %v6815_v27  ;;  %1211 = vmatprep.subr.bf16.mxu1 %v6818_v28  ;;  %v6899_v27 = vld [vmem:[%s9797_s1 + $0x1e4] ss:$16 sps:$4 sm:$0xff]   ;;  %v6902_v28 = vld [vmem:[%s9797_s1 + $0x1ec] ss:$16 sps:$4 sm:$0xff]  }
  0x49   : > { %772 = vmatprep.mubr.bf16.mxu0 %v405_v29  ;;  %823 = vmatprep.mubr.bf16.mxu1 %v405_v29  ;;  %v6897_v29 = vld [vmem:[%s9797_s1 + $0x1e0] ss:$16 sps:$4 sm:$0xff]  }
  0x4b   : > { %1161 = vmatpush1.bf16.msra.mxu0 %v6813_v30  ;;  %1212 = vmatpush1.bf16.msra.mxu1 %v6816_v32  ;;  %v6900_v30 = vld [vmem:[%s9797_s1 + $0x1e8] ss:$16 sps:$4 sm:$0xff]   ;;  %v6908_v32 = vld [vmem:[%s9797_s1 + $0x40c] ss:$16 sps:$4 sm:$0xff]  }
  0x4c   : > { %1162 = vmatprep.subr.bf16.mxu0 %v6821_v33  ;;  %1213 = vmatprep.subr.bf16.mxu1 %v6824_v34  ;;  %v6903_v33 = vld [vmem:[%s9797_s1 + $0x400] ss:$16 sps:$4 sm:$0xff]   ;;  %v6906_v34 = vld [vmem:[%s9797_s1 + $0x408] ss:$16 sps:$4 sm:$0xff]  }
  0x4e   : > { %773 = vmatmul.mubr.bf16.gmra.mrb[4].mxu0 %v402_v36  ;;  %824 = vmatmul.mubr.bf16.gmra.mrb[4].mxu1 %v402_v36  ;;  %v6914_v36 = vld [vmem:[%s9797_s1 + $0x42c] ss:$16 sps:$4 sm:$0xff]  }
  0x4f   : > { %1163 = vmatpush1.bf16.msra.mxu0 %v6819_v35  ;;  %1214 = vmatpush1.bf16.msra.mxu1 %v6822_v37  ;;  %v6911_v35 = vld [vmem:[%s9797_s1 + $0x424] ss:$16 sps:$4 sm:$0xff]   ;;  %v5561_v37 = vcombine.high %v7842_v50, %v7842_v50 }
  0x50   : > { %1164 = vmatprep.subr.bf16.mxu0 %v6827_v38  ;;  %1215 = vmatprep.subr.bf16.mxu1 %v6830_v39  ;;  %v8130_v38 = vld [vmem:[%s7823_s17] sm:$0xee] }
  0x51   : > { %1190 = vmatprep.mubr.bf16.mxu0 %v7849_v53  ;;  %1241 = vmatprep.mubr.bf16.mxu1 %v7849_v53  ;;  %v6848_v53 = vld [vmem:[%s9797_s1 + $0xcc] ss:$16 sps:$4 sm:$0xff]   ;;  %v6909_v39 = vld [vmem:[%s9797_s1 + $0x420] ss:$16 sps:$4 sm:$0xff]  }
  0x53   : > { %1165 = vmatpush1.bf16.msra.mxu0 %v6825_v40  ;;  %1216 = vmatpush1.bf16.msra.mxu1 %v6828_v41  ;;  %v6912_v40 = vld [vmem:[%s9797_s1 + $0x428] ss:$16 sps:$4 sm:$0xff]   ;;  %v5691_v41 = vcombine.high %v8130_v38, %v7839_v49  ;;  %v5560_v49 = vcombine.low %v7842_v50, %v7842_v50  ;;  %v6928_v50 = vld [vmem:[%s9797_s1 + $0x46c] ss:$16 sps:$4 sm:$0xff]  }
  0x54   : > { %1166 = vmatprep.subr.bf16.mxu0 %v6833_v42  ;;  %1217 = vmatprep.subr.bf16.mxu1 %v6836_v43  ;;  %v6919_v42 = vld [vmem:[%s9797_s1 + $0x444] ss:$16 sps:$4 sm:$0xff]   ;;  %v8149_v43 = vrot.slane %v7852_v54, 1  ;;  %v6923_v54 = vld [vmem:[%s9797_s1 + $0x460] ss:$16 sps:$4 sm:$0xff]  }
  0x57   : > { %1167 = vmatpush1.bf16.msra.mxu0 %v6831_v44  ;;  %1218 = vmatpush1.bf16.msra.mxu1 %v6834_v45  ;;  %v6917_v44 = vld [vmem:[%s9797_s1 + $0x440] ss:$16 sps:$4 sm:$0xff]   ;;  %v6920_v45 = vld [vmem:[%s9797_s1 + $0x448] ss:$16 sps:$4 sm:$0xff]  }
  0x58   : > { %1168 = vmatprep.subr.bf16.mxu0 %v6839_v46  ;;  %1219 = vmatprep.subr.bf16.mxu1 %v6842_v47  ;;  %v1335_v46 = vrot.slane %v5691_v41, 1  ;;  %v6925_v47 = vld [vmem:[%s9797_s1 + $0x464] ss:$16 sps:$4 sm:$0xff]   ;;  %v6998_v41 = vld [vmem:[%s9797_s1 + $0x5e8] ss:$16 sps:$4 sm:$0xff]  }
  0x5b   : > { %1169 = vmatpush1.bf16.msra.mxu0 %v6837_v48  ;;  %1220 = vmatpush1.bf16.msra.mxu1 %v6840_v51  ;;  %v6926_v48 = vld [vmem:[%s9797_s1 + $0x468] ss:$16 sps:$4 sm:$0xff]   ;;  %v1337_v51 = vsel %vm1331_vm1, %v1335_v46, %v8149_v43  ;;  %v8339_v46 = vld [vmem:[%s7823_s17] sm:$0x88] }
  0x5c   : > { %1170 = vmatprep.subr.bf16.mxu0 %v6845_v52  ;;  %1221 = vmatprep.subr.bf16.mxu1 %v6848_v53  ;;  %v6931_v52 = vld [vmem:[%s9797_s1 + $0x484] ss:$16 sps:$4 sm:$0xff]   ;;  %v6934_v53 = vld [vmem:[%s9797_s1 + $0x48c] ss:$16 sps:$4 sm:$0xff]  }
  0x5f   : > { %1171 = vmatpush1.bf16.msra.mxu0 %v6843_v55  ;;  %1222 = vmatpush1.bf16.msra.mxu1 %v6846_v56  ;;  %v6929_v55 = vld [vmem:[%s9797_s1 + $0x480] ss:$16 sps:$4 sm:$0xff]   ;;  %v6932_v56 = vld [vmem:[%s9797_s1 + $0x488] ss:$16 sps:$4 sm:$0xff]  }
  0x60   : > { %1172 = vmatprep.subr.bf16.mxu0 %v6851_v57  ;;  %1223 = vmatprep.subr.bf16.mxu1 %v6854_v58  ;;  %v6937_v57 = vld [vmem:[%s9797_s1 + $0x4a4] ss:$16 sps:$4 sm:$0xff]   ;;  %v6940_v58 = vld [vmem:[%s9797_s1 + $0x4ac] ss:$16 sps:$4 sm:$0xff]  }
  0x63   : > { %1173 = vmatpush1.bf16.msra.mxu0 %v6849_v59  ;;  %1224 = vmatpush1.bf16.msra.mxu1 %v6852_v60  ;;  %v6935_v59 = vld [vmem:[%s9797_s1 + $0x4a0] ss:$16 sps:$4 sm:$0xff]   ;;  %v6938_v60 = vld [vmem:[%s9797_s1 + $0x4a8] ss:$16 sps:$4 sm:$0xff]  }
  0x64   : > { %1174 = vmatprep.subr.bf16.mxu0 %v6857_v61  ;;  %1225 = vmatprep.subr.bf16.mxu1 %v6860_v62  ;;  %v6943_v61 = vld [vmem:[%s9797_s1 + $0x4c4] ss:$16 sps:$4 sm:$0xff]   ;;  %v6946_v62 = vld [vmem:[%s9797_s1 + $0x4cc] ss:$16 sps:$4 sm:$0xff]  }
  0x67   : > { %1175 = vmatpush1.bf16.msra.mxu0 %v6855_v63  ;;  %1226 = vmatpush1.bf16.msra.mxu1 %v6858_v1  ;;  %v6941_v63 = vld [vmem:[%s9797_s1 + $0x4c0] ss:$16 sps:$4 sm:$0xff]   ;;  %v6944_v1 = vld [vmem:[%s9797_s1 + $0x4c8] ss:$16 sps:$4 sm:$0xff]  }
  0x68   : > { %1176 = vmatprep.subr.bf16.mxu0 %v6863_v2  ;;  %1227 = vmatprep.subr.bf16.mxu1 %v6866_v3  ;;  %v6949_v2 = vld [vmem:[%s9797_s1 + $0x4e4] ss:$16 sps:$4 sm:$0xff]   ;;  %v6952_v3 = vld [vmem:[%s9797_s1 + $0x4ec] ss:$16 sps:$4 sm:$0xff]  }
  0x6b   : > { %1177 = vmatpush1.bf16.msra.mxu0 %v6861_v4  ;;  %1228 = vmatpush1.bf16.msra.mxu1 %v6864_v5  ;;  %v6947_v4 = vld [vmem:[%s9797_s1 + $0x4e0] ss:$16 sps:$4 sm:$0xff]   ;;  %v6950_v5 = vld [vmem:[%s9797_s1 + $0x4e8] ss:$16 sps:$4 sm:$0xff]  }
  0x6c   : > { %1178 = vmatprep.subr.bf16.mxu0 %v6869_v6  ;;  %1229 = vmatprep.subr.bf16.mxu1 %v6872_v8  ;;  %v6955_v6 = vld [vmem:[%s9797_s1 + $0x504] ss:$16 sps:$4 sm:$0xff]   ;;  %v6958_v8 = vld [vmem:[%s9797_s1 + $0x50c] ss:$16 sps:$4 sm:$0xff]  }
  0x6f   : > { %1179 = vmatpush1.bf16.msra.mxu0 %v6867_v9  ;;  %1230 = vmatpush1.bf16.msra.mxu1 %v6870_v10  ;;  %v6953_v9 = vld [vmem:[%s9797_s1 + $0x500] ss:$16 sps:$4 sm:$0xff]   ;;  %v6956_v10 = vld [vmem:[%s9797_s1 + $0x508] ss:$16 sps:$4 sm:$0xff]  }
  0x70   : > { %1180 = vmatprep.subr.bf16.mxu0 %v6875_v11  ;;  %1231 = vmatprep.subr.bf16.mxu1 %v6878_v12  ;;  %v6961_v11 = vld [vmem:[%s9797_s1 + $0x524] ss:$16 sps:$4 sm:$0xff]   ;;  %v6964_v12 = vld [vmem:[%s9797_s1 + $0x52c] ss:$16 sps:$4 sm:$0xff]  }
  0x73   : > { %1181 = vmatpush1.bf16.msra.mxu0 %v6873_v13  ;;  %1232 = vmatpush1.bf16.msra.mxu1 %v6876_v14  ;;  %v6959_v13 = vld [vmem:[%s9797_s1 + $0x520] ss:$16 sps:$4 sm:$0xff]   ;;  %v6962_v14 = vld [vmem:[%s9797_s1 + $0x528] ss:$16 sps:$4 sm:$0xff]  }
  0x74   : > { %1182 = vmatprep.subr.bf16.mxu0 %v6881_v15  ;;  %1233 = vmatprep.subr.bf16.mxu1 %v6884_v16  ;;  %v6967_v15 = vld [vmem:[%s9797_s1 + $0x544] ss:$16 sps:$4 sm:$0xff]   ;;  %v6970_v16 = vld [vmem:[%s9797_s1 + $0x54c] ss:$16 sps:$4 sm:$0xff]  }
  0x77   : > { %1183 = vmatpush1.bf16.msra.mxu0 %v6879_v17  ;;  %1234 = vmatpush1.bf16.msra.mxu1 %v6882_v18  ;;  %v6965_v17 = vld [vmem:[%s9797_s1 + $0x540] ss:$16 sps:$4 sm:$0xff]   ;;  %v6968_v18 = vld [vmem:[%s9797_s1 + $0x548] ss:$16 sps:$4 sm:$0xff]  }
  0x78   : > { %1184 = vmatprep.subr.bf16.mxu0 %v6887_v19  ;;  %1235 = vmatprep.subr.bf16.mxu1 %v6890_v20  ;;  %v6973_v19 = vld [vmem:[%s9797_s1 + $0x564] ss:$16 sps:$4 sm:$0xff]   ;;  %v6976_v20 = vld [vmem:[%s9797_s1 + $0x56c] ss:$16 sps:$4 sm:$0xff]  }
  0x7b   : > { %1185 = vmatpush1.bf16.msra.mxu0 %v6885_v21  ;;  %1236 = vmatpush1.bf16.msra.mxu1 %v6888_v22  ;;  %v6971_v21 = vld [vmem:[%s9797_s1 + $0x560] ss:$16 sps:$4 sm:$0xff]   ;;  %v6974_v22 = vld [vmem:[%s9797_s1 + $0x568] ss:$16 sps:$4 sm:$0xff]  }
  0x7c   : > { %1186 = vmatprep.subr.bf16.mxu0 %v6893_v23  ;;  %1237 = vmatprep.subr.bf16.mxu1 %v6896_v24  ;;  %v6979_v23 = vld [vmem:[%s9797_s1 + $0x584] ss:$16 sps:$4 sm:$0xff]   ;;  %v6982_v24 = vld [vmem:[%s9797_s1 + $0x58c] ss:$16 sps:$4 sm:$0xff]  }
  0x7f   : > { %1187 = vmatpush1.bf16.msra.mxu0 %v6891_v25  ;;  %1238 = vmatpush1.bf16.msra.mxu1 %v6894_v26  ;;  %v6977_v25 = vld [vmem:[%s9797_s1 + $0x580] ss:$16 sps:$4 sm:$0xff]   ;;  %v6980_v26 = vld [vmem:[%s9797_s1 + $0x588] ss:$16 sps:$4 sm:$0xff]  }
  0x80   : > { %1188 = vmatprep.subr.bf16.mxu0 %v6899_v27  ;;  %1239 = vmatprep.subr.bf16.mxu1 %v6902_v28  ;;  %v6985_v27 = vld [vmem:[%s9797_s1 + $0x5a4] ss:$16 sps:$4 sm:$0xff]   ;;  %v6988_v28 = vld [vmem:[%s9797_s1 + $0x5ac] ss:$16 sps:$4 sm:$0xff]  }
  0x83   : > { %1189 = vmatpush1.bf16.msra.mxu0 %v6897_v29  ;;  %1240 = vmatpush1.bf16.msra.mxu1 %v6900_v30  ;;  %v6983_v29 = vld [vmem:[%s9797_s1 + $0x5a0] ss:$16 sps:$4 sm:$0xff]   ;;  %v6986_v30 = vld [vmem:[%s9797_s1 + $0x5a8] ss:$16 sps:$4 sm:$0xff]  }
  0x84   : > { %1662 = vmatprep.subr.bf16.mxu0 %v6905_v31  ;;  %1713 = vmatprep.subr.bf16.mxu1 %v6908_v32  ;;  %v6991_v31 = vld [vmem:[%s9797_s1 + $0x5c4] ss:$16 sps:$4 sm:$0xff]   ;;  %v6994_v32 = vld [vmem:[%s9797_s1 + $0x5cc] ss:$16 sps:$4 sm:$0xff]  }
  0x86   : > { %1191 = vmatmul.mubr.bf16.vlgmr.msra.gmra.mrb[0].mxu0 %v7870_v0  ;;  %1242 = vmatmul.mubr.bf16.vlgmr.msra.gmra.mrb[0].mxu1 %v7870_v0  ;;  %v6922_v0 = vld [vmem:[%s9797_s1 + $0x44c] ss:$16 sps:$4 sm:$0xff]  }
  0x87   : > { %1663 = vmatpush1.bf16.msra.mxu0 %v6903_v33  ;;  %1714 = vmatpush1.bf16.msra.mxu1 %v6906_v34  ;;  %v6989_v33 = vld [vmem:[%s9797_s1 + $0x5c0] ss:$16 sps:$4 sm:$0xff]   ;;  %v6992_v34 = vld [vmem:[%s9797_s1 + $0x5c8] ss:$16 sps:$4 sm:$0xff]  }
  0x88   : > { %1664 = vmatprep.subr.bf16.mxu0 %v6911_v35  ;;  %1715 = vmatprep.subr.bf16.mxu1 %v6914_v36  ;;  %v6997_v35 = vld [vmem:[%s9797_s1 + $0x5e4] ss:$16 sps:$4 sm:$0xff]   ;;  %v8309_v36 = vld [vmem:[%s7823_s17 + $0x8] sm:$0xff] }
  0x89   : > { %1200 = vmatprep.mubr.bf16.mxu0 %v5561_v37  ;;  %1251 = vmatprep.mubr.bf16.mxu1 %v5561_v37  ;;  %v5690_v37 = vcombine.low %v8130_v38, %v8309_v36  ;;  %v1333_v38 = vrot.slane %v7886_v7, 1  ;;  %v7011_v7 = vld [vmem:[%s9797_s1 + $0x624] ss:$16 sps:$4 sm:$0xff]  }
  0x8b   : > { %1665 = vmatpush1.bf16.msra.mxu0 %v6909_v39  ;;  %1716 = vmatpush1.bf16.msra.mxu1 %v6912_v40  ;;  %v7000_v39 = vld [vmem:[%s9797_s1 + $0x5ec] ss:$16 sps:$4 sm:$0xff]   ;;  %v6995_v40 = vld [vmem:[%s9797_s1 + $0x5e0] ss:$16 sps:$4 sm:$0xff]  }
  0x8c   : > { %1666 = vmatprep.subr.bf16.mxu0 %v6919_v42  ;;  %1717 = vmatprep.subr.bf16.mxu1 %v6922_v0  ;;  %v1332_v42 = vrot.slane %v5690_v37, 1  ;;  %v7005_v0 = vld [vmem:[%s9797_s1 + $0x604] ss:$16 sps:$4 sm:$0xff]  }
  0x8d   : > { %v7077_v37 = vld [vmem:[%s9797_s1 + $0x784] ss:$16 sps:$4 sm:$0xff]  }
  0x8e   : > { %1201 = vmatmul.mubr.bf16.gmra.mrb[8].mxu0 %v5560_v49  ;;  %1252 = vmatmul.mubr.bf16.gmra.mrb[8].mxu1 %v5560_v49  ;;  %v7008_v49 = vld [vmem:[%s9797_s1 + $0x60c] ss:$16 sps:$4 sm:$0xff]  }
  0x8f   : > { %1667 = vmatpush1.bf16.msra.mxu0 %v6917_v44  ;;  %1718 = vmatpush1.bf16.msra.mxu1 %v6920_v45  ;;  %v7003_v44 = vld [vmem:[%s9797_s1 + $0x600] ss:$16 sps:$4 sm:$0xff]   ;;  %v7006_v45 = vld [vmem:[%s9797_s1 + $0x608] ss:$16 sps:$4 sm:$0xff]  }
  0x90   : > { %1668 = vmatprep.subr.bf16.mxu0 %v6925_v47  ;;  %1719 = vmatprep.subr.bf16.mxu1 %v6928_v50  ;;  %v1334_v47 = vsel %vm1331_vm1, %v1332_v42, %v1333_v38  ;;  %v8343_v50 = vld [vmem:[%s7823_s17 + $0x18] sm:$0x77]  ;;  %v7083_v42 = vld [vmem:[%s9797_s1 + $0x7a4] ss:$16 sps:$4 sm:$0xff]  }
  0x91   : > { %1694 = vmatprep.mubr.bf16.mxu0 %v1337_v51  ;;  %1745 = vmatprep.mubr.bf16.mxu1 %v1337_v51  ;;  %v7012_v51 = vld [vmem:[%s9797_s1 + $0x628] ss:$16 sps:$4 sm:$0xff]  }
  0x93   : > { %1669 = vmatpush1.bf16.msra.mxu0 %v6923_v54  ;;  %1720 = vmatpush1.bf16.msra.mxu1 %v6926_v48  ;;  %v7014_v54 = vld [vmem:[%s9797_s1 + $0x62c] ss:$16 sps:$4 sm:$0xff]   ;;  %v7009_v48 = vld [vmem:[%s9797_s1 + $0x620] ss:$16 sps:$4 sm:$0xff]  }
  0x94   : > { %1670 = vmatprep.subr.bf16.mxu0 %v6931_v52  ;;  %1721 = vmatprep.subr.bf16.mxu1 %v6934_v53  ;;  %v8356_v52 = vcombine.high %v8339_v46, %v8309_v36  ;;  %v8359_v53 = vld [vmem:[%s7823_s17 + $0x10] sm:$0xff] }
  0x97   : > { %1671 = vmatpush1.bf16.msra.mxu0 %v6929_v55  ;;  %1722 = vmatpush1.bf16.msra.mxu1 %v6932_v56  ;;  %v5823_v55 = vcombine.high %v8359_v53, %v8343_v50  ;;  %v7017_v56 = vld [vmem:[%s9797_s1 + $0x644] ss:$16 sps:$4 sm:$0xff]  }
  0x98   : > { %1672 = vmatprep.subr.bf16.mxu0 %v6937_v57  ;;  %1723 = vmatprep.subr.bf16.mxu1 %v6940_v58  ;;  %v7020_v57 = vld [vmem:[%s9797_s1 + $0x64c] ss:$16 sps:$4 sm:$0xff]   ;;  %v7015_v58 = vld [vmem:[%s9797_s1 + $0x640] ss:$16 sps:$4 sm:$0xff]  }
  0x9b   : > { %1673 = vmatpush1.bf16.msra.mxu0 %v6935_v59  ;;  %1724 = vmatpush1.bf16.msra.mxu1 %v6938_v60  ;;  %v7018_v59 = vld [vmem:[%s9797_s1 + $0x648] ss:$16 sps:$4 sm:$0xff]   ;;  %v1857_v60 = vrot.slane %v8356_v52, 3 }
  0x9c   : > { %1674 = vmatprep.subr.bf16.mxu0 %v6943_v61  ;;  %1725 = vmatprep.subr.bf16.mxu1 %v6946_v62  ;;  %v8378_v61 = vrot.slane %v5823_v55, 3  ;;  %v7023_v62 = vld [vmem:[%s9797_s1 + $0x664] ss:$16 sps:$4 sm:$0xff]  }
  0x9d   : > { %v7095_v55 = vld [vmem:[%s9797_s1 + $0x7e4] ss:$16 sps:$4 sm:$0xff]  }
  0x9f   : > { %1675 = vmatpush1.bf16.msra.mxu0 %v6941_v63  ;;  %1726 = vmatpush1.bf16.msra.mxu1 %v6944_v1  ;;  %v7021_v63 = vld [vmem:[%s9797_s1 + $0x660] ss:$16 sps:$4 sm:$0xff]   ;;  %v7024_v1 = vld [vmem:[%s9797_s1 + $0x668] ss:$16 sps:$4 sm:$0xff]  }
  0xa0   : > { %1676 = vmatprep.subr.bf16.mxu0 %v6949_v2  ;;  %1727 = vmatprep.subr.bf16.mxu1 %v6952_v3  ;;  %v1859_v2 = vsel %vm1853_vm2, %v1857_v60, %v8378_v61  ;;  %v7029_v3 = vld [vmem:[%s9797_s1 + $0x684] ss:$16 sps:$4 sm:$0xff]   ;;  %v7108_v60 = vld [vmem:[%s9797_s1 + $0x80c] ss:$16 sps:$4 sm:$0xff]  }
  0xa3   : > { %1677 = vmatpush1.bf16.msra.mxu0 %v6947_v4  ;;  %1728 = vmatpush1.bf16.msra.mxu1 %v6950_v5  ;;  %v7032_v4 = vld [vmem:[%s9797_s1 + $0x68c] ss:$16 sps:$4 sm:$0xff]   ;;  %v7027_v5 = vld [vmem:[%s9797_s1 + $0x680] ss:$16 sps:$4 sm:$0xff]  }
  0xa4   : > { %1678 = vmatprep.subr.bf16.mxu0 %v6955_v6  ;;  %1729 = vmatprep.subr.bf16.mxu1 %v6958_v8  ;;  %v7030_v6 = vld [vmem:[%s9797_s1 + $0x688] ss:$16 sps:$4 sm:$0xff]   ;;  %v7035_v8 = vld [vmem:[%s9797_s1 + $0x6a4] ss:$16 sps:$4 sm:$0xff]  }
  0xa7   : > { %1679 = vmatpush1.bf16.msra.mxu0 %v6953_v9  ;;  %1730 = vmatpush1.bf16.msra.mxu1 %v6956_v10  ;;  %v7038_v9 = vld [vmem:[%s9797_s1 + $0x6ac] ss:$16 sps:$4 sm:$0xff]   ;;  %v7033_v10 = vld [vmem:[%s9797_s1 + $0x6a0] ss:$16 sps:$4 sm:$0xff]  }
  0xa8   : > { %1680 = vmatprep.subr.bf16.mxu0 %v6961_v11  ;;  %1731 = vmatprep.subr.bf16.mxu1 %v6964_v12  ;;  %v7036_v11 = vld [vmem:[%s9797_s1 + $0x6a8] ss:$16 sps:$4 sm:$0xff]   ;;  %v7041_v12 = vld [vmem:[%s9797_s1 + $0x6c4] ss:$16 sps:$4 sm:$0xff]  }
  0xab   : > { %1681 = vmatpush1.bf16.msra.mxu0 %v6959_v13  ;;  %1732 = vmatpush1.bf16.msra.mxu1 %v6962_v14  ;;  %v7044_v13 = vld [vmem:[%s9797_s1 + $0x6cc] ss:$16 sps:$4 sm:$0xff]   ;;  %v7039_v14 = vld [vmem:[%s9797_s1 + $0x6c0] ss:$16 sps:$4 sm:$0xff]  }
  0xac   : > { %1682 = vmatprep.subr.bf16.mxu0 %v6967_v15  ;;  %1733 = vmatprep.subr.bf16.mxu1 %v6970_v16  ;;  %v7042_v15 = vld [vmem:[%s9797_s1 + $0x6c8] ss:$16 sps:$4 sm:$0xff]   ;;  %v7047_v16 = vld [vmem:[%s9797_s1 + $0x6e4] ss:$16 sps:$4 sm:$0xff]  }
  0xaf   : > { %1683 = vmatpush1.bf16.msra.mxu0 %v6965_v17  ;;  %1734 = vmatpush1.bf16.msra.mxu1 %v6968_v18  ;;  %v7050_v17 = vld [vmem:[%s9797_s1 + $0x6ec] ss:$16 sps:$4 sm:$0xff]   ;;  %v7045_v18 = vld [vmem:[%s9797_s1 + $0x6e0] ss:$16 sps:$4 sm:$0xff]  }
  0xb0   : > { %1684 = vmatprep.subr.bf16.mxu0 %v6973_v19  ;;  %1735 = vmatprep.subr.bf16.mxu1 %v6976_v20  ;;  %v7048_v19 = vld [vmem:[%s9797_s1 + $0x6e8] ss:$16 sps:$4 sm:$0xff]   ;;  %v7053_v20 = vld [vmem:[%s9797_s1 + $0x704] ss:$16 sps:$4 sm:$0xff]  }
  0xb3   : > { %1685 = vmatpush1.bf16.msra.mxu0 %v6971_v21  ;;  %1736 = vmatpush1.bf16.msra.mxu1 %v6974_v22  ;;  %v7056_v21 = vld [vmem:[%s9797_s1 + $0x70c] ss:$16 sps:$4 sm:$0xff]   ;;  %v7051_v22 = vld [vmem:[%s9797_s1 + $0x700] ss:$16 sps:$4 sm:$0xff]  }
  0xb4   : > { %1686 = vmatprep.subr.bf16.mxu0 %v6979_v23  ;;  %1737 = vmatprep.subr.bf16.mxu1 %v6982_v24  ;;  %v7054_v23 = vld [vmem:[%s9797_s1 + $0x708] ss:$16 sps:$4 sm:$0xff]   ;;  %v7059_v24 = vld [vmem:[%s9797_s1 + $0x724] ss:$16 sps:$4 sm:$0xff]  }
  0xb7   : > { %1687 = vmatpush1.bf16.msra.mxu0 %v6977_v25  ;;  %1738 = vmatpush1.bf16.msra.mxu1 %v6980_v26  ;;  %v7062_v25 = vld [vmem:[%s9797_s1 + $0x72c] ss:$16 sps:$4 sm:$0xff]   ;;  %v7057_v26 = vld [vmem:[%s9797_s1 + $0x720] ss:$16 sps:$4 sm:$0xff]  }
  0xb8   : > { %1688 = vmatprep.subr.bf16.mxu0 %v6985_v27  ;;  %1739 = vmatprep.subr.bf16.mxu1 %v6988_v28  ;;  %v7060_v27 = vld [vmem:[%s9797_s1 + $0x728] ss:$16 sps:$4 sm:$0xff]   ;;  %v7065_v28 = vld [vmem:[%s9797_s1 + $0x744] ss:$16 sps:$4 sm:$0xff]  }
  0xbb   : > { %1689 = vmatpush1.bf16.msra.mxu0 %v6983_v29  ;;  %1740 = vmatpush1.bf16.msra.mxu1 %v6986_v30  ;;  %v7068_v29 = vld [vmem:[%s9797_s1 + $0x74c] ss:$16 sps:$4 sm:$0xff]   ;;  %v7063_v30 = vld [vmem:[%s9797_s1 + $0x740] ss:$16 sps:$4 sm:$0xff]  }
  0xbc   : > { %1690 = vmatprep.subr.bf16.mxu0 %v6991_v31  ;;  %1741 = vmatprep.subr.bf16.mxu1 %v6994_v32  ;;  %v7066_v31 = vld [vmem:[%s9797_s1 + $0x748] ss:$16 sps:$4 sm:$0xff]   ;;  %v7071_v32 = vld [vmem:[%s9797_s1 + $0x764] ss:$16 sps:$4 sm:$0xff]  }
  0xbf   : > { %1691 = vmatpush1.bf16.msra.mxu0 %v6989_v33  ;;  %1742 = vmatpush1.bf16.msra.mxu1 %v6992_v34  ;;  %v7074_v33 = vld [vmem:[%s9797_s1 + $0x76c] ss:$16 sps:$4 sm:$0xff]   ;;  %v7069_v34 = vld [vmem:[%s9797_s1 + $0x760] ss:$16 sps:$4 sm:$0xff]  }
  0xc0   : > { %1692 = vmatprep.subr.bf16.mxu0 %v6997_v35  ;;  %1743 = vmatprep.subr.bf16.mxu1 %v7000_v39  ;;  %v7072_v35 = vld [vmem:[%s9797_s1 + $0x768] ss:$16 sps:$4 sm:$0xff]   ;;  %v7080_v39 = vld [vmem:[%s9797_s1 + $0x78c] ss:$16 sps:$4 sm:$0xff]  }
  0xc3   : > { %1693 = vmatpush1.bf16.msra.mxu0 %v6995_v40  ;;  %1744 = vmatpush1.bf16.msra.mxu1 %v6998_v41  ;;  %v7075_v40 = vld [vmem:[%s9797_s1 + $0x780] ss:$16 sps:$4 sm:$0xff]   ;;  %v7078_v41 = vld [vmem:[%s9797_s1 + $0x788] ss:$16 sps:$4 sm:$0xff]  }
  0xc4   : > { %2184 = vmatprep.subr.bf16.mxu0 %v7005_v0  ;;  %2235 = vmatprep.subr.bf16.mxu1 %v7008_v49  ;;  %v7081_v0 = vld [vmem:[%s9797_s1 + $0x7a0] ss:$16 sps:$4 sm:$0xff]   ;;  %v7084_v49 = vld [vmem:[%s9797_s1 + $0x7a8] ss:$16 sps:$4 sm:$0xff]  }
  0xc6   : > { %1695 = vmatmul.mubr.bf16.vlgmr.msra.gmra.mrb[0].mxu0 %v1334_v47  ;;  %1746 = vmatmul.mubr.bf16.vlgmr.msra.gmra.mrb[0].mxu1 %v1334_v47  ;;  %v7090_v47 = vld [vmem:[%s9797_s1 + $0x7c8] ss:$16 sps:$4 sm:$0xff]  }
  0xc7   : > { %2185 = vmatpush1.bf16.msra.mxu0 %v7003_v44  ;;  %2236 = vmatpush1.bf16.msra.mxu1 %v7006_v45  ;;  %v7089_v44 = vld [vmem:[%s9797_s1 + $0x7c4] ss:$16 sps:$4 sm:$0xff]   ;;  %v7092_v45 = vld [vmem:[%s9797_s1 + $0x7cc] ss:$16 sps:$4 sm:$0xff]  }
  0xc8   : > { %2186 = vmatprep.subr.bf16.mxu0 %v7011_v7  ;;  %2237 = vmatprep.subr.bf16.mxu1 %v7014_v54  ;;  %v7087_v7 = vld [vmem:[%s9797_s1 + $0x7c0] ss:$16 sps:$4 sm:$0xff]   ;;  %v8528_v54 = vcombine.low %v8339_v46, %v8309_v36 }
  0xc9   : > { %1704 = vmatprep.mubr.bf16.mxu0 %v8149_v43  ;;  %1755 = vmatprep.mubr.bf16.mxu1 %v8149_v43  ;;  %v7026_v43 = vld [vmem:[%s9797_s1 + $0x66c] ss:$16 sps:$4 sm:$0xff]   ;;  %v7093_v36 = vld [vmem:[%s9797_s1 + $0x7e0] ss:$16 sps:$4 sm:$0xff]  }
  0xcb   : > { %2187 = vmatpush1.bf16.msra.mxu0 %v7009_v48  ;;  %2238 = vmatpush1.bf16.msra.mxu1 %v7012_v51  ;;  %v5822_v48 = vcombine.low %v8359_v53, %v8343_v50  ;;  %v8533_v51 = vld [vmem:[%s7823_s17 + $0x18] sm:$0xff] }
  0xcc   : > { %2188 = vmatprep.subr.bf16.mxu0 %v7017_v56  ;;  %2239 = vmatprep.subr.bf16.mxu1 %v7020_v57  ;;  %v7098_v56 = vld [vmem:[%s9797_s1 + $0x7ec] ss:$16 sps:$4 sm:$0xff]   ;;  %v5953_v46 = vcombine.high %v8359_v53, %v8533_v51  ;;  %v7096_v50 = vld [vmem:[%s9797_s1 + $0x7e8] ss:$16 sps:$4 sm:$0xff]  }
  0xcd   : > { %v1855_v57 = vrot.slane %v5822_v48, 3 }
  0xce   : > { %1705 = vmatmul.mubr.bf16.gmra.mrb[12].mxu0 %v1333_v38  ;;  %1756 = vmatmul.mubr.bf16.gmra.mrb[12].mxu1 %v1333_v38  ;;  %v7086_v38 = vld [vmem:[%s9797_s1 + $0x7ac] ss:$16 sps:$4 sm:$0xff]  }
  0xcf   : > { %2189 = vmatpush1.bf16.msra.mxu0 %v7015_v58  ;;  %2240 = vmatpush1.bf16.msra.mxu1 %v7018_v59  ;;  %v1854_v58 = vrot.slane %v8528_v54, 3  ;;  %v7105_v59 = vld [vmem:[%s9797_s1 + $0x804] ss:$16 sps:$4 sm:$0xff]  }
  0xd0   : > { %2190 = vmatprep.subr.bf16.mxu0 %v7023_v62  ;;  %2241 = vmatprep.subr.bf16.mxu1 %v7026_v43  ;;  %v7103_v62 = vld [vmem:[%s9797_s1 + $0x800] ss:$16 sps:$4 sm:$0xff]   ;;  %v2388_v43 = vshrl.u32 %v8356_v52, 16 }
  0xd1   : > { %2216 = vmatprep.mubr.bf16.mxu0 %v1859_v2  ;;  %2267 = vmatprep.mubr.bf16.mxu1 %v1859_v2  ;;  %v2399_v2 = vshll.u32 %v5953_v46, 16 }
  0xd3   : > { %2191 = vmatpush1.bf16.msra.mxu0 %v7021_v63  ;;  %2242 = vmatpush1.bf16.msra.mxu1 %v7024_v1  ;;  %v2391_v63 = vshll.u32 %v8356_v52, 16  ;;  %v2396_v1 = vshrl.u32 %v5953_v46, 16  ;;  %v7114_v52 = vld [vmem:[%s9797_s1 + $0x82c] ss:$16 sps:$4 sm:$0xff]  }
  0xd4   : > { %2192 = vmatprep.subr.bf16.mxu0 %v7029_v3  ;;  %2243 = vmatprep.subr.bf16.mxu1 %v7032_v4  ;;  %v1856_v3 = vsel %vm1853_vm2, %v1854_v58, %v1855_v57  ;;  %v7106_v4 = vld [vmem:[%s9797_s1 + $0x808] ss:$16 sps:$4 sm:$0xff]   ;;  %v7165_v58 = vld [vmem:[%s9797_s1 + $0x944] ss:$16 sps:$4 sm:$0xff]  }
  0xd7   : > { %2193 = vmatpush1.bf16.msra.mxu0 %v7027_v5  ;;  %2244 = vmatpush1.bf16.msra.mxu1 %v7030_v6  ;;  %v7111_v5 = vld [vmem:[%s9797_s1 + $0x824] ss:$16 sps:$4 sm:$0xff]   ;;  %v7109_v6 = vld [vmem:[%s9797_s1 + $0x820] ss:$16 sps:$4 sm:$0xff]  }
  0xd8   : > { %2194 = vmatprep.subr.bf16.mxu0 %v7035_v8  ;;  %2245 = vmatprep.subr.bf16.mxu1 %v7038_v9  ;;  %v2390_v8 = vrot.slane %v2388_v43, 3  ;;  %v2393_v9 = vrot.slane %v2391_v63, 4  ;;  %v7171_v43 = vld [vmem:[%s9797_s1 + $0x964] ss:$16 sps:$4 sm:$0xff]   ;;  %v7174_v63 = vld [vmem:[%s9797_s1 + $0x96c] ss:$16 sps:$4 sm:$0xff]  }
  0xdb   : > { %2195 = vmatpush1.bf16.msra.mxu0 %v7033_v10  ;;  %2246 = vmatpush1.bf16.msra.mxu1 %v7036_v11  ;;  %v2398_v10 = vrot.slane %v2396_v1, 3  ;;  %v2401_v11 = vrot.slane %v2399_v2, 4  ;;  %v7169_v1 = vld [vmem:[%s9797_s1 + $0x960] ss:$16 sps:$4 sm:$0xff]   ;;  %v7172_v2 = vld [vmem:[%s9797_s1 + $0x968] ss:$16 sps:$4 sm:$0xff]  }
  0xdc   : > { %2196 = vmatprep.subr.bf16.mxu0 %v7041_v12  ;;  %2247 = vmatprep.subr.bf16.mxu1 %v7044_v13  ;;  %v7112_v12 = vld [vmem:[%s9797_s1 + $0x828] ss:$16 sps:$4 sm:$0xff]   ;;  %v7117_v13 = vld [vmem:[%s9797_s1 + $0x844] ss:$16 sps:$4 sm:$0xff]  }
  0xdf   : > { %2197 = vmatpush1.bf16.msra.mxu0 %v7039_v14  ;;  %2248 = vmatpush1.bf16.msra.mxu1 %v7042_v15  ;;  %v7120_v14 = vld [vmem:[%s9797_s1 + $0x84c] ss:$16 sps:$4 sm:$0xff]   ;;  %v7115_v15 = vld [vmem:[%s9797_s1 + $0x840] ss:$16 sps:$4 sm:$0xff]  }
  0xe0   : > { %2198 = vmatprep.subr.bf16.mxu0 %v7047_v16  ;;  %2249 = vmatprep.subr.bf16.mxu1 %v7050_v17  ;;  %v2394_v16 = vor.u32 %v2393_v9, %v2390_v8  ;;  %v8588_v17 = vor.u32 %v2401_v11, %v2398_v10  ;;  %v7183_v8 = vld [vmem:[%s9797_s1 + $0x9a4] ss:$16 sps:$4 sm:$0xff]   ;;  %v7186_v9 = vld [vmem:[%s9797_s1 + $0x9ac] ss:$16 sps:$4 sm:$0xff]   ;;  %v7181_v10 = vld [vmem:[%s9797_s1 + $0x9a0] ss:$16 sps:$4 sm:$0xff]  }
  0xe1   : > { %v2371_v11 = vshrl.u32 %v8528_v54, 16 }
  0xe3   : > { %2199 = vmatpush1.bf16.msra.mxu0 %v7045_v18  ;;  %2250 = vmatpush1.bf16.msra.mxu1 %v7048_v19  ;;  %v7118_v18 = vld [vmem:[%s9797_s1 + $0x848] ss:$16 sps:$4 sm:$0xff]   ;;  %v7126_v19 = vld [vmem:[%s9797_s1 + $0x86c] ss:$16 sps:$4 sm:$0xff]  }
  0xe4   : > { %2200 = vmatprep.subr.bf16.mxu0 %v7053_v20  ;;  %2251 = vmatprep.subr.bf16.mxu1 %v7056_v21  ;;  %v7121_v20 = vld [vmem:[%s9797_s1 + $0x860] ss:$16 sps:$4 sm:$0xff]   ;;  %v2403_v21 = vsel %vm2369_vm3, %v2394_v16, %v8588_v17 }
  0xe5   : > { %v7187_v16 = vld [vmem:[%s9797_s1 + $0x9c0] ss:$16 sps:$4 sm:$0xff]  }
  0xe7   : > { %2201 = vmatpush1.bf16.msra.mxu0 %v7051_v22  ;;  %2252 = vmatpush1.bf16.msra.mxu1 %v7054_v23  ;;  %v7124_v22 = vld [vmem:[%s9797_s1 + $0x868] ss:$16 sps:$4 sm:$0xff]   ;;  %v7129_v23 = vld [vmem:[%s9797_s1 + $0x884] ss:$16 sps:$4 sm:$0xff]  }
  0xe8   : > { %2202 = vmatprep.subr.bf16.mxu0 %v7059_v24  ;;  %2253 = vmatprep.subr.bf16.mxu1 %v7062_v25  ;;  %v7132_v24 = vld [vmem:[%s9797_s1 + $0x88c] ss:$16 sps:$4 sm:$0xff]   ;;  %v7127_v25 = vld [vmem:[%s9797_s1 + $0x880] ss:$16 sps:$4 sm:$0xff]  }
  0xeb   : > { %2203 = vmatpush1.bf16.msra.mxu0 %v7057_v26  ;;  %2254 = vmatpush1.bf16.msra.mxu1 %v7060_v27  ;;  %v7130_v26 = vld [vmem:[%s9797_s1 + $0x888] ss:$16 sps:$4 sm:$0xff]   ;;  %v7135_v27 = vld [vmem:[%s9797_s1 + $0x8a4] ss:$16 sps:$4 sm:$0xff]  }
  0xec   : > { %2204 = vmatprep.subr.bf16.mxu0 %v7065_v28  ;;  %2255 = vmatprep.subr.bf16.mxu1 %v7068_v29  ;;  %v7138_v28 = vld [vmem:[%s9797_s1 + $0x8ac] ss:$16 sps:$4 sm:$0xff]   ;;  %v7133_v29 = vld [vmem:[%s9797_s1 + $0x8a0] ss:$16 sps:$4 sm:$0xff]  }
  0xef   : > { %2205 = vmatpush1.bf16.msra.mxu0 %v7063_v30  ;;  %2256 = vmatpush1.bf16.msra.mxu1 %v7066_v31  ;;  %v7136_v30 = vld [vmem:[%s9797_s1 + $0x8a8] ss:$16 sps:$4 sm:$0xff]   ;;  %v7141_v31 = vld [vmem:[%s9797_s1 + $0x8c4] ss:$16 sps:$4 sm:$0xff]  }
  0xf0   : > { %2206 = vmatprep.subr.bf16.mxu0 %v7071_v32  ;;  %2257 = vmatprep.subr.bf16.mxu1 %v7074_v33  ;;  %v7144_v32 = vld [vmem:[%s9797_s1 + $0x8cc] ss:$16 sps:$4 sm:$0xff]   ;;  %v7139_v33 = vld [vmem:[%s9797_s1 + $0x8c0] ss:$16 sps:$4 sm:$0xff]  }
  0xf3   : > { %2207 = vmatpush1.bf16.msra.mxu0 %v7069_v34  ;;  %2258 = vmatpush1.bf16.msra.mxu1 %v7072_v35  ;;  %v7142_v34 = vld [vmem:[%s9797_s1 + $0x8c8] ss:$16 sps:$4 sm:$0xff]   ;;  %v7147_v35 = vld [vmem:[%s9797_s1 + $0x8e4] ss:$16 sps:$4 sm:$0xff]  }
  0xf4   : > { %2208 = vmatprep.subr.bf16.mxu0 %v7077_v37  ;;  %2259 = vmatprep.subr.bf16.mxu1 %v7080_v39  ;;  %v7150_v37 = vld [vmem:[%s9797_s1 + $0x8ec] ss:$16 sps:$4 sm:$0xff]   ;;  %v7145_v39 = vld [vmem:[%s9797_s1 + $0x8e0] ss:$16 sps:$4 sm:$0xff]  }
  0xf7   : > { %2209 = vmatpush1.bf16.msra.mxu0 %v7075_v40  ;;  %2260 = vmatpush1.bf16.msra.mxu1 %v7078_v41  ;;  %v7148_v40 = vld [vmem:[%s9797_s1 + $0x8e8] ss:$16 sps:$4 sm:$0xff]   ;;  %v7153_v41 = vld [vmem:[%s9797_s1 + $0x904] ss:$16 sps:$4 sm:$0xff]  }
  0xf8   : > { %2210 = vmatprep.subr.bf16.mxu0 %v7083_v42  ;;  %2261 = vmatprep.subr.bf16.mxu1 %v7086_v38  ;;  %v7156_v42 = vld [vmem:[%s9797_s1 + $0x90c] ss:$16 sps:$4 sm:$0xff]  }
  0xfb   : > { %2211 = vmatpush1.bf16.msra.mxu0 %v7081_v0  ;;  %2262 = vmatpush1.bf16.msra.mxu1 %v7084_v49 }
  0xfc   : > { %2212 = vmatprep.subr.bf16.mxu0 %v7089_v44  ;;  %2263 = vmatprep.subr.bf16.mxu1 %v7092_v45  ;;  %v7151_v45 = vld [vmem:[%s9797_s1 + $0x900] ss:$16 sps:$4 sm:$0xff]  }
  0xff   : > { %2213 = vmatpush1.bf16.msra.mxu0 %v7087_v7  ;;  %2264 = vmatpush1.bf16.msra.mxu1 %v7090_v47  ;;  %v7154_v7 = vld [vmem:[%s9797_s1 + $0x908] ss:$16 sps:$4 sm:$0xff]  }
 0x100   : > { %2214 = vmatprep.subr.bf16.mxu0 %v7095_v55  ;;  %2265 = vmatprep.subr.bf16.mxu1 %v7098_v56  ;;  %v7159_v55 = vld [vmem:[%s9797_s1 + $0x924] ss:$16 sps:$4 sm:$0xff]   ;;  %v7162_v56 = vld [vmem:[%s9797_s1 + $0x92c] ss:$16 sps:$4 sm:$0xff]  }
 0x103   : > { %2215 = vmatpush1.bf16.msra.mxu0 %v7093_v36  ;;  %2266 = vmatpush1.bf16.msra.mxu1 %v7096_v50  ;;  %v7157_v50 = vld [vmem:[%s9797_s1 + $0x920] ss:$16 sps:$4 sm:$0xff]  }
 0x104   : > { %2728 = vmatprep.subr.bf16.mxu0 %v7105_v59  ;;  %2779 = vmatprep.subr.bf16.mxu1 %v7108_v60  ;;  %v7168_v59 = vld [vmem:[%s9797_s1 + $0x94c] ss:$16 sps:$4 sm:$0xff]   ;;  %v7163_v60 = vld [vmem:[%s9797_s1 + $0x940] ss:$16 sps:$4 sm:$0xff]  }
 0x106   : > { %2217 = vmatmul.mubr.bf16.vlgmr.msra.gmra.mrb[0].mxu0 %v1856_v3  ;;  %2268 = vmatmul.mubr.bf16.vlgmr.msra.gmra.mrb[0].mxu1 %v1856_v3  ;;  %v7177_v3 = vld [vmem:[%s9797_s1 + $0x984] ss:$16 sps:$4 sm:$0xff]  }
 0x107   : > { %2729 = vmatpush1.bf16.msra.mxu0 %v7103_v62  ;;  %2780 = vmatpush1.bf16.msra.mxu1 %v7106_v4  ;;  %v7166_v62 = vld [vmem:[%s9797_s1 + $0x948] ss:$16 sps:$4 sm:$0xff]   ;;  %v7180_v4 = vld [vmem:[%s9797_s1 + $0x98c] ss:$16 sps:$4 sm:$0xff]  }
 0x108   : > { %2730 = vmatprep.subr.bf16.mxu0 %v7111_v5  ;;  %2781 = vmatprep.subr.bf16.mxu1 %v7114_v52  ;;  %v7175_v5 = vld [vmem:[%s9797_s1 + $0x980] ss:$16 sps:$4 sm:$0xff]   ;;  %v7178_v52 = vld [vmem:[%s9797_s1 + $0x988] ss:$16 sps:$4 sm:$0xff]  }
 0x109   : > { %2226 = vmatprep.mubr.bf16.mxu0 %v8378_v61  ;;  %2277 = vmatprep.mubr.bf16.mxu1 %v8378_v61  ;;  %v7123_v61 = vld [vmem:[%s9797_s1 + $0x864] ss:$16 sps:$4 sm:$0xff]  }
 0x10b   : > { %2731 = vmatpush1.bf16.msra.mxu0 %v7109_v6  ;;  %2782 = vmatpush1.bf16.msra.mxu1 %v7112_v12  ;;  %v5952_v6 = vcombine.low %v8359_v53, %v8533_v51  ;;  %v7184_v53 = vld [vmem:[%s9797_s1 + $0x9a8] ss:$16 sps:$4 sm:$0xff]   ;;  %v2374_v51 = vshll.u32 %v8528_v54, 16 }
 0x10c   : > { %2732 = vmatprep.subr.bf16.mxu0 %v7117_v13  ;;  %2783 = vmatprep.subr.bf16.mxu1 %v7120_v14  ;;  %v7189_v14 = vld [vmem:[%s9797_s1 + $0x9c4] ss:$16 sps:$4 sm:$0xff]   ;;  %v7190_v54 = vld [vmem:[%s9797_s1 + $0x9c8] ss:$16 sps:$4 sm:$0xff]  }
 0x10d   : > { %v2379_v12 = vshrl.u32 %v5952_v6, 16  ;;  %v2382_v13 = vshll.u32 %v5952_v6, 16  ;;  %v7254_v6 = vld [vmem:[%s9797_s1 + $0xb0c] ss:$16 sps:$4 sm:$0xff]  }
 0x10e   : > { %2227 = vmatmul.mubr.bf16.gmra.mrb[16].mxu0 %v1855_v57  ;;  %2278 = vmatmul.mubr.bf16.gmra.mrb[16].mxu1 %v1855_v57  ;;  %v7160_v57 = vld [vmem:[%s9797_s1 + $0x928] ss:$16 sps:$4 sm:$0xff]  }
 0x10f   : > { %2733 = vmatpush1.bf16.msra.mxu0 %v7115_v15  ;;  %2784 = vmatpush1.bf16.msra.mxu1 %v7118_v18  ;;  %v7192_v15 = vld [vmem:[%s9797_s1 + $0x9cc] ss:$16 sps:$4 sm:$0xff]   ;;  %v2373_v18 = vrot.slane %v2371_v11, 3 }
 0x110   : > { %2734 = vmatprep.subr.bf16.mxu0 %v7123_v61  ;;  %2785 = vmatprep.subr.bf16.mxu1 %v7126_v19  ;;  %v2376_v61 = vrot.slane %v2374_v51, 4  ;;  %v2381_v19 = vrot.slane %v2379_v12, 3 }
 0x111   : > { %2760 = vmatprep.mubr.bf16.mxu0 %v2403_v21  ;;  %2811 = vmatprep.mubr.bf16.mxu1 %v2403_v21  ;;  %v7195_v21 = vld [vmem:[%s9797_s1 + $0x9e4] ss:$16 sps:$4 sm:$0xff]  }
 0x113   : > { %2735 = vmatpush1.bf16.msra.mxu0 %v7121_v20  ;;  %2786 = vmatpush1.bf16.msra.mxu1 %v7124_v22  ;;  %v2384_v20 = vrot.slane %v2382_v13, 4  ;;  %v7198_v22 = vld [vmem:[%s9797_s1 + $0x9ec] ss:$16 sps:$4 sm:$0xff]  }
 0x114   : > { %2736 = vmatprep.subr.bf16.mxu0 %v7129_v23  ;;  %2787 = vmatprep.subr.bf16.mxu1 %v7132_v24  ;;  %v7193_v23 = vld [vmem:[%s9797_s1 + $0x9e0] ss:$16 sps:$4 sm:$0xff]   ;;  %v7196_v24 = vld [vmem:[%s9797_s1 + $0x9e8] ss:$16 sps:$4 sm:$0xff]  }
 0x117   : > { %2737 = vmatpush1.bf16.msra.mxu0 %v7127_v25  ;;  %2788 = vmatpush1.bf16.msra.mxu1 %v7130_v26  ;;  %v2377_v25 = vor.u32 %v2376_v61, %v2373_v18  ;;  %v2385_v26 = vor.u32 %v2384_v20, %v2381_v19  ;;  %v7258_v61 = vld [vmem:[%s9797_s1 + $0xb28] ss:$16 sps:$4 sm:$0xff]   ;;  %v7263_v19 = vld [vmem:[%s9797_s1 + $0xb44] ss:$16 sps:$4 sm:$0xff]   ;;  %v7266_v20 = vld [vmem:[%s9797_s1 + $0xb4c] ss:$16 sps:$4 sm:$0xff]  }
 0x118   : > { %2738 = vmatprep.subr.bf16.mxu0 %v7135_v27  ;;  %2789 = vmatprep.subr.bf16.mxu1 %v7138_v28  ;;  %v7203_v27 = vld [vmem:[%s9797_s1 + $0xa04] ss:$16 sps:$4 sm:$0xff]   ;;  %v7206_v28 = vld [vmem:[%s9797_s1 + $0xa0c] ss:$16 sps:$4 sm:$0xff]  }
 0x11b   : > { %2739 = vmatpush1.bf16.msra.mxu0 %v7133_v29  ;;  %2790 = vmatpush1.bf16.msra.mxu1 %v7136_v30  ;;  %v7201_v29 = vld [vmem:[%s9797_s1 + $0xa00] ss:$16 sps:$4 sm:$0xff]   ;;  %v7204_v30 = vld [vmem:[%s9797_s1 + $0xa08] ss:$16 sps:$4 sm:$0xff]  }
 0x11c   : > { %2740 = vmatprep.subr.bf16.mxu0 %v7141_v31  ;;  %2791 = vmatprep.subr.bf16.mxu1 %v7144_v32  ;;  %v2386_v31 = vsel %vm2369_vm3, %v2377_v25, %v2385_v26  ;;  %v7209_v32 = vld [vmem:[%s9797_s1 + $0xa24] ss:$16 sps:$4 sm:$0xff]   ;;  %v7267_v25 = vld [vmem:[%s9797_s1 + $0xb60] ss:$16 sps:$4 sm:$0xff]  }
 0x11f   : > { %2741 = vmatpush1.bf16.msra.mxu0 %v7139_v33  ;;  %2792 = vmatpush1.bf16.msra.mxu1 %v7142_v34  ;;  %v7212_v33 = vld [vmem:[%s9797_s1 + $0xa2c] ss:$16 sps:$4 sm:$0xff]   ;;  %v7207_v34 = vld [vmem:[%s9797_s1 + $0xa20] ss:$16 sps:$4 sm:$0xff]  }
 0x120   : > { %2742 = vmatprep.subr.bf16.mxu0 %v7147_v35  ;;  %2793 = vmatprep.subr.bf16.mxu1 %v7150_v37  ;;  %v7210_v35 = vld [vmem:[%s9797_s1 + $0xa28] ss:$16 sps:$4 sm:$0xff]   ;;  %v7215_v37 = vld [vmem:[%s9797_s1 + $0xa44] ss:$16 sps:$4 sm:$0xff]  }
 0x121   : > { %v8661_v38 = vpop.f32.mrb[4].mxu0  ;;  %v8663_v0 = vpop.f32.mrb[4].mxu1 }
 0x122   : > { %v8665_v49 = vpop.f32.mrb[5].mxu0  ;;  %v8667_v44 = vpop.f32.mrb[5].mxu1 }
 0x123   : > { %2743 = vmatpush1.bf16.msra.mxu0 %v7145_v39  ;;  %2794 = vmatpush1.bf16.msra.mxu1 %v7148_v40  ;;  %v778_v47 = vpop.f32.mrb[6].mxu0  ;;  %v829_v48 = vpop.f32.mrb[6].mxu1  ;;  %v7218_v39 = vld [vmem:[%s9797_s1 + $0xa4c] ss:$16 sps:$4 sm:$0xff]   ;;  %v7213_v40 = vld [vmem:[%s9797_s1 + $0xa40] ss:$16 sps:$4 sm:$0xff]  }
 0x124   : > { %2744 = vmatprep.subr.bf16.mxu0 %v7153_v41  ;;  %2795 = vmatprep.subr.bf16.mxu1 %v7156_v42  ;;  %v779_v36 = vpop.f32.mrb[7].mxu0  ;;  %v830_v46 = vpop.f32.mrb[7].mxu1  ;;  %v7216_v41 = vld [vmem:[%s9797_s1 + $0xa48] ss:$16 sps:$4 sm:$0xff]   ;;  %v7221_v42 = vld [vmem:[%s9797_s1 + $0xa64] ss:$16 sps:$4 sm:$0xff]  }
 0x125   : > { %v7219_v48 = vld [vmem:[%s9797_s1 + $0xa60] ss:$16 sps:$4 sm:$0xff]   ;;  %v7230_v36 = vld [vmem:[%s9797_s1 + $0xa8c] ss:$16 sps:$4 sm:$0xff]  }
 0x126   : > { %v7225_v46 = vld [vmem:[%s9797_s1 + $0xa80] ss:$16 sps:$4 sm:$0xff]  }
 0x127   : > { %2745 = vmatpush1.bf16.msra.mxu0 %v7151_v45  ;;  %2796 = vmatpush1.bf16.msra.mxu1 %v7154_v7  ;;  %v8809_v45 = vld [vmem:[%s7823_s17 + $0x8] sm:$0xff]  ;;  %v8812_v7 = vld [vmem:[%s7823_s17 + $0x10] sm:$0xff] }
 0x128   : > { %2746 = vmatprep.subr.bf16.mxu0 %v7159_v55  ;;  %2797 = vmatprep.subr.bf16.mxu1 %v7162_v56  ;;  %v6083_v47 = vcombine.high %v8809_v45, %v8812_v7  ;;  %v7222_v55 = vld [vmem:[%s9797_s1 + $0xa68] ss:$16 sps:$4 sm:$0xff]   ;;  %v7227_v56 = vld [vmem:[%s9797_s1 + $0xa84] ss:$16 sps:$4 sm:$0xff]  }
 0x12b   : > { %2747 = vmatpush1.bf16.msra.mxu0 %v7157_v50  ;;  %2798 = vmatpush1.bf16.msra.mxu1 %v7160_v57  ;;  %v7228_v50 = vld [vmem:[%s9797_s1 + $0xa88] ss:$16 sps:$4 sm:$0xff]   ;;  %v7233_v57 = vld [vmem:[%s9797_s1 + $0xaa4] ss:$16 sps:$4 sm:$0xff]  }
 0x12c   : > { %2748 = vmatprep.subr.bf16.mxu0 %v7165_v58  ;;  %2799 = vmatprep.subr.bf16.mxu1 %v7168_v59  ;;  %v7236_v58 = vld [vmem:[%s9797_s1 + $0xaac] ss:$16 sps:$4 sm:$0xff]   ;;  %v7231_v59 = vld [vmem:[%s9797_s1 + $0xaa0] ss:$16 sps:$4 sm:$0xff]  }
 0x12f   : > { %2749 = vmatpush1.bf16.msra.mxu0 %v7163_v60  ;;  %2800 = vmatpush1.bf16.msra.mxu1 %v7166_v62  ;;  %v7234_v60 = vld [vmem:[%s9797_s1 + $0xaa8] ss:$16 sps:$4 sm:$0xff]   ;;  %v7239_v62 = vld [vmem:[%s9797_s1 + $0xac4] ss:$16 sps:$4 sm:$0xff]  }
 0x130   : > { %2750 = vmatprep.subr.bf16.mxu0 %v7171_v43  ;;  %2801 = vmatprep.subr.bf16.mxu1 %v7174_v63  ;;  %v7242_v43 = vld [vmem:[%s9797_s1 + $0xacc] ss:$16 sps:$4 sm:$0xff]   ;;  %v7237_v63 = vld [vmem:[%s9797_s1 + $0xac0] ss:$16 sps:$4 sm:$0xff]  }
 0x133   : > { %2751 = vmatpush1.bf16.msra.mxu0 %v7169_v1  ;;  %2802 = vmatpush1.bf16.msra.mxu1 %v7172_v2  ;;  %v7240_v1 = vld [vmem:[%s9797_s1 + $0xac8] ss:$16 sps:$4 sm:$0xff]   ;;  %v7245_v2 = vld [vmem:[%s9797_s1 + $0xae4] ss:$16 sps:$4 sm:$0xff]  }
 0x134   : > { %2752 = vmatprep.subr.bf16.mxu0 %v7177_v3  ;;  %2803 = vmatprep.subr.bf16.mxu1 %v7180_v4  ;;  %v7248_v3 = vld [vmem:[%s9797_s1 + $0xaec] ss:$16 sps:$4 sm:$0xff]   ;;  %v7243_v4 = vld [vmem:[%s9797_s1 + $0xae0] ss:$16 sps:$4 sm:$0xff]  }
 0x137   : > { %2753 = vmatpush1.bf16.msra.mxu0 %v7175_v5  ;;  %2804 = vmatpush1.bf16.msra.mxu1 %v7178_v52  ;;  %v7246_v5 = vld [vmem:[%s9797_s1 + $0xae8] ss:$16 sps:$4 sm:$0xff]   ;;  %v7251_v52 = vld [vmem:[%s9797_s1 + $0xb04] ss:$16 sps:$4 sm:$0xff]  }
 0x138   : > { %2754 = vmatprep.subr.bf16.mxu0 %v7183_v8  ;;  %2805 = vmatprep.subr.bf16.mxu1 %v7186_v9 }
 0x13b   : > { %2755 = vmatpush1.bf16.msra.mxu0 %v7181_v10  ;;  %2806 = vmatpush1.bf16.msra.mxu1 %v7184_v53 }
 0x13c   : > { %2756 = vmatprep.subr.bf16.mxu0 %v7189_v14  ;;  %2807 = vmatprep.subr.bf16.mxu1 %v7192_v15  ;;  %v7249_v14 = vld [vmem:[%s9797_s1 + $0xb00] ss:$16 sps:$4 sm:$0xff]  }
 0x13f   : > { %2757 = vmatpush1.bf16.msra.mxu0 %v7187_v16  ;;  %2808 = vmatpush1.bf16.msra.mxu1 %v7190_v54  ;;  %v7255_v54 = vld [vmem:[%s9797_s1 + $0xb20] ss:$16 sps:$4 sm:$0xff]  }
 0x140   : > { %2758 = vmatprep.subr.bf16.mxu0 %v7195_v21  ;;  %2809 = vmatprep.subr.bf16.mxu1 %v7198_v22  ;;  %v7261_v21 = vld [vmem:[%s9797_s1 + $0xb40] ss:$16 sps:$4 sm:$0xff]   ;;  %v7264_v22 = vld [vmem:[%s9797_s1 + $0xb48] ss:$16 sps:$4 sm:$0xff]  }
 0x143   : > { %2759 = vmatpush1.bf16.msra.mxu0 %v7193_v23  ;;  %2810 = vmatpush1.bf16.msra.mxu1 %v7196_v24  ;;  %v7269_v23 = vld [vmem:[%s9797_s1 + $0xb64] ss:$16 sps:$4 sm:$0xff]   ;;  %v7272_v24 = vld [vmem:[%s9797_s1 + $0xb6c] ss:$16 sps:$4 sm:$0xff]  }
 0x144   : > { %3235 = vmatprep.subr.bf16.mxu0 %v7203_v27  ;;  %3286 = vmatprep.subr.bf16.mxu1 %v7206_v28  ;;  %v7275_v27 = vld [vmem:[%s9797_s1 + $0xb84] ss:$16 sps:$4 sm:$0xff]   ;;  %v7278_v28 = vld [vmem:[%s9797_s1 + $0xb8c] ss:$16 sps:$4 sm:$0xff]  }
 0x146   : > { %2761 = vmatmul.mubr.bf16.vlgmr.msra.gmra.mrb[0].mxu0 %v2386_v31  ;;  %2812 = vmatmul.mubr.bf16.vlgmr.msra.gmra.mrb[0].mxu1 %v2386_v31  ;;  %v7281_v31 = vld [vmem:[%s9797_s1 + $0xba4] ss:$16 sps:$4 sm:$0xff]  }
 0x147   : > { %3236 = vmatpush1.bf16.msra.mxu0 %v7201_v29  ;;  %3287 = vmatpush1.bf16.msra.mxu1 %v7204_v30  ;;  %v7273_v29 = vld [vmem:[%s9797_s1 + $0xb80] ss:$16 sps:$4 sm:$0xff]   ;;  %v7276_v30 = vld [vmem:[%s9797_s1 + $0xb88] ss:$16 sps:$4 sm:$0xff]  }
 0x148   : > { %3237 = vmatprep.subr.bf16.mxu0 %v7209_v32  ;;  %3288 = vmatprep.subr.bf16.mxu1 %v7212_v33  ;;  %v7284_v32 = vld [vmem:[%s9797_s1 + $0xbac] ss:$16 sps:$4 sm:$0xff]   ;;  %v7279_v33 = vld [vmem:[%s9797_s1 + $0xba0] ss:$16 sps:$4 sm:$0xff]  }
 0x149   : > { %2770 = vmatprep.mubr.bf16.mxu0 %v8588_v17  ;;  %2821 = vmatprep.mubr.bf16.mxu1 %v8588_v17  ;;  %v7224_v17 = vld [vmem:[%s9797_s1 + $0xa6c] ss:$16 sps:$4 sm:$0xff]  }
 0x14b   : > { %3238 = vmatpush1.bf16.msra.mxu0 %v7207_v34  ;;  %3289 = vmatpush1.bf16.msra.mxu1 %v7210_v35  ;;  %v7282_v34 = vld [vmem:[%s9797_s1 + $0xba8] ss:$16 sps:$4 sm:$0xff]   ;;  %v7287_v35 = vld [vmem:[%s9797_s1 + $0xbc4] ss:$16 sps:$4 sm:$0xff]  }
 0x14c   : > { %3239 = vmatprep.subr.bf16.mxu0 %v7215_v37  ;;  %3290 = vmatprep.subr.bf16.mxu1 %v7218_v39  ;;  %v7290_v37 = vld [vmem:[%s9797_s1 + $0xbcc] ss:$16 sps:$4 sm:$0xff]   ;;  %v7285_v39 = vld [vmem:[%s9797_s1 + $0xbc0] ss:$16 sps:$4 sm:$0xff]  }
 0x14e   : > { %2771 = vmatmul.mubr.bf16.gmra.mrb[20].mxu0 %v2385_v26  ;;  %2822 = vmatmul.mubr.bf16.gmra.mrb[20].mxu1 %v2385_v26  ;;  %v7270_v26 = vld [vmem:[%s9797_s1 + $0xb68] ss:$16 sps:$4 sm:$0xff]  }
 0x14f   : > { %3240 = vmatpush1.bf16.msra.mxu0 %v7213_v40  ;;  %3291 = vmatpush1.bf16.msra.mxu1 %v7216_v41  ;;  %v7288_v40 = vld [vmem:[%s9797_s1 + $0xbc8] ss:$16 sps:$4 sm:$0xff]   ;;  %v7293_v41 = vld [vmem:[%s9797_s1 + $0xbe4] ss:$16 sps:$4 sm:$0xff]  }
 0x150   : > { %3241 = vmatprep.subr.bf16.mxu0 %v7221_v42  ;;  %3292 = vmatprep.subr.bf16.mxu1 %v7224_v17  ;;  %v7296_v42 = vld [vmem:[%s9797_s1 + $0xbec] ss:$16 sps:$4 sm:$0xff]   ;;  %v7291_v17 = vld [vmem:[%s9797_s1 + $0xbe0] ss:$16 sps:$4 sm:$0xff]  }
 0x151   : > { %3267 = vmatprep.mubr.bf16.mxu0 %v6083_v47  ;;  %3318 = vmatprep.mubr.bf16.mxu1 %v6083_v47  ;;  %v7294_v47 = vld [vmem:[%s9797_s1 + $0xbe8] ss:$16 sps:$4 sm:$0xff]  }
 0x153   : > { %3242 = vmatpush1.bf16.msra.mxu0 %v7219_v48  ;;  %3293 = vmatpush1.bf16.msra.mxu1 %v7222_v55  ;;  %v7301_v48 = vld [vmem:[%s9797_s1 + $0xc04] ss:$16 sps:$4 sm:$0xff]   ;;  %v7304_v55 = vld [vmem:[%s9797_s1 + $0xc0c] ss:$16 sps:$4 sm:$0xff]  }
 0x154   : > { %3243 = vmatprep.subr.bf16.mxu0 %v7227_v56  ;;  %3294 = vmatprep.subr.bf16.mxu1 %v7230_v36  ;;  %v8985_v56 = vld [vmem:[%s7823_s17 + $0x8] sm:$0xcc]  ;;  %v8988_v36 = vld [vmem:[%s7823_s17 + $0x10] sm:$0xff] }
 0x157   : > { %3244 = vmatpush1.bf16.msra.mxu0 %v7225_v46  ;;  %3295 = vmatpush1.bf16.msra.mxu1 %v7228_v50  ;;  %v8991_v46 = vld [vmem:[%s7823_s17 + $0x20] sm:$0x33]  ;;  %v6082_v50 = vcombine.low %v8809_v45, %v8812_v7  ;;  %v7310_v45 = vld [vmem:[%s9797_s1 + $0xc2c] ss:$16 sps:$4 sm:$0xff]   ;;  %v9009_v7 = vcombine.high %v8985_v56, %v8988_v36 }
 0x158   : > { %3245 = vmatprep.subr.bf16.mxu0 %v7233_v57  ;;  %3296 = vmatprep.subr.bf16.mxu1 %v7236_v58  ;;  %v7299_v57 = vld [vmem:[%s9797_s1 + $0xc00] ss:$16 sps:$4 sm:$0xff]   ;;  %v7302_v58 = vld [vmem:[%s9797_s1 + $0xc08] ss:$16 sps:$4 sm:$0xff]  }
 0x15b   : > { %3246 = vmatpush1.bf16.msra.mxu0 %v7231_v59  ;;  %3297 = vmatpush1.bf16.msra.mxu1 %v7234_v60  ;;  %v7307_v59 = vld [vmem:[%s9797_s1 + $0xc24] ss:$16 sps:$4 sm:$0xff]   ;;  %v9012_v60 = vld [vmem:[%s7823_s17 + $0x18] sm:$0xff] }
 0x15c   : > { %3247 = vmatprep.subr.bf16.mxu0 %v7239_v62  ;;  %3298 = vmatprep.subr.bf16.mxu1 %v7242_v43  ;;  %v6217_v62 = vcombine.high %v9012_v60, %v8991_v46  ;;  %v7305_v43 = vld [vmem:[%s9797_s1 + $0xc20] ss:$16 sps:$4 sm:$0xff]  }
 0x15f   : > { %3248 = vmatpush1.bf16.msra.mxu0 %v7237_v63  ;;  %3299 = vmatpush1.bf16.msra.mxu1 %v7240_v1  ;;  %v7308_v63 = vld [vmem:[%s9797_s1 + $0xc28] ss:$16 sps:$4 sm:$0xff]   ;;  %v6085_v1 = vcombine.high %v9012_v60, %v9012_v60 }
 0x160   : > { %3249 = vmatprep.subr.bf16.mxu0 %v7245_v2  ;;  %3300 = vmatprep.subr.bf16.mxu1 %v7248_v3  ;;  %v7315_v2 = vld [vmem:[%s9797_s1 + $0xc44] ss:$16 sps:$4 sm:$0xff]   ;;  %v7318_v3 = vld [vmem:[%s9797_s1 + $0xc4c] ss:$16 sps:$4 sm:$0xff]  }
 0x161   : > { %v1202_v8 = vpop.f32.mrb[8].mxu0  ;;  %v1253_v9 = vpop.f32.mrb[8].mxu1 }
 0x162   : > { %v8877_v10 = vadd.f32 %v1202_v8, %v8661_v38  ;;  %v8880_v11 = vadd.f32 %v1253_v9, %v8663_v0  ;;  %v1204_v53 = vpop.f32.mrb[9].mxu0  ;;  %v1255_v51 = vpop.f32.mrb[9].mxu1  ;;  %v7252_v38 = vld [vmem:[%s9797_s1 + $0xb08] ss:$16 sps:$4 sm:$0xff]   ;;  %v6084_v8 = vcombine.low %v9012_v60, %v9012_v60  ;;  %v7321_v9 = vld [vmem:[%s9797_s1 + $0xc64] ss:$16 sps:$4 sm:$0xff]  }
 0x163   : > { %v8883_v12 = vadd.f32 %v1204_v53, %v8665_v49  ;;  %v8886_v13 = vadd.f32 %v1255_v51, %v8667_v44  ;;  %3250 = vmatpush1.bf16.msra.mxu0 %v7243_v4  ;;  %3301 = vmatpush1.bf16.msra.mxu1 %v7246_v5  ;;  %v1206_v0 = vpop.f32.mrb[10].mxu0  ;;  %v1257_v15 = vpop.f32.mrb[10].mxu1  ;;  %v7257_v49 = vld [vmem:[%s9797_s1 + $0xb24] ss:$16 sps:$4 sm:$0xff]   ;;  %v7260_v44 = vld [vmem:[%s9797_s1 + $0xb2c] ss:$16 sps:$4 sm:$0xff]  }
 0x164   : > { %3251 = vmatprep.subr.bf16.mxu0 %v7251_v52  ;;  %3302 = vmatprep.subr.bf16.mxu1 %v7254_v6  ;;  %v1207_v16 = vpop.f32.mrb[11].mxu0  ;;  %v1258_v18 = vpop.f32.mrb[11].mxu1  ;;  %v3438_v4 = vrot.slane %v9009_v7, 2  ;;  %v9031_v5 = vrot.slane %v6217_v62, 2  ;;  %v7313_v52 = vld [vmem:[%s9797_s1 + $0xc40] ss:$16 sps:$4 sm:$0xff]  }
 0x165   : > { %v7316_v6 = vld [vmem:[%s9797_s1 + $0xc48] ss:$16 sps:$4 sm:$0xff]   ;;  %v7324_v53 = vld [vmem:[%s9797_s1 + $0xc6c] ss:$16 sps:$4 sm:$0xff]   ;;  %v7327_v0 = vld [vmem:[%s9797_s1 + $0xc84] ss:$16 sps:$4 sm:$0xff]  }
 0x166   : > { %v3440_v51 = vsel %vm3434_vm4, %v3438_v4, %v9031_v5  ;;  %v7330_v15 = vld [vmem:[%s9797_s1 + $0xc8c] ss:$16 sps:$4 sm:$0xff]   ;;  %v7333_v16 = vld [vmem:[%s9797_s1 + $0xca4] ss:$16 sps:$4 sm:$0xff]   ;;  %v7370_v62 = vld [vmem:[%s9797_s1 + $0xd68] ss:$16 sps:$4 sm:$0xff]  }
 0x167   : > { %3252 = vmatpush1.bf16.msra.mxu0 %v7249_v14  ;;  %3303 = vmatpush1.bf16.msra.mxu1 %v7252_v38  ;;  %v7319_v14 = vld [vmem:[%s9797_s1 + $0xc60] ss:$16 sps:$4 sm:$0xff]   ;;  %v7322_v38 = vld [vmem:[%s9797_s1 + $0xc68] ss:$16 sps:$4 sm:$0xff]   ;;  %v7336_v18 = vld [vmem:[%s9797_s1 + $0xcac] ss:$16 sps:$4 sm:$0xff]  }
 0x168   : > { %3253 = vmatprep.subr.bf16.mxu0 %v7257_v49  ;;  %3304 = vmatprep.subr.bf16.mxu1 %v7260_v44  ;;  %v7325_v49 = vld [vmem:[%s9797_s1 + $0xc80] ss:$16 sps:$4 sm:$0xff]   ;;  %v7328_v44 = vld [vmem:[%s9797_s1 + $0xc88] ss:$16 sps:$4 sm:$0xff]   ;;  %v7384_v4 = vld [vmem:[%s9797_s1 + $0xdac] ss:$16 sps:$4 sm:$0xff]  }
 0x16b   : > { %3254 = vmatpush1.bf16.msra.mxu0 %v7255_v54  ;;  %3305 = vmatpush1.bf16.msra.mxu1 %v7258_v61  ;;  %v7331_v54 = vld [vmem:[%s9797_s1 + $0xca0] ss:$16 sps:$4 sm:$0xff]   ;;  %v7334_v61 = vld [vmem:[%s9797_s1 + $0xca8] ss:$16 sps:$4 sm:$0xff]  }
 0x16c   : > { %3255 = vmatprep.subr.bf16.mxu0 %v7263_v19  ;;  %3306 = vmatprep.subr.bf16.mxu1 %v7266_v20  ;;  %v7339_v19 = vld [vmem:[%s9797_s1 + $0xcc4] ss:$16 sps:$4 sm:$0xff]   ;;  %v7342_v20 = vld [vmem:[%s9797_s1 + $0xccc] ss:$16 sps:$4 sm:$0xff]  }
 0x16f   : > { %3256 = vmatpush1.bf16.msra.mxu0 %v7261_v21  ;;  %3307 = vmatpush1.bf16.msra.mxu1 %v7264_v22  ;;  %v7337_v21 = vld [vmem:[%s9797_s1 + $0xcc0] ss:$16 sps:$4 sm:$0xff]   ;;  %v7340_v22 = vld [vmem:[%s9797_s1 + $0xcc8] ss:$16 sps:$4 sm:$0xff]  }
 0x170   : > { %3257 = vmatprep.subr.bf16.mxu0 %v7269_v23  ;;  %3308 = vmatprep.subr.bf16.mxu1 %v7272_v24  ;;  %v7345_v23 = vld [vmem:[%s9797_s1 + $0xce4] ss:$16 sps:$4 sm:$0xff]   ;;  %v7348_v24 = vld [vmem:[%s9797_s1 + $0xcec] ss:$16 sps:$4 sm:$0xff]  }
 0x173   : > { %3258 = vmatpush1.bf16.msra.mxu0 %v7267_v25  ;;  %3309 = vmatpush1.bf16.msra.mxu1 %v7270_v26  ;;  %v7343_v25 = vld [vmem:[%s9797_s1 + $0xce0] ss:$16 sps:$4 sm:$0xff]   ;;  %v7346_v26 = vld [vmem:[%s9797_s1 + $0xce8] ss:$16 sps:$4 sm:$0xff]  }
 0x174   : > { %3259 = vmatprep.subr.bf16.mxu0 %v7275_v27  ;;  %3310 = vmatprep.subr.bf16.mxu1 %v7278_v28  ;;  %v7351_v27 = vld [vmem:[%s9797_s1 + $0xd04] ss:$16 sps:$4 sm:$0xff]   ;;  %v7354_v28 = vld [vmem:[%s9797_s1 + $0xd0c] ss:$16 sps:$4 sm:$0xff]  }
 0x177   : > { %3260 = vmatpush1.bf16.msra.mxu0 %v7273_v29  ;;  %3311 = vmatpush1.bf16.msra.mxu1 %v7276_v30 }
 0x178   : > { %3261 = vmatprep.subr.bf16.mxu0 %v7281_v31  ;;  %3312 = vmatprep.subr.bf16.mxu1 %v7284_v32 }
 0x17b   : > { %3262 = vmatpush1.bf16.msra.mxu0 %v7279_v33  ;;  %3313 = vmatpush1.bf16.msra.mxu1 %v7282_v34 }
 0x17c   : > { %3263 = vmatprep.subr.bf16.mxu0 %v7287_v35  ;;  %3314 = vmatprep.subr.bf16.mxu1 %v7290_v37 }
 0x17f   : > { %3264 = vmatpush1.bf16.msra.mxu0 %v7285_v39  ;;  %3315 = vmatpush1.bf16.msra.mxu1 %v7288_v40  ;;  %v7349_v39 = vld [vmem:[%s9797_s1 + $0xd00] ss:$16 sps:$4 sm:$0xff]  }
 0x180   : > { %3265 = vmatprep.subr.bf16.mxu0 %v7293_v41  ;;  %3316 = vmatprep.subr.bf16.mxu1 %v7296_v42 }
 0x183   : > { %3266 = vmatpush1.bf16.msra.mxu0 %v7291_v17  ;;  %3317 = vmatpush1.bf16.msra.mxu1 %v7294_v47  ;;  %v7355_v17 = vld [vmem:[%s9797_s1 + $0xd20] ss:$16 sps:$4 sm:$0xff]   ;;  %v7358_v47 = vld [vmem:[%s9797_s1 + $0xd28] ss:$16 sps:$4 sm:$0xff]  }
 0x184   : > { %3765 = vmatprep.subr.bf16.mxu0 %v7301_v48  ;;  %3816 = vmatprep.subr.bf16.mxu1 %v7304_v55  ;;  %v7363_v48 = vld [vmem:[%s9797_s1 + $0xd44] ss:$16 sps:$4 sm:$0xff]   ;;  %v7366_v55 = vld [vmem:[%s9797_s1 + $0xd4c] ss:$16 sps:$4 sm:$0xff]  }
 0x186   : > { %3268 = vmatmul.mubr.bf16.vlgmr.msra.gmra.mrb[0].mxu0 %v6082_v50  ;;  %3319 = vmatmul.mubr.bf16.vlgmr.msra.gmra.mrb[0].mxu1 %v6082_v50  ;;  %v7361_v50 = vld [vmem:[%s9797_s1 + $0xd40] ss:$16 sps:$4 sm:$0xff]  }
 0x187   : > { %3766 = vmatpush1.bf16.msra.mxu0 %v7299_v57  ;;  %3817 = vmatpush1.bf16.msra.mxu1 %v7302_v58  ;;  %v7364_v57 = vld [vmem:[%s9797_s1 + $0xd48] ss:$16 sps:$4 sm:$0xff]   ;;  %v7369_v58 = vld [vmem:[%s9797_s1 + $0xd64] ss:$16 sps:$4 sm:$0xff]  }
 0x188   : > { %3767 = vmatprep.subr.bf16.mxu0 %v7307_v59  ;;  %3818 = vmatprep.subr.bf16.mxu1 %v7310_v45  ;;  %v7372_v59 = vld [vmem:[%s9797_s1 + $0xd6c] ss:$16 sps:$4 sm:$0xff]   ;;  %v7367_v45 = vld [vmem:[%s9797_s1 + $0xd60] ss:$16 sps:$4 sm:$0xff]  }
 0x189   : > { %3277 = vmatprep.mubr.bf16.mxu0 %v6085_v1  ;;  %3328 = vmatprep.mubr.bf16.mxu1 %v6085_v1  ;;  %v7373_v1 = vld [vmem:[%s9797_s1 + $0xd80] ss:$16 sps:$4 sm:$0xff]  }
 0x18b   : > { %3768 = vmatpush1.bf16.msra.mxu0 %v7305_v43  ;;  %3819 = vmatpush1.bf16.msra.mxu1 %v7308_v63  ;;  %v7375_v43 = vld [vmem:[%s9797_s1 + $0xd84] ss:$16 sps:$4 sm:$0xff]   ;;  %v7378_v63 = vld [vmem:[%s9797_s1 + $0xd8c] ss:$16 sps:$4 sm:$0xff]  }
 0x18c   : > { %3769 = vmatprep.subr.bf16.mxu0 %v7315_v2  ;;  %3820 = vmatprep.subr.bf16.mxu1 %v7318_v3  ;;  %v7376_v2 = vld [vmem:[%s9797_s1 + $0xd88] ss:$16 sps:$4 sm:$0xff]   ;;  %v7381_v3 = vld [vmem:[%s9797_s1 + $0xda4] ss:$16 sps:$4 sm:$0xff]  }
 0x18e   : > { %3278 = vmatmul.mubr.bf16.gmra.mrb[24].mxu0 %v6084_v8  ;;  %3329 = vmatmul.mubr.bf16.gmra.mrb[24].mxu1 %v6084_v8  ;;  %v7387_v8 = vld [vmem:[%s9797_s1 + $0xdc4] ss:$16 sps:$4 sm:$0xff]  }
 0x18f   : > { %3770 = vmatpush1.bf16.msra.mxu0 %v7313_v52  ;;  %3821 = vmatpush1.bf16.msra.mxu1 %v7316_v6  ;;  %v7379_v52 = vld [vmem:[%s9797_s1 + $0xda0] ss:$16 sps:$4 sm:$0xff]   ;;  %v7382_v6 = vld [vmem:[%s9797_s1 + $0xda8] ss:$16 sps:$4 sm:$0xff]  }
 0x190   : > { %3771 = vmatprep.subr.bf16.mxu0 %v7321_v9  ;;  %3822 = vmatprep.subr.bf16.mxu1 %v7324_v53  ;;  %v7390_v9 = vld [vmem:[%s9797_s1 + $0xdcc] ss:$16 sps:$4 sm:$0xff]   ;;  %v7385_v53 = vld [vmem:[%s9797_s1 + $0xdc0] ss:$16 sps:$4 sm:$0xff]  }
 0x191   : > { %3797 = vmatprep.mubr.bf16.mxu0 %v3440_v51  ;;  %3848 = vmatprep.mubr.bf16.mxu1 %v3440_v51  ;;  %v7388_v51 = vld [vmem:[%s9797_s1 + $0xdc8] ss:$16 sps:$4 sm:$0xff]  }
 0x193   : > { %3772 = vmatpush1.bf16.msra.mxu0 %v7319_v14  ;;  %3823 = vmatpush1.bf16.msra.mxu1 %v7322_v38  ;;  %v9201_v14 = vcombine.low %v8985_v56, %v8988_v36  ;;  %v6216_v38 = vcombine.low %v9012_v60, %v8991_v46  ;;  %v7391_v56 = vld [vmem:[%s9797_s1 + $0xde0] ss:$16 sps:$4 sm:$0xff]   ;;  %v7394_v46 = vld [vmem:[%s9797_s1 + $0xde8] ss:$16 sps:$4 sm:$0xff]  }
 0x194   : > { %3773 = vmatprep.subr.bf16.mxu0 %v7327_v0  ;;  %3824 = vmatprep.subr.bf16.mxu1 %v7330_v15  ;;  %v9206_v0 = vld [vmem:[%s7823_s17 + $0x20] sm:$0x77] }
 0x195   : > { %v7393_v15 = vld [vmem:[%s9797_s1 + $0xde4] ss:$16 sps:$4 sm:$0xff]  }
 0x197   : > { %3774 = vmatpush1.bf16.msra.mxu0 %v7325_v49  ;;  %3825 = vmatpush1.bf16.msra.mxu1 %v7328_v44  ;;  %v7396_v49 = vld [vmem:[%s9797_s1 + $0xdec] ss:$16 sps:$4 sm:$0xff]   ;;  %v9216_v44 = vcombine.high %v9012_v60, %v9206_v0 }
 0x198   : > { %3775 = vmatprep.subr.bf16.mxu0 %v7333_v16  ;;  %3826 = vmatprep.subr.bf16.mxu1 %v7336_v18  ;;  %v3436_v16 = vrot.slane %v6216_v38, 2  ;;  %v3435_v18 = vrot.slane %v9201_v14, 2 }
 0x19b   : > { %3776 = vmatpush1.bf16.msra.mxu0 %v7331_v54  ;;  %3827 = vmatpush1.bf16.msra.mxu1 %v7334_v61  ;;  %v7403_v54 = vld [vmem:[%s9797_s1 + $0xe04] ss:$16 sps:$4 sm:$0xff]   ;;  %v7406_v61 = vld [vmem:[%s9797_s1 + $0xe0c] ss:$16 sps:$4 sm:$0xff]  }
 0x19c   : > { %3777 = vmatprep.subr.bf16.mxu0 %v7339_v19  ;;  %3828 = vmatprep.subr.bf16.mxu1 %v7342_v20  ;;  %v3969_v19 = vshrl.u32 %v9009_v7, 16  ;;  %v3972_v20 = vshll.u32 %v9009_v7, 16  ;;  %v7409_v7 = vld [vmem:[%s9797_s1 + $0xe24] ss:$16 sps:$4 sm:$0xff]  }
 0x19f   : > { %3778 = vmatpush1.bf16.msra.mxu0 %v7337_v21  ;;  %3829 = vmatpush1.bf16.msra.mxu1 %v7340_v22  ;;  %v3977_v21 = vshrl.u32 %v9216_v44, 16  ;;  %v3980_v22 = vshll.u32 %v9216_v44, 16 }
 0x1a0   : > { %3779 = vmatprep.subr.bf16.mxu0 %v7345_v23  ;;  %3830 = vmatprep.subr.bf16.mxu1 %v7348_v24  ;;  %v3437_v23 = vsel %vm3434_vm4, %v3435_v18, %v3436_v16  ;;  %v7401_v24 = vld [vmem:[%s9797_s1 + $0xe00] ss:$16 sps:$4 sm:$0xff]  }
 0x1a1   : > { %v1706_v29 = vpop.f32.mrb[12].mxu0  ;;  %v1757_v30 = vpop.f32.mrb[12].mxu1  ;;  %v7449_v18 = vld [vmem:[%s9797_s1 + $0xf00] ss:$16 sps:$4 sm:$0xff]  }
 0x1a2   : > { %v9110_v31 = vadd.f32 %v1706_v29, %v8877_v10  ;;  %v9113_v32 = vadd.f32 %v1757_v30, %v8880_v11  ;;  %v1708_v33 = vpop.f32.mrb[13].mxu0  ;;  %v1759_v34 = vpop.f32.mrb[13].mxu1  ;;  %v7352_v10 = vld [vmem:[%s9797_s1 + $0xd08] ss:$16 sps:$4 sm:$0xff]   ;;  %v3979_v29 = vrot.slane %v3977_v21, 2  ;;  %v3982_v30 = vrot.slane %v3980_v22, 3 }
 0x1a3   : > { %v9116_v35 = vadd.f32 %v1708_v33, %v8883_v12  ;;  %v9119_v37 = vadd.f32 %v1759_v34, %v8886_v13  ;;  %3780 = vmatpush1.bf16.msra.mxu0 %v7343_v25  ;;  %3831 = vmatpush1.bf16.msra.mxu1 %v7346_v26  ;;  %v1710_v11 = vpop.f32.mrb[14].mxu0  ;;  %v1761_v40 = vpop.f32.mrb[14].mxu1  ;;  %v7357_v12 = vld [vmem:[%s9797_s1 + $0xd24] ss:$16 sps:$4 sm:$0xff]   ;;  %v7360_v13 = vld [vmem:[%s9797_s1 + $0xd2c] ss:$16 sps:$4 sm:$0xff]  }
 0x1a4   : > { %3781 = vmatprep.subr.bf16.mxu0 %v7351_v27  ;;  %3832 = vmatprep.subr.bf16.mxu1 %v7354_v28  ;;  %v1711_v41 = vpop.f32.mrb[15].mxu0  ;;  %v1762_v42 = vpop.f32.mrb[15].mxu1  ;;  %v7404_v25 = vld [vmem:[%s9797_s1 + $0xe08] ss:$16 sps:$4 sm:$0xff]   ;;  %v7412_v26 = vld [vmem:[%s9797_s1 + $0xe2c] ss:$16 sps:$4 sm:$0xff]   ;;  %v9262_v40 = vor.u32 %v3982_v30, %v3979_v29 }
 0x1a5   : > { %v3971_v27 = vrot.slane %v3969_v19, 2  ;;  %v3974_v28 = vrot.slane %v3972_v20, 3  ;;  %v7407_v33 = vld [vmem:[%s9797_s1 + $0xe20] ss:$16 sps:$4 sm:$0xff]   ;;  %v7410_v34 = vld [vmem:[%s9797_s1 + $0xe28] ss:$16 sps:$4 sm:$0xff]  }
 0x1a6   : > { %v7424_v41 = vld [vmem:[%s9797_s1 + $0xe6c] ss:$16 sps:$4 sm:$0xff]   ;;  %v7455_v20 = vld [vmem:[%s9797_s1 + $0xf20] ss:$16 sps:$4 sm:$0xff]   ;;  %v7458_v21 = vld [vmem:[%s9797_s1 + $0xf28] ss:$16 sps:$4 sm:$0xff]  }
 0x1a7   : > { %3782 = vmatpush1.bf16.msra.mxu0 %v7349_v39  ;;  %3833 = vmatpush1.bf16.msra.mxu1 %v7352_v10  ;;  %v7415_v39 = vld [vmem:[%s9797_s1 + $0xe44] ss:$16 sps:$4 sm:$0xff]   ;;  %v7418_v10 = vld [vmem:[%s9797_s1 + $0xe4c] ss:$16 sps:$4 sm:$0xff]   ;;  %v3975_v11 = vor.u32 %v3974_v28, %v3971_v27  ;;  %v7467_v27 = vld [vmem:[%s9797_s1 + $0xf60] ss:$16 sps:$4 sm:$0xff]  }
 0x1a8   : > { %3783 = vmatprep.subr.bf16.mxu0 %v7357_v12  ;;  %3834 = vmatprep.subr.bf16.mxu1 %v7360_v13  ;;  %v7413_v12 = vld [vmem:[%s9797_s1 + $0xe40] ss:$16 sps:$4 sm:$0xff]   ;;  %v7416_v13 = vld [vmem:[%s9797_s1 + $0xe48] ss:$16 sps:$4 sm:$0xff]   ;;  %v7463_v22 = vld [vmem:[%s9797_s1 + $0xf44] ss:$16 sps:$4 sm:$0xff]  }
 0x1a9   : > { %v3984_v42 = vsel %vm3950_vm5, %v3975_v11, %v9262_v40  ;;  %v7470_v28 = vld [vmem:[%s9797_s1 + $0xf68] ss:$16 sps:$4 sm:$0xff]   ;;  %v7475_v29 = vld [vmem:[%s9797_s1 + $0xf84] ss:$16 sps:$4 sm:$0xff]   ;;  %v7478_v30 = vld [vmem:[%s9797_s1 + $0xf8c] ss:$16 sps:$4 sm:$0xff]  }
 0x1aa   : > { %v7484_v11 = vld [vmem:[%s9797_s1 + $0xfac] ss:$16 sps:$4 sm:$0xff]  }
 0x1ab   : > { %3784 = vmatpush1.bf16.msra.mxu0 %v7355_v17  ;;  %3835 = vmatpush1.bf16.msra.mxu1 %v7358_v47  ;;  %v7419_v17 = vld [vmem:[%s9797_s1 + $0xe60] ss:$16 sps:$4 sm:$0xff]   ;;  %v7422_v47 = vld [vmem:[%s9797_s1 + $0xe68] ss:$16 sps:$4 sm:$0xff]  }
 0x1ac   : > { %3785 = vmatprep.subr.bf16.mxu0 %v7363_v48  ;;  %3836 = vmatprep.subr.bf16.mxu1 %v7366_v55  ;;  %v7427_v48 = vld [vmem:[%s9797_s1 + $0xe84] ss:$16 sps:$4 sm:$0xff]   ;;  %v7430_v55 = vld [vmem:[%s9797_s1 + $0xe8c] ss:$16 sps:$4 sm:$0xff]  }
 0x1af   : > { %3786 = vmatpush1.bf16.msra.mxu0 %v7361_v50  ;;  %3837 = vmatpush1.bf16.msra.mxu1 %v7364_v57  ;;  %v7425_v50 = vld [vmem:[%s9797_s1 + $0xe80] ss:$16 sps:$4 sm:$0xff]   ;;  %v7428_v57 = vld [vmem:[%s9797_s1 + $0xe88] ss:$16 sps:$4 sm:$0xff]  }
 0x1b0   : > { %3787 = vmatprep.subr.bf16.mxu0 %v7369_v58  ;;  %3838 = vmatprep.subr.bf16.mxu1 %v7372_v59  ;;  %v7433_v58 = vld [vmem:[%s9797_s1 + $0xea4] ss:$16 sps:$4 sm:$0xff]   ;;  %v7436_v59 = vld [vmem:[%s9797_s1 + $0xeac] ss:$16 sps:$4 sm:$0xff]  }
 0x1b3   : > { %3788 = vmatpush1.bf16.msra.mxu0 %v7367_v45  ;;  %3839 = vmatpush1.bf16.msra.mxu1 %v7370_v62  ;;  %v7431_v45 = vld [vmem:[%s9797_s1 + $0xea0] ss:$16 sps:$4 sm:$0xff]   ;;  %v7434_v62 = vld [vmem:[%s9797_s1 + $0xea8] ss:$16 sps:$4 sm:$0xff]  }
 0x1b4   : > { %3789 = vmatprep.subr.bf16.mxu0 %v7375_v43  ;;  %3840 = vmatprep.subr.bf16.mxu1 %v7378_v63  ;;  %v7439_v43 = vld [vmem:[%s9797_s1 + $0xec4] ss:$16 sps:$4 sm:$0xff]   ;;  %v7442_v63 = vld [vmem:[%s9797_s1 + $0xecc] ss:$16 sps:$4 sm:$0xff]  }
 0x1b7   : > { %3790 = vmatpush1.bf16.msra.mxu0 %v7373_v1  ;;  %3841 = vmatpush1.bf16.msra.mxu1 %v7376_v2  ;;  %v7437_v1 = vld [vmem:[%s9797_s1 + $0xec0] ss:$16 sps:$4 sm:$0xff]   ;;  %v7440_v2 = vld [vmem:[%s9797_s1 + $0xec8] ss:$16 sps:$4 sm:$0xff]  }
 0x1b8   : > { %3791 = vmatprep.subr.bf16.mxu0 %v7381_v3  ;;  %3842 = vmatprep.subr.bf16.mxu1 %v7384_v4  ;;  %v7445_v3 = vld [vmem:[%s9797_s1 + $0xee4] ss:$16 sps:$4 sm:$0xff]   ;;  %v7448_v4 = vld [vmem:[%s9797_s1 + $0xeec] ss:$16 sps:$4 sm:$0xff]  }
 0x1bb   : > { %3792 = vmatpush1.bf16.msra.mxu0 %v7379_v52  ;;  %3843 = vmatpush1.bf16.msra.mxu1 %v7382_v6  ;;  %v7443_v52 = vld [vmem:[%s9797_s1 + $0xee0] ss:$16 sps:$4 sm:$0xff]   ;;  %v7446_v6 = vld [vmem:[%s9797_s1 + $0xee8] ss:$16 sps:$4 sm:$0xff]  }
 0x1bc   : > { %3793 = vmatprep.subr.bf16.mxu0 %v7387_v8  ;;  %3844 = vmatprep.subr.bf16.mxu1 %v7390_v9  ;;  %v7451_v8 = vld [vmem:[%s9797_s1 + $0xf04] ss:$16 sps:$4 sm:$0xff]   ;;  %v7454_v9 = vld [vmem:[%s9797_s1 + $0xf0c] ss:$16 sps:$4 sm:$0xff]  }
 0x1bf   : > { %3794 = vmatpush1.bf16.msra.mxu0 %v7385_v53  ;;  %3845 = vmatpush1.bf16.msra.mxu1 %v7388_v51 }
 0x1c0   : > { %3795 = vmatprep.subr.bf16.mxu0 %v7393_v15  ;;  %3846 = vmatprep.subr.bf16.mxu1 %v7396_v49 }
 0x1c3   : > { %3796 = vmatpush1.bf16.msra.mxu0 %v7391_v56  ;;  %3847 = vmatpush1.bf16.msra.mxu1 %v7394_v46 }
 0x1c4   : > { %4309 = vmatprep.subr.bf16.mxu0 %v7403_v54  ;;  %4360 = vmatprep.subr.bf16.mxu1 %v7406_v61 }
 0x1c6   : > { %3798 = vmatmul.mubr.bf16.vlgmr.msra.gmra.mrb[0].mxu0 %v3437_v23  ;;  %3849 = vmatmul.mubr.bf16.vlgmr.msra.gmra.mrb[0].mxu1 %v3437_v23  ;;  %v7466_v23 = vld [vmem:[%s9797_s1 + $0xf4c] ss:$16 sps:$4 sm:$0xff]  }
 0x1c7   : > { %4310 = vmatpush1.bf16.msra.mxu0 %v7401_v24  ;;  %4361 = vmatpush1.bf16.msra.mxu1 %v7404_v25  ;;  %v7461_v24 = vld [vmem:[%s9797_s1 + $0xf40] ss:$16 sps:$4 sm:$0xff]   ;;  %v7464_v25 = vld [vmem:[%s9797_s1 + $0xf48] ss:$16 sps:$4 sm:$0xff]  }
 0x1c8   : > { %4311 = vmatprep.subr.bf16.mxu0 %v7409_v7  ;;  %4362 = vmatprep.subr.bf16.mxu1 %v7412_v26  ;;  %v7469_v7 = vld [vmem:[%s9797_s1 + $0xf64] ss:$16 sps:$4 sm:$0xff]   ;;  %v7472_v26 = vld [vmem:[%s9797_s1 + $0xf6c] ss:$16 sps:$4 sm:$0xff]  }
 0x1c9   : > { %3807 = vmatprep.mubr.bf16.mxu0 %v9031_v5  ;;  %3858 = vmatprep.mubr.bf16.mxu1 %v9031_v5  ;;  %v7421_v5 = vld [vmem:[%s9797_s1 + $0xe64] ss:$16 sps:$4 sm:$0xff]  }
 0x1cb   : > { %4312 = vmatpush1.bf16.msra.mxu0 %v7407_v33  ;;  %4363 = vmatpush1.bf16.msra.mxu1 %v7410_v34  ;;  %v7473_v33 = vld [vmem:[%s9797_s1 + $0xf80] ss:$16 sps:$4 sm:$0xff]   ;;  %v7476_v34 = vld [vmem:[%s9797_s1 + $0xf88] ss:$16 sps:$4 sm:$0xff]  }
 0x1cc   : > { %4313 = vmatprep.subr.bf16.mxu0 %v7415_v39  ;;  %4364 = vmatprep.subr.bf16.mxu1 %v7418_v10  ;;  %v9406_v39 = vcombine.low %v9012_v60, %v9206_v0  ;;  %v7481_v10 = vld [vmem:[%s9797_s1 + $0xfa4] ss:$16 sps:$4 sm:$0xff]   ;;  %v7482_v60 = vld [vmem:[%s9797_s1 + $0xfa8] ss:$16 sps:$4 sm:$0xff]   ;;  %v3952_v0 = vshrl.u32 %v9201_v14, 16 }
 0x1ce   : > { %3808 = vmatmul.mubr.bf16.gmra.mrb[28].mxu0 %v3436_v16  ;;  %3859 = vmatmul.mubr.bf16.gmra.mrb[28].mxu1 %v3436_v16 }
 0x1cf   : > { %4314 = vmatpush1.bf16.msra.mxu0 %v7413_v12  ;;  %4365 = vmatpush1.bf16.msra.mxu1 %v7416_v13  ;;  %v7479_v12 = vld [vmem:[%s9797_s1 + $0xfa0] ss:$16 sps:$4 sm:$0xff]   ;;  %v3955_v13 = vshll.u32 %v9201_v14, 16  ;;  %v7488_v14 = vld [vmem:[%s9797_s1 + $0xfc8] ss:$16 sps:$4 sm:$0xff]  }
 0x1d0   : > { %4315 = vmatprep.subr.bf16.mxu0 %v7421_v5  ;;  %4366 = vmatprep.subr.bf16.mxu1 %v7424_v41  ;;  %v3960_v5 = vshrl.u32 %v9406_v39, 16  ;;  %v3963_v41 = vshll.u32 %v9406_v39, 16 }
 0x1d1   : > { %4341 = vmatprep.mubr.bf16.mxu0 %v3984_v42  ;;  %4392 = vmatprep.mubr.bf16.mxu1 %v3984_v42  ;;  %v7487_v42 = vld [vmem:[%s9797_s1 + $0xfc4] ss:$16 sps:$4 sm:$0xff]  }
 0x1d3   : > { %4316 = vmatpush1.bf16.msra.mxu0 %v7419_v17  ;;  %4367 = vmatpush1.bf16.msra.mxu1 %v7422_v47  ;;  %v7490_v17 = vld [vmem:[%s9797_s1 + $0xfcc] ss:$16 sps:$4 sm:$0xff]   ;;  %v7485_v47 = vld [vmem:[%s9797_s1 + $0xfc0] ss:$16 sps:$4 sm:$0xff]  }
 0x1d4   : > { %4317 = vmatprep.subr.bf16.mxu0 %v7427_v48  ;;  %4368 = vmatprep.subr.bf16.mxu1 %v7430_v55  ;;  %v3954_v48 = vrot.slane %v3952_v0, 2  ;;  %v3957_v55 = vrot.slane %v3955_v13, 3 }
 0x1d7   : > { %4318 = vmatpush1.bf16.msra.mxu0 %v7425_v50  ;;  %4369 = vmatpush1.bf16.msra.mxu1 %v7428_v57  ;;  %v3962_v50 = vrot.slane %v3960_v5, 2  ;;  %v3965_v57 = vrot.slane %v3963_v41, 3 }
 0x1d8   : > { %4319 = vmatprep.subr.bf16.mxu0 %v7433_v58  ;;  %4370 = vmatprep.subr.bf16.mxu1 %v7436_v59  ;;  %v7493_v58 = vld [vmem:[%s9797_s1 + $0xfe4] ss:$16 sps:$4 sm:$0xff]   ;;  %v7496_v59 = vld [vmem:[%s9797_s1 + $0xfec] ss:$16 sps:$4 sm:$0xff]  }
 0x1db   : > { %4320 = vmatpush1.bf16.msra.mxu0 %v7431_v45  ;;  %4371 = vmatpush1.bf16.msra.mxu1 %v7434_v62  ;;  %v7491_v45 = vld [vmem:[%s9797_s1 + $0xfe0] ss:$16 sps:$4 sm:$0xff]   ;;  %v7494_v62 = vld [vmem:[%s9797_s1 + $0xfe8] ss:$16 sps:$4 sm:$0xff]  }
 0x1dc   : > { %4321 = vmatprep.subr.bf16.mxu0 %v7439_v43  ;;  %4372 = vmatprep.subr.bf16.mxu1 %v7442_v63  ;;  %v3958_v43 = vor.u32 %v3957_v55, %v3954_v48  ;;  %v3966_v63 = vor.u32 %v3965_v57, %v3962_v50  ;;  %v7553_v57 = vld [vmem:[%s9797_s1 + $0x1120] ss:$16 sps:$4 sm:$0xff]  }
 0x1df   : > { %4322 = vmatpush1.bf16.msra.mxu0 %v7437_v1  ;;  %4373 = vmatpush1.bf16.msra.mxu1 %v7440_v2  ;;  %v7501_v1 = vld [vmem:[%s9797_s1 + $0x1004] ss:$16 sps:$4 sm:$0xff]   ;;  %v7504_v2 = vld [vmem:[%s9797_s1 + $0x100c] ss:$16 sps:$4 sm:$0xff]  }
 0x1e0   : > { %4323 = vmatprep.subr.bf16.mxu0 %v7445_v3  ;;  %4374 = vmatprep.subr.bf16.mxu1 %v7448_v4  ;;  %v3967_v3 = vsel %vm3950_vm5, %v3958_v43, %v3966_v63  ;;  %v7499_v4 = vld [vmem:[%s9797_s1 + $0x1000] ss:$16 sps:$4 sm:$0xff]   ;;  %v7562_v43 = vld [vmem:[%s9797_s1 + $0x1148] ss:$16 sps:$4 sm:$0xff]  }
 0x1e1   : > { %v2228_v53 = vpop.f32.mrb[16].mxu0  ;;  %v2279_v51 = vpop.f32.mrb[16].mxu1 }
 0x1e2   : > { %v9339_v38 = vadd.f32 %v2228_v53, %v9110_v31  ;;  %v9342_v15 = vadd.f32 %v2279_v51, %v9113_v32  ;;  %v2230_v49 = vpop.f32.mrb[17].mxu0  ;;  %v2281_v56 = vpop.f32.mrb[17].mxu1  ;;  %v7452_v31 = vld [vmem:[%s9797_s1 + $0xf08] ss:$16 sps:$4 sm:$0xff]   ;;  %v7505_v51 = vld [vmem:[%s9797_s1 + $0x1020] ss:$16 sps:$4 sm:$0xff]  }
 0x1e3   : > { %v9345_v46 = vadd.f32 %v2230_v49, %v9116_v35  ;;  %v9348_v16 = vadd.f32 %v2281_v56, %v9119_v37  ;;  %4324 = vmatpush1.bf16.msra.mxu0 %v7443_v52  ;;  %4375 = vmatpush1.bf16.msra.mxu1 %v7446_v6  ;;  %v2232_v32 = vpop.f32.mrb[18].mxu0  ;;  %v2283_v54 = vpop.f32.mrb[18].mxu1  ;;  %v7457_v35 = vld [vmem:[%s9797_s1 + $0xf24] ss:$16 sps:$4 sm:$0xff]   ;;  %v7460_v37 = vld [vmem:[%s9797_s1 + $0xf2c] ss:$16 sps:$4 sm:$0xff]  }
 0x1e4   : > { %4325 = vmatprep.subr.bf16.mxu0 %v7451_v8  ;;  %4376 = vmatprep.subr.bf16.mxu1 %v7454_v9  ;;  %v2233_v61 = vpop.f32.mrb[19].mxu0  ;;  %v2284_v19 = vpop.f32.mrb[19].mxu1  ;;  %v7502_v52 = vld [vmem:[%s9797_s1 + $0x1008] ss:$16 sps:$4 sm:$0xff]   ;;  %v7507_v8 = vld [vmem:[%s9797_s1 + $0x1024] ss:$16 sps:$4 sm:$0xff]  }
 0x1e5   : > { %v9462_v6 = vld [vmem:[%s7823_s17 + $0x8] sm:$0x88]  ;;  %v7513_v56 = vld [vmem:[%s9797_s1 + $0x1044] ss:$16 sps:$4 sm:$0xff]   ;;  %v7511_v32 = vld [vmem:[%s9797_s1 + $0x1040] ss:$16 sps:$4 sm:$0xff]  }
 0x1e6   : > { %v7510_v9 = vld [vmem:[%s9797_s1 + $0x102c] ss:$16 sps:$4 sm:$0xff]   ;;  %v6477_v53 = vcombine.high %v9462_v6, %v8988_v36  ;;  %v7508_v49 = vld [vmem:[%s9797_s1 + $0x1028] ss:$16 sps:$4 sm:$0xff]   ;;  %v7525_v19 = vld [vmem:[%s9797_s1 + $0x1084] ss:$16 sps:$4 sm:$0xff]  }
 0x1e7   : > { %4326 = vmatpush1.bf16.msra.mxu0 %v7449_v18  ;;  %4377 = vmatpush1.bf16.msra.mxu1 %v7452_v31  ;;  %v7516_v36 = vld [vmem:[%s9797_s1 + $0x104c] ss:$16 sps:$4 sm:$0xff]   ;;  %v9487_v31 = vrot.slane %v9216_v44, 3  ;;  %v7514_v54 = vld [vmem:[%s9797_s1 + $0x1048] ss:$16 sps:$4 sm:$0xff]  }
 0x1e8   : > { %4327 = vmatprep.subr.bf16.mxu0 %v7457_v35  ;;  %4378 = vmatprep.subr.bf16.mxu1 %v7460_v37  ;;  %v4497_v18 = vrot.slane %v6477_v53, 3  ;;  %v7522_v44 = vld [vmem:[%s9797_s1 + $0x106c] ss:$16 sps:$4 sm:$0xff]   ;;  %v7517_v37 = vld [vmem:[%s9797_s1 + $0x1060] ss:$16 sps:$4 sm:$0xff]  }
 0x1e9   : > { %v7520_v61 = vld [vmem:[%s9797_s1 + $0x1068] ss:$16 sps:$4 sm:$0xff]   ;;  %v7579_v53 = vld [vmem:[%s9797_s1 + $0x11a4] ss:$16 sps:$4 sm:$0xff]  }
 0x1ea   : > { %v4499_v35 = vsel %vm1853_vm2, %v4497_v18, %v9487_v31  ;;  %v7588_v18 = vld [vmem:[%s9797_s1 + $0x11cc] ss:$16 sps:$4 sm:$0xff]  }
 0x1eb   : > { %4328 = vmatpush1.bf16.msra.mxu0 %v7455_v20  ;;  %4379 = vmatpush1.bf16.msra.mxu1 %v7458_v21  ;;  %v7528_v20 = vld [vmem:[%s9797_s1 + $0x108c] ss:$16 sps:$4 sm:$0xff]   ;;  %v7523_v21 = vld [vmem:[%s9797_s1 + $0x1080] ss:$16 sps:$4 sm:$0xff]  }
 0x1ec   : > { %4329 = vmatprep.subr.bf16.mxu0 %v7463_v22  ;;  %4380 = vmatprep.subr.bf16.mxu1 %v7466_v23  ;;  %v7526_v22 = vld [vmem:[%s9797_s1 + $0x1088] ss:$16 sps:$4 sm:$0xff]   ;;  %v7531_v23 = vld [vmem:[%s9797_s1 + $0x10a4] ss:$16 sps:$4 sm:$0xff]  }
 0x1ef   : > { %4330 = vmatpush1.bf16.msra.mxu0 %v7461_v24  ;;  %4381 = vmatpush1.bf16.msra.mxu1 %v7464_v25  ;;  %v7534_v24 = vld [vmem:[%s9797_s1 + $0x10ac] ss:$16 sps:$4 sm:$0xff]   ;;  %v7529_v25 = vld [vmem:[%s9797_s1 + $0x10a0] ss:$16 sps:$4 sm:$0xff]  }
 0x1f0   : > { %4331 = vmatprep.subr.bf16.mxu0 %v7469_v7  ;;  %4382 = vmatprep.subr.bf16.mxu1 %v7472_v26  ;;  %v7532_v7 = vld [vmem:[%s9797_s1 + $0x10a8] ss:$16 sps:$4 sm:$0xff]   ;;  %v7537_v26 = vld [vmem:[%s9797_s1 + $0x10c4] ss:$16 sps:$4 sm:$0xff]  }
 0x1f3   : > { %4332 = vmatpush1.bf16.msra.mxu0 %v7467_v27  ;;  %4383 = vmatpush1.bf16.msra.mxu1 %v7470_v28  ;;  %v7540_v27 = vld [vmem:[%s9797_s1 + $0x10cc] ss:$16 sps:$4 sm:$0xff]   ;;  %v7535_v28 = vld [vmem:[%s9797_s1 + $0x10c0] ss:$16 sps:$4 sm:$0xff]  }
 0x1f4   : > { %4333 = vmatprep.subr.bf16.mxu0 %v7475_v29  ;;  %4384 = vmatprep.subr.bf16.mxu1 %v7478_v30  ;;  %v7538_v29 = vld [vmem:[%s9797_s1 + $0x10c8] ss:$16 sps:$4 sm:$0xff]   ;;  %v7543_v30 = vld [vmem:[%s9797_s1 + $0x10e4] ss:$16 sps:$4 sm:$0xff]  }
 0x1f7   : > { %4334 = vmatpush1.bf16.msra.mxu0 %v7473_v33  ;;  %4385 = vmatpush1.bf16.msra.mxu1 %v7476_v34  ;;  %v7546_v33 = vld [vmem:[%s9797_s1 + $0x10ec] ss:$16 sps:$4 sm:$0xff]   ;;  %v7541_v34 = vld [vmem:[%s9797_s1 + $0x10e0] ss:$16 sps:$4 sm:$0xff]  }
 0x1f8   : > { %4335 = vmatprep.subr.bf16.mxu0 %v7481_v10  ;;  %4386 = vmatprep.subr.bf16.mxu1 %v7484_v11  ;;  %v7544_v10 = vld [vmem:[%s9797_s1 + $0x10e8] ss:$16 sps:$4 sm:$0xff]   ;;  %v7549_v11 = vld [vmem:[%s9797_s1 + $0x1104] ss:$16 sps:$4 sm:$0xff]  }
 0x1fb   : > { %4336 = vmatpush1.bf16.msra.mxu0 %v7479_v12  ;;  %4387 = vmatpush1.bf16.msra.mxu1 %v7482_v60  ;;  %v7552_v12 = vld [vmem:[%s9797_s1 + $0x110c] ss:$16 sps:$4 sm:$0xff]  }
 0x1fc   : > { %4337 = vmatprep.subr.bf16.mxu0 %v7487_v42  ;;  %4388 = vmatprep.subr.bf16.mxu1 %v7490_v17 }
 0x1ff   : > { %4338 = vmatpush1.bf16.msra.mxu0 %v7485_v47  ;;  %4389 = vmatpush1.bf16.msra.mxu1 %v7488_v14  ;;  %v7547_v14 = vld [vmem:[%s9797_s1 + $0x1100] ss:$16 sps:$4 sm:$0xff]  }
 0x200   : > { %4339 = vmatprep.subr.bf16.mxu0 %v7493_v58  ;;  %4390 = vmatprep.subr.bf16.mxu1 %v7496_v59  ;;  %v7556_v58 = vld [vmem:[%s9797_s1 + $0x1128] ss:$16 sps:$4 sm:$0xff]   ;;  %v7561_v59 = vld [vmem:[%s9797_s1 + $0x1144] ss:$16 sps:$4 sm:$0xff]  }
 0x203   : > { %4340 = vmatpush1.bf16.msra.mxu0 %v7491_v45  ;;  %4391 = vmatpush1.bf16.msra.mxu1 %v7494_v62  ;;  %v7564_v45 = vld [vmem:[%s9797_s1 + $0x114c] ss:$16 sps:$4 sm:$0xff]   ;;  %v7559_v62 = vld [vmem:[%s9797_s1 + $0x1140] ss:$16 sps:$4 sm:$0xff]  }
 0x204   : > { %4824 = vmatprep.subr.bf16.mxu0 %v7501_v1  ;;  %4875 = vmatprep.subr.bf16.mxu1 %v7504_v2  ;;  %v7570_v1 = vld [vmem:[%s9797_s1 + $0x116c] ss:$16 sps:$4 sm:$0xff]   ;;  %v7565_v2 = vld [vmem:[%s9797_s1 + $0x1160] ss:$16 sps:$4 sm:$0xff]  }
 0x206   : > { %4342 = vmatmul.mubr.bf16.vlgmr.msra.gmra.mrb[0].mxu0 %v3967_v3  ;;  %4393 = vmatmul.mubr.bf16.vlgmr.msra.gmra.mrb[0].mxu1 %v3967_v3  ;;  %v7568_v3 = vld [vmem:[%s9797_s1 + $0x1168] ss:$16 sps:$4 sm:$0xff]  }
 0x207   : > { %4825 = vmatpush1.bf16.msra.mxu0 %v7499_v4  ;;  %4876 = vmatpush1.bf16.msra.mxu1 %v7502_v52  ;;  %v7573_v4 = vld [vmem:[%s9797_s1 + $0x1184] ss:$16 sps:$4 sm:$0xff]   ;;  %v7576_v52 = vld [vmem:[%s9797_s1 + $0x118c] ss:$16 sps:$4 sm:$0xff]  }
 0x208   : > { %4826 = vmatprep.subr.bf16.mxu0 %v7507_v8  ;;  %4877 = vmatprep.subr.bf16.mxu1 %v7510_v9  ;;  %v7571_v8 = vld [vmem:[%s9797_s1 + $0x1180] ss:$16 sps:$4 sm:$0xff]   ;;  %v7574_v9 = vld [vmem:[%s9797_s1 + $0x1188] ss:$16 sps:$4 sm:$0xff]  }
 0x209   : > { %4351 = vmatprep.mubr.bf16.mxu0 %v9262_v40  ;;  %4402 = vmatprep.mubr.bf16.mxu1 %v9262_v40  ;;  %v7519_v40 = vld [vmem:[%s9797_s1 + $0x1064] ss:$16 sps:$4 sm:$0xff]  }
 0x20b   : > { %4827 = vmatpush1.bf16.msra.mxu0 %v7505_v51  ;;  %4878 = vmatpush1.bf16.msra.mxu1 %v7508_v49  ;;  %v7582_v51 = vld [vmem:[%s9797_s1 + $0x11ac] ss:$16 sps:$4 sm:$0xff]   ;;  %v7577_v49 = vld [vmem:[%s9797_s1 + $0x11a0] ss:$16 sps:$4 sm:$0xff]  }
 0x20c   : > { %4828 = vmatprep.subr.bf16.mxu0 %v7513_v56  ;;  %4879 = vmatprep.subr.bf16.mxu1 %v7516_v36  ;;  %v7580_v56 = vld [vmem:[%s9797_s1 + $0x11a8] ss:$16 sps:$4 sm:$0xff]   ;;  %v7585_v36 = vld [vmem:[%s9797_s1 + $0x11c4] ss:$16 sps:$4 sm:$0xff]  }
 0x20e   : > { %4352 = vmatmul.mubr.bf16.gmra.mrb[32].mxu0 %v3966_v63  ;;  %4403 = vmatmul.mubr.bf16.gmra.mrb[32].mxu1 %v3966_v63  ;;  %v7567_v63 = vld [vmem:[%s9797_s1 + $0x1164] ss:$16 sps:$4 sm:$0xff]  }
 0x20f   : > { %4829 = vmatpush1.bf16.msra.mxu0 %v7511_v32  ;;  %4880 = vmatpush1.bf16.msra.mxu1 %v7514_v54  ;;  %v7583_v32 = vld [vmem:[%s9797_s1 + $0x11c0] ss:$16 sps:$4 sm:$0xff]   ;;  %v7586_v54 = vld [vmem:[%s9797_s1 + $0x11c8] ss:$16 sps:$4 sm:$0xff]  }
 0x210   : > { %4830 = vmatprep.subr.bf16.mxu0 %v7519_v40  ;;  %4881 = vmatprep.subr.bf16.mxu1 %v7522_v44  ;;  %v7634_v40 = vld [vmem:[%s7823_s17 + $0x10] sm:$0xff]  ;;  %s6698_s17 = smul.u32 24, %s9803_s19 }
 0x211   : > { %4856 = vmatprep.mubr.bf16.mxu0 %v4499_v35  ;;  %4907 = vmatprep.mubr.bf16.mxu1 %v4499_v35  ;;  %v6476_v44 = vcombine.low %v9462_v6, %v7634_v40  ;;  %v7591_v35 = vld [vmem:[%s9797_s1 + $0x11e4] ss:$16 sps:$4 sm:$0xff]   ;;  %v7592_v6 = vld [vmem:[%s9797_s1 + $0x11e8] ss:$16 sps:$4 sm:$0xff]  }
 0x212   : > { %s224_s29 = scalar_lea.vmem %s9801_s5, %s6698_s17 }
 0x213   : > { %4831 = vmatpush1.bf16.msra.mxu0 %v7517_v37  ;;  %4882 = vmatpush1.bf16.msra.mxu1 %v7520_v61  ;;  %v7594_v37 = vld [vmem:[%s9797_s1 + $0x11ec] ss:$16 sps:$4 sm:$0xff]   ;;  %v7589_v61 = vld [vmem:[%s9797_s1 + $0x11e0] ss:$16 sps:$4 sm:$0xff]  }
 0x214   : > { %4832 = vmatprep.subr.bf16.mxu0 %v7525_v19  ;;  %4883 = vmatprep.subr.bf16.mxu1 %v7528_v20  ;;  %v4494_v19 = vrot.slane %v6476_v44, 3  ;;  %v4495_v20 = vrot.slane %v9406_v39, 3 }
 0x217   : > { %4833 = vmatpush1.bf16.msra.mxu0 %v7523_v21  ;;  %4884 = vmatpush1.bf16.msra.mxu1 %v7526_v22  ;;  %v4496_v21 = vsel %vm1853_vm2, %v4494_v19, %v4495_v20 }
 0x218   : > { %4834 = vmatprep.subr.bf16.mxu0 %v7531_v23  ;;  %4885 = vmatprep.subr.bf16.mxu1 %v7534_v24 }
 0x21b   : > { %4835 = vmatpush1.bf16.msra.mxu0 %v7529_v25  ;;  %4886 = vmatpush1.bf16.msra.mxu1 %v7532_v7 }
 0x21c   : > { %4836 = vmatprep.subr.bf16.mxu0 %v7537_v26  ;;  %4887 = vmatprep.subr.bf16.mxu1 %v7540_v27 }
 0x21f   : > { %4837 = vmatpush1.bf16.msra.mxu0 %v7535_v28  ;;  %4888 = vmatpush1.bf16.msra.mxu1 %v7538_v29  ;;  %v7597_v29 = vld [vmem:[%s9799_s3 + $0x40] sm:$0xff]  }
 0x220   : > { %4838 = vmatprep.subr.bf16.mxu0 %v7543_v30  ;;  %4889 = vmatprep.subr.bf16.mxu1 %v7546_v33  ;;  %v7598_v30 = vld [vmem:[%s9799_s3 + $0xc0] sm:$0xff]  }
 0x221   : > { %v2772_v60 = vpop.f32.mrb[20].mxu0  ;;  %v2823_v0 = vpop.f32.mrb[20].mxu1  ;;  %v7599_v33 = vld [vmem:[%s9799_s3] sm:$0xff]  }
 0x222   : > { %v9564_v13 = vadd.f32 %v2772_v60, %v9339_v38  ;;  %v9567_v5 = vadd.f32 %v2823_v0, %v9342_v15  ;;  %v2774_v41 = vpop.f32.mrb[21].mxu0  ;;  %v2825_v42 = vpop.f32.mrb[21].mxu1  ;;  %v7550_v38 = vld [vmem:[%s9797_s1 + $0x1108] ss:$16 sps:$4 sm:$0xff]  }
 0x223   : > { %v9570_v17 = vadd.f32 %v2774_v41, %v9345_v46  ;;  %v9573_v47 = vadd.f32 %v2825_v42, %v9348_v16  ;;  %4839 = vmatpush1.bf16.msra.mxu0 %v7541_v34  ;;  %4890 = vmatpush1.bf16.msra.mxu1 %v7544_v10  ;;  %v2776_v15 = vpop.f32.mrb[22].mxu0  ;;  %v2827_v48 = vpop.f32.mrb[22].mxu1  ;;  %v7555_v46 = vld [vmem:[%s9797_s1 + $0x1124] ss:$16 sps:$4 sm:$0xff]   ;;  %v7558_v16 = vld [vmem:[%s9797_s1 + $0x112c] ss:$16 sps:$4 sm:$0xff]  }
 0x224   : > { %4840 = vmatprep.subr.bf16.mxu0 %v7549_v11  ;;  %4891 = vmatprep.subr.bf16.mxu1 %v7552_v12  ;;  %v2777_v55 = vpop.f32.mrb[23].mxu0  ;;  %v2828_v50 = vpop.f32.mrb[23].mxu1  ;;  %v7600_v11 = vld [vmem:[%s9799_s3 + $0x80] sm:$0xff]   ;;  %v7601_v12 = vld [vmem:[%s9799_s3 + $0x48] sm:$0xff]   ;;  %v7606_v41 = vld [vmem:[%s9799_s3 + $0xd0] sm:$0xff]  }
 0x225   : > { %v7602_v60 = vld [vmem:[%s9799_s3 + $0xc8] sm:$0xff]   ;;  %v7607_v42 = vld [vmem:[%s9799_s3 + $0x10] sm:$0xff]   ;;  %v7612_v15 = vld [vmem:[%s9799_s3 + $0x98] sm:$0xff]  }
 0x226   : > { %v7603_v0 = vld [vmem:[%s9799_s3 + $0x8] sm:$0xff]   ;;  %v7613_v48 = vld [vmem:[%s9799_s3 + $0x60] sm:$0xff]  }
 0x227   : > { %4841 = vmatpush1.bf16.msra.mxu0 %v7547_v14  ;;  %4892 = vmatpush1.bf16.msra.mxu1 %v7550_v38  ;;  %v7610_v14 = vld [vmem:[%s9799_s3 + $0xd8] sm:$0xff]   ;;  %v7616_v55 = vld [vmem:[%s9799_s3 + $0xa0] sm:$0xff]   ;;  %v7617_v50 = vld [vmem:[%s9799_s3 + $0x68] sm:$0xff]  }
 0x228   : > { %4842 = vmatprep.subr.bf16.mxu0 %v7555_v46  ;;  %4893 = vmatprep.subr.bf16.mxu1 %v7558_v16  ;;  %v7611_v38 = vld [vmem:[%s9799_s3 + $0x18] sm:$0xff]   ;;  %v7614_v46 = vld [vmem:[%s9799_s3 + $0xe0] sm:$0xff]  }
 0x229   : > { %v7615_v16 = vld [vmem:[%s9799_s3 + $0x20] sm:$0xff]  }
 0x22b   : > { %4843 = vmatpush1.bf16.msra.mxu0 %v7553_v57  ;;  %4894 = vmatpush1.bf16.msra.mxu1 %v7556_v58  ;;  %v7618_v57 = vld [vmem:[%s9799_s3 + $0xe8] sm:$0xff]  }
 0x22c   : > { %4844 = vmatprep.subr.bf16.mxu0 %v7561_v59  ;;  %4895 = vmatprep.subr.bf16.mxu1 %v7564_v45  ;;  %v7619_v58 = vld [vmem:[%s9799_s3 + $0x28] sm:$0xff]   ;;  %v7621_v45 = vld [vmem:[%s9799_s3 + $0x70] sm:$0xff]  }
 0x22d   : > { %v7620_v59 = vld [vmem:[%s9799_s3 + $0xa8] sm:$0xff]  }
 0x22f   : > { %4845 = vmatpush1.bf16.msra.mxu0 %v7559_v62  ;;  %4896 = vmatpush1.bf16.msra.mxu1 %v7562_v43  ;;  %v7622_v62 = vld [vmem:[%s9799_s3 + $0xf0] sm:$0xff]  }
 0x230   : > { %4846 = vmatprep.subr.bf16.mxu0 %v7567_v63  ;;  %4897 = vmatprep.subr.bf16.mxu1 %v7570_v1  ;;  %v7623_v43 = vld [vmem:[%s9799_s3 + $0x30] sm:$0xff]   ;;  %v7625_v1 = vld [vmem:[%s9799_s3 + $0x78] sm:$0xff]  }
 0x231   : > { %v7624_v63 = vld [vmem:[%s9799_s3 + $0xb0] sm:$0xff]  }
 0x233   : > { %4847 = vmatpush1.bf16.msra.mxu0 %v7565_v2  ;;  %4898 = vmatpush1.bf16.msra.mxu1 %v7568_v3  ;;  %v7626_v2 = vld [vmem:[%s9799_s3 + $0xf8] sm:$0xff]  }
 0x234   : > { %4848 = vmatprep.subr.bf16.mxu0 %v7573_v4  ;;  %4899 = vmatprep.subr.bf16.mxu1 %v7576_v52  ;;  %v7627_v52 = vld [vmem:[%s9799_s3 + $0x38] sm:$0xff]  }
 0x237   : > { %4849 = vmatpush1.bf16.msra.mxu0 %v7571_v8  ;;  %4900 = vmatpush1.bf16.msra.mxu1 %v7574_v9  ;;  %v7628_v8 = vld [vmem:[%s9799_s3 + $0xb8] sm:$0xff]  }
 0x238   : > { %4850 = vmatprep.subr.bf16.mxu0 %v7579_v53  ;;  %4901 = vmatprep.subr.bf16.mxu1 %v7582_v51 }
 0x23b   : > { %4851 = vmatpush1.bf16.msra.mxu0 %v7577_v49  ;;  %4902 = vmatpush1.bf16.msra.mxu1 %v7580_v56 }
 0x23c   : > { %4852 = vmatprep.subr.bf16.mxu0 %v7585_v36  ;;  %4903 = vmatprep.subr.bf16.mxu1 %v7588_v18 }
 0x23f   : > { %4853 = vmatpush1.bf16.msra.mxu0 %v7583_v32  ;;  %4904 = vmatpush1.bf16.msra.mxu1 %v7586_v54 }
 0x240   : > { %4854 = vmatprep.subr.bf16.mxu0 %v7591_v35  ;;  %4905 = vmatprep.subr.bf16.mxu1 %v7594_v37 }
 0x243   : > { %4855 = vmatpush1.bf16.msra.mxu0 %v7589_v61  ;;  %4906 = vmatpush1.bf16.msra.mxu1 %v7592_v6 }
 0x244   : > { %6577 = vmatprep.subr.bf16.mxu0 %v7597_v29  ;;  %6605 = vmatprep.subr.bf16.mxu1 %v7598_v30 }
 0x246   : > { %4857 = vmatmul.mubr.bf16.vlgmr.msra.gmra.mrb[0].mxu0 %v4496_v21  ;;  %4908 = vmatmul.mubr.bf16.vlgmr.msra.gmra.mrb[0].mxu1 %v4496_v21 }
 0x247   : > { %4866 = vmatprep.mubr.bf16.mxu0 %v9487_v31  ;;  %4917 = vmatprep.mubr.bf16.mxu1 %v9487_v31 }
 0x248   : > { %6578 = vmatpush3.bf16.msra.mxu0 %v7599_v33  ;;  %6606 = vmatpush3.bf16.msra.mxu1 %v7600_v11 }
 0x249   : > { %6579 = vmatprep.subr.bf16.mxu0 %v7601_v12  ;;  %6607 = vmatprep.subr.bf16.mxu1 %v7602_v60 }
 0x24c   : > { %6580 = vmatpush3.bf16.msra.mxu0 %v7603_v0 }
 0x24e   : > { %4867 = vmatmul.mubr.bf16.gmra.mrb[36].mxu0 %v4495_v20  ;;  %4918 = vmatmul.mubr.bf16.gmra.mrb[36].mxu1 %v4495_v20 }
 0x261   : > { %v3279_v22 = vpop.f32.mrb[24].mxu0  ;;  %v3330_v23 = vpop.f32.mrb[24].mxu1 }
 0x262   : > { %v9672_v24 = vadd.f32 %v3279_v22, %v9564_v13  ;;  %v9675_v39 = vadd.f32 %v3330_v23, %v9567_v5  ;;  %v3281_v25 = vpop.f32.mrb[25].mxu0  ;;  %v3332_v7 = vpop.f32.mrb[25].mxu1  ;;  %v7604_v13 = vld [vmem:[%s9799_s3 + $0x88] sm:$0xff]   ;;  %v7605_v5 = vld [vmem:[%s9799_s3 + $0x50] sm:$0xff]  }
 0x263   : > { %v9678_v26 = vadd.f32 %v3281_v25, %v9570_v17  ;;  %v9681_v27 = vadd.f32 %v3332_v7, %v9573_v47  ;;  %v3283_v28 = vpop.f32.mrb[26].mxu0  ;;  %v3334_v31 = vpop.f32.mrb[26].mxu1  ;;  %6608 = vmatpush3.bf16.msra.mxu1 %v7604_v13  ;;  %v7608_v17 = vld [vmem:[%s9799_s3 + $0x90] sm:$0xff]   ;;  %6581 = vmatprep.subr.bf16.mxu0 %v7605_v5  ;;  %v7609_v47 = vld [vmem:[%s9799_s3 + $0x58] sm:$0xff]   ;;  %v4940_v25 = vlaneseq }
 0x264   : > { %v3284_v34 = vpop.f32.mrb[27].mxu0  ;;  %v3335_v10 = vpop.f32.mrb[27].mxu1  ;;  %6609 = vmatprep.subr.bf16.mxu1 %v7606_v41  ;;  %6582 = vmatpush3.bf16.msra.mxu0 %v7607_v42  ;;  %v4938_v28 = vld [vmem:[%s9798_s2] sm:$0xf] }
 0x265   : > { %6583 = vmatprep.subr.bf16.mxu0 %v7609_v47  ;;  %v4941_v7 = vshrl.u32 %v4940_v25, 7 }
 0x267   : > { %6610 = vmatpush3.bf16.msra.mxu1 %v7608_v17  ;;  %v4946_v31 = vsub.s32 1, %v4941_v7  ;;  %v4954_v29 = vsub.s32 3, %v4941_v7 }
 0x268   : > { %6611 = vmatprep.subr.bf16.mxu1 %v7610_v14  ;;  %6584 = vmatpush3.bf16.msra.mxu0 %v7611_v38 }
 0x269   : > { %6585 = vmatprep.subr.bf16.mxu0 %v7613_v48  ;;  %v4947_v34 = vrot.slane %v4938_v28, %v4946_v31  ;;  %v4955_v10 = vrot.slane %v4938_v28, %v4954_v29 }
 0x26b   : > { %6612 = vmatpush3.bf16.msra.mxu1 %v7612_v15 }
 0x26c   : > { %6613 = vmatprep.subr.bf16.mxu1 %v7614_v46  ;;  %6586 = vmatpush3.bf16.msra.mxu0 %v7615_v16 }
 0x26d   : > { %6587 = vmatprep.subr.bf16.mxu0 %v7617_v50 }
 0x26f   : > { %6614 = vmatpush3.bf16.msra.mxu1 %v7616_v55 }
 0x270   : > { %6615 = vmatprep.subr.bf16.mxu1 %v7618_v57  ;;  %6588 = vmatpush3.bf16.msra.mxu0 %v7619_v58 }
 0x271   : > { %6589 = vmatprep.subr.bf16.mxu0 %v7621_v45 }
 0x273   : > { %6616 = vmatpush3.bf16.msra.mxu1 %v7620_v59 }
 0x274   : > { %6617 = vmatprep.subr.bf16.mxu1 %v7622_v62  ;;  %6590 = vmatpush3.bf16.msra.mxu0 %v7623_v43 }
 0x275   : > { %6591 = vmatprep.subr.bf16.mxu0 %v7625_v1 }
 0x277   : > { %6618 = vmatpush3.bf16.msra.mxu1 %v7624_v63 }
 0x278   : > { %6619 = vmatprep.subr.bf16.mxu1 %v7626_v2  ;;  %6592 = vmatpush3.bf16.msra.mxu0 %v7627_v52 }
 0x27b   : > { %6620 = vmatpush3.bf16.msra.mxu1 %v7628_v8 }
 0x2a1   : > { %v3809_v3 = vpop.f32.mrb[28].mxu0  ;;  %v3860_v4 = vpop.f32.mrb[28].mxu1 }
 0x2a2   : > { %v3875_v9 = vadd.f32 %v3809_v3, %v9672_v24  ;;  %v3877_v53 = vadd.f32 %v3860_v4, %v9675_v39  ;;  %v3811_v51 = vpop.f32.mrb[29].mxu0  ;;  %v3862_v49 = vpop.f32.mrb[29].mxu1 }
 0x2a3   : > { %v3876_v56 = vadd.f32 %v3811_v51, %v9678_v26  ;;  %v3878_v36 = vadd.f32 %v3862_v49, %v9681_v27  ;;  %v3813_v18 = vpop.f32.mrb[30].mxu0  ;;  %v3864_v32 = vpop.f32.mrb[30].mxu1  ;;  %v4942_v26 = vsub.s32 0, %v4941_v7  ;;  %v4950_v27 = vsub.s32 2, %v4941_v7 }
 0x2a4   : > { %v3814_v54 = vpop.f32.mrb[31].mxu0  ;;  %v3865_v40 = vpop.f32.mrb[31].mxu1 }
 0x2a5   : > { %v4943_v30 = vrot.slane %v4938_v28, %v4942_v26  ;;  %v4951_v33 = vrot.slane %v4938_v28, %v4950_v27 }
 0x2e1   : > { %v4353_v44 = vpop.f32.mrb[32].mxu0  ;;  %v4404_v35 = vpop.f32.mrb[32].mxu1 }
 0x2e2   : > { %v4419_v37 = vadd.f32 %v4353_v44, %v3875_v9  ;;  %v4421_v61 = vadd.f32 %v4404_v35, %v3877_v53  ;;  %v4355_v6 = vpop.f32.mrb[33].mxu0  ;;  %v4406_v19 = vpop.f32.mrb[33].mxu1 }
 0x2e3   : > { %v4420_v20 = vadd.f32 %v4355_v6, %v3876_v56  ;;  %v4422_v21 = vadd.f32 %v4406_v19, %v3878_v36  ;;  %v4357_v22 = vpop.f32.mrb[34].mxu0  ;;  %v4408_v23 = vpop.f32.mrb[34].mxu1 }
 0x2e4   : > { %v4358_v24 = vpop.f32.mrb[35].mxu0  ;;  %v4409_v39 = vpop.f32.mrb[35].mxu1 }
 0x319   : > { %v4858_v11 = vpop.f32.mrb[0].mxu0  ;;  %v4909_v12 = vpop.f32.mrb[0].mxu1 }
 0x31a   : > { %v4960_v60 = vadd.f32 %v4943_v30, %v4858_v11  ;;  %v4962_v0 = vadd.f32 %v4951_v33, %v4909_v12  ;;  %v4860_v13 = vpop.f32.mrb[1].mxu0  ;;  %v4911_v5 = vpop.f32.mrb[1].mxu1 }
 0x31b   : > { %v4961_v41 = vadd.f32 %v4947_v34, %v4860_v13  ;;  %v4963_v42 = vadd.f32 %v4955_v10, %v4911_v5  ;;  %v4862_v17 = vpop.f32.mrb[2].mxu0  ;;  %v4913_v47 = vpop.f32.mrb[2].mxu1 }
 0x31c   : > { %v4972_v14 = vmul.f32 0.1, %v4960_v60  ;;  %v4974_v38 = vmul.f32 0.1, %v4962_v0  ;;  %v4964_v15 = vadd.f32 %v4943_v30, %v4862_v17  ;;  %v4966_v48 = vadd.f32 %v4951_v33, %v4913_v47  ;;  %v4864_v46 = vpop.f32.mrb[3].mxu0  ;;  %v4915_v16 = vpop.f32.mrb[3].mxu1 }
 0x31d   : > { %v4973_v55 = vmul.f32 0.1, %v4961_v41  ;;  %v4975_v50 = vmul.f32 0.1, %v4963_v42  ;;  %v4965_v57 = vadd.f32 %v4947_v34, %v4864_v46  ;;  %v4967_v58 = vadd.f32 %v4955_v10, %v4915_v16 }
 0x31e   : > { %v4976_v59 = vmul.f32 0.1, %v4964_v15  ;;  %v4978_v45 = vmul.f32 0.1, %v4966_v48  ;;  %v4984_v63 = vmax.f32 %v4960_v60, %v4972_v14  ;;  %v4986_v1 = vmax.f32 %v4962_v0, %v4974_v38  ;;  %v6542_v60 = vld [vmem:[%s9800_s4] ss:$0 sm:$0xff] }
 0x31f   : > { %v4977_v62 = vmul.f32 0.1, %v4965_v57  ;;  %v4979_v43 = vmul.f32 0.1, %v4967_v58  ;;  %v4985_v4 = vmax.f32 %v4961_v41, %v4973_v55  ;;  %v4987_v52 = vmax.f32 %v4963_v42, %v4975_v50 }
 0x320   : > { %v4988_v2 = vmax.f32 %v4964_v15, %v4976_v59  ;;  %v4990_v3 = vmax.f32 %v4966_v48, %v4978_v45 }
 0x321   : > { %v4989_v8 = vmax.f32 %v4965_v57, %v4977_v62  ;;  %v4991_v9 = vmax.f32 %v4967_v58, %v4979_v43  ;;  %v4868_v53 = vpop.f32.mrb[36].mxu0  ;;  %v4919_v51 = vpop.f32.mrb[36].mxu1 }
 0x322   : > { %v4996_v49 = vpack.c.bf16 %v4988_v2, %v4984_v63  ;;  %v4998_v56 = vpack.c.bf16 %v4990_v3, %v4986_v1  ;;  %v4934_v36 = vadd.f32 %v4868_v53, %v4419_v37  ;;  %v4936_v18 = vadd.f32 %v4919_v51, %v4421_v61  ;;  %v4870_v32 = vpop.f32.mrb[37].mxu0  ;;  %v4921_v54 = vpop.f32.mrb[37].mxu1 }
 0x323   : > { %v4935_v40 = vadd.f32 %v4870_v32, %v4420_v20  ;;  %v4937_v44 = vadd.f32 %v4921_v54, %v4422_v21  ;;  %v4872_v35 = vpop.f32.mrb[38].mxu0  ;;  %v4923_v6 = vpop.f32.mrb[38].mxu1  ;;  %v4997_v19 = vpack.c.bf16 %v4989_v8, %v4985_v4  ;;  %v4999_v22 = vpack.c.bf16 %v4991_v9, %v4987_v52 }
 0x324   : > { %v4968_v23 = vadd.f32 %v4943_v30, %v4934_v36  ;;  %v4970_v24 = vadd.f32 %v4951_v33, %v4936_v18  ;;  %v4873_v39 = vpop.f32.mrb[39].mxu0  ;;  %v4924_v25 = vpop.f32.mrb[39].mxu1 }
 0x325   : > { %v4969_v7 = vadd.f32 %v4947_v34, %v4935_v40  ;;  %v4971_v26 = vadd.f32 %v4955_v10, %v4937_v44  ;;  %5299 = vmatprep.mubr.bf16.mxu0 %v4997_v19  ;;  %5347 = vmatprep.mubr.bf16.mxu1 %v4999_v22 }
 0x326   : > { %v4980_v27 = vmul.f32 0.1, %v4968_v23  ;;  %v4982_v28 = vmul.f32 0.1, %v4970_v24  ;;  %5300 = vmatmul.mubr.bf16.vlgmr.msra.gmra.mrb[40].mxu0 %v4996_v49  ;;  %5348 = vmatmul.mubr.bf16.vlgmr.msra.gmra.mrb[40].mxu1 %v4998_v56 }
 0x327   : > { %v4981_v37 = vmul.f32 0.1, %v4969_v7  ;;  %v4983_v61 = vmul.f32 0.1, %v4971_v26 }
 0x328   : > { %v4992_v20 = vmax.f32 %v4968_v23, %v4980_v27  ;;  %v4994_v21 = vmax.f32 %v4970_v24, %v4982_v28 }
 0x329   : > { %v4993_v31 = vmax.f32 %v4969_v7, %v4981_v37  ;;  %v4995_v29 = vmax.f32 %v4971_v26, %v4983_v61 }
 0x32a   : > { %v5000_v33 = vpack.c.bf16 %v4992_v20, %v4992_v20  ;;  %v5002_v12 = vpack.c.bf16 %v4994_v21, %v4994_v21 }
 0x32b   : > { %v5001_v11 = vpack.c.bf16 %v4993_v31, %v4993_v31  ;;  %v5003_v30 = vpack.c.bf16 %v4995_v29, %v4995_v29 }
 0x32d   : > { %5307 = vmatprep.mubr.bf16.mxu0 %v5001_v11  ;;  %5355 = vmatprep.mubr.bf16.mxu1 %v5003_v30 }
 0x32e   : > { %5308 = vmatmul.mubr.bf16.gmra.mrb[44].mxu0 %v5000_v33  ;;  %5356 = vmatmul.mubr.bf16.gmra.mrb[44].mxu1 %v5002_v12 }
 0x3f9   : > { %v6593_v34 = vpop.f32.mrb[40].mxu0  ;;  %v6621_v10 = vpop.f32.mrb[40].mxu1 }
 0x3fa   : > { %v6594_v0 = vpop.f32.mrb[41].mxu0  ;;  %v6622_v13 = vpop.f32.mrb[41].mxu1 }
 0x3fb   : > { %v6595_v5 = vadd.f32 %v6594_v0, %v6593_v34  ;;  %v6623_v41 = vadd.f32 %v6622_v13, %v6621_v10  ;;  %v6596_v42 = vpop.f32.mrb[42].mxu0  ;;  %v6624_v17 = vpop.f32.mrb[42].mxu1 }
 0x3fc   : > { %v6597_v47 = vpop.f32.mrb[43].mxu0  ;;  %v6625_v14 = vpop.f32.mrb[43].mxu1 }
 0x3fd   : > { %v5302_v38 = vadd.f32 %v6595_v5, %v6542_v60  ;;  %v6598_v15 = vadd.f32 %v6597_v47, %v6596_v42  ;;  %v6626_v48 = vadd.f32 %v6625_v14, %v6624_v17 }
 0x3ff   : > { %v5350_v46 = vadd.f32 %v6623_v41, %v5302_v38  ;;  %v5305_v16 = vadd.f32 %v6598_v15, %v6542_v60 }
 0x401   : > { %5363 = vst [vmem:[%s224_s29] sm:$0xff] %v5350_v46  ;;  %v5353_v55 = vadd.f32 %v6626_v48, %v5305_v16  ;;  %v6599_v50 = vpop.f32.mrb[44].mxu0  ;;  %v6627_v57 = vpop.f32.mrb[44].mxu1 }
 0x402   : > { %v6600_v58 = vpop.f32.mrb[45].mxu0  ;;  %v6628_v59 = vpop.f32.mrb[45].mxu1 }
 0x403   : > { %5364 = vst [vmem:[%s224_s29 + $0x8] sm:$0xff] %v5353_v55  ;;  %v6601_v45 = vadd.f32 %v6600_v58, %v6599_v50  ;;  %v6629_v62 = vadd.f32 %v6628_v59, %v6627_v57  ;;  %v6602_v43 = vpop.f32.mrb[46].mxu0  ;;  %v6630_v63 = vpop.f32.mrb[46].mxu1 }
 0x404   : > { %v6603_v1 = vpop.f32.mrb[47].mxu0  ;;  %v6631_v2 = vpop.f32.mrb[47].mxu1 }
 0x405   : > { %v5310_v3 = vadd.f32 %v6601_v45, %v6542_v60 }
 0x407   : > { %v5358_v4 = vadd.f32 %v6629_v62, %v5310_v3 }
 0x409   : > { %5365 = vst [vmem:[%s224_s29 + $0x10] sm:$0xff] %v5358_v4 }
 0x40a PF: > { %s15_s18 = sadd.s32 1, %s7641_s18  }
 0x40b   : > { %p12_p4 = scmp.ge.s32.totalorder %s15_s18, 4  }
 0x40d   :  { %14 = sbr.rel (!%p12_p4) target bundleno = 1 (0x1), region = 78 }

// kernel: yolo_body_forward.5
= control target key start
LH: loop header
LB: loop body
LE: loop exit
PB: predicated region body
PF: predicated region fallthrough
CT: control target
= control target key end

     0   :  { %s8354_s24 = smov 0   ;;  %s10543_s0 = inlined_call_operand.vmem [shape: bf16[2,110,128], index: 0, kind: input, shape index: {}]   ;;  %s10544_s1 = inlined_call_operand.vmem [shape: bf16[2,110,256], index: 1, kind: input, shape index: {}]   ;;  %s10545_s2 = inlined_call_operand.vmem [shape: bf16[9,128,256], index: 2, kind: input, shape index: {}]   ;;  %s10546_s3 = inlined_call_operand.vmem [shape: bf16[9,256,256], index: 3, kind: input, shape index: {}]   ;;  %s10547_s4 = inlined_call_operand.vmem [shape: f32[1,256], index: 4, kind: input, shape index: {}]   ;;  %s10548_s5 = inlined_call_operand.vmem [shape: bf16[256,128], index: 5, kind: input, shape index: {}]   ;;  %s10549_s6 = inlined_call_operand.vmem [shape: f32[1,128], index: 6, kind: input, shape index: {}]   ;;  %s10550_s7 = inlined_call_operand.vmem [shape: f32[2,80,128], index: 7, kind: output, shape index: {}]  }
   0x1 LB: > { %s6230_s25 = sadd.s32 4294967295, %s8311_s24   ;;  %p6234_p0 = scmp.ge.s32.totalorder %s8311_s24, 1  ;;  %s8311_s24 = sphi %s8354_s24, %s17_s24  }
   0x2   : > { %p247_p1 = scmp.lt.s32.totalorder %s8311_s24, 3 }
   0x4   : > { %p248_p2 = pnand %p6234_p0, %p247_p1 }
   0x5   : > { %v7550_v0 = vld [vmem:[%s10545_s2 + $0x84] ss:$8 sps:$4 sm:$0xff] (!%p248_p2)   ;;  %v8313_v2 = vmov (!%p248_p2), 0   ;;  %v7554_v3 = vld [vmem:[%s10545_s2 + $0x80] ss:$8 sps:$4 sm:$0xff] (!%p248_p2)   ;;  %p284_p3 = scmp.lt.s32.totalorder (!%p248_p2), %s6230_s25, 1 }
   0x6   : > { %251 = sbr.rel (%p248_p2) target bundleno = 964 (0x3c4), region = 48  ;;  %v7552_v1 = vld [vmem:[%s10546_s3 + $0x4] ss:$8 sps:$4 sm:$0xff] (!%p248_p2)   ;;  %534 = vmatprep.mubr.bf16.mxu0 (!%p248_p2), %v8313_v2  ;;  %502 = vmatprep.subr.bf16.mxu0 (!%p248_p2), %v7550_v0  ;;  %v7555_v4 = vld [vmem:[%s10546_s3] ss:$8 sps:$4 sm:$0xff] (!%p248_p2)   ;;  %vm774_vm1 = vcmask (!%p248_p2), 1046528  }
   0x7   : > { %2704 = vmatprep.subr.bf16.mxu1 (!%p248_p2), %v7552_v1  ;;  %v7556_v5 = vld [vmem:[%s10545_s2 + $0x94] ss:$8 sps:$4 sm:$0xff] (!%p248_p2)   ;;  %503 = vmatpush1.bf16.msra.mxu0 (!%p248_p2), %v7554_v3  ;;  %v7560_v7 = vld [vmem:[%s10545_s2 + $0x90] ss:$8 sps:$4 sm:$0xff] (!%p248_p2)   ;;  %v7562_v9 = vld [vmem:[%s10545_s2 + $0xa4] ss:$8 sps:$4 sm:$0xff] (!%p248_p2)  }
   0x8   : > { %2705 = vmatpush1.bf16.msra.mxu1 (!%p248_p2), %v7555_v4  ;;  %v7558_v6 = vld [vmem:[%s10546_s3 + $0x14] ss:$8 sps:$4 sm:$0xff] (!%p248_p2)   ;;  %504 = vmatprep.subr.bf16.mxu0 (!%p248_p2), %v7556_v5  ;;  %v7561_v8 = vld [vmem:[%s10546_s3 + $0x10] ss:$8 sps:$4 sm:$0xff] (!%p248_p2)   ;;  %v7564_v10 = vld [vmem:[%s10546_s3 + $0x24] ss:$8 sps:$4 sm:$0xff] (!%p248_p2)  }
   0x9   : > { %2706 = vmatprep.subr.bf16.mxu1 (!%p248_p2), %v7558_v6  ;;  %v7566_v11 = vld [vmem:[%s10545_s2 + $0xa0] ss:$8 sps:$4 sm:$0xff] (!%p248_p2)   ;;  %v7568_v13 = vld [vmem:[%s10545_s2 + $0xb4] ss:$8 sps:$4 sm:$0xff] (!%p248_p2)   ;;  %v7572_v15 = vld [vmem:[%s10545_s2 + $0xb0] ss:$8 sps:$4 sm:$0xff] (!%p248_p2)  }
   0xa   : > { %v7567_v12 = vld [vmem:[%s10546_s3 + $0x20] ss:$8 sps:$4 sm:$0xff] (!%p248_p2)   ;;  %v7570_v14 = vld [vmem:[%s10546_s3 + $0x34] ss:$8 sps:$4 sm:$0xff] (!%p248_p2)   ;;  %v7573_v16 = vld [vmem:[%s10546_s3 + $0x30] ss:$8 sps:$4 sm:$0xff] (!%p248_p2)  }
   0xb   : > { %505 = vmatpush1.bf16.msra.mxu0 (!%p248_p2), %v7560_v7  ;;  %v7574_v17 = vld [vmem:[%s10545_s2 + $0xc4] ss:$8 sps:$4 sm:$0xff] (!%p248_p2)   ;;  %v7578_v19 = vld [vmem:[%s10545_s2 + $0xc0] ss:$8 sps:$4 sm:$0xff] (!%p248_p2)   ;;  %v7580_v21 = vld [vmem:[%s10545_s2 + $0xd4] ss:$8 sps:$4 sm:$0xff] (!%p248_p2)  }
   0xc   : > { %2707 = vmatpush1.bf16.msra.mxu1 (!%p248_p2), %v7561_v8  ;;  %506 = vmatprep.subr.bf16.mxu0 (!%p248_p2), %v7562_v9  ;;  %v7576_v18 = vld [vmem:[%s10546_s3 + $0x44] ss:$8 sps:$4 sm:$0xff] (!%p248_p2)   ;;  %v7579_v20 = vld [vmem:[%s10546_s3 + $0x40] ss:$8 sps:$4 sm:$0xff] (!%p248_p2)   ;;  %v7582_v22 = vld [vmem:[%s10546_s3 + $0x54] ss:$8 sps:$4 sm:$0xff] (!%p248_p2)  }
   0xd   : > { %2708 = vmatprep.subr.bf16.mxu1 %v7564_v10  ;;  %s10552_s25 = smov (!%p284_p3, %s6230_s25), 1  ;;  %v7584_v23 = vld [vmem:[%s10545_s2 + $0xd0] ss:$8 sps:$4 sm:$0xff]   ;;  %v7586_v25 = vld [vmem:[%s10545_s2 + $0xe4] ss:$8 sps:$4 sm:$0xff]   ;;  %vm1513_vm2 = vcmask 1045504  }
   0xe   : > { %s7538_s18 = smul.u32 56, %s10552_s25  ;;  %v7585_v24 = vld [vmem:[%s10546_s3 + $0x50] ss:$8 sps:$4 sm:$0xff]   ;;  %v7588_v26 = vld [vmem:[%s10546_s3 + $0x64] ss:$8 sps:$4 sm:$0xff]   ;;  %vm2252_vm4 = vcmask 1044480  }
   0xf   : > { %507 = vmatpush1.bf16.msra.mxu0 %v7566_v11  ;;  %v7590_v31 = vld [vmem:[%s10545_s2 + $0xe0] ss:$8 sps:$4 sm:$0xff]   ;;  %v7592_v36 = vld [vmem:[%s10545_s2 + $0xf4] ss:$8 sps:$4 sm:$0xff]   ;;  %v7596_v38 = vld [vmem:[%s10545_s2 + $0xf0] ss:$8 sps:$4 sm:$0xff]  }
  0x10   : > { %2709 = vmatpush1.bf16.msra.mxu1 %v7567_v12  ;;  %508 = vmatprep.subr.bf16.mxu0 %v7568_v13  ;;  %s8439_s8 = scalar_lea.vmem %s10543_s0, %s7538_s18  ;;  %v7591_v32 = vld [vmem:[%s10546_s3 + $0x60] ss:$8 sps:$4 sm:$0xff]   ;;  %v7594_v37 = vld [vmem:[%s10546_s3 + $0x74] ss:$8 sps:$4 sm:$0xff]   ;;  %v7597_v39 = vld [vmem:[%s10546_s3 + $0x70] ss:$8 sps:$4 sm:$0xff]  }
  0x11   : > { %2710 = vmatprep.subr.bf16.mxu1 %v7570_v14  ;;  %v300_v27 = vld [vmem:[%s8439_s8] sm:$0xf]  ;;  %v8455_v28 = vld [vmem:[%s8439_s8 + $0x4] sm:$0xf]  ;;  %v8461_v30 = vld [vmem:[%s8439_s8 + $0x8] sm:$0xff]   ;;  %s7539_s9 = smul.u32 112, %s10552_s25 }
  0x12   : > { %v8458_v29 = vcombine.low %v300_v27, %v8455_v28  ;;  %v381_v35 = vshll.u32 %v8461_v30, 16  ;;  %v7602_v41 = vld [vmem:[%s10545_s2 + $0x4] ss:$8 sps:$4 sm:$0xff]   ;;  %vm372_vm0 = vsmask.f32 7424  ;;  %v8491_v45 = vld [vmem:[%s8439_s8 + $0x10] sm:$0xff]  }
  0x13   : > { %509 = vmatpush1.bf16.msra.mxu0 %v7572_v15  ;;  %v7603_v44 = vld [vmem:[%s10546_s3 + $0x84] ss:$8 sps:$4 sm:$0xff]   ;;  %v7600_v46 = vld [vmem:[%s10545_s2] ss:$8 sps:$4 sm:$0xff]   ;;  %v385_v48 = vshrl.u32 %v8461_v30, 16  ;;  %v389_v50 = vshll.u32 %v8491_v45, 16  ;;  %s8556_s20 = scalar_lea.vmem %s10544_s1, %s7539_s9 }
  0x14   : > { %2711 = vmatpush1.bf16.msra.mxu1 %v7573_v16  ;;  %510 = vmatprep.subr.bf16.mxu0 %v7574_v17  ;;  %v374_v33 = vshrl.u32 %v8458_v29, 16  ;;  %v376_v34 = vshll.u32 %v8458_v29, 16  ;;  %v383_v43 = vrot.slane %v381_v35, 1  ;;  %v7605_v47 = vld [vmem:[%s10546_s3 + $0x80] ss:$8 sps:$4 sm:$0xff]   ;;  %v776_v51 = vrot.slane %v8461_v30, 1 }
  0x15   : > { %2712 = vmatprep.subr.bf16.mxu1 %v7576_v18  ;;  %v778_v52 = vrot.slane %v8491_v45, 1  ;;  %v7606_v53 = vld [vmem:[%s10546_s3 + $0x94] ss:$8 sps:$4 sm:$0xff]   ;;  %v7608_v55 = vld [vmem:[%s10545_s2 + $0x10] ss:$8 sps:$4 sm:$0xff]   ;;  %v391_v60 = vrot.slane %v389_v50, 1 }
  0x16   : > { %v378_v40 = vrot.slane %v376_v34, 1  ;;  %v7610_v54 = vld [vmem:[%s10545_s2 + $0x14] ss:$8 sps:$4 sm:$0xff]   ;;  %v7611_v56 = vld [vmem:[%s10546_s3 + $0x90] ss:$8 sps:$4 sm:$0xff]   ;;  %v387_v59 = vor.u32 %v385_v48, %v383_v43  ;;  %v393_v4 = vshrl.u32 %v8491_v45, 16 }
  0x17   : > { %511 = vmatpush1.bf16.msra.mxu0 %v7578_v19  ;;  %v8519_v57 = vsel %vm774_vm1, %v776_v51, %v778_v52  ;;  %v7613_v58 = vld [vmem:[%s10546_s3 + $0xa4] ss:$8 sps:$4 sm:$0xff]   ;;  %v8525_v61 = vld [vmem:[%s8439_s8 + $0x18] sm:$0xff]   ;;  %v7615_v0 = vld [vmem:[%s10546_s3 + $0xa0] ss:$8 sps:$4 sm:$0xff]  }
  0x18   : > { %2713 = vmatpush1.bf16.msra.mxu1 %v7579_v20  ;;  %512 = vmatprep.subr.bf16.mxu0 %v7580_v21  ;;  %v379_v42 = vor.u32 %v378_v40, %v374_v33  ;;  %v7618_v62 = vld [vmem:[%s10545_s2 + $0x24] ss:$8 sps:$4 sm:$0xff]   ;;  %v780_v63 = vrot.slane %v8525_v61, 1  ;;  %v7616_v1 = vld [vmem:[%s10545_s2 + $0x20] ss:$8 sps:$4 sm:$0xff]   ;;  %v392_v3 = vsel %vm372_vm0, %v387_v59, %v391_v60  ;;  %v397_v5 = vshll.u32 %v8525_v61, 16 }
  0x19   : > { %2714 = vmatprep.subr.bf16.mxu1 %v7582_v22  ;;  %v7619_v7 = vld [vmem:[%s10546_s3 + $0xb4] ss:$8 sps:$4 sm:$0xff]   ;;  %v7621_v9 = vld [vmem:[%s10546_s3 + $0xb0] ss:$8 sps:$4 sm:$0xff]   ;;  %v395_v11 = vor.u32 %v393_v4, %v391_v60  ;;  %v7626_v13 = vld [vmem:[%s10546_s3 + $0xc4] ss:$8 sps:$4 sm:$0xff]  }
  0x1a   : > { %v384_v49 = vsel %vm372_vm0, %v379_v42, %v383_v43  ;;  %v8545_v6 = vsel %vm774_vm1, %v778_v52, %v780_v63  ;;  %v7624_v8 = vld [vmem:[%s10545_s2 + $0x34] ss:$8 sps:$4 sm:$0xff]   ;;  %v7622_v10 = vld [vmem:[%s10545_s2 + $0x30] ss:$8 sps:$4 sm:$0xff]   ;;  %v399_v12 = vrot.slane %v397_v5, 1  ;;  %v8568_v14 = vld [vmem:[%s8439_s8 + $0x20] sm:$0xff]  }
  0x1b   : > { %513 = vmatpush1.bf16.msra.mxu0 %v7584_v23  ;;  %v7631_v15 = vld [vmem:[%s10545_s2 + $0x44] ss:$8 sps:$4 sm:$0xff]   ;;  %v7628_v17 = vld [vmem:[%s10546_s3 + $0xc0] ss:$8 sps:$4 sm:$0xff]   ;;  %v401_v21 = vshrl.u32 %v8525_v61, 16  ;;  %v405_v22 = vshll.u32 %v8568_v14, 16 }
  0x1c   : > { %2715 = vmatpush1.bf16.msra.mxu1 %v7585_v24  ;;  %514 = vmatprep.subr.bf16.mxu0 %v7586_v25  ;;  %v2452_v16 = vld [vmem:[%s8556_s20] sm:$0xff]  ;;  %v2453_v18 = vld [vmem:[%s8556_s20 + $0x8] sm:$0xff]  ;;  %v400_v19 = vsel %vm372_vm0, %v395_v11, %v399_v12  ;;  %v7632_v24 = vld [vmem:[%s10546_s3 + $0xd4] ss:$8 sps:$4 sm:$0xff]   ;;  %vm1250_vm3 = vsmask.f32 6400 }
  0x1d   : > { %2716 = vmatprep.subr.bf16.mxu1 %v7588_v26  ;;  %v7629_v20 = vld [vmem:[%s10545_s2 + $0x40] ss:$8 sps:$4 sm:$0xff]   ;;  %v8585_v23 = vcombine.high %v2452_v16, %v2453_v18  ;;  %v7634_v25 = vld [vmem:[%s10546_s3 + $0xd0] ss:$8 sps:$4 sm:$0xff]   ;;  %v7640_v26 = vld [vmem:[%s10545_s2 + $0x54] ss:$8 sps:$4 sm:$0xff]   ;;  %v8638_v50 = vcombine.low %v2452_v16, %v2453_v18 }
  0x1e   : > { %v7636_v27 = vld [vmem:[%s10546_s3 + $0xe4] ss:$8 sps:$4 sm:$0xff]   ;;  %v407_v33 = vrot.slane %v405_v22, 1  ;;  %v8604_v34 = vld [vmem:[%s8439_s8 + $0x28] ss:$0 sps:$4 sm:$0x11]  }
  0x1f   : > { %515 = vmatpush1.bf16.msra.mxu0 %v7590_v31  ;;  %2736 = vmatprep.mubr.bf16.mxu1 %v8585_v23  ;;  %v7638_v31 = vld [vmem:[%s10545_s2 + $0x50] ss:$8 sps:$4 sm:$0xff]   ;;  %v7647_v35 = vld [vmem:[%s10545_s2 + $0x64] ss:$8 sps:$4 sm:$0xff]   ;;  %v413_v40 = vshll.u32 %v8604_v34, 16 }
  0x20   : > { %2717 = vmatpush1.bf16.msra.mxu1 %v7591_v32  ;;  %516 = vmatprep.subr.bf16.mxu0 %v7592_v36  ;;  %v403_v32 = vor.u32 %v401_v21, %v399_v12  ;;  %v409_v36 = vshrl.u32 %v8568_v14, 16  ;;  %v7656_v42 = vld [vmem:[%s10545_s2 + $0x74] ss:$8 sps:$4 sm:$0xff]   ;;  %v7644_v43 = vld [vmem:[%s10546_s3 + $0xf0] ss:$8 sps:$4 sm:$0xff]  }
  0x21   : > { %2718 = vmatprep.subr.bf16.mxu1 %v7594_v37  ;;  %v7654_v48 = vld [vmem:[%s10545_s2 + $0x70] ss:$8 sps:$4 sm:$0xff]   ;;  %v7660_v59 = vld [vmem:[%s10545_s2 + $0x100] ss:$8 sps:$4 sm:$0xff]   ;;  %v7683_v16 = vld [vmem:[%s10545_s2 + $0x134] ss:$8 sps:$4 sm:$0xff]  }
  0x22   : > { %v408_v37 = vsel %vm372_vm0, %v403_v32, %v407_v33  ;;  %v8663_v60 = vld [vmem:[%s8556_s20 + $0x10] ss:$8 sps:$4 sm:$0xff]   ;;  %v7675_v12 = vld [vmem:[%s10545_s2 + $0x120] ss:$8 sps:$4 sm:$0xff]   ;;  %v7689_v21 = vld [vmem:[%s10545_s2 + $0x144] ss:$8 sps:$4 sm:$0xff]  }
  0x23   : > { %517 = vmatpush1.bf16.msra.mxu0 %v7596_v38  ;;  %v7641_v38 = vld [vmem:[%s10546_s3 + $0xe0] ss:$8 sps:$4 sm:$0xff]   ;;  %v7666_v4 = vld [vmem:[%s10546_s3 + $0x130] ss:$8 sps:$4 sm:$0xff]   ;;  %vm1989_vm5 = vsmask.f32 5376 }
  0x24   : > { %2719 = vmatpush1.bf16.msra.mxu1 %v7597_v39  ;;  %670 = vmatprep.subr.bf16.mxu0 %v7602_v41  ;;  %v7642_v39 = vld [vmem:[%s10546_s3 + $0xf4] ss:$8 sps:$4 sm:$0xff]   ;;  %v7645_v41 = vld [vmem:[%s10545_s2 + $0x60] ss:$8 sps:$4 sm:$0xff]   ;;  %v7669_v5 = vld [vmem:[%s10545_s2 + $0x110] ss:$8 sps:$4 sm:$0xff]  }
  0x25   : > { %2720 = vmatprep.subr.bf16.mxu1 %v7603_v44  ;;  %v411_v44 = vor.u32 %v409_v36, %v407_v33  ;;  %v7681_v18 = vld [vmem:[%s10545_s2 + $0x130] ss:$8 sps:$4 sm:$0xff]  }
  0x26   : > { %535 = vmatmul.mubr.bf16.vlgmr.msra.gmra.mrb[0].mxu0 %v384_v49  ;;  %v7662_v49 = vld [vmem:[%s10545_s2 + $0x104] ss:$8 sps:$4 sm:$0xff]   ;;  %v8739_v22 = vld [vmem:[%s8556_s20 + $0x30] ss:$8 sps:$4 sm:$0xff]  }
  0x27   : > { %671 = vmatpush1.bf16.msra.mxu0 %v7600_v46  ;;  %544 = vmatprep.mubr.bf16.mxu0 %v8313_v2  ;;  %v415_v46 = vrot.slane %v413_v40, 1  ;;  %v7690_v33 = vld [vmem:[%s10546_s3 + $0x170] ss:$8 sps:$4 sm:$0xff]  }
  0x28   : > { %2721 = vmatpush1.bf16.msra.mxu1 %v7605_v47  ;;  %672 = vmatprep.subr.bf16.mxu0 %v7610_v54  ;;  %v7653_v47 = vld [vmem:[%s10546_s3 + $0x104] ss:$8 sps:$4 sm:$0xff]   ;;  %v7659_v54 = vld [vmem:[%s10546_s3 + $0x114] ss:$8 sps:$4 sm:$0xff]   ;;  %v7698_v36 = vld [vmem:[%s10545_s2 + $0x150] ss:$8 sps:$4 sm:$0xff]  }
  0x29   : > { %2722 = vmatprep.subr.bf16.mxu1 %v7606_v53  ;;  %v416_v52 = vsel %vm372_vm0, %v411_v44, %v415_v46  ;;  %v7651_v53 = vld [vmem:[%s10546_s3 + $0x100] ss:$8 sps:$4 sm:$0xff]   ;;  %v3297_v46 = vrot.slane %v8663_v60, 1 }
  0x2a   : > { %v7705_v44 = vld [vmem:[%s10545_s2 + $0x160] ss:$8 sps:$4 sm:$0xff]  }
  0x2b   : > { %673 = vmatpush1.bf16.msra.mxu0 %v7608_v55  ;;  %v8649_v55 = vld [vmem:[%s8556_s20 + $0x14] ss:$8 sps:$4 sm:$0xff]  }
  0x2c   : > { %2723 = vmatpush1.bf16.msra.mxu1 %v7611_v56  ;;  %674 = vmatprep.subr.bf16.mxu0 %v7618_v62  ;;  %v7657_v56 = vld [vmem:[%s10546_s3 + $0x110] ss:$8 sps:$4 sm:$0xff]   ;;  %v7663_v62 = vld [vmem:[%s10546_s3 + $0x120] ss:$8 sps:$4 sm:$0xff]  }
  0x2d   : > { %2724 = vmatprep.subr.bf16.mxu1 %v7613_v58  ;;  %v7665_v58 = vld [vmem:[%s10546_s3 + $0x124] ss:$8 sps:$4 sm:$0xff]  }
  0x2e   : > { %545 = vmatmul.mubr.bf16.gmra.mrb[4].mxu0 %v392_v3  ;;  %v8675_v3 = vld [vmem:[%s8556_s20 + $0x24] ss:$8 sps:$4 sm:$0xff]  }
  0x2f   : > { %675 = vmatpush1.bf16.msra.mxu0 %v7616_v1  ;;  %554 = vmatprep.mubr.bf16.mxu0 %v8313_v2  ;;  %v7671_v1 = vld [vmem:[%s10545_s2 + $0x114] ss:$8 sps:$4 sm:$0xff]  }
  0x30   : > { %2725 = vmatpush1.bf16.msra.mxu1 %v7615_v0  ;;  %676 = vmatprep.subr.bf16.mxu0 %v7624_v8  ;;  %v7668_v0 = vld [vmem:[%s10546_s3 + $0x134] ss:$8 sps:$4 sm:$0xff]   ;;  %v753_v8 = vld [vmem:[%s8439_s8] sm:$0xe] }
  0x31   : > { %2726 = vmatprep.subr.bf16.mxu1 %v7619_v7  ;;  %v7674_v7 = vld [vmem:[%s10546_s3 + $0x144] ss:$8 sps:$4 sm:$0xff]   ;;  %v6308_v11 = vcombine.low %v753_v8, %v8455_v28  ;;  %v7678_v28 = vld [vmem:[%s10546_s3 + $0x150] ss:$8 sps:$4 sm:$0xff]  }
  0x32   : > { %v7728_v8 = vld [vmem:[%s10546_s3 + $0x1c4] ss:$8 sps:$4 sm:$0xff]  }
  0x33   : > { %677 = vmatpush1.bf16.msra.mxu0 %v7622_v10  ;;  %v8698_v10 = vld [vmem:[%s8556_s20 + $0x20] ss:$8 sps:$4 sm:$0xff]  }
  0x34   : > { %2727 = vmatpush1.bf16.msra.mxu1 %v7621_v9  ;;  %678 = vmatprep.subr.bf16.mxu0 %v7631_v15  ;;  %v7672_v9 = vld [vmem:[%s10546_s3 + $0x140] ss:$8 sps:$4 sm:$0xff]   ;;  %v775_v15 = vrot.slane %v6308_v11, 1 }
  0x35   : > { %2728 = vmatprep.subr.bf16.mxu1 %v7626_v13  ;;  %v7680_v13 = vld [vmem:[%s10546_s3 + $0x154] ss:$8 sps:$4 sm:$0xff]   ;;  %v7726_v11 = vld [vmem:[%s10546_s3 + $0x1c0] ss:$8 sps:$4 sm:$0xff]  }
  0x36   : > { %555 = vmatmul.mubr.bf16.gmra.mrb[8].mxu0 %v400_v19  ;;  %v8724_v19 = vsel %vm774_vm1, %v775_v15, %v776_v51  ;;  %v7684_v51 = vld [vmem:[%s10546_s3 + $0x160] ss:$8 sps:$4 sm:$0xff]   ;;  %v7730_v15 = vld [vmem:[%s10546_s3 + $0x1d0] ss:$8 sps:$4 sm:$0xff]  }
  0x37   : > { %679 = vmatpush1.bf16.msra.mxu0 %v7629_v20  ;;  %564 = vmatprep.mubr.bf16.mxu0 %v8313_v2  ;;  %v7686_v20 = vld [vmem:[%s10546_s3 + $0x164] ss:$8 sps:$4 sm:$0xff]  }
  0x38   : > { %2729 = vmatpush1.bf16.msra.mxu1 %v7628_v17  ;;  %680 = vmatprep.subr.bf16.mxu0 %v7640_v26  ;;  %v8711_v17 = vld [vmem:[%s8556_s20 + $0x34] ss:$8 sps:$4 sm:$0xff]   ;;  %v2909_v26 = vshrl.u32 %v8585_v23, 16 }
  0x39   : > { %2730 = vmatprep.subr.bf16.mxu1 %v7632_v24  ;;  %v7687_v24 = vld [vmem:[%s10545_s2 + $0x140] ss:$8 sps:$4 sm:$0xff]  }
  0x3b   : > { %681 = vmatpush1.bf16.msra.mxu0 %v7638_v31  ;;  %v8752_v31 = vld [vmem:[%s8556_s20 + $0x44] ss:$8 sps:$4 sm:$0xff]  }
  0x3c   : > { %2731 = vmatpush1.bf16.msra.mxu1 %v7634_v25  ;;  %682 = vmatprep.subr.bf16.mxu0 %v7647_v35  ;;  %v7692_v25 = vld [vmem:[%s10546_s3 + $0x174] ss:$8 sps:$4 sm:$0xff]   ;;  %v7697_v35 = vld [vmem:[%s10546_s3 + $0x184] ss:$8 sps:$4 sm:$0xff]  }
  0x3d   : > { %2732 = vmatprep.subr.bf16.mxu1 %v7636_v27  ;;  %v7700_v27 = vld [vmem:[%s10545_s2 + $0x154] ss:$8 sps:$4 sm:$0xff]  }
  0x3e   : > { %565 = vmatmul.mubr.bf16.gmra.mrb[12].mxu0 %v408_v37  ;;  %v7695_v37 = vld [vmem:[%s10546_s3 + $0x180] ss:$8 sps:$4 sm:$0xff]  }
  0x3f   : > { %574 = vmatprep.mubr.bf16.mxu0 %v8313_v2  ;;  %683 = vmatpush1.bf16.msra.mxu0 %v7645_v41  ;;  %v7704_v41 = vld [vmem:[%s10546_s3 + $0x194] ss:$8 sps:$4 sm:$0xff]  }
  0x40   : > { %2733 = vmatpush1.bf16.msra.mxu1 %v7641_v38  ;;  %684 = vmatprep.subr.bf16.mxu0 %v7656_v42  ;;  %v8775_v38 = vld [vmem:[%s8556_s20 + $0x40] ss:$8 sps:$4 sm:$0xff]   ;;  %v3300_v42 = vrot.slane %v8649_v55, 1 }
  0x41   : > { %2734 = vmatprep.subr.bf16.mxu1 %v7642_v39 }
  0x43   : > { %685 = vmatpush1.bf16.msra.mxu0 %v7654_v48  ;;  %v7716_v48 = vld [vmem:[%s10545_s2 + $0x174] ss:$8 sps:$4 sm:$0xff]  }
  0x44   : > { %2735 = vmatpush1.bf16.msra.mxu1 %v7644_v43  ;;  %871 = vmatprep.subr.bf16.mxu0 %v7662_v49  ;;  %v3304_v43 = vrot.slane %v8675_v3, 1 }
  0x45   : > { %3154 = vmatprep.subr.bf16.mxu1 %v7653_v47  ;;  %v3302_v47 = vrot.slane %v8698_v10, 1 }
  0x46   : > { %575 = vmatmul.mubr.bf16.gmra.mrb[16].mxu0 %v416_v52  ;;  %v8795_v49 = vsel %vm774_vm1, %v3300_v42, %v3304_v43  ;;  %v7702_v52 = vld [vmem:[%s10546_s3 + $0x190] ss:$8 sps:$4 sm:$0xff]  }
  0x47   : > { %2737 = vmatmul.mubr.bf16.vlgmr.msra.gmra.mrb[0].mxu1 %v8638_v50  ;;  %702 = vmatprep.mubr.bf16.mxu0 %v8313_v2 }
  0x48   : > { %3155 = vmatpush1.bf16.msra.mxu1 %v7651_v53  ;;  %2746 = vmatprep.mubr.bf16.mxu1 %v8649_v55 }
  0x49   : > { %3156 = vmatprep.subr.bf16.mxu1 %v7659_v54  ;;  %v8807_v54 = vsel %vm774_vm1, %v3297_v46, %v3302_v47 }
  0x4c   : > { %3157 = vmatpush1.bf16.msra.mxu1 %v7657_v56  ;;  %v7712_v56 = vld [vmem:[%s10546_s3 + $0x1a4] ss:$8 sps:$4 sm:$0xff]  }
  0x4d   : > { %3158 = vmatprep.subr.bf16.mxu1 %v7665_v58  ;;  %v7714_v58 = vld [vmem:[%s10545_s2 + $0x170] ss:$8 sps:$4 sm:$0xff]  }
  0x4e   : > { %703 = vmatmul.mubr.bf16.vlgmr.msra.gmra.mrb[0].mxu0 %v8458_v29  ;;  %v7677_v29 = vld [vmem:[%s10545_s2 + $0x124] ss:$8 sps:$4 sm:$0xff]  }
  0x4f   : > { %2747 = vmatmul.mubr.bf16.gmra.mrb[4].mxu1 %v8663_v60  ;;  %872 = vmatpush1.bf16.msra.mxu0 %v7660_v59  ;;  %v7723_v59 = vld [vmem:[%s10545_s2 + $0x184] ss:$8 sps:$4 sm:$0xff]  }
  0x50   : > { %3159 = vmatpush1.bf16.msra.mxu1 %v7663_v62  ;;  %873 = vmatprep.subr.bf16.mxu0 %v7671_v1  ;;  %v7710_v62 = vld [vmem:[%s10546_s3 + $0x1a0] ss:$8 sps:$4 sm:$0xff]   ;;  %v7719_v1 = vld [vmem:[%s10546_s3 + $0x1b4] ss:$8 sps:$4 sm:$0xff]  }
  0x51   : > { %3160 = vmatprep.subr.bf16.mxu1 %v7668_v0  ;;  %712 = vmatprep.mubr.bf16.mxu0 %v8313_v2  ;;  %v3308_v0 = vrot.slane %v8711_v17, 1 }
  0x52   : > { %2756 = vmatprep.mubr.bf16.mxu1 %v8675_v3 }
  0x53   : > { %874 = vmatpush1.bf16.msra.mxu0 %v7669_v5  ;;  %v3306_v5 = vrot.slane %v8739_v22, 1 }
  0x54   : > { %3161 = vmatpush1.bf16.msra.mxu1 %v7666_v4  ;;  %875 = vmatprep.subr.bf16.mxu0 %v7677_v29  ;;  %v8827_v4 = vsel %vm774_vm1, %v3304_v43, %v3308_v0  ;;  %v8909_v43 = vld [vmem:[%s8439_s8 + $0x1c] sm:$0xff]  }
  0x55   : > { %3162 = vmatprep.subr.bf16.mxu1 %v7674_v7  ;;  %v7717_v7 = vld [vmem:[%s10546_s3 + $0x1b0] ss:$8 sps:$4 sm:$0xff]   ;;  %v8836_v29 = vsel %vm774_vm1, %v3302_v47, %v3306_v5 }
  0x56   : > { %713 = vmatmul.mubr.bf16.gmra.mrb[4].mxu0 %v8461_v30  ;;  %v2911_v30 = vshll.u32 %v8585_v23, 16  ;;  %v2916_v23 = vshll.u32 %v8649_v55, 16 }
  0x57   : > { %2757 = vmatmul.mubr.bf16.gmra.mrb[8].mxu1 %v8698_v10  ;;  %876 = vmatpush1.bf16.msra.mxu0 %v7675_v12  ;;  %v7732_v12 = vld [vmem:[%s10546_s3 + $0x1d4] ss:$8 sps:$4 sm:$0xff]  }
  0x58   : > { %3163 = vmatpush1.bf16.msra.mxu1 %v7672_v9  ;;  %722 = vmatprep.mubr.bf16.mxu0 %v8313_v2  ;;  %v2913_v32 = vrot.slane %v2911_v30, 1  ;;  %v8777_v40 = vrot.slane %v2916_v23, 1  ;;  %v7721_v9 = vld [vmem:[%s10545_s2 + $0x180] ss:$8 sps:$4 sm:$0xff]   ;;  %v7744_v30 = vld [vmem:[%s10545_s2 + $0x1a4] ss:$8 sps:$4 sm:$0xff]  }
  0x59   : > { %3164 = vmatprep.subr.bf16.mxu1 %v7680_v13  ;;  %877 = vmatprep.subr.bf16.mxu0 %v7683_v16  ;;  %v7735_v13 = vld [vmem:[%s10545_s2 + $0x194] ss:$8 sps:$4 sm:$0xff]   ;;  %v7733_v16 = vld [vmem:[%s10545_s2 + $0x190] ss:$8 sps:$4 sm:$0xff]  }
  0x5a   : > { %2766 = vmatprep.mubr.bf16.mxu1 %v8711_v17  ;;  %v2914_v39 = vor.u32 %v2913_v32, %v2909_v26  ;;  %v2904_v26 = vshll.u32 %v8663_v60, 16  ;;  %v7738_v32 = vld [vmem:[%s10546_s3 + $0x1e0] ss:$8 sps:$4 sm:$0xff]   ;;  %v7750_v23 = vld [vmem:[%s10545_s2 + $0x1b4] ss:$8 sps:$4 sm:$0xff]  }
  0x5b   : > { %878 = vmatpush1.bf16.msra.mxu0 %v7681_v18  ;;  %v8862_v18 = vld [vmem:[%s8439_s8 + $0xc] sm:$0xff]  }
  0x5c   : > { %3165 = vmatpush1.bf16.msra.mxu1 %v7678_v28  ;;  %879 = vmatprep.subr.bf16.mxu0 %v7689_v21  ;;  %v2919_v53 = vsel %vm372_vm0, %v2914_v39, %v8777_v40  ;;  %v2899_v28 = vshll.u32 %v8638_v50, 16  ;;  %v7740_v21 = vld [vmem:[%s10546_s3 + $0x1e4] ss:$8 sps:$4 sm:$0xff]   ;;  %v7745_v39 = vld [vmem:[%s10546_s3 + $0x1f0] ss:$8 sps:$4 sm:$0xff]  }
  0x5d   : > { %3166 = vmatprep.subr.bf16.mxu1 %v7686_v20  ;;  %v8865_v20 = vld [vmem:[%s8439_s8 + $0x14] sm:$0xff]  }
  0x5e   : > { %723 = vmatmul.mubr.bf16.gmra.mrb[8].mxu0 %v8491_v45  ;;  %v7707_v45 = vld [vmem:[%s10545_s2 + $0x164] ss:$8 sps:$4 sm:$0xff]  }
  0x5f   : > { %2767 = vmatmul.mubr.bf16.gmra.mrb[12].mxu1 %v8739_v22  ;;  %880 = vmatpush1.bf16.msra.mxu0 %v7687_v24  ;;  %v2897_v24 = vshrl.u32 %v8638_v50, 16  ;;  %v3312_v50 = vrot.slane %v8752_v31, 1 }
  0x60   : > { %3167 = vmatpush1.bf16.msra.mxu1 %v7684_v51  ;;  %732 = vmatprep.mubr.bf16.mxu0 %v8313_v2  ;;  %v1517_v51 = vrot.slane %v8865_v20, 2 }
  0x61   : > { %3168 = vmatprep.subr.bf16.mxu1 %v7692_v25  ;;  %881 = vmatprep.subr.bf16.mxu0 %v7700_v27  ;;  %v2901_v25 = vrot.slane %v2899_v28, 1  ;;  %v2817_v28 = vld [vmem:[%s8556_s20 + $0x50] sm:$0x11] }
  0x62   : > { %2776 = vmatprep.mubr.bf16.mxu1 %v8752_v31 }
  0x63   : > { %882 = vmatpush1.bf16.msra.mxu0 %v7698_v36  ;;  %v2928_v36 = vshrl.u32 %v8649_v55, 16  ;;  %v2902_v47 = vor.u32 %v2901_v25, %v2897_v24  ;;  %v7762_v24 = vld [vmem:[%s10546_s3 + $0x224] ss:$8 sps:$4 sm:$0xff]  }
  0x64   : > { %3169 = vmatpush1.bf16.msra.mxu1 %v7690_v33  ;;  %883 = vmatprep.subr.bf16.mxu0 %v7707_v45  ;;  %v7742_v33 = vld [vmem:[%s10545_s2 + $0x1a0] ss:$8 sps:$4 sm:$0xff]   ;;  %v8900_v45 = vsel %vm774_vm1, %v3308_v0, %v3312_v50  ;;  %v7771_v25 = vld [vmem:[%s10545_s2 + $0x1e4] ss:$8 sps:$4 sm:$0xff]  }
  0x65   : > { %3170 = vmatprep.subr.bf16.mxu1 %v7697_v35  ;;  %v7747_v35 = vld [vmem:[%s10546_s3 + $0x1f4] ss:$8 sps:$4 sm:$0xff]  }
  0x66   : > { %733 = vmatmul.mubr.bf16.gmra.mrb[12].mxu0 %v8525_v61  ;;  %v7769_v61 = vld [vmem:[%s10545_s2 + $0x1e0] ss:$8 sps:$4 sm:$0xff]  }
  0x67   : > { %2777 = vmatmul.mubr.bf16.gmra.mrb[16].mxu1 %v8775_v38  ;;  %742 = vmatprep.mubr.bf16.mxu0 %v8313_v2 }
  0x68   : > { %3171 = vmatpush1.bf16.msra.mxu1 %v7695_v37  ;;  %884 = vmatpush1.bf16.msra.mxu0 %v7705_v44  ;;  %v3310_v37 = vrot.slane %v8775_v38, 1  ;;  %v7748_v44 = vld [vmem:[%s10545_s2 + $0x1b0] ss:$8 sps:$4 sm:$0xff]  }
  0x69   : > { %3172 = vmatprep.subr.bf16.mxu1 %v7704_v41  ;;  %885 = vmatprep.subr.bf16.mxu0 %v7716_v48  ;;  %v2932_v41 = vshll.u32 %v8675_v3, 16  ;;  %v2906_v48 = vrot.slane %v2904_v26, 1  ;;  %v8969_v26 = vcombine.high %v2817_v28, %v2817_v28 }
  0x6a   : > { %3186 = vmatprep.mubr.bf16.mxu1 %v2919_v53  ;;  %v7756_v53 = vld [vmem:[%s10545_s2 + $0x1c4] ss:$8 sps:$4 sm:$0xff]  }
  0x6c   : > { %3173 = vmatpush1.bf16.msra.mxu1 %v7702_v52  ;;  %886 = vmatpush1.bf16.msra.mxu0 %v7714_v58  ;;  %v7753_v52 = vld [vmem:[%s10546_s3 + $0x204] ss:$8 sps:$4 sm:$0xff]   ;;  %v2930_v58 = vor.u32 %v2928_v36, %v8777_v40  ;;  %v2924_v40 = vshll.u32 %v8698_v10, 16 }
  0x6d   : > { %3174 = vmatprep.subr.bf16.mxu1 %v7712_v56  ;;  %1126 = vmatprep.subr.bf16.mxu0 %v7723_v59  ;;  %v1519_v56 = vrot.slane %v8909_v43, 2  ;;  %v2934_v59 = vrot.slane %v2932_v41, 1  ;;  %v7768_v41 = vld [vmem:[%s10546_s3 + $0x234] ss:$8 sps:$4 sm:$0xff]  }
  0x6e   : > { %743 = vmatmul.mubr.bf16.gmra.mrb[16].mxu0 %v8568_v14 }
  0x6f   : > { %903 = vmatprep.mubr.bf16.mxu0 %v8313_v2  ;;  %v8930_v0 = vsel %vm1513_vm2, %v1517_v51, %v1519_v56 }
  0x70   : > { %3175 = vmatpush1.bf16.msra.mxu1 %v7710_v62  ;;  %v2920_v62 = vshrl.u32 %v8663_v60, 16  ;;  %v1278_v60 = vshrl.u32 %v8909_v43, 16 }
  0x71   : > { %3176 = vmatprep.subr.bf16.mxu1 %v7719_v1  ;;  %v7751_v1 = vld [vmem:[%s10546_s3 + $0x200] ss:$8 sps:$4 sm:$0xff]  }
  0x74   : > { %3177 = vmatpush1.bf16.msra.mxu1 %v7717_v7  ;;  %v7754_v7 = vld [vmem:[%s10545_s2 + $0x1c0] ss:$8 sps:$4 sm:$0xff]  }
  0x75   : > { %3178 = vmatprep.subr.bf16.mxu1 %v7728_v8  ;;  %v7759_v8 = vld [vmem:[%s10546_s3 + $0x214] ss:$8 sps:$4 sm:$0xff]  }
  0x76   : > { %904 = vmatmul.mubr.bf16.vlgmr.msra.gmra.mrb[0].mxu0 %v8724_v19  ;;  %v1515_v19 = vrot.slane %v8862_v18, 2 }
  0x77   : > { %1127 = vmatpush1.bf16.msra.mxu0 %v7721_v9  ;;  %913 = vmatprep.mubr.bf16.mxu0 %v8313_v2  ;;  %v2944_v9 = vshrl.u32 %v8675_v3, 16 }
  0x78   : > { %3179 = vmatpush1.bf16.msra.mxu1 %v7726_v11  ;;  %1128 = vmatprep.subr.bf16.mxu0 %v7735_v13  ;;  %v8881_v27 = vsel %vm1513_vm2, %v1515_v19, %v1517_v51  ;;  %v8945_v11 = vld [vmem:[%s8439_s8 + $0x24] sm:$0xff]   ;;  %v2948_v13 = vshll.u32 %v8711_v17, 16  ;;  %v2922_v51 = vor.u32 %v2920_v62, %v2906_v48 }
  0x79   : > { %3180 = vmatprep.subr.bf16.mxu1 %v7732_v12  ;;  %v7765_v12 = vld [vmem:[%s10545_s2 + $0x1d4] ss:$8 sps:$4 sm:$0xff]   ;;  %v1521_v3 = vrot.slane %v8945_v11, 2 }
  0x7b   : > { %1129 = vmatpush1.bf16.msra.mxu0 %v7733_v16  ;;  %v2935_v16 = vsel %vm372_vm0, %v2930_v58, %v2934_v59  ;;  %v7766_v58 = vld [vmem:[%s10546_s3 + $0x230] ss:$8 sps:$4 sm:$0xff]  }
  0x7c   : > { %3181 = vmatpush1.bf16.msra.mxu1 %v7730_v15  ;;  %1130 = vmatprep.subr.bf16.mxu0 %v7744_v30  ;;  %v7757_v15 = vld [vmem:[%s10546_s3 + $0x210] ss:$8 sps:$4 sm:$0xff]  }
  0x7d   : > { %3182 = vmatprep.subr.bf16.mxu1 %v7740_v21  ;;  %v782_v21 = vrot.slane %v8568_v14, 1  ;;  %v7763_v30 = vld [vmem:[%s10545_s2 + $0x1d0] ss:$8 sps:$4 sm:$0xff]   ;;  %v8974_v14 = vsel %vm1513_vm2, %v1519_v56, %v1521_v3  ;;  %v2964_v56 = vshll.u32 %v8752_v31, 16 }
  0x7e   : > { %914 = vmatmul.mubr.bf16.gmra.mrb[4].mxu0 %v8519_v57  ;;  %v8917_v57 = vsel %vm774_vm1, %v3306_v5, %v3310_v37  ;;  %v2907_v5 = vsel %vm372_vm0, %v2902_v47, %v2906_v48  ;;  %v2936_v47 = vshrl.u32 %v8698_v10, 16  ;;  %v2940_v48 = vshll.u32 %v8739_v22, 16  ;;  %v7777_v10 = vld [vmem:[%s10545_s2 + $0x1f4] ss:$8 sps:$4 sm:$0xff]  }
  0x7f   : > { %1131 = vmatpush1.bf16.msra.mxu0 %v7742_v33  ;;  %923 = vmatprep.mubr.bf16.mxu0 %v8313_v2  ;;  %v2950_v33 = vrot.slane %v2948_v13, 1  ;;  %v783_v36 = vsel %vm774_vm1, %v780_v63, %v782_v21  ;;  %v2956_v13 = vshll.u32 %v8775_v38, 16 }
  0x80   : > { %3183 = vmatpush1.bf16.msra.mxu1 %v7738_v32  ;;  %1132 = vmatprep.subr.bf16.mxu0 %v7750_v23  ;;  %v2946_v32 = vor.u32 %v2944_v9, %v2934_v59  ;;  %v3316_v23 = vrot.slane %v8969_v26, 1  ;;  %v7775_v59 = vld [vmem:[%s10545_s2 + $0x1f0] ss:$8 sps:$4 sm:$0xff]   ;;  %v7785_v9 = vld [vmem:[%s10545_s2 + $0x204] ss:$8 sps:$4 sm:$0xff]  }
  0x81   : > { %3184 = vmatprep.subr.bf16.mxu1 %v7747_v35  ;;  %v8976_v35 = vcombine.low %v2817_v28, %v2817_v28 }
  0x82   : > { %v8997_v63 = vsel %vm774_vm1, %v3312_v50, %v3316_v23  ;;  %v7774_v50 = vld [vmem:[%s10546_s3 + $0x244] ss:$8 sps:$4 sm:$0xff]   ;;  %v2951_v62 = vsel %vm372_vm0, %v2946_v32, %v2950_v33 }
  0x83   : > { %1133 = vmatpush1.bf16.msra.mxu0 %v7748_v44 }
  0x84   : > { %3185 = vmatpush1.bf16.msra.mxu1 %v7745_v39  ;;  %1134 = vmatprep.subr.bf16.mxu0 %v7756_v53  ;;  %v7760_v39 = vld [vmem:[%s10546_s3 + $0x220] ss:$8 sps:$4 sm:$0xff]   ;;  %v2960_v53 = vshrl.u32 %v8711_v17, 16 }
  0x85   : > { %3488 = vmatprep.subr.bf16.mxu1 %v7753_v52  ;;  %v3314_v52 = vrot.slane %v8976_v35, 1 }
  0x86   : > { %924 = vmatmul.mubr.bf16.gmra.mrb[8].mxu0 %v8545_v6  ;;  %v2926_v6 = vrot.slane %v2924_v40, 1  ;;  %v2942_v40 = vrot.slane %v2940_v48, 1 }
  0x87   : > { %3187 = vmatmul.mubr.bf16.vlgmr.msra.gmra.mrb[0].mxu1 %v2907_v5  ;;  %1135 = vmatpush1.bf16.msra.mxu0 %v7754_v7  ;;  %v9018_v17 = vsel %vm774_vm1, %v3310_v37, %v3314_v52  ;;  %v974_v5 = vld [vmem:[%s8439_s8 + $0x4] sm:$0xe]  ;;  %v2962_v37 = vor.u32 %v2960_v53, %v2950_v33  ;;  %v1031_v33 = vrot.slane %v8862_v18, 1  ;;  %v2972_v52 = vshll.u32 %v8976_v35, 16  ;;  %v7794_v53 = vld [vmem:[%s10545_s2 + $0x214] ss:$8 sps:$4 sm:$0xff]  }
  0x88   : > { %3489 = vmatpush1.bf16.msra.mxu1 %v7751_v1  ;;  %933 = vmatprep.mubr.bf16.mxu0 %v8313_v2  ;;  %v2927_v44 = vsel %vm372_vm0, %v2922_v51, %v2926_v6  ;;  %v784_v1 = vrot.slane %v8604_v34, 1  ;;  %v2938_v7 = vor.u32 %v2936_v47, %v2926_v6  ;;  %v7780_v51 = vld [vmem:[%s10546_s3 + $0x254] ss:$8 sps:$4 sm:$0xff]   ;;  %v2958_v6 = vrot.slane %v2956_v13, 1  ;;  %v9081_v35 = vld [vmem:[%s8556_s20 + $0x8] sm:$0xff] }
  0x89   : > { %3490 = vmatprep.subr.bf16.mxu1 %v7759_v8  ;;  %1136 = vmatprep.subr.bf16.mxu0 %v7765_v12  ;;  %v9024_v8 = vld [vmem:[%s8439_s8 + $0x8] sm:$0xf]  ;;  %v2966_v12 = vrot.slane %v2964_v56, 1  ;;  %v7789_v56 = vld [vmem:[%s10546_s3 + $0x270] ss:$8 sps:$4 sm:$0xff]  }
  0x8a   : > { %3196 = vmatprep.mubr.bf16.mxu1 %v2935_v16  ;;  %v785_v34 = vsel %vm774_vm1, %v782_v21, %v784_v1  ;;  %v9035_v16 = vcombine.low %v974_v5, %v9024_v8  ;;  %v2943_v28 = vsel %vm372_vm0, %v2938_v7, %v2942_v40  ;;  %v2974_v1 = vrot.slane %v2972_v52, 1  ;;  %v7798_v5 = vld [vmem:[%s10546_s3 + $0x284] ss:$8 sps:$4 sm:$0xff]   ;;  %v7804_v13 = vld [vmem:[%s10546_s3 + $0x294] ss:$8 sps:$4 sm:$0xff]  }
  0x8b   : > { %1137 = vmatpush1.bf16.msra.mxu0 %v7763_v30  ;;  %v2952_v30 = vshrl.u32 %v8739_v22, 16  ;;  %v2967_v21 = vsel %vm372_vm0, %v2962_v37, %v2966_v12  ;;  %v7778_v22 = vld [vmem:[%s10546_s3 + $0x250] ss:$8 sps:$4 sm:$0xff]   ;;  %v7801_v7 = vld [vmem:[%s10545_s2 + $0x224] ss:$8 sps:$4 sm:$0xff]  }
  0x8c   : > { %3491 = vmatpush1.bf16.msra.mxu1 %v7757_v15  ;;  %1138 = vmatprep.subr.bf16.mxu0 %v7771_v25  ;;  %v7772_v15 = vld [vmem:[%s10546_s3 + $0x240] ss:$8 sps:$4 sm:$0xff]   ;;  %v2980_v25 = vshll.u32 %v8969_v26, 16  ;;  %v1030_v32 = vrot.slane %v9035_v16, 1 }
  0x8d   : > { %3492 = vmatprep.subr.bf16.mxu1 %v7762_v24  ;;  %v2976_v24 = vshrl.u32 %v8752_v31, 16  ;;  %v2954_v23 = vor.u32 %v2952_v30, %v2942_v40  ;;  %v7788_v31 = vld [vmem:[%s10546_s3 + $0x264] ss:$8 sps:$4 sm:$0xff]   ;;  %v7783_v26 = vld [vmem:[%s10545_s2 + $0x200] ss:$8 sps:$4 sm:$0xff]  }
  0x8e   : > { %934 = vmatmul.mubr.bf16.gmra.mrb[12].mxu0 %v783_v36  ;;  %v7786_v36 = vld [vmem:[%s10546_s3 + $0x260] ss:$8 sps:$4 sm:$0xff]   ;;  %v1032_v47 = vsel %vm774_vm1, %v1030_v32, %v1031_v33 }
  0x8f   : > { %3197 = vmatmul.mubr.bf16.gmra.mrb[4].mxu1 %v2927_v44  ;;  %943 = vmatprep.mubr.bf16.mxu0 %v8313_v2  ;;  %v2982_v44 = vrot.slane %v2980_v25, 1  ;;  %v2959_v48 = vsel %vm372_vm0, %v2954_v23, %v2958_v6  ;;  %v7796_v37 = vld [vmem:[%s10546_s3 + $0x280] ss:$8 sps:$4 sm:$0xff]   ;;  %v7817_v23 = vld [vmem:[%s10546_s3 + $0x2b4] ss:$8 sps:$4 sm:$0xff]  }
  0x90   : > { %3493 = vmatpush1.bf16.msra.mxu1 %v7760_v39  ;;  %1139 = vmatpush1.bf16.msra.mxu0 %v7769_v61  ;;  %v7791_v39 = vld [vmem:[%s10546_s3 + $0x274] ss:$8 sps:$4 sm:$0xff]   ;;  %v2968_v61 = vshrl.u32 %v8775_v38, 16  ;;  %v7828_v52 = vld [vmem:[%s10545_s2 + $0x260] ss:$8 sps:$4 sm:$0xff]  }
  0x91   : > { %3494 = vmatprep.subr.bf16.mxu1 %v7768_v41  ;;  %1140 = vmatprep.subr.bf16.mxu0 %v7777_v10  ;;  %v2978_v41 = vor.u32 %v2976_v24, %v2966_v12  ;;  %v9068_v10 = vld [vmem:[%s8556_s20] sm:$0xee]  ;;  %v1035_v24 = vrot.slane %v8909_v43, 1 }
  0x92   : > { %3206 = vmatprep.mubr.bf16.mxu1 %v2951_v62  ;;  %v2970_v62 = vor.u32 %v2968_v61, %v2958_v6  ;;  %v7799_v12 = vld [vmem:[%s10545_s2 + $0x220] ss:$8 sps:$4 sm:$0xff]   ;;  %v7827_v61 = vld [vmem:[%s10546_s3 + $0x2d4] ss:$8 sps:$4 sm:$0xff]  }
  0x93   : > { %v2983_v38 = vsel %vm372_vm0, %v2978_v41, %v2982_v44  ;;  %v7830_v41 = vld [vmem:[%s10545_s2 + $0x264] ss:$8 sps:$4 sm:$0xff]  }
  0x94   : > { %3495 = vmatpush1.bf16.msra.mxu1 %v7766_v58  ;;  %1141 = vmatpush1.bf16.msra.mxu0 %v7775_v59  ;;  %v7792_v58 = vld [vmem:[%s10545_s2 + $0x210] ss:$8 sps:$4 sm:$0xff]   ;;  %v1033_v59 = vrot.slane %v8865_v20, 1 }
  0x95   : > { %3496 = vmatprep.subr.bf16.mxu1 %v7774_v50  ;;  %1389 = vmatprep.subr.bf16.mxu0 %v7785_v9  ;;  %v6684_v50 = vcombine.high %v9068_v10, %v9081_v35 }
  0x96   : > { %944 = vmatmul.mubr.bf16.gmra.mrb[16].mxu0 %v785_v34  ;;  %v1034_v9 = vsel %vm774_vm1, %v1031_v33, %v1033_v59  ;;  %v2975_v34 = vsel %vm372_vm0, %v2970_v62, %v2974_v1  ;;  %v1036_v32 = vsel %vm774_vm1, %v1033_v59, %v1035_v24  ;;  %v7812_v33 = vld [vmem:[%s10545_s2 + $0x240] ss:$8 sps:$4 sm:$0xff]   ;;  %v7835_v62 = vld [vmem:[%s10546_s3 + $0x2e4] ss:$8 sps:$4 sm:$0xff]   ;;  %v1263_v1 = vshll.u32 %v8862_v18, 16 }
  0x97   : > { %3207 = vmatmul.mubr.bf16.gmra.mrb[8].mxu1 %v2943_v28  ;;  %1158 = vmatprep.mubr.bf16.mxu0 %v8313_v2  ;;  %v3299_v40 = vrot.slane %v6684_v50, 1  ;;  %v7807_v28 = vld [vmem:[%s10545_s2 + $0x234] ss:$8 sps:$4 sm:$0xff]   ;;  %v7825_v50 = vld [vmem:[%s10546_s3 + $0x2d0] ss:$8 sps:$4 sm:$0xff]  }
  0x98   : > { %3497 = vmatpush1.bf16.msra.mxu1 %v7772_v15  ;;  %3216 = vmatprep.mubr.bf16.mxu1 %v2967_v21  ;;  %v1492_v15 = vld [vmem:[%s8439_s8 + $0x4] sm:$0xc]  ;;  %v7805_v21 = vld [vmem:[%s10545_s2 + $0x230] ss:$8 sps:$4 sm:$0xff]  }
  0x99   : > { %3498 = vmatprep.subr.bf16.mxu1 %v7780_v51  ;;  %v6412_v30 = vcombine.low %v1492_v15, %v9024_v8  ;;  %v7802_v51 = vld [vmem:[%s10546_s3 + $0x290] ss:$8 sps:$4 sm:$0xff]   ;;  %v3301_v6 = vsel %vm774_vm1, %v3299_v40, %v3300_v42  ;;  %v7811_v8 = vld [vmem:[%s10546_s3 + $0x2a4] ss:$8 sps:$4 sm:$0xff]   ;;  %v7809_v42 = vld [vmem:[%s10546_s3 + $0x2a0] ss:$8 sps:$4 sm:$0xff]  }
  0x9a   : > { %v7840_v15 = vld [vmem:[%s10546_s3 + $0x2f0] ss:$8 sps:$4 sm:$0xff]  }
  0x9b   : > { %v1514_v25 = vrot.slane %v6412_v30, 2 }
  0x9c   : > { %3499 = vmatpush1.bf16.msra.mxu1 %v7778_v22  ;;  %v7814_v22 = vld [vmem:[%s10545_s2 + $0x244] ss:$8 sps:$4 sm:$0xff]  }
  0x9d   : > { %3500 = vmatprep.subr.bf16.mxu1 %v7788_v31  ;;  %v9129_v55 = vsel %vm1513_vm2, %v1514_v25, %v1515_v19  ;;  %v7824_v19 = vld [vmem:[%s10545_s2 + $0x254] ss:$8 sps:$4 sm:$0xff]   ;;  %v7815_v31 = vld [vmem:[%s10546_s3 + $0x2b0] ss:$8 sps:$4 sm:$0xff]   ;;  %v7848_v25 = vld [vmem:[%s10546_s3 + $0x300] ss:$8 sps:$4 sm:$0xff]  }
  0x9e   : > { %1159 = vmatmul.mubr.bf16.vlgmr.msra.gmra.mrb[0].mxu0 %v1032_v47  ;;  %v7819_v47 = vld [vmem:[%s10546_s3 + $0x2c0] ss:$8 sps:$4 sm:$0xff]  }
  0x9f   : > { %3217 = vmatmul.mubr.bf16.gmra.mrb[12].mxu1 %v2959_v48  ;;  %1390 = vmatpush1.bf16.msra.mxu0 %v7783_v26  ;;  %v7821_v26 = vld [vmem:[%s10546_s3 + $0x2c4] ss:$8 sps:$4 sm:$0xff]  }
  0xa0   : > { %3501 = vmatpush1.bf16.msra.mxu1 %v7786_v36  ;;  %1391 = vmatprep.subr.bf16.mxu0 %v7794_v53  ;;  %v1037_v36 = vrot.slane %v8945_v11, 1  ;;  %v7831_v48 = vld [vmem:[%s8439_s8 + $0x2c] ss:$0 sps:$4 sm:$0x11]   ;;  %v7839_v53 = vld [vmem:[%s10545_s2 + $0x274] ss:$8 sps:$4 sm:$0xff]  }
  0xa1   : > { %3502 = vmatprep.subr.bf16.mxu1 %v7791_v39  ;;  %1168 = vmatprep.mubr.bf16.mxu0 %v8313_v2  ;;  %v7822_v39 = vld [vmem:[%s10545_s2 + $0x250] ss:$8 sps:$4 sm:$0xff]   ;;  %v1039_v59 = vrot.slane %v7831_v48, 1  ;;  %v1287_v48 = vshrl.u32 %v8945_v11, 16 }
  0xa2   : > { %3226 = vmatprep.mubr.bf16.mxu1 %v2983_v38  ;;  %v1038_v44 = vsel %vm774_vm1, %v1035_v24, %v1037_v36  ;;  %v1260_v38 = vshrl.u32 %v8862_v18, 16  ;;  %v7833_v18 = vld [vmem:[%s10546_s3 + $0x2e0] ss:$8 sps:$4 sm:$0xff]  }
  0xa3   : > { %1392 = vmatpush1.bf16.msra.mxu0 %v7792_v58  ;;  %v1255_v58 = vshll.u32 %v9035_v16, 16 }
  0xa4   : > { %3503 = vmatpush1.bf16.msra.mxu1 %v7789_v56  ;;  %1393 = vmatprep.subr.bf16.mxu0 %v7801_v7  ;;  %v1252_v56 = vshrl.u32 %v9035_v16, 16  ;;  %v7837_v16 = vld [vmem:[%s10545_s2 + $0x270] ss:$8 sps:$4 sm:$0xff]  }
  0xa5   : > { %3504 = vmatprep.subr.bf16.mxu1 %v7798_v5  ;;  %v7845_v5 = vld [vmem:[%s10545_s2 + $0x284] ss:$8 sps:$4 sm:$0xff]   ;;  %v1257_v40 = vrot.slane %v1255_v58, 2 }
  0xa6   : > { %1169 = vmatmul.mubr.bf16.gmra.mrb[4].mxu0 %v1034_v9  ;;  %v1254_v7 = vrot.slane %v1252_v56, 1  ;;  %v1040_v9 = vsel %vm774_vm1, %v1037_v36, %v1039_v59  ;;  %v1280_v36 = vrot.slane %v1278_v60, 1  ;;  %v1290_v56 = vshll.u32 %v8945_v11, 16  ;;  %v7874_v58 = vld [vmem:[%s10545_s2 + $0x2c4] ss:$8 sps:$4 sm:$0xff]  }
  0xa7   : > { %3227 = vmatmul.mubr.bf16.gmra.mrb[16].mxu1 %v2975_v34  ;;  %1394 = vmatpush1.bf16.msra.mxu0 %v7799_v12  ;;  %v1265_v12 = vrot.slane %v1263_v1, 2  ;;  %v7842_v34 = vld [vmem:[%s10546_s3 + $0x2f4] ss:$8 sps:$4 sm:$0xff]   ;;  %v7872_v59 = vld [vmem:[%s10545_s2 + $0x2c0] ss:$8 sps:$4 sm:$0xff]  }
  0xa8   : > { %3505 = vmatpush1.bf16.msra.mxu1 %v7796_v37  ;;  %1178 = vmatprep.mubr.bf16.mxu0 %v8313_v2  ;;  %v1262_v37 = vrot.slane %v1260_v38, 1  ;;  %v1258_v30 = vor.u32 %v1257_v40, %v1254_v7  ;;  %v7869_v38 = vld [vmem:[%s10546_s3 + $0x340] ss:$8 sps:$4 sm:$0xff]   ;;  %v1292_v1 = vrot.slane %v1290_v56, 2  ;;  %v7875_v7 = vld [vmem:[%s10546_s3 + $0x350] ss:$8 sps:$4 sm:$0xff]  }
  0xa9   : > { %3506 = vmatprep.subr.bf16.mxu1 %v7804_v13  ;;  %1395 = vmatprep.subr.bf16.mxu0 %v7807_v28  ;;  %v6683_v13 = vcombine.low %v9068_v10, %v9081_v35  ;;  %v1269_v28 = vshrl.u32 %v8865_v20, 16  ;;  %v1272_v35 = vshll.u32 %v8865_v20, 16  ;;  %v7899_v60 = vld [vmem:[%s10546_s3 + $0x394] ss:$8 sps:$4 sm:$0xff]  }
  0xaa   : > { %3520 = vmatprep.mubr.bf16.mxu1 %v3301_v6  ;;  %v7843_v6 = vld [vmem:[%s10545_s2 + $0x280] ss:$8 sps:$4 sm:$0xff]   ;;  %v7921_v56 = vld [vmem:[%s10546_s3 + $0x3d4] ss:$8 sps:$4 sm:$0xff]  }
  0xab   : > { %1396 = vmatpush1.bf16.msra.mxu0 %v7805_v21  ;;  %v3296_v10 = vrot.slane %v6683_v13, 1  ;;  %v7850_v21 = vld [vmem:[%s10546_s3 + $0x304] ss:$8 sps:$4 sm:$0xff]   ;;  %v1271_v24 = vrot.slane %v1269_v28, 1  ;;  %v7878_v13 = vld [vmem:[%s10546_s3 + $0x360] ss:$8 sps:$4 sm:$0xff]  }
  0xac   : > { %3507 = vmatpush1.bf16.msra.mxu1 %v7802_v51  ;;  %1397 = vmatprep.subr.bf16.mxu0 %v7814_v22  ;;  %v1266_v51 = vor.u32 %v1265_v12, %v1262_v37  ;;  %v7853_v22 = vld [vmem:[%s10546_s3 + $0x314] ss:$8 sps:$4 sm:$0xff]   ;;  %v7880_v12 = vld [vmem:[%s10546_s3 + $0x364] ss:$8 sps:$4 sm:$0xff]  }
  0xad   : > { %3508 = vmatprep.subr.bf16.mxu1 %v7811_v8  ;;  %v3298_v20 = vsel %vm774_vm1, %v3296_v10, %v3297_v46  ;;  %v7854_v46 = vld [vmem:[%s10545_s2 + $0x290] ss:$8 sps:$4 sm:$0xff]   ;;  %v9543_v11 = vld [vmem:[%s8556_s20 + $0x4c] ss:$8 sps:$4 sm:$0xff]  }
  0xae   : > { %1179 = vmatmul.mubr.bf16.gmra.mrb[8].mxu0 %v1036_v32  ;;  %v1267_v8 = vsel %vm1250_vm3, %v1258_v30, %v1266_v51  ;;  %v7856_v32 = vld [vmem:[%s10545_s2 + $0x294] ss:$8 sps:$4 sm:$0xff]  }
  0xaf   : > { %1398 = vmatpush1.bf16.msra.mxu0 %v7812_v33  ;;  %1188 = vmatprep.mubr.bf16.mxu0 %v8313_v2  ;;  %v7851_v33 = vld [vmem:[%s10546_s3 + $0x310] ss:$8 sps:$4 sm:$0xff]   ;;  %v7886_v30 = vld [vmem:[%s10546_s3 + $0x374] ss:$8 sps:$4 sm:$0xff]  }
  0xb0   : > { %3509 = vmatpush1.bf16.msra.mxu1 %v7809_v42  ;;  %1399 = vmatprep.subr.bf16.mxu0 %v7824_v19  ;;  %v1274_v42 = vrot.slane %v1272_v35, 2  ;;  %v7859_v19 = vld [vmem:[%s10546_s3 + $0x324] ss:$8 sps:$4 sm:$0xff]   ;;  %v7887_v35 = vld [vmem:[%s10545_s2 + $0x2e0] ss:$8 sps:$4 sm:$0xff]  }
  0xb1   : > { %3510 = vmatprep.subr.bf16.mxu1 %v7817_v23 }
  0xb2   : > { %v1275_v23 = vor.u32 %v1274_v42, %v1271_v24  ;;  %v7884_v24 = vld [vmem:[%s10546_s3 + $0x370] ss:$8 sps:$4 sm:$0xff]  }
  0xb3   : > { %1400 = vmatpush1.bf16.msra.mxu0 %v7822_v39 }
  0xb4   : > { %3511 = vmatpush1.bf16.msra.mxu1 %v7815_v31  ;;  %1401 = vmatprep.subr.bf16.mxu0 %v7830_v41  ;;  %v1281_v31 = vshll.u32 %v8909_v43, 16  ;;  %v1276_v39 = vsel %vm1250_vm3, %v1266_v51, %v1275_v23  ;;  %v7857_v41 = vld [vmem:[%s10546_s3 + $0x320] ss:$8 sps:$4 sm:$0xff]  }
  0xb5   : > { %3512 = vmatprep.subr.bf16.mxu1 %v7821_v26  ;;  %v7862_v26 = vld [vmem:[%s10545_s2 + $0x2a4] ss:$8 sps:$4 sm:$0xff]   ;;  %v7860_v43 = vld [vmem:[%s10545_s2 + $0x2a0] ss:$8 sps:$4 sm:$0xff]  }
  0xb6   : > { %1189 = vmatmul.mubr.bf16.gmra.mrb[12].mxu0 %v1038_v44  ;;  %v1283_v44 = vrot.slane %v1281_v31, 2  ;;  %v9370_v31 = vld [vmem:[%s8439_s8 + $0x10] sm:$0xff]  }
  0xb7   : > { %1198 = vmatprep.mubr.bf16.mxu0 %v8313_v2  ;;  %1402 = vmatpush1.bf16.msra.mxu0 %v7828_v52  ;;  %v7866_v52 = vld [vmem:[%s10545_s2 + $0x2b0] ss:$8 sps:$4 sm:$0xff]  }
  0xb8   : > { %3513 = vmatpush1.bf16.msra.mxu1 %v7819_v47  ;;  %1403 = vmatprep.subr.bf16.mxu0 %v7839_v53  ;;  %v7868_v47 = vld [vmem:[%s10545_s2 + $0x2b4] ss:$8 sps:$4 sm:$0xff]   ;;  %v1284_v53 = vor.u32 %v1283_v44, %v1280_v36  ;;  %v7907_v44 = vld [vmem:[%s10546_s3 + $0x3b0] ss:$8 sps:$4 sm:$0xff]  }
  0xb9   : > { %3514 = vmatprep.subr.bf16.mxu1 %v7827_v61  ;;  %v7863_v61 = vld [vmem:[%s10546_s3 + $0x330] ss:$8 sps:$4 sm:$0xff]   ;;  %v7909_v36 = vld [vmem:[%s10546_s3 + $0x3b4] ss:$8 sps:$4 sm:$0xff]  }
  0xbb   : > { %1404 = vmatpush1.bf16.msra.mxu0 %v7837_v16  ;;  %v9277_v16 = vld [vmem:[%s8439_s8 + $0x2c] ss:$0 sps:$4 sm:$0x33]  }
  0xbc   : > { %3515 = vmatpush1.bf16.msra.mxu1 %v7825_v50  ;;  %1610 = vmatprep.subr.bf16.mxu0 %v7845_v5  ;;  %v1289_v50 = vrot.slane %v1287_v48, 1  ;;  %v7877_v5 = vld [vmem:[%s10546_s3 + $0x354] ss:$8 sps:$4 sm:$0xff]   ;;  %v1299_v37 = vshll.u32 %v9277_v16, 16  ;;  %v7915_v48 = vld [vmem:[%s10546_s3 + $0x3c4] ss:$8 sps:$4 sm:$0xff]  }
  0xbd   : > { %3516 = vmatprep.subr.bf16.mxu1 %v7835_v62  ;;  %v1285_v62 = vsel %vm1250_vm3, %v1275_v23, %v1284_v53  ;;  %v7906_v23 = vld [vmem:[%s10546_s3 + $0x3a4] ss:$8 sps:$4 sm:$0xff]  }
  0xbe   : > { %1199 = vmatmul.mubr.bf16.gmra.mrb[16].mxu0 %v1040_v9  ;;  %v1293_v40 = vor.u32 %v1292_v1, %v1289_v50  ;;  %v7881_v9 = vld [vmem:[%s10545_s2 + $0x2d0] ss:$8 sps:$4 sm:$0xff]   ;;  %v1301_v10 = vrot.slane %v1299_v37, 2  ;;  %v7925_v1 = vld [vmem:[%s10546_s3 + $0x3e0] ss:$8 sps:$4 sm:$0xff]  }
  0xbf   : > { %1421 = vmatprep.mubr.bf16.mxu0 %v8313_v2  ;;  %v7919_v50 = vld [vmem:[%s10546_s3 + $0x3d0] ss:$8 sps:$4 sm:$0xff]  }
  0xc0   : > { %3517 = vmatpush1.bf16.msra.mxu1 %v7833_v18  ;;  %v1296_v18 = vshrl.u32 %v9277_v16, 16  ;;  %v1294_v28 = vsel %vm1250_vm3, %v1284_v53, %v1293_v40  ;;  %v7916_v53 = vld [vmem:[%s10545_s2 + $0x320] ss:$8 sps:$4 sm:$0xff]  }
  0xc1   : > { %3518 = vmatprep.subr.bf16.mxu1 %v7842_v34  ;;  %v9306_v34 = vld [vmem:[%s8556_s20 + $0x8] sm:$0xee] }
  0xc2   : > { %v1298_v51 = vrot.slane %v1296_v18, 1  ;;  %v9449_v18 = vld [vmem:[%s8556_s20 + $0x18] ss:$8 sps:$4 sm:$0xff]  }
  0xc4   : > { %3519 = vmatpush1.bf16.msra.mxu1 %v7840_v15  ;;  %v9309_v15 = vld [vmem:[%s8556_s20 + $0x10] sm:$0xff] }
  0xc5   : > { %3872 = vmatprep.subr.bf16.mxu1 %v7850_v21  ;;  %v9323_v21 = vcombine.high %v9306_v34, %v9309_v15 }
  0xc6   : > { %1422 = vmatmul.mubr.bf16.vlgmr.msra.gmra.mrb[0].mxu0 %v1267_v8  ;;  %v1302_v8 = vor.u32 %v1301_v10, %v1298_v51  ;;  %v7942_v10 = vld [vmem:[%s10545_s2 + $0x350] ss:$8 sps:$4 sm:$0xff]  }
  0xc7   : > { %3521 = vmatmul.mubr.bf16.vlgmr.msra.gmra.mrb[0].mxu1 %v3298_v20  ;;  %1611 = vmatpush1.bf16.msra.mxu0 %v7843_v6  ;;  %v9326_v6 = vld [vmem:[%s8556_s20 + $0x1c] ss:$8 sps:$4 sm:$0xff]   ;;  %v7894_v20 = vld [vmem:[%s10545_s2 + $0x2f0] ss:$8 sps:$4 sm:$0xff]  }
  0xc8   : > { %3873 = vmatpush1.bf16.msra.mxu1 %v7848_v25  ;;  %1612 = vmatprep.subr.bf16.mxu0 %v7856_v32  ;;  %v7893_v25 = vld [vmem:[%s10546_s3 + $0x384] ss:$8 sps:$4 sm:$0xff]   ;;  %v3684_v42 = vrot.slane %v9326_v6, 1  ;;  %v1303_v32 = vsel %vm1250_vm3, %v1293_v40, %v1302_v8  ;;  %v2231_v40 = vld [vmem:[%s8439_s8 + $0x8] sm:$0x8] }
  0xc9   : > { %3874 = vmatprep.subr.bf16.mxu1 %v7853_v22  ;;  %1431 = vmatprep.mubr.bf16.mxu0 %v8313_v2  ;;  %v3683_v22 = vrot.slane %v9323_v21, 1  ;;  %v7939_v8 = vld [vmem:[%s10546_s3 + $0x400] ss:$8 sps:$4 sm:$0xff]  }
  0xca   : > { %3530 = vmatprep.mubr.bf16.mxu1 %v8795_v49  ;;  %v7865_v49 = vld [vmem:[%s10546_s3 + $0x334] ss:$8 sps:$4 sm:$0xff]  }
  0xcb   : > { %1613 = vmatpush1.bf16.msra.mxu0 %v7854_v46  ;;  %v7897_v46 = vld [vmem:[%s10546_s3 + $0x390] ss:$8 sps:$4 sm:$0xff]  }
  0xcc   : > { %3875 = vmatpush1.bf16.msra.mxu1 %v7851_v33  ;;  %1614 = vmatprep.subr.bf16.mxu0 %v7862_v26  ;;  %v7891_v33 = vld [vmem:[%s10546_s3 + $0x380] ss:$8 sps:$4 sm:$0xff]   ;;  %v9373_v26 = vld [vmem:[%s8439_s8 + $0x18] sm:$0xff]  }
  0xcd   : > { %3876 = vmatprep.subr.bf16.mxu1 %v7859_v19  ;;  %v7901_v19 = vld [vmem:[%s10545_s2 + $0x300] ss:$8 sps:$4 sm:$0xff]  }
  0xce   : > { %1432 = vmatmul.mubr.bf16.gmra.mrb[4].mxu0 %v1276_v39  ;;  %v7912_v39 = vld [vmem:[%s10545_s2 + $0x314] ss:$8 sps:$4 sm:$0xff]  }
  0xcf   : > { %3531 = vmatmul.mubr.bf16.gmra.mrb[4].mxu1 %v8807_v54  ;;  %1615 = vmatpush1.bf16.msra.mxu0 %v7860_v43  ;;  %v7871_v54 = vld [vmem:[%s10546_s3 + $0x344] ss:$8 sps:$4 sm:$0xff]   ;;  %v2256_v43 = vrot.slane %v9373_v26, 3 }
  0xd0   : > { %3877 = vmatpush1.bf16.msra.mxu1 %v7857_v41  ;;  %1441 = vmatprep.mubr.bf16.mxu0 %v8313_v2  ;;  %v2254_v41 = vrot.slane %v9370_v31, 3 }
  0xd1   : > { %3878 = vmatprep.subr.bf16.mxu1 %v7865_v49  ;;  %1616 = vmatprep.subr.bf16.mxu0 %v7868_v47  ;;  %v7910_v49 = vld [vmem:[%s10545_s2 + $0x310] ss:$8 sps:$4 sm:$0xff]  }
  0xd2   : > { %3540 = vmatprep.mubr.bf16.mxu1 %v8827_v4  ;;  %v7883_v4 = vld [vmem:[%s10545_s2 + $0x2d4] ss:$8 sps:$4 sm:$0xff]   ;;  %v9391_v47 = vsel %vm2252_vm4, %v2254_v41, %v2256_v43 }
  0xd3   : > { %1617 = vmatpush1.bf16.msra.mxu0 %v7866_v52  ;;  %v9404_v52 = vld [vmem:[%s8439_s8 + $0x20] sm:$0xff]  }
  0xd4   : > { %3879 = vmatpush1.bf16.msra.mxu1 %v7863_v61  ;;  %1618 = vmatprep.subr.bf16.mxu0 %v7874_v58  ;;  %v7913_v61 = vld [vmem:[%s10546_s3 + $0x3c0] ss:$8 sps:$4 sm:$0xff]   ;;  %v7924_v58 = vld [vmem:[%s10545_s2 + $0x334] ss:$8 sps:$4 sm:$0xff]  }
  0xd5   : > { %3880 = vmatprep.subr.bf16.mxu1 %v7871_v54  ;;  %v2258_v54 = vrot.slane %v9404_v52, 3 }
  0xd6   : > { %1442 = vmatmul.mubr.bf16.gmra.mrb[8].mxu0 %v1285_v62  ;;  %v7927_v62 = vld [vmem:[%s10546_s3 + $0x3e4] ss:$8 sps:$4 sm:$0xff]  }
  0xd7   : > { %3541 = vmatmul.mubr.bf16.gmra.mrb[8].mxu1 %v8836_v29  ;;  %1619 = vmatpush1.bf16.msra.mxu0 %v7872_v59  ;;  %v7889_v29 = vld [vmem:[%s10545_s2 + $0x2e4] ss:$8 sps:$4 sm:$0xff]   ;;  %v7922_v59 = vld [vmem:[%s10545_s2 + $0x330] ss:$8 sps:$4 sm:$0xff]  }
  0xd8   : > { %3881 = vmatpush1.bf16.msra.mxu1 %v7869_v38  ;;  %1451 = vmatprep.mubr.bf16.mxu0 %v8313_v2  ;;  %v9418_v38 = vsel %vm2252_vm4, %v2256_v43, %v2258_v54 }
  0xd9   : > { %3882 = vmatprep.subr.bf16.mxu1 %v7877_v5  ;;  %1620 = vmatprep.subr.bf16.mxu0 %v7883_v4  ;;  %v7928_v5 = vld [vmem:[%s10545_s2 + $0x340] ss:$8 sps:$4 sm:$0xff]   ;;  %v1714_v4 = vld [vmem:[%s8439_s8 + $0xc] sm:$0xf] }
  0xda   : > { %3550 = vmatprep.mubr.bf16.mxu1 %v8900_v45  ;;  %v7896_v45 = vld [vmem:[%s10545_s2 + $0x2f4] ss:$8 sps:$4 sm:$0xff]   ;;  %v6516_v37 = vcombine.low %v2231_v40, %v1714_v4 }
  0xdb   : > { %1621 = vmatpush1.bf16.msra.mxu0 %v7881_v9  ;;  %v9446_v9 = vcombine.low %v9306_v34, %v9309_v15  ;;  %v7944_v34 = vld [vmem:[%s10545_s2 + $0x354] ss:$8 sps:$4 sm:$0xff]  }
  0xdc   : > { %3883 = vmatpush1.bf16.msra.mxu1 %v7875_v7  ;;  %1622 = vmatprep.subr.bf16.mxu0 %v7889_v29  ;;  %v9441_v7 = vld [vmem:[%s8439_s8 + $0x28] sm:$0xff]   ;;  %v2253_v15 = vrot.slane %v6516_v37, 3  ;;  %v7973_v40 = vld [vmem:[%s10545_s2 + $0x394] ss:$8 sps:$4 sm:$0xff]   ;;  %v7968_v37 = vld [vmem:[%s10546_s3 + $0x450] ss:$8 sps:$4 sm:$0xff]  }
  0xdd   : > { %3884 = vmatprep.subr.bf16.mxu1 %v7880_v12  ;;  %v7933_v12 = vld [vmem:[%s10546_s3 + $0x3f4] ss:$8 sps:$4 sm:$0xff]   ;;  %v2260_v29 = vrot.slane %v9441_v7, 3 }
  0xde   : > { %1452 = vmatmul.mubr.bf16.gmra.mrb[12].mxu0 %v1294_v28  ;;  %v7941_v28 = vld [vmem:[%s10546_s3 + $0x404] ss:$8 sps:$4 sm:$0xff]  }
  0xdf   : > { %3551 = vmatmul.mubr.bf16.gmra.mrb[12].mxu1 %v8917_v57  ;;  %1461 = vmatprep.mubr.bf16.mxu0 %v8313_v2  ;;  %v7903_v57 = vld [vmem:[%s10545_s2 + $0x304] ss:$8 sps:$4 sm:$0xff]   ;;  %v9471_v51 = vsel %vm2252_vm4, %v2258_v54, %v2260_v29 }
  0xe0   : > { %3885 = vmatpush1.bf16.msra.mxu1 %v7878_v13  ;;  %1623 = vmatpush1.bf16.msra.mxu0 %v7887_v35  ;;  %v7931_v13 = vld [vmem:[%s10546_s3 + $0x3f0] ss:$8 sps:$4 sm:$0xff]   ;;  %v3681_v35 = vrot.slane %v9449_v18, 1  ;;  %v7967_v54 = vld [vmem:[%s10546_s3 + $0x444] ss:$8 sps:$4 sm:$0xff]  }
  0xe1   : > { %3886 = vmatprep.subr.bf16.mxu1 %v7886_v30  ;;  %1624 = vmatprep.subr.bf16.mxu0 %v7896_v45  ;;  %v9466_v30 = vld [vmem:[%s8556_s20 + $0x2c] ss:$8 sps:$4 sm:$0xff]   ;;  %v9479_v45 = vsel %vm2252_vm4, %v2253_v15, %v2254_v41  ;;  %v1772_v15 = vrot.slane %v9373_v26, 2 }
  0xe2   : > { %3560 = vmatprep.mubr.bf16.mxu1 %v8997_v63  ;;  %v3685_v63 = vsel %vm774_vm1, %v3683_v22, %v3684_v42  ;;  %v9494_v22 = vld [vmem:[%s8556_s20 + $0x28] ss:$8 sps:$4 sm:$0xff]  }
  0xe4   : > { %3887 = vmatpush1.bf16.msra.mxu1 %v7884_v24  ;;  %1625 = vmatpush1.bf16.msra.mxu0 %v7894_v20  ;;  %v7950_v24 = vld [vmem:[%s10545_s2 + $0x364] ss:$8 sps:$4 sm:$0xff]   ;;  %v3688_v20 = vrot.slane %v9466_v30, 1 }
  0xe5   : > { %3888 = vmatprep.subr.bf16.mxu1 %v7893_v25  ;;  %1865 = vmatprep.subr.bf16.mxu0 %v7903_v57  ;;  %v7947_v25 = vld [vmem:[%s10546_s3 + $0x414] ss:$8 sps:$4 sm:$0xff]  }
  0xe6   : > { %1462 = vmatmul.mubr.bf16.gmra.mrb[16].mxu0 %v1303_v32  ;;  %v7948_v32 = vld [vmem:[%s10545_s2 + $0x360] ss:$8 sps:$4 sm:$0xff]  }
  0xe7   : > { %3561 = vmatmul.mubr.bf16.gmra.mrb[16].mxu1 %v9018_v17  ;;  %1642 = vmatprep.mubr.bf16.mxu0 %v8313_v2  ;;  %v7904_v17 = vld [vmem:[%s10546_s3 + $0x3a0] ss:$8 sps:$4 sm:$0xff]  }
  0xe8   : > { %3889 = vmatpush1.bf16.msra.mxu1 %v7891_v33  ;;  %3904 = vmatprep.mubr.bf16.mxu1 %v3685_v63  ;;  %v7956_v33 = vld [vmem:[%s10545_s2 + $0x374] ss:$8 sps:$4 sm:$0xff]   ;;  %v7945_v63 = vld [vmem:[%s10546_s3 + $0x410] ss:$8 sps:$4 sm:$0xff]  }
  0xe9   : > { %3890 = vmatprep.subr.bf16.mxu1 %v7899_v60  ;;  %v9503_v60 = vld [vmem:[%s8556_s20 + $0x3c] ss:$8 sps:$4 sm:$0xff]  }
  0xec   : > { %3891 = vmatpush1.bf16.msra.mxu1 %v7897_v46  ;;  %v7953_v46 = vld [vmem:[%s10546_s3 + $0x424] ss:$8 sps:$4 sm:$0xff]  }
  0xed   : > { %3892 = vmatprep.subr.bf16.mxu1 %v7906_v23  ;;  %v3689_v23 = vsel %vm774_vm1, %v3684_v42, %v3688_v20  ;;  %v7964_v42 = vld [vmem:[%s10545_s2 + $0x384] ss:$8 sps:$4 sm:$0xff]  }
  0xee   : > { %1643 = vmatmul.mubr.bf16.vlgmr.msra.gmra.mrb[0].mxu0 %v9129_v55  ;;  %v7918_v55 = vld [vmem:[%s10545_s2 + $0x324] ss:$8 sps:$4 sm:$0xff]  }
  0xef   : > { %1866 = vmatpush1.bf16.msra.mxu0 %v7901_v19  ;;  %1652 = vmatprep.mubr.bf16.mxu0 %v8313_v2  ;;  %v1523_v19 = vrot.slane %v9277_v16, 2  ;;  %v7951_v16 = vld [vmem:[%s10546_s3 + $0x420] ss:$8 sps:$4 sm:$0xff]  }
  0xf0   : > { %3893 = vmatpush1.bf16.msra.mxu1 %v7904_v17  ;;  %1867 = vmatprep.subr.bf16.mxu0 %v7912_v39  ;;  %v3686_v17 = vrot.slane %v9494_v22, 1  ;;  %v3692_v39 = vrot.slane %v9503_v60, 1 }
  0xf1   : > { %3894 = vmatprep.subr.bf16.mxu1 %v7909_v36  ;;  %v1713_v36 = vld [vmem:[%s8439_s8 + $0x8] sm:$0xc]  ;;  %v1524_v41 = vsel %vm1513_vm2, %v1521_v3, %v1523_v19  ;;  %v7957_v3 = vld [vmem:[%s10546_s3 + $0x430] ss:$8 sps:$4 sm:$0xff]  }
  0xf2   : > { %v9532_v43 = vcombine.low %v1713_v36, %v1714_v4  ;;  %v3601_v4 = vld [vmem:[%s8556_s20 + $0x58] sm:$0x11] }
  0xf3   : > { %1868 = vmatpush1.bf16.msra.mxu0 %v7910_v49  ;;  %v9536_v49 = vld [vmem:[%s8556_s20 + $0x38] ss:$8 sps:$4 sm:$0xff]  }
  0xf4   : > { %3895 = vmatpush1.bf16.msra.mxu1 %v7907_v44  ;;  %1869 = vmatprep.subr.bf16.mxu0 %v7918_v55  ;;  %v3687_v44 = vsel %vm774_vm1, %v3681_v35, %v3686_v17  ;;  %v3693_v55 = vsel %vm774_vm1, %v3688_v20, %v3692_v39  ;;  %v4040_v20 = vshrl.u32 %v9326_v6, 16 }
  0xf5   : > { %3896 = vmatprep.subr.bf16.mxu1 %v7915_v48  ;;  %v7959_v48 = vld [vmem:[%s10546_s3 + $0x434] ss:$8 sps:$4 sm:$0xff]  }
  0xf6   : > { %1653 = vmatmul.mubr.bf16.gmra.mrb[4].mxu0 %v8881_v27  ;;  %v7930_v27 = vld [vmem:[%s10545_s2 + $0x344] ss:$8 sps:$4 sm:$0xff]  }
  0xf7   : > { %1870 = vmatpush1.bf16.msra.mxu0 %v7916_v53  ;;  %1662 = vmatprep.mubr.bf16.mxu0 %v8313_v2  ;;  %v1770_v53 = vrot.slane %v9370_v31, 2 }
  0xf8   : > { %3897 = vmatpush1.bf16.msra.mxu1 %v7913_v61  ;;  %1871 = vmatprep.subr.bf16.mxu0 %v7924_v58  ;;  %v1769_v61 = vrot.slane %v9532_v43, 2  ;;  %v7962_v58 = vld [vmem:[%s10545_s2 + $0x380] ss:$8 sps:$4 sm:$0xff]  }
  0xf9   : > { %3898 = vmatprep.subr.bf16.mxu1 %v7921_v56  ;;  %v3690_v56 = vrot.slane %v9536_v49, 1 }
  0xfb   : > { %1872 = vmatpush1.bf16.msra.mxu0 %v7922_v59  ;;  %v7970_v59 = vld [vmem:[%s10546_s3 + $0x454] ss:$8 sps:$4 sm:$0xff]  }
  0xfc   : > { %3899 = vmatpush1.bf16.msra.mxu1 %v7919_v50  ;;  %1873 = vmatprep.subr.bf16.mxu0 %v7930_v27  ;;  %v7965_v50 = vld [vmem:[%s10546_s3 + $0x440] ss:$8 sps:$4 sm:$0xff]  }
  0xfd   : > { %3900 = vmatprep.subr.bf16.mxu1 %v7927_v62  ;;  %v3696_v62 = vrot.slane %v9543_v11, 1  ;;  %v9566_v27 = vld [vmem:[%s8556_s20 + $0x48] ss:$8 sps:$4 sm:$0xff]  }
  0xfe   : > { %1663 = vmatmul.mubr.bf16.gmra.mrb[8].mxu0 %v8930_v0  ;;  %v3680_v0 = vrot.slane %v9446_v9, 1 }
  0xff   : > { %1874 = vmatpush1.bf16.msra.mxu0 %v7928_v5  ;;  %1672 = vmatprep.mubr.bf16.mxu0 %v8313_v2  ;;  %v3691_v5 = vsel %vm774_vm1, %v3686_v17, %v3690_v56 }
 0x100   : > { %3901 = vmatpush1.bf16.msra.mxu1 %v7925_v1  ;;  %1875 = vmatprep.subr.bf16.mxu0 %v7944_v34  ;;  %v3682_v57 = vsel %vm774_vm1, %v3680_v0, %v3681_v35  ;;  %v1771_v1 = vsel %vm1513_vm2, %v1769_v61, %v1770_v53  ;;  %v6760_v34 = vcombine.high %v3601_v4, %v3601_v4  ;;  %v7980_v0 = vld [vmem:[%s10545_s2 + $0x3a4] ss:$8 sps:$4 sm:$0xff]   ;;  %v4032_v35 = vshrl.u32 %v9323_v21, 16 }
 0x101   : > { %3902 = vmatprep.subr.bf16.mxu1 %v7933_v12  ;;  %v7971_v12 = vld [vmem:[%s10545_s2 + $0x390] ss:$8 sps:$4 sm:$0xff]  }
 0x102   : > { %v4034_v19 = vrot.slane %v4032_v35, 1  ;;  %v1994_v35 = vshll.u32 %v9532_v43, 16 }
 0x103   : > { %1876 = vmatpush1.bf16.msra.mxu0 %v7942_v10  ;;  %v3694_v10 = vrot.slane %v9566_v27, 1 }
 0x104   : > { %3903 = vmatpush1.bf16.msra.mxu1 %v7931_v13  ;;  %1877 = vmatprep.subr.bf16.mxu0 %v7950_v24  ;;  %v3697_v13 = vsel %vm774_vm1, %v3692_v39, %v3696_v62  ;;  %v4035_v24 = vshll.u32 %v9323_v21, 16  ;;  %v6759_v21 = vcombine.low %v3601_v4, %v3601_v4  ;;  %v8005_v4 = vld [vmem:[%s10546_s3 + $0x4a4] ss:$8 sps:$4 sm:$0xff]  }
 0x105   : > { %4290 = vmatprep.subr.bf16.mxu1 %v7941_v28  ;;  %v7977_v28 = vld [vmem:[%s10546_s3 + $0x464] ss:$8 sps:$4 sm:$0xff]  }
 0x106   : > { %1673 = vmatmul.mubr.bf16.gmra.mrb[12].mxu0 %v8974_v14  ;;  %v7954_v14 = vld [vmem:[%s10545_s2 + $0x370] ss:$8 sps:$4 sm:$0xff]   ;;  %v4037_v36 = vrot.slane %v4035_v24, 2  ;;  %v1999_v24 = vshrl.u32 %v9370_v31, 16 }
 0x107   : > { %3905 = vmatmul.mubr.bf16.vlgmr.msra.gmra.mrb[0].mxu1 %v3682_v57  ;;  %1682 = vmatprep.mubr.bf16.mxu0 %v8313_v2  ;;  %v4043_v57 = vshll.u32 %v9326_v6, 16  ;;  %v7981_v6 = vld [vmem:[%s10546_s3 + $0x470] ss:$8 sps:$4 sm:$0xff]  }
 0x108   : > { %4291 = vmatpush1.bf16.msra.mxu1 %v7939_v8  ;;  %1878 = vmatpush1.bf16.msra.mxu0 %v7948_v32  ;;  %v7975_v8 = vld [vmem:[%s10546_s3 + $0x460] ss:$8 sps:$4 sm:$0xff]   ;;  %v1773_v32 = vsel %vm1513_vm2, %v1770_v53, %v1772_v15 }
 0x109   : > { %4292 = vmatprep.subr.bf16.mxu1 %v7947_v25  ;;  %1879 = vmatprep.subr.bf16.mxu0 %v7956_v33  ;;  %v3700_v25 = vrot.slane %v6760_v34, 1  ;;  %v7978_v33 = vld [vmem:[%s10545_s2 + $0x3a0] ss:$8 sps:$4 sm:$0xff]   ;;  %v4045_v39 = vrot.slane %v4043_v57, 2  ;;  %v8012_v34 = vld [vmem:[%s10546_s3 + $0x4b4] ss:$8 sps:$4 sm:$0xff]  }
 0x10a   : > { %3914 = vmatprep.mubr.bf16.mxu1 %v3689_v23  ;;  %v7986_v23 = vld [vmem:[%s10545_s2 + $0x3b4] ss:$8 sps:$4 sm:$0xff]   ;;  %v8023_v57 = vld [vmem:[%s10545_s2 + $0x3f0] ss:$8 sps:$4 sm:$0xff]  }
 0x10b   : > { %v3701_v17 = vsel %vm774_vm1, %v3696_v62, %v3700_v25  ;;  %v7997_v62 = vld [vmem:[%s10546_s3 + $0x490] ss:$8 sps:$4 sm:$0xff]   ;;  %v8021_v25 = vld [vmem:[%s10546_s3 + $0x4c4] ss:$8 sps:$4 sm:$0xff]  }
 0x10c   : > { %4293 = vmatpush1.bf16.msra.mxu1 %v7945_v63  ;;  %1880 = vmatpush1.bf16.msra.mxu0 %v7954_v14  ;;  %v3695_v63 = vsel %vm774_vm1, %v3690_v56, %v3694_v10  ;;  %v7984_v14 = vld [vmem:[%s10545_s2 + $0x3b0] ss:$8 sps:$4 sm:$0xff]   ;;  %v7994_v56 = vld [vmem:[%s10545_s2 + $0x3c0] ss:$8 sps:$4 sm:$0xff]  }
 0x10d   : > { %4294 = vmatprep.subr.bf16.mxu1 %v7953_v46  ;;  %2128 = vmatprep.subr.bf16.mxu0 %v7964_v42  ;;  %v7983_v46 = vld [vmem:[%s10546_s3 + $0x474] ss:$8 sps:$4 sm:$0xff]   ;;  %v4042_v42 = vrot.slane %v4040_v20, 1  ;;  %v2002_v20 = vshll.u32 %v9370_v31, 16  ;;  %v8019_v31 = vld [vmem:[%s10546_s3 + $0x4c0] ss:$8 sps:$4 sm:$0xff]  }
 0x10e   : > { %1683 = vmatmul.mubr.bf16.gmra.mrb[16].mxu0 %v1524_v41  ;;  %v7992_v41 = vld [vmem:[%s10546_s3 + $0x484] ss:$8 sps:$4 sm:$0xff]  }
 0x10f   : > { %3915 = vmatmul.mubr.bf16.gmra.mrb[4].mxu1 %v3687_v44  ;;  %1897 = vmatprep.mubr.bf16.mxu0 %v8313_v2  ;;  %v3698_v44 = vrot.slane %v6759_v21, 1  ;;  %v9626_v61 = vor.u32 %v4045_v39, %v4042_v42  ;;  %v2001_v21 = vrot.slane %v1999_v24, 2  ;;  %v8026_v42 = vld [vmem:[%s10546_s3 + $0x4d0] ss:$8 sps:$4 sm:$0xff]  }
 0x110   : > { %4295 = vmatpush1.bf16.msra.mxu1 %v7951_v16  ;;  %3924 = vmatprep.mubr.bf16.mxu1 %v3693_v55  ;;  %v1774_v16 = vrot.slane %v9404_v52, 2  ;;  %v7990_v55 = vld [vmem:[%s10546_s3 + $0x480] ss:$8 sps:$4 sm:$0xff]  }
 0x111   : > { %4296 = vmatprep.subr.bf16.mxu1 %v7959_v48  ;;  %v7996_v48 = vld [vmem:[%s10545_s2 + $0x3c4] ss:$8 sps:$4 sm:$0xff]  }
 0x112   : > { %v1775_v53 = vsel %vm1513_vm2, %v1772_v15, %v1774_v16  ;;  %v8013_v15 = vld [vmem:[%s10545_s2 + $0x3e0] ss:$8 sps:$4 sm:$0xff]  }
 0x114   : > { %4297 = vmatpush1.bf16.msra.mxu1 %v7957_v3  ;;  %v4038_v3 = vor.u32 %v4037_v36, %v4034_v19  ;;  %v2011_v19 = vshll.u32 %v9373_v26, 16  ;;  %v4023_v36 = vshrl.u32 %v9449_v18, 16 }
 0x115   : > { %4298 = vmatprep.subr.bf16.mxu1 %v7967_v54  ;;  %v3699_v54 = vsel %vm774_vm1, %v3694_v10, %v3698_v44  ;;  %v8010_v10 = vld [vmem:[%s10546_s3 + $0x4b0] ss:$8 sps:$4 sm:$0xff]  }
 0x116   : > { %1898 = vmatmul.mubr.bf16.vlgmr.msra.gmra.mrb[0].mxu0 %v1771_v1  ;;  %v1776_v1 = vrot.slane %v9441_v7, 2  ;;  %v2013_v44 = vrot.slane %v2011_v19, 3 }
 0x117   : > { %3925 = vmatmul.mubr.bf16.gmra.mrb[8].mxu1 %v3691_v5  ;;  %2129 = vmatpush1.bf16.msra.mxu0 %v7962_v58  ;;  %v7999_v58 = vld [vmem:[%s10546_s3 + $0x494] ss:$8 sps:$4 sm:$0xff]   ;;  %v8006_v5 = vld [vmem:[%s10545_s2 + $0x3d0] ss:$8 sps:$4 sm:$0xff]  }
 0x118   : > { %4299 = vmatpush1.bf16.msra.mxu1 %v7965_v50  ;;  %2130 = vmatprep.subr.bf16.mxu0 %v7973_v40  ;;  %v8008_v50 = vld [vmem:[%s10545_s2 + $0x3d4] ss:$8 sps:$4 sm:$0xff]   ;;  %v8015_v40 = vld [vmem:[%s10545_s2 + $0x3e4] ss:$8 sps:$4 sm:$0xff]  }
 0x119   : > { %4300 = vmatprep.subr.bf16.mxu1 %v7970_v59  ;;  %1907 = vmatprep.mubr.bf16.mxu0 %v8313_v2  ;;  %v4047_v59 = vsel %vm1250_vm3, %v4038_v3, %v9626_v61  ;;  %v4025_v3 = vrot.slane %v4023_v36, 1  ;;  %v4070_v36 = vshll.u32 %v9536_v49, 16 }
 0x11a   : > { %3934 = vmatprep.mubr.bf16.mxu1 %v3697_v13  ;;  %v8016_v13 = vld [vmem:[%s8439_s8 + $0x30] ss:$0 sps:$4 sm:$0x33]  }
 0x11b   : > { %2131 = vmatpush1.bf16.msra.mxu0 %v7971_v12  ;;  %v1777_v12 = vsel %vm1513_vm2, %v1774_v16, %v1776_v1 }
 0x11c   : > { %4301 = vmatpush1.bf16.msra.mxu1 %v7968_v37  ;;  %2132 = vmatprep.subr.bf16.mxu0 %v7980_v0  ;;  %v8003_v37 = vld [vmem:[%s10546_s3 + $0x4a0] ss:$8 sps:$4 sm:$0xff]   ;;  %v1991_v0 = vshrl.u32 %v9532_v43, 16  ;;  %v8031_v43 = vld [vmem:[%s10545_s2 + $0x404] ss:$8 sps:$4 sm:$0xff]  }
 0x11d   : > { %4302 = vmatprep.subr.bf16.mxu1 %v7977_v28  ;;  %v8025_v28 = vld [vmem:[%s10545_s2 + $0x3f4] ss:$8 sps:$4 sm:$0xff]  }
 0x11e   : > { %1908 = vmatmul.mubr.bf16.gmra.mrb[4].mxu0 %v1773_v32  ;;  %v1993_v32 = vrot.slane %v1991_v0, 2 }
 0x11f   : > { %3935 = vmatmul.mubr.bf16.gmra.mrb[12].mxu1 %v3695_v63  ;;  %2133 = vmatpush1.bf16.msra.mxu0 %v7978_v33  ;;  %v1996_v33 = vrot.slane %v1994_v35, 3 }
 0x120   : > { %4303 = vmatpush1.bf16.msra.mxu1 %v7975_v8  ;;  %1917 = vmatprep.mubr.bf16.mxu0 %v8313_v2  ;;  %v1778_v8 = vrot.slane %v8016_v13, 2 }
 0x121   : > { %4304 = vmatprep.subr.bf16.mxu1 %v7983_v46  ;;  %2134 = vmatprep.subr.bf16.mxu0 %v7986_v23  ;;  %v2004_v46 = vrot.slane %v2002_v20, 3  ;;  %v2008_v23 = vshrl.u32 %v9373_v26, 16  ;;  %v1997_v39 = vor.u32 %v1996_v33, %v1993_v32  ;;  %v8035_v26 = vld [vmem:[%s10546_s3 + $0x4e4] ss:$8 sps:$4 sm:$0xff]   ;;  %v8043_v20 = vld [vmem:[%s10546_s3 + $0x500] ss:$8 sps:$4 sm:$0xff]  }
 0x122   : > { %3944 = vmatprep.mubr.bf16.mxu1 %v3701_v17  ;;  %v1779_v63 = vsel %vm1513_vm2, %v1776_v1, %v1778_v8  ;;  %v4018_v17 = vshll.u32 %v9446_v9, 16  ;;  %v8037_v1 = vld [vmem:[%s10546_s3 + $0x4f0] ss:$8 sps:$4 sm:$0xff]   ;;  %v4076_v8 = vshrl.u32 %v9503_v60, 16 }
 0x123   : > { %2135 = vmatpush1.bf16.msra.mxu0 %v7984_v14  ;;  %v4015_v14 = vshrl.u32 %v9446_v9, 16  ;;  %v2005_v16 = vor.u32 %v2004_v46, %v2001_v21  ;;  %v2010_v9 = vrot.slane %v2008_v23, 2  ;;  %v8052_v21 = vld [vmem:[%s10545_s2 + $0x430] ss:$8 sps:$4 sm:$0xff]   ;;  %v8054_v46 = vld [vmem:[%s10545_s2 + $0x434] ss:$8 sps:$4 sm:$0xff]  }
 0x124   : > { %4305 = vmatpush1.bf16.msra.mxu1 %v7981_v6  ;;  %2136 = vmatprep.subr.bf16.mxu0 %v7996_v48  ;;  %v8028_v6 = vld [vmem:[%s10546_s3 + $0x4d4] ss:$8 sps:$4 sm:$0xff]   ;;  %v4067_v23 = vshrl.u32 %v9536_v49, 16  ;;  %v8055_v49 = vld [vmem:[%s10546_s3 + $0x520] ss:$8 sps:$4 sm:$0xff]  }
 0x125   : > { %4306 = vmatprep.subr.bf16.mxu1 %v7992_v41  ;;  %v4026_v41 = vshll.u32 %v9449_v18, 16  ;;  %v4017_v48 = vrot.slane %v4015_v14, 1  ;;  %v8029_v18 = vld [vmem:[%s10545_s2 + $0x400] ss:$8 sps:$4 sm:$0xff]   ;;  %v4078_v14 = vrot.slane %v4076_v8, 1 }
 0x126   : > { %1918 = vmatmul.mubr.bf16.gmra.mrb[8].mxu0 %v1775_v53  ;;  %v4058_v53 = vshrl.u32 %v9466_v30, 16 }
 0x127   : > { %3945 = vmatmul.mubr.bf16.gmra.mrb[16].mxu1 %v3699_v54  ;;  %2137 = vmatpush1.bf16.msra.mxu0 %v7994_v56  ;;  %v4061_v56 = vshll.u32 %v9466_v30, 16  ;;  %v2006_v54 = vsel %vm1989_vm5, %v1997_v39, %v2005_v16  ;;  %v8042_v30 = vld [vmem:[%s10545_s2 + $0x414] ss:$8 sps:$4 sm:$0xff]   ;;  %v8057_v39 = vld [vmem:[%s10546_s3 + $0x524] ss:$8 sps:$4 sm:$0xff]  }
 0x128   : > { %4307 = vmatpush1.bf16.msra.mxu1 %v7990_v55  ;;  %1927 = vmatprep.mubr.bf16.mxu0 %v8313_v2  ;;  %v4020_v55 = vrot.slane %v4018_v17, 2 }
 0x129   : > { %4308 = vmatprep.subr.bf16.mxu1 %v7999_v58  ;;  %2138 = vmatprep.subr.bf16.mxu0 %v8008_v50  ;;  %v8033_v58 = vld [vmem:[%s10546_s3 + $0x4e0] ss:$8 sps:$4 sm:$0xff]   ;;  %v4028_v50 = vrot.slane %v4026_v41, 2 }
 0x12a   : > { %4322 = vmatprep.mubr.bf16.mxu1 %v4047_v59  ;;  %v8039_v59 = vld [vmem:[%s10546_s3 + $0x4f4] ss:$8 sps:$4 sm:$0xff]   ;;  %v4021_v13 = vor.u32 %v4020_v55, %v4017_v48  ;;  %v4094_v48 = vshrl.u32 %v9543_v11, 16 }
 0x12b   : > { %2139 = vmatpush1.bf16.msra.mxu0 %v8006_v5  ;;  %v9725_v5 = vor.u32 %v2013_v44, %v2010_v9  ;;  %v4069_v44 = vrot.slane %v4067_v23, 1  ;;  %v8079_v23 = vld [vmem:[%s10546_s3 + $0x564] ss:$8 sps:$4 sm:$0xff]  }
 0x12c   : > { %4309 = vmatpush1.bf16.msra.mxu1 %v7997_v62  ;;  %2140 = vmatprep.subr.bf16.mxu0 %v8015_v40  ;;  %v2017_v62 = vshrl.u32 %v9404_v52, 16  ;;  %v4060_v40 = vrot.slane %v4058_v53, 1  ;;  %v4097_v53 = vshll.u32 %v9543_v11, 16  ;;  %v8069_v11 = vld [vmem:[%s10545_s2 + $0x454] ss:$8 sps:$4 sm:$0xff]  }
 0x12d   : > { %4310 = vmatprep.subr.bf16.mxu1 %v8005_v4  ;;  %v2020_v4 = vshll.u32 %v9404_v52, 16  ;;  %v8045_v52 = vld [vmem:[%s10546_s3 + $0x504] ss:$8 sps:$4 sm:$0xff]  }
 0x12e   : > { %1928 = vmatmul.mubr.bf16.gmra.mrb[12].mxu0 %v1777_v12  ;;  %v8040_v12 = vld [vmem:[%s10545_s2 + $0x410] ss:$8 sps:$4 sm:$0xff]   ;;  %v2019_v0 = vrot.slane %v2017_v62, 2 }
 0x12f   : > { %1937 = vmatprep.mubr.bf16.mxu0 %v8313_v2  ;;  %2141 = vmatpush1.bf16.msra.mxu0 %v8013_v15  ;;  %v4049_v15 = vshrl.u32 %v9494_v22, 16  ;;  %v2022_v35 = vrot.slane %v2020_v4, 3  ;;  %v8066_v4 = vld [vmem:[%s10546_s3 + $0x544] ss:$8 sps:$4 sm:$0xff]  }
 0x130   : > { %4311 = vmatpush1.bf16.msra.mxu1 %v8003_v37  ;;  %2142 = vmatprep.subr.bf16.mxu0 %v8025_v28  ;;  %v4063_v37 = vrot.slane %v4061_v56, 2  ;;  %v4052_v28 = vshll.u32 %v9494_v22, 16  ;;  %v4079_v22 = vshll.u32 %v9503_v60, 16  ;;  %v8051_v60 = vld [vmem:[%s10546_s3 + $0x514] ss:$8 sps:$4 sm:$0xff]  }
 0x131   : > { %4312 = vmatprep.subr.bf16.mxu1 %v8012_v34  ;;  %v4029_v34 = vor.u32 %v4028_v50, %v4025_v3  ;;  %v4051_v32 = vrot.slane %v4049_v15, 1  ;;  %v4072_v3 = vrot.slane %v4070_v36, 2  ;;  %v8063_v50 = vld [vmem:[%s10546_s3 + $0x534] ss:$8 sps:$4 sm:$0xff]   ;;  %v8080_v36 = vld [vmem:[%s10545_s2 + $0x470] ss:$8 sps:$4 sm:$0xff]  }
 0x132   : > { %v9740_v24 = vor.u32 %v4063_v37, %v4060_v40  ;;  %v4054_v33 = vrot.slane %v4052_v28, 2  ;;  %v4081_v17 = vrot.slane %v4079_v22, 2 }
 0x133   : > { %2143 = vmatpush1.bf16.msra.mxu0 %v8023_v57  ;;  %v4030_v57 = vsel %vm1250_vm3, %v4021_v13, %v4029_v34  ;;  %v4073_v37 = vor.u32 %v4072_v3, %v4069_v44  ;;  %v4099_v13 = vrot.slane %v4097_v53, 2  ;;  %v8085_v44 = vld [vmem:[%s10546_s3 + $0x574] ss:$8 sps:$4 sm:$0xff]   ;;  %v8083_v53 = vld [vmem:[%s10546_s3 + $0x570] ss:$8 sps:$4 sm:$0xff]  }
 0x134   : > { %4313 = vmatpush1.bf16.msra.mxu1 %v8010_v10  ;;  %2349 = vmatprep.subr.bf16.mxu0 %v8031_v43  ;;  %v8048_v10 = vld [vmem:[%s10545_s2 + $0x424] ss:$8 sps:$4 sm:$0xff]   ;;  %v8046_v43 = vld [vmem:[%s10545_s2 + $0x420] ss:$8 sps:$4 sm:$0xff]   ;;  %v4065_v19 = vsel %vm1250_vm3, %v9626_v61, %v9740_v24  ;;  %v4055_v41 = vor.u32 %v4054_v33, %v4051_v32  ;;  %v4082_v55 = vor.u32 %v4081_v17, %v4078_v14 }
 0x135   : > { %4314 = vmatprep.subr.bf16.mxu1 %v8021_v25  ;;  %v2015_v25 = vsel %vm1989_vm5, %v2005_v16, %v9725_v5  ;;  %v8060_v16 = vld [vmem:[%s10545_s2 + $0x444] ss:$8 sps:$4 sm:$0xff]  }
 0x136   : > { %1938 = vmatmul.mubr.bf16.gmra.mrb[16].mxu0 %v1779_v63  ;;  %v2026_v63 = vshrl.u32 %v9441_v7, 16  ;;  %v4083_v40 = vsel %vm1250_vm3, %v9740_v24, %v4082_v55  ;;  %v4074_v22 = vsel %vm1250_vm3, %v4055_v41, %v4073_v37 }
 0x137   : > { %2160 = vmatprep.mubr.bf16.mxu0 %v8313_v2 }
 0x138   : > { %4315 = vmatpush1.bf16.msra.mxu1 %v8019_v31  ;;  %v8049_v31 = vld [vmem:[%s10546_s3 + $0x510] ss:$8 sps:$4 sm:$0xff]   ;;  %v2028_v61 = vrot.slane %v2026_v63, 2 }
 0x139   : > { %4316 = vmatprep.subr.bf16.mxu1 %v8028_v6  ;;  %v2029_v6 = vshll.u32 %v9441_v7, 16 }
 0x13b   : > { %v2031_v9 = vrot.slane %v2029_v6, 3 }
 0x13c   : > { %4317 = vmatpush1.bf16.msra.mxu1 %v8026_v42  ;;  %v2023_v42 = vor.u32 %v2022_v35, %v2019_v0  ;;  %v8064_v35 = vld [vmem:[%s10546_s3 + $0x540] ss:$8 sps:$4 sm:$0xff]  }
 0x13d   : > { %4318 = vmatprep.subr.bf16.mxu1 %v8035_v26  ;;  %v3975_v26 = vld [vmem:[%s8556_s20 + $0x58] sm:$0x33]  ;;  %v2032_v62 = vor.u32 %v2031_v9, %v2028_v61  ;;  %v9861_v9 = vld [vmem:[%s8556_s20 + $0x8] sm:$0xcc] }
 0x13e   : > { %2161 = vmatmul.mubr.bf16.vlgmr.msra.gmra.mrb[0].mxu0 %v2006_v54  ;;  %v2024_v56 = vsel %vm1989_vm5, %v9725_v5, %v2023_v42  ;;  %v8058_v54 = vld [vmem:[%s10545_s2 + $0x440] ss:$8 sps:$4 sm:$0xff]   ;;  %v4085_v5 = vshrl.u32 %v9566_v27, 16  ;;  %v9834_v33 = vcombine.low %v3975_v26, %v3975_v26 }
 0x13f   : > { %2350 = vmatpush1.bf16.msra.mxu0 %v8029_v18  ;;  %2170 = vmatprep.mubr.bf16.mxu0 %v8313_v2  ;;  %v9791_v18 = vld [vmem:[%s8439_s8 + $0x30] ss:$0 sps:$4 sm:$0x77]   ;;  %v2033_v8 = vsel %vm1989_vm5, %v2023_v42, %v2032_v62  ;;  %v8088_v42 = vld [vmem:[%s10546_s3 + $0x704] ss:$8 sps:$4 sm:$0xff]  }
 0x140   : > { %4319 = vmatpush1.bf16.msra.mxu1 %v8033_v58  ;;  %2351 = vmatprep.subr.bf16.mxu0 %v8042_v30  ;;  %v4056_v58 = vsel %vm1250_vm3, %v4029_v34, %v4055_v41  ;;  %v8061_v30 = vld [vmem:[%s10546_s3 + $0x530] ss:$8 sps:$4 sm:$0xff]   ;;  %v8075_v34 = vld [vmem:[%s10545_s2 + $0x464] ss:$8 sps:$4 sm:$0xff]   ;;  %v2035_v15 = vshrl.u32 %v9791_v18, 16  ;;  %v2038_v28 = vshll.u32 %v9791_v18, 16 }
 0x141   : > { %4320 = vmatprep.subr.bf16.mxu1 %v8039_v59  ;;  %v9800_v59 = vcombine.high %v3975_v26, %v3975_v26  ;;  %v4087_v24 = vrot.slane %v4085_v5, 1  ;;  %v4103_v14 = vshrl.u32 %v9834_v33, 16  ;;  %v4106_v17 = vshll.u32 %v9834_v33, 16  ;;  %v8077_v41 = vld [vmem:[%s10546_s3 + $0x560] ss:$8 sps:$4 sm:$0xff]  }
 0x143   : > { %2352 = vmatpush1.bf16.msra.mxu0 %v8040_v12  ;;  %v4096_v12 = vrot.slane %v4094_v48, 1  ;;  %v4115_v0 = vshll.u32 %v9800_v59, 16  ;;  %v4105_v61 = vrot.slane %v4103_v14, 1 }
 0x144   : > { %4321 = vmatpush1.bf16.msra.mxu1 %v8037_v1  ;;  %2353 = vmatprep.subr.bf16.mxu0 %v8048_v10  ;;  %v8067_v1 = vld [vmem:[%s10545_s2 + $0x450] ss:$8 sps:$4 sm:$0xff]   ;;  %v4112_v10 = vshrl.u32 %v9800_v59, 16 }
 0x145   : > { %4624 = vmatprep.subr.bf16.mxu1 %v8045_v52  ;;  %v4088_v52 = vshll.u32 %v9566_v27, 16  ;;  %v8072_v27 = vld [vmem:[%s10546_s3 + $0x554] ss:$8 sps:$4 sm:$0xff]  }
 0x146   : > { %2171 = vmatmul.mubr.bf16.gmra.mrb[4].mxu0 %v2015_v25  ;;  %v4100_v25 = vor.u32 %v4099_v13, %v4096_v12  ;;  %v4114_v63 = vrot.slane %v4112_v10, 1  ;;  %v8086_v13 = vld [vmem:[%s10546_s3 + $0x700] ss:$8 sps:$4 sm:$0xff]   ;;  %v8095_v10 = vld [vmem:[%s10546_s3 + $0x714] ss:$8 sps:$4 sm:$0xff]  }
 0x147   : > { %4323 = vmatmul.mubr.bf16.vlgmr.msra.gmra.mrb[0].mxu1 %v4030_v57  ;;  %2354 = vmatpush1.bf16.msra.mxu0 %v8046_v43  ;;  %v2037_v57 = vrot.slane %v2035_v15, 2  ;;  %v2040_v43 = vrot.slane %v2038_v28, 3  ;;  %v4090_v32 = vrot.slane %v4088_v52, 2 }
 0x148   : > { %4625 = vmatpush1.bf16.msra.mxu1 %v8043_v20  ;;  %2180 = vmatprep.mubr.bf16.mxu0 %v8313_v2  ;;  %v8073_v20 = vld [vmem:[%s10545_s2 + $0x460] ss:$8 sps:$4 sm:$0xff]  }
 0x149   : > { %4626 = vmatprep.subr.bf16.mxu1 %v8051_v60  ;;  %2355 = vmatprep.subr.bf16.mxu0 %v8054_v46  ;;  %v8082_v60 = vld [vmem:[%s10545_s2 + $0x474] ss:$8 sps:$4 sm:$0xff]   ;;  %v8070_v46 = vld [vmem:[%s10546_s3 + $0x550] ss:$8 sps:$4 sm:$0xff]   ;;  %v2041_v6 = vor.u32 %v2040_v43, %v2037_v57 }
 0x14a   : > { %4332 = vmatprep.mubr.bf16.mxu1 %v4065_v19  ;;  %v4091_v19 = vor.u32 %v4090_v32, %v4087_v24  ;;  %v8096_v57 = vld [vmem:[%s10546_s3 + $0x590] ss:$8 sps:$4 sm:$0xff]   ;;  %v8104_v32 = vld [vmem:[%s10546_s3 + $0x5a4] ss:$8 sps:$4 sm:$0xff]  }
 0x14b   : > { %2356 = vmatpush1.bf16.msra.mxu0 %v8052_v21  ;;  %v4101_v21 = vsel %vm1250_vm3, %v4082_v55, %v4100_v25  ;;  %v9868_v55 = vld [vmem:[%s8556_s20 + $0x10] sm:$0xff] }
 0x14c   : > { %4627 = vmatpush1.bf16.msra.mxu1 %v8049_v31  ;;  %2357 = vmatprep.subr.bf16.mxu0 %v8060_v16  ;;  %v4117_v31 = vrot.slane %v4115_v0, 2  ;;  %v2042_v16 = vsel %vm1989_vm5, %v2032_v62, %v2041_v6  ;;  %v4092_v26 = vsel %vm1250_vm3, %v4073_v37, %v4091_v19  ;;  %v6892_v3 = vcombine.high %v9861_v9, %v9868_v55  ;;  %v9888_v62 = vld [vmem:[%s8556_s20 + $0x20] ss:$8 sps:$4 sm:$0xff]   ;;  %v8098_v0 = vld [vmem:[%s10546_s3 + $0x594] ss:$8 sps:$4 sm:$0xff]  }
 0x14d   : > { %4628 = vmatprep.subr.bf16.mxu1 %v8057_v39  ;;  %v5569_v52 = vrot.slane %v9888_v62, 3  ;;  %v8110_v6 = vld [vmem:[%s10546_s3 + $0x5b4] ss:$8 sps:$4 sm:$0xff]  }
 0x14e   : > { %2181 = vmatmul.mubr.bf16.gmra.mrb[8].mxu0 %v2024_v56  ;;  %v4118_v39 = vor.u32 %v4117_v31, %v4114_v63  ;;  %v4435_v5 = vrot.slane %v6892_v3, 2  ;;  %v8099_v31 = vld [vmem:[%s10546_s3 + $0x720] ss:$8 sps:$4 sm:$0xff]   ;;  %v10003_v3 = vld [vmem:[%s8556_s20 + $0x54] ss:$8 sps:$4 sm:$0xff]  }
 0x14f   : > { %4333 = vmatmul.mubr.bf16.gmra.mrb[4].mxu1 %v4056_v58  ;;  %2358 = vmatpush1.bf16.msra.mxu0 %v8058_v54  ;;  %v9877_v54 = vld [vmem:[%s8556_s20 + $0x18] sm:$0xff]  ;;  %v5529_v58 = vld [vmem:[%s8556_s20 + $0x10] sm:$0x88] }
 0x150   : > { %4629 = vmatpush1.bf16.msra.mxu1 %v8055_v49  ;;  %2190 = vmatprep.mubr.bf16.mxu0 %v8313_v2  ;;  %v4108_v49 = vrot.slane %v4106_v17, 2  ;;  %v4119_v48 = vsel %vm1250_vm3, %v4100_v25, %v4118_v39  ;;  %v8105_v17 = vld [vmem:[%s10546_s3 + $0x730] ss:$8 sps:$4 sm:$0xff]   ;;  %v8116_v39 = vld [vmem:[%s10546_s3 + $0x5c4] ss:$8 sps:$4 sm:$0xff]  }
 0x151   : > { %4630 = vmatprep.subr.bf16.mxu1 %v8063_v50  ;;  %2359 = vmatprep.subr.bf16.mxu0 %v8069_v11  ;;  %v8092_v50 = vld [vmem:[%s10546_s3 + $0x584] ss:$8 sps:$4 sm:$0xff]  }
 0x152   : > { %4342 = vmatprep.mubr.bf16.mxu1 %v4083_v40  ;;  %v4109_v56 = vor.u32 %v4108_v49, %v4105_v61  ;;  %v9884_v11 = vld [vmem:[%s8556_s20 + $0x24] ss:$8 sps:$4 sm:$0xff]   ;;  %v8111_v61 = vld [vmem:[%s10546_s3 + $0x740] ss:$8 sps:$4 sm:$0xff]  }
 0x153   : > { %2360 = vmatpush1.bf16.msra.mxu0 %v8067_v1  ;;  %v7099_v1 = vcombine.low %v5529_v58, %v9877_v54  ;;  %v5572_v12 = vrot.slane %v9884_v11, 3  ;;  %v8114_v49 = vld [vmem:[%s10546_s3 + $0x5c0] ss:$8 sps:$4 sm:$0xff]  }
 0x154   : > { %4631 = vmatpush1.bf16.msra.mxu1 %v8061_v30  ;;  %2361 = vmatprep.subr.bf16.mxu0 %v8075_v34  ;;  %v7100_v30 = vcombine.high %v5529_v58, %v9877_v54  ;;  %v8090_v34 = vld [vmem:[%s10546_s3 + $0x580] ss:$8 sps:$4 sm:$0xff]   ;;  %v4110_v15 = vsel %vm1250_vm3, %v4091_v19, %v4109_v56  ;;  %v10010_v56 = vld [vmem:[%s8556_s20 + $0x50] ss:$8 sps:$4 sm:$0xff]   ;;  %v5584_v58 = vrot.slane %v10003_v3, 3 }
 0x155   : > { %4632 = vmatprep.subr.bf16.mxu1 %v8066_v4  ;;  %v9892_v4 = vld [vmem:[%s8556_s20 + $0x1c] ss:$8 sps:$4 sm:$0xff]   ;;  %v5568_v28 = vrot.slane %v7099_v1, 3  ;;  %v9963_v19 = vld [vmem:[%s8556_s20 + $0x40] ss:$8 sps:$4 sm:$0xff]   ;;  %v5582_v1 = vrot.slane %v10010_v56, 3 }
 0x156   : > { %2191 = vmatmul.mubr.bf16.gmra.mrb[12].mxu0 %v2033_v8  ;;  %v4436_v40 = vrot.slane %v9892_v4, 2  ;;  %v5571_v37 = vrot.slane %v7100_v30, 3  ;;  %v9917_v8 = vld [vmem:[%s8556_s20 + $0x30] ss:$8 sps:$4 sm:$0xff]   ;;  %v8153_v4 = vld [vmem:[%s10546_s3 + $0x7a4] ss:$8 sps:$4 sm:$0xff]  }
 0x157   : > { %4343 = vmatmul.mubr.bf16.gmra.mrb[8].mxu1 %v4074_v22  ;;  %2200 = vmatprep.mubr.bf16.mxu0 %v8313_v2  ;;  %v5574_v43 = vrot.slane %v9917_v8, 3  ;;  %v8120_v30 = vld [vmem:[%s10546_s3 + $0x5d0] ss:$8 sps:$4 sm:$0xff]  }
 0x158   : > { %4633 = vmatpush1.bf16.msra.mxu1 %v8064_v35  ;;  %2362 = vmatpush1.bf16.msra.mxu0 %v8073_v20  ;;  %v9911_v35 = vld [vmem:[%s8556_s20 + $0x34] ss:$8 sps:$4 sm:$0xff]   ;;  %v9914_v24 = vsel %vm2252_vm4, %v5571_v37, %v5572_v12  ;;  %v4437_v22 = vsel %vm1513_vm2, %v4435_v5, %v4436_v40  ;;  %v8093_v20 = vld [vmem:[%s10546_s3 + $0x710] ss:$8 sps:$4 sm:$0xff]   ;;  %v8129_v5 = vld [vmem:[%s10546_s3 + $0x5e4] ss:$8 sps:$4 sm:$0xff]  }
 0x159   : > { %4634 = vmatprep.subr.bf16.mxu1 %v8072_v27  ;;  %2363 = vmatprep.subr.bf16.mxu0 %v8082_v60  ;;  %v9920_v27 = vsel %vm2252_vm4, %v5568_v28, %v5569_v52  ;;  %v5576_v25 = vrot.slane %v9911_v35, 3  ;;  %v9945_v63 = vsel %vm2252_vm4, %v5569_v52, %v5574_v43  ;;  %v5176_v28 = vshrl.u32 %v9884_v11, 16 }
 0x15a   : > { %4352 = vmatprep.mubr.bf16.mxu1 %v4101_v21  ;;  %v8102_v21 = vld [vmem:[%s10546_s3 + $0x5a0] ss:$8 sps:$4 sm:$0xff]   ;;  %v5179_v52 = vshll.u32 %v9884_v11, 16 }
 0x15b   : > { %v9941_v60 = vsel %vm2252_vm4, %v5572_v12, %v5576_v25 }
 0x15c   : > { %4635 = vmatpush1.bf16.msra.mxu1 %v8070_v46  ;;  %2364 = vmatpush1.bf16.msra.mxu0 %v8080_v36  ;;  %v8107_v46 = vld [vmem:[%s10546_s3 + $0x734] ss:$8 sps:$4 sm:$0xff]   ;;  %v8108_v36 = vld [vmem:[%s10546_s3 + $0x5b0] ss:$8 sps:$4 sm:$0xff]  }
 0x15d   : > { %4636 = vmatprep.subr.bf16.mxu1 %v8079_v23  ;;  %5426 = vmatprep.subr.bf16.mxu0 %v8088_v42  ;;  %v9960_v23 = vld [vmem:[%s8556_s20 + $0x44] ss:$8 sps:$4 sm:$0xff]   ;;  %v5578_v42 = vrot.slane %v9963_v19, 3 }
 0x15e   : > { %2201 = vmatmul.mubr.bf16.gmra.mrb[16].mxu0 %v2042_v16  ;;  %v5580_v14 = vrot.slane %v9960_v23, 3 }
 0x15f   : > { %4353 = vmatmul.mubr.bf16.gmra.mrb[12].mxu1 %v4092_v26  ;;  %2381 = vmatprep.mubr.bf16.mxu0 %v8313_v2  ;;  %v9988_v26 = vld [vmem:[%s8556_s20 + $0x10] sm:$0xcc] }
 0x160   : > { %4637 = vmatpush1.bf16.msra.mxu1 %v8077_v41  ;;  %4362 = vmatprep.mubr.bf16.mxu1 %v4119_v48  ;;  %v9981_v16 = vsel %vm2252_vm4, %v5576_v25, %v5580_v14  ;;  %v9985_v41 = vsel %vm2252_vm4, %v5574_v43, %v5578_v42  ;;  %v8122_v48 = vld [vmem:[%s10546_s3 + $0x5d4] ss:$8 sps:$4 sm:$0xff]   ;;  %v10028_v37 = vsel %vm2252_vm4, %v5580_v14, %v5584_v58  ;;  %v2262_v43 = vrot.slane %v9791_v18, 3  ;;  %v8131_v14 = vld [vmem:[%s10546_s3 + $0x770] ss:$8 sps:$4 sm:$0xff]  }
 0x161   : > { %4638 = vmatprep.subr.bf16.mxu1 %v8085_v44  ;;  %v8119_v44 = vld [vmem:[%s10546_s3 + $0x754] ss:$8 sps:$4 sm:$0xff]   ;;  %v8134_v18 = vld [vmem:[%s10546_s3 + $0x5f0] ss:$8 sps:$4 sm:$0xff]  }
 0x162   : > { %v8133_v25 = vld [vmem:[%s10546_s3 + $0x774] ss:$8 sps:$4 sm:$0xff]  }
 0x164   : > { %4639 = vmatpush1.bf16.msra.mxu1 %v8083_v53  ;;  %v10007_v53 = vcombine.high %v9988_v26, %v9877_v54 }
 0x165   : > { %4640 = vmatprep.subr.bf16.mxu1 %v8092_v50  ;;  %v8117_v50 = vld [vmem:[%s10546_s3 + $0x750] ss:$8 sps:$4 sm:$0xff]  }
 0x166   : > { %2382 = vmatmul.mubr.bf16.vlgmr.msra.gmra.mrb[0].mxu0 %v9479_v45  ;;  %v8101_v45 = vld [vmem:[%s10546_s3 + $0x724] ss:$8 sps:$4 sm:$0xff]   ;;  %v5168_v12 = vshrl.u32 %v10007_v53, 16 }
 0x167   : > { %4363 = vmatmul.mubr.bf16.gmra.mrb[16].mxu1 %v4110_v15  ;;  %5427 = vmatpush1.bf16.msra.mxu0 %v8086_v13  ;;  %v5111_v13 = vld [vmem:[%s8556_s20 + $0x60] sm:$0x77]  ;;  %v5171_v15 = vshll.u32 %v10007_v53, 16 }
 0x168   : > { %4641 = vmatpush1.bf16.msra.mxu1 %v8090_v34  ;;  %5428 = vmatprep.subr.bf16.mxu0 %v8095_v10  ;;  %v10034_v34 = vsel %vm2252_vm4, %v5578_v42, %v5582_v1  ;;  %v8123_v10 = vld [vmem:[%s10546_s3 + $0x760] ss:$8 sps:$4 sm:$0xff]   ;;  %v8144_v42 = vld [vmem:[%s10546_s3 + $0x604] ss:$8 sps:$4 sm:$0xff]  }
 0x169   : > { %4642 = vmatprep.subr.bf16.mxu1 %v8098_v0  ;;  %2391 = vmatprep.mubr.bf16.mxu0 %v8313_v2  ;;  %v8127_v0 = vld [vmem:[%s10546_s3 + $0x5e0] ss:$8 sps:$4 sm:$0xff]  }
 0x16a   : > { %4656 = vmatprep.mubr.bf16.mxu1 %v4437_v22  ;;  %v6891_v22 = vcombine.low %v9861_v9, %v9868_v55  ;;  %v5173_v9 = vrot.slane %v5171_v15, 3  ;;  %v5178_v55 = vrot.slane %v5176_v28, 2  ;;  %v8301_v28 = vld [vmem:[%s8556_s20 + $0x3c] ss:$8 sps:$4 sm:$0xff]  }
 0x16b   : > { %5429 = vmatpush1.bf16.msra.mxu0 %v8093_v20  ;;  %v8136_v20 = vld [vmem:[%s10546_s3 + $0x5f4] ss:$8 sps:$4 sm:$0xff]  }
 0x16c   : > { %4643 = vmatpush1.bf16.msra.mxu1 %v8096_v57  ;;  %5430 = vmatprep.subr.bf16.mxu0 %v8101_v45  ;;  %v10053_v57 = vcombine.high %v5111_v13, %v5111_v13  ;;  %v8298_v45 = vld [vmem:[%s8556_s20 + $0x18] ss:$8 sps:$4 sm:$0xff]  }
 0x16d   : > { %4644 = vmatprep.subr.bf16.mxu1 %v8104_v32  ;;  %v4433_v32 = vrot.slane %v8298_v45, 2  ;;  %v8157_v45 = vld [vmem:[%s10546_s3 + $0x7b0] ss:$8 sps:$4 sm:$0xff]  }
 0x16e   : > { %2392 = vmatmul.mubr.bf16.gmra.mrb[4].mxu0 %v9391_v47  ;;  %v8113_v47 = vld [vmem:[%s10546_s3 + $0x744] ss:$8 sps:$4 sm:$0xff]  }
 0x16f   : > { %5431 = vmatpush1.bf16.msra.mxu0 %v8099_v31  ;;  %2401 = vmatprep.mubr.bf16.mxu0 %v8313_v2  ;;  %v5170_v31 = vrot.slane %v5168_v12, 2  ;;  %v8148_v12 = vld [vmem:[%s10546_s3 + $0x610] ss:$8 sps:$4 sm:$0xff]  }
 0x170   : > { %4645 = vmatpush1.bf16.msra.mxu1 %v8102_v21  ;;  %5432 = vmatprep.subr.bf16.mxu0 %v8107_v46  ;;  %v10057_v21 = vcombine.low %v5111_v13, %v5111_v13  ;;  %v5181_v46 = vrot.slane %v5179_v52, 3  ;;  %v8300_v13 = vld [vmem:[%s8556_s20 + $0x28] ss:$8 sps:$4 sm:$0xff]   ;;  %v4444_v52 = vrot.slane %v8301_v28, 2 }
 0x171   : > { %4646 = vmatprep.subr.bf16.mxu1 %v8110_v6  ;;  %v5588_v6 = vrot.slane %v10053_v57, 3  ;;  %v4438_v15 = vrot.slane %v8300_v13, 2  ;;  %v5194_v13 = vshrl.u32 %v9911_v35, 16 }
 0x173   : > { %5433 = vmatpush1.bf16.msra.mxu0 %v8105_v17  ;;  %v4432_v17 = vrot.slane %v6891_v22, 2  ;;  %v4439_v22 = vsel %vm1513_vm2, %v4433_v32, %v4438_v15 }
 0x174   : > { %4647 = vmatpush1.bf16.msra.mxu1 %v8108_v36  ;;  %5434 = vmatprep.subr.bf16.mxu0 %v8113_v47  ;;  %v5586_v36 = vrot.slane %v10057_v21, 3  ;;  %v10075_v47 = vsel %vm2252_vm4, %v5584_v58, %v5588_v6  ;;  %v2263_v58 = vsel %vm2252_vm4, %v2260_v29, %v2262_v43  ;;  %v10148_v6 = vcombine.low %v9988_v26, %v9877_v54  ;;  %v8171_v54 = vld [vmem:[%s10546_s3 + $0x7d4] ss:$8 sps:$4 sm:$0xff]  }
 0x175   : > { %4648 = vmatprep.subr.bf16.mxu1 %v8116_v39  ;;  %v8174_v26 = vld [vmem:[%s10546_s3 + $0x654] ss:$8 sps:$4 sm:$0xff]  }
 0x176   : > { %2402 = vmatmul.mubr.bf16.gmra.mrb[8].mxu0 %v9418_v38  ;;  %v8125_v38 = vld [vmem:[%s10546_s3 + $0x764] ss:$8 sps:$4 sm:$0xff]   ;;  %v10079_v39 = vsel %vm2252_vm4, %v5582_v1, %v5586_v36  ;;  %v8147_v1 = vld [vmem:[%s10546_s3 + $0x794] ss:$8 sps:$4 sm:$0xff]   ;;  %v8166_v36 = vld [vmem:[%s10546_s3 + $0x640] ss:$8 sps:$4 sm:$0xff]  }
 0x177   : > { %5435 = vmatpush1.bf16.msra.mxu0 %v8111_v61  ;;  %2411 = vmatprep.mubr.bf16.mxu0 %v8313_v2  ;;  %v8299_v61 = vld [vmem:[%s8556_s20 + $0x2c] ss:$8 sps:$4 sm:$0xff]  }
 0x178   : > { %4649 = vmatpush1.bf16.msra.mxu1 %v8114_v49  ;;  %5436 = vmatprep.subr.bf16.mxu0 %v8119_v44  ;;  %v4440_v49 = vrot.slane %v8299_v61, 2  ;;  %v5174_v44 = vor.u32 %v5173_v9, %v5170_v31  ;;  %v8302_v31 = vld [vmem:[%s8556_s20 + $0x38] ss:$8 sps:$4 sm:$0xff]  }
 0x179   : > { %4650 = vmatprep.subr.bf16.mxu1 %v8122_v48  ;;  %v10082_v48 = vor.u32 %v5181_v46, %v5178_v55  ;;  %v4442_v9 = vrot.slane %v8302_v31, 2  ;;  %v8165_v55 = vld [vmem:[%s10546_s3 + $0x7c4] ss:$8 sps:$4 sm:$0xff]   ;;  %v8169_v61 = vld [vmem:[%s10546_s3 + $0x7d0] ss:$8 sps:$4 sm:$0xff]  }
 0x17a   : > { %v4441_v7 = vsel %vm1513_vm2, %v4436_v40, %v4440_v49  ;;  %v8156_v40 = vld [vmem:[%s10546_s3 + $0x624] ss:$8 sps:$4 sm:$0xff]   ;;  %v4445_v43 = vsel %vm1513_vm2, %v4440_v49, %v4444_v52  ;;  %v5154_v49 = vshll.u32 %v10148_v6, 16 }
 0x17b   : > { %5437 = vmatpush1.bf16.msra.mxu0 %v8117_v50  ;;  %v8137_v50 = vld [vmem:[%s10546_s3 + $0x780] ss:$8 sps:$4 sm:$0xff]   ;;  %v5183_v29 = vsel %vm1989_vm5, %v5174_v44, %v10082_v48  ;;  %v8168_v46 = vld [vmem:[%s10546_s3 + $0x644] ss:$8 sps:$4 sm:$0xff]  }
 0x17c   : > { %4651 = vmatpush1.bf16.msra.mxu1 %v8120_v30  ;;  %5438 = vmatprep.subr.bf16.mxu0 %v8125_v38  ;;  %v4434_v30 = vsel %vm1513_vm2, %v4432_v17, %v4433_v32  ;;  %v8150_v38 = vld [vmem:[%s10546_s3 + $0x614] ss:$8 sps:$4 sm:$0xff]   ;;  %v8160_v32 = vld [vmem:[%s10546_s3 + $0x630] ss:$8 sps:$4 sm:$0xff]   ;;  %v8163_v17 = vld [vmem:[%s10546_s3 + $0x7c0] ss:$8 sps:$4 sm:$0xff]  }
 0x17d   : > { %4652 = vmatprep.subr.bf16.mxu1 %v8129_v5  ;;  %v8145_v5 = vld [vmem:[%s10546_s3 + $0x790] ss:$8 sps:$4 sm:$0xff]  }
 0x17e   : > { %2412 = vmatmul.mubr.bf16.gmra.mrb[12].mxu0 %v9471_v51  ;;  %v8139_v51 = vld [vmem:[%s10546_s3 + $0x784] ss:$8 sps:$4 sm:$0xff]  }
 0x17f   : > { %5439 = vmatpush1.bf16.msra.mxu0 %v8123_v10  ;;  %2421 = vmatprep.mubr.bf16.mxu0 %v8313_v2  ;;  %v8142_v2 = vld [vmem:[%s10546_s3 + $0x600] ss:$8 sps:$4 sm:$0xff]  }
 0x180   : > { %4653 = vmatpush1.bf16.msra.mxu1 %v8127_v0  ;;  %5440 = vmatprep.subr.bf16.mxu0 %v8133_v25  ;;  %v8151_v10 = vld [vmem:[%s10546_s3 + $0x7a0] ss:$8 sps:$4 sm:$0xff]   ;;  %v8159_v25 = vld [vmem:[%s10546_s3 + $0x7b4] ss:$8 sps:$4 sm:$0xff]  }
 0x181   : > { %4654 = vmatprep.subr.bf16.mxu1 %v8136_v20  ;;  %v8154_v0 = vld [vmem:[%s10546_s3 + $0x620] ss:$8 sps:$4 sm:$0xff]   ;;  %v8162_v20 = vld [vmem:[%s10546_s3 + $0x634] ss:$8 sps:$4 sm:$0xff]  }
 0x183   : > { %5441 = vmatpush1.bf16.msra.mxu0 %v8131_v14  ;;  %v8303_v14 = vld [vmem:[%s8556_s20 + $0x4c] ss:$8 sps:$4 sm:$0xff]  }
 0x184   : > { %4655 = vmatpush1.bf16.msra.mxu1 %v8134_v18  ;;  %5442 = vmatprep.subr.bf16.mxu0 %v8139_v51  ;;  %v4448_v18 = vrot.slane %v8303_v14, 2  ;;  %v4443_v51 = vsel %vm1513_vm2, %v4438_v15, %v4442_v9  ;;  %v5197_v15 = vshll.u32 %v9911_v35, 16  ;;  %v8194_v14 = vld [vmem:[%s10546_s3 + $0x804] ss:$8 sps:$4 sm:$0xff]  }
 0x185   : > { %5008 = vmatprep.subr.bf16.mxu1 %v8144_v42  ;;  %v5151_v42 = vshrl.u32 %v10148_v6, 16 }
 0x186   : > { %2422 = vmatmul.mubr.bf16.gmra.mrb[16].mxu0 %v2263_v58  ;;  %v4449_v44 = vsel %vm1513_vm2, %v4444_v52, %v4448_v18  ;;  %v5159_v58 = vshrl.u32 %v9888_v62, 16 }
 0x187   : > { %4657 = vmatmul.mubr.bf16.vlgmr.msra.gmra.mrb[0].mxu1 %v4434_v30  ;;  %5443 = vmatpush1.bf16.msra.mxu0 %v8137_v50  ;;  %v8172_v50 = vld [vmem:[%s10546_s3 + $0x650] ss:$8 sps:$4 sm:$0xff]  }
 0x188   : > { %5009 = vmatpush1.bf16.msra.mxu1 %v8142_v2  ;;  %5444 = vmatprep.subr.bf16.mxu0 %v8147_v1  ;;  %v5162_v2 = vshll.u32 %v9888_v62, 16  ;;  %v8304_v30 = vld [vmem:[%s8556_s20 + $0x48] ss:$8 sps:$4 sm:$0xff]   ;;  %v5161_v28 = vrot.slane %v5159_v58, 2  ;;  %v8203_v58 = vld [vmem:[%s10546_s3 + $0x694] ss:$8 sps:$4 sm:$0xff]  }
 0x189   : > { %5010 = vmatprep.subr.bf16.mxu1 %v8150_v38  ;;  %4666 = vmatprep.mubr.bf16.mxu1 %v4441_v7  ;;  %v4446_v1 = vrot.slane %v8304_v30, 2  ;;  %v8177_v38 = vld [vmem:[%s10546_s3 + $0x7e4] ss:$8 sps:$4 sm:$0xff]  }
 0x18a   : > { %5458 = vmatprep.mubr.bf16.mxu0 %v5183_v29  ;;  %v8180_v7 = vld [vmem:[%s10546_s3 + $0x664] ss:$8 sps:$4 sm:$0xff]   ;;  %v5153_v29 = vrot.slane %v5151_v42, 2  ;;  %v5164_v52 = vrot.slane %v5162_v2, 3  ;;  %v8195_v42 = vld [vmem:[%s10546_s3 + $0x680] ss:$8 sps:$4 sm:$0xff]  }
 0x18b   : > { %5445 = vmatpush1.bf16.msra.mxu0 %v8145_v5  ;;  %v5156_v5 = vrot.slane %v5154_v49, 3 }
 0x18c   : > { %5011 = vmatpush1.bf16.msra.mxu1 %v8148_v12  ;;  %5446 = vmatprep.subr.bf16.mxu0 %v8153_v4  ;;  %v4452_v12 = vrot.slane %v9800_v59, 2  ;;  %v8175_v4 = vld [vmem:[%s10546_s3 + $0x7e0] ss:$8 sps:$4 sm:$0xff]   ;;  %v8183_v59 = vld [vmem:[%s10546_s3 + $0x7f4] ss:$8 sps:$4 sm:$0xff]   ;;  %v5165_v31 = vor.u32 %v5164_v52, %v5161_v28  ;;  %v5233_v28 = vshll.u32 %v10003_v3, 16 }
 0x18d   : > { %5012 = vmatprep.subr.bf16.mxu1 %v8156_v40  ;;  %v8178_v40 = vld [vmem:[%s10546_s3 + $0x660] ss:$8 sps:$4 sm:$0xff]  }
 0x18e   : > { %v8204_v52 = vld [vmem:[%s10546_s3 + $0x820] ss:$8 sps:$4 sm:$0xff]  }
 0x18f   : > { %4667 = vmatmul.mubr.bf16.gmra.mrb[4].mxu1 %v4439_v22  ;;  %5447 = vmatpush1.bf16.msra.mxu0 %v8151_v10  ;;  %v4447_v10 = vsel %vm1513_vm2, %v4442_v9, %v4446_v1  ;;  %v8181_v22 = vld [vmem:[%s10546_s3 + $0x7f0] ss:$8 sps:$4 sm:$0xff]   ;;  %v4450_v9 = vrot.slane %v9834_v33, 2  ;;  %v4820_v33 = vrot.slane %v9884_v11, 2  ;;  %v8252_v11 = vld [vmem:[%s10546_s3 + $0x8a0] ss:$8 sps:$4 sm:$0xff]  }
 0x190   : > { %5013 = vmatpush1.bf16.msra.mxu1 %v8154_v0  ;;  %5448 = vmatprep.subr.bf16.mxu0 %v8159_v25  ;;  %v8186_v0 = vld [vmem:[%s10546_s3 + $0x674] ss:$8 sps:$4 sm:$0xff]   ;;  %v5157_v25 = vor.u32 %v5156_v5, %v5153_v29  ;;  %v8201_v29 = vld [vmem:[%s10546_s3 + $0x690] ss:$8 sps:$4 sm:$0xff]  }
 0x191   : > { %5014 = vmatprep.subr.bf16.mxu1 %v8162_v20  ;;  %4676 = vmatprep.mubr.bf16.mxu1 %v4445_v43  ;;  %v4453_v20 = vsel %vm1513_vm2, %v4448_v18, %v4452_v12  ;;  %v5196_v43 = vrot.slane %v5194_v13, 2  ;;  %v8197_v18 = vld [vmem:[%s10546_s3 + $0x684] ss:$8 sps:$4 sm:$0xff]   ;;  %v5203_v12 = vshrl.u32 %v9963_v19, 16 }
 0x192   : > { %v8206_v13 = vld [vmem:[%s10546_s3 + $0x824] ss:$8 sps:$4 sm:$0xff]  }
 0x193   : > { %5449 = vmatpush1.bf16.msra.mxu0 %v8157_v45  ;;  %v5199_v45 = vrot.slane %v5197_v15, 3  ;;  %v8209_v15 = vld [vmem:[%s10546_s3 + $0x6a4] ss:$8 sps:$4 sm:$0xff]  }
 0x194   : > { %5015 = vmatpush1.bf16.msra.mxu1 %v8160_v32  ;;  %5450 = vmatprep.subr.bf16.mxu0 %v8165_v55  ;;  %v8184_v32 = vld [vmem:[%s10546_s3 + $0x670] ss:$8 sps:$4 sm:$0xff]   ;;  %v5185_v55 = vshrl.u32 %v9917_v8, 16 }
 0x195   : > { %5016 = vmatprep.subr.bf16.mxu1 %v8168_v46  ;;  %v5188_v46 = vshll.u32 %v9917_v8, 16 }
 0x196   : > { %v5187_v49 = vrot.slane %v5185_v55, 2 }
 0x197   : > { %4677 = vmatmul.mubr.bf16.gmra.mrb[8].mxu1 %v4443_v51  ;;  %5451 = vmatpush1.bf16.msra.mxu0 %v8163_v17  ;;  %v4819_v17 = vrot.slane %v10007_v53, 2  ;;  %v5212_v51 = vshrl.u32 %v9960_v23, 16  ;;  %v4451_v53 = vsel %vm1513_vm2, %v4446_v1, %v4450_v9  ;;  %v8213_v9 = vld [vmem:[%s10546_s3 + $0x6b0] ss:$8 sps:$4 sm:$0xff]  }
 0x198   : > { %5017 = vmatpush1.bf16.msra.mxu1 %v8166_v36  ;;  %5452 = vmatprep.subr.bf16.mxu0 %v8171_v54  ;;  %v5200_v36 = vor.u32 %v5199_v45, %v5196_v43  ;;  %v5215_v54 = vshll.u32 %v9960_v23, 16 }
 0x199   : > { %5018 = vmatprep.subr.bf16.mxu1 %v8174_v26  ;;  %4686 = vmatprep.mubr.bf16.mxu1 %v4449_v44  ;;  %v8192_v26 = vld [vmem:[%s10546_s3 + $0x800] ss:$8 sps:$4 sm:$0xff]   ;;  %v5190_v44 = vrot.slane %v5188_v46, 3  ;;  %v4821_v30 = vsel %vm1513_vm2, %v4819_v17, %v4820_v33  ;;  %v5214_v1 = vrot.slane %v5212_v51, 2  ;;  %v5221_v46 = vshrl.u32 %v10010_v56, 16 }
 0x19a   : > { %v5201_v2 = vsel %vm1989_vm5, %v10082_v48, %v5200_v36  ;;  %v5206_v48 = vshll.u32 %v9963_v19, 16  ;;  %v8221_v17 = vld [vmem:[%s10546_s3 + $0x6c4] ss:$8 sps:$4 sm:$0xff]   ;;  %v5248_v51 = vshrl.u32 %v10053_v57, 16 }
 0x19b   : > { %5453 = vmatpush1.bf16.msra.mxu0 %v8169_v61  ;;  %v5166_v61 = vsel %vm1989_vm5, %v5157_v25, %v5165_v31  ;;  %v5191_v5 = vor.u32 %v5190_v44, %v5187_v49  ;;  %v8212_v25 = vld [vmem:[%s10546_s3 + $0x834] ss:$8 sps:$4 sm:$0xff]  }
 0x19c   : > { %5019 = vmatpush1.bf16.msra.mxu1 %v8172_v50  ;;  %5454 = vmatprep.subr.bf16.mxu0 %v8177_v38  ;;  %v8200_v50 = vld [vmem:[%s10546_s3 + $0x814] ss:$8 sps:$4 sm:$0xff]   ;;  %v5217_v38 = vrot.slane %v5215_v54, 3  ;;  %v5251_v54 = vshll.u32 %v10053_v57, 16 }
 0x19d   : > { %5020 = vmatprep.subr.bf16.mxu1 %v8180_v7  ;;  %v8198_v7 = vld [vmem:[%s10546_s3 + $0x810] ss:$8 sps:$4 sm:$0xff]   ;;  %v8224_v57 = vld [vmem:[%s10546_s3 + $0x854] ss:$8 sps:$4 sm:$0xff]  }
 0x19e   : > { %v8227_v44 = vld [vmem:[%s10546_s3 + $0x6d4] ss:$8 sps:$4 sm:$0xff]  }
 0x19f   : > { %4687 = vmatmul.mubr.bf16.gmra.mrb[12].mxu1 %v4447_v10  ;;  %5455 = vmatpush1.bf16.msra.mxu0 %v8175_v4  ;;  %v5218_v4 = vor.u32 %v5217_v38, %v5214_v1  ;;  %v8207_v10 = vld [vmem:[%s10546_s3 + $0x6a0] ss:$8 sps:$4 sm:$0xff]   ;;  %v8225_v1 = vld [vmem:[%s10546_s3 + $0x6d0] ss:$8 sps:$4 sm:$0xff]  }
 0x1a0   : > { %5021 = vmatpush1.bf16.msra.mxu1 %v8178_v40  ;;  %5456 = vmatprep.subr.bf16.mxu0 %v8183_v59  ;;  %v5230_v40 = vshrl.u32 %v10003_v3, 16  ;;  %v5192_v59 = vsel %vm1989_vm5, %v5165_v31, %v5191_v5  ;;  %v8210_v31 = vld [vmem:[%s10546_s3 + $0x830] ss:$8 sps:$4 sm:$0xff]  }
 0x1a1   : > { %5022 = vmatprep.subr.bf16.mxu1 %v8186_v0  ;;  %4696 = vmatprep.mubr.bf16.mxu1 %v4453_v20  ;;  %v5205_v0 = vrot.slane %v5203_v12, 2  ;;  %v8215_v20 = vld [vmem:[%s10546_s3 + $0x6b4] ss:$8 sps:$4 sm:$0xff]   ;;  %v5219_v43 = vsel %vm1989_vm5, %v5200_v36, %v5218_v4  ;;  %v8233_v12 = vld [vmem:[%s10546_s3 + $0x6e4] ss:$8 sps:$4 sm:$0xff]  }
 0x1a2   : > { %v5232_v45 = vrot.slane %v5230_v40, 2 }
 0x1a3   : > { %5457 = vmatpush1.bf16.msra.mxu0 %v8181_v22  ;;  %v5208_v22 = vrot.slane %v5206_v48, 3 }
 0x1a4   : > { %5023 = vmatpush1.bf16.msra.mxu1 %v8184_v32  ;;  %5760 = vmatprep.subr.bf16.mxu0 %v8194_v14  ;;  %v5235_v32 = vrot.slane %v5233_v28, 3  ;;  %v5224_v14 = vshll.u32 %v10010_v56, 16  ;;  %v8236_v28 = vld [vmem:[%s10546_s3 + $0x874] ss:$8 sps:$4 sm:$0xff]  }
 0x1a5   : > { %5024 = vmatprep.subr.bf16.mxu1 %v8197_v18  ;;  %v5209_v55 = vor.u32 %v5208_v22, %v5205_v0  ;;  %v8218_v18 = vld [vmem:[%s10546_s3 + $0x844] ss:$8 sps:$4 sm:$0xff]   ;;  %v8237_v0 = vld [vmem:[%s10546_s3 + $0x6f0] ss:$8 sps:$4 sm:$0xff]   ;;  %v4816_v22 = vrot.slane %v10148_v6, 2 }
 0x1a6   : > { %5459 = vmatmul.mubr.bf16.vlgmr.msra.gmra.mrb[20].mxu0 %v5166_v61  ;;  %v5236_v36 = vor.u32 %v5235_v32, %v5232_v45  ;;  %v5226_v49 = vrot.slane %v5224_v14, 3  ;;  %v4824_v45 = vrot.slane %v9911_v35, 2  ;;  %v8243_v32 = vld [vmem:[%s10546_s3 + $0x880] ss:$8 sps:$4 sm:$0xff]   ;;  %v4828_v14 = vrot.slane %v9960_v23, 2 }
 0x1a7   : > { %4697 = vmatmul.mubr.bf16.gmra.mrb[16].mxu1 %v4451_v53  ;;  %5761 = vmatpush1.bf16.msra.mxu0 %v8192_v26  ;;  %v8216_v26 = vld [vmem:[%s10546_s3 + $0x840] ss:$8 sps:$4 sm:$0xff]   ;;  %v5210_v61 = vsel %vm1989_vm5, %v5191_v5, %v5209_v55  ;;  %v5223_v53 = vrot.slane %v5221_v46, 2  ;;  %v8230_v5 = vld [vmem:[%s10546_s3 + $0x864] ss:$8 sps:$4 sm:$0xff]   ;;  %v4826_v23 = vrot.slane %v9963_v19, 2 }
 0x1a8   : > { %5025 = vmatpush1.bf16.msra.mxu1 %v8195_v42  ;;  %5762 = vmatprep.subr.bf16.mxu0 %v8200_v50  ;;  %v8219_v42 = vld [vmem:[%s10546_s3 + $0x6c0] ss:$8 sps:$4 sm:$0xff]   ;;  %v5237_v50 = vsel %vm1989_vm5, %v5218_v4, %v5236_v36  ;;  %v4825_v35 = vsel %vm1513_vm2, %v4820_v33, %v4824_v45  ;;  %v8254_v46 = vld [vmem:[%s10546_s3 + $0x8a4] ss:$8 sps:$4 sm:$0xff]   ;;  %v8266_v19 = vld [vmem:[%s10546_s3 + $0x8d4] ss:$8 sps:$4 sm:$0xff]  }
 0x1a9   : > { %5026 = vmatprep.subr.bf16.mxu1 %v8203_v58  ;;  %5468 = vmatprep.mubr.bf16.mxu0 %v5201_v2  ;;  %v5250_v58 = vrot.slane %v5248_v51, 2  ;;  %v5253_v2 = vrot.slane %v5251_v54, 3  ;;  %v5227_v38 = vor.u32 %v5226_v49, %v5223_v53  ;;  %v4737_v51 = vld [vmem:[%s8556_s20 + $0x60] sm:$0x33]  ;;  %v4830_v53 = vrot.slane %v10010_v56, 2  ;;  %s7540_s20 = smul.u32 80, %s10552_s25 }
 0x1aa   : > { %5040 = vmatprep.mubr.bf16.mxu1 %v4821_v30  ;;  %v8222_v30 = vld [vmem:[%s10546_s3 + $0x850] ss:$8 sps:$4 sm:$0xff]   ;;  %v8261_v54 = vld [vmem:[%s10546_s3 + $0x8c0] ss:$8 sps:$4 sm:$0xff]   ;;  %v8271_v49 = vld [vmem:[%s10546_s3 + $0x8e4] ss:$8 sps:$4 sm:$0xff]  }
 0x1ab   : > { %5763 = vmatpush1.bf16.msra.mxu0 %v8198_v7  ;;  %v5239_v7 = vshrl.u32 %v10057_v21, 16  ;;  %v5254_v48 = vor.u32 %v5253_v2, %v5250_v58  ;;  %v6967_v58 = vcombine.low %v4737_v51, %v4737_v51  ;;  %v8274_v2 = vld [vmem:[%s10546_s3 + $0x8f4] ss:$8 sps:$4 sm:$0xff]   ;;  %s10528_s15 = scalar_lea.vmem %s10550_s7, %s7540_s20 }
 0x1ac   : > { %5027 = vmatpush1.bf16.msra.mxu1 %v8201_v29  ;;  %5764 = vmatprep.subr.bf16.mxu0 %v8206_v13  ;;  %v5242_v29 = vshll.u32 %v10057_v21, 16  ;;  %v8228_v13 = vld [vmem:[%s10546_s3 + $0x860] ss:$8 sps:$4 sm:$0xff]  }
 0x1ad   : > { %5028 = vmatprep.subr.bf16.mxu1 %v8209_v15  ;;  %v8231_v21 = vld [vmem:[%s10546_s3 + $0x6e0] ss:$8 sps:$4 sm:$0xff]   ;;  %v5228_v15 = vsel %vm1989_vm5, %v5209_v55, %v5227_v38  ;;  %v5241_v4 = vrot.slane %v5239_v7, 2  ;;  %v4822_v55 = vrot.slane %v9917_v8, 2  ;;  %v8257_v8 = vld [vmem:[%s10546_s3 + $0x8b4] ss:$8 sps:$4 sm:$0xff]  }
 0x1ae   : > { %5469 = vmatmul.mubr.bf16.gmra.mrb[24].mxu0 %v5192_v59  ;;  %v5244_v40 = vrot.slane %v5242_v29, 3  ;;  %v8234_v59 = vld [vmem:[%s10546_s3 + $0x870] ss:$8 sps:$4 sm:$0xff]   ;;  %v8288_v7 = vld [vmem:[%s10548_s5 + $0x20] sm:$0xff]  }
 0x1af   : > { %5765 = vmatpush1.bf16.msra.mxu0 %v8204_v52  ;;  %5478 = vmatprep.mubr.bf16.mxu0 %v5219_v43  ;;  %v8239_v52 = vld [vmem:[%s10546_s3 + $0x6f4] ss:$8 sps:$4 sm:$0xff]   ;;  %v8245_v43 = vld [vmem:[%s10546_s3 + $0x884] ss:$8 sps:$4 sm:$0xff]  }
 0x1b0   : > { %5029 = vmatpush1.bf16.msra.mxu1 %v8207_v10  ;;  %5766 = vmatprep.subr.bf16.mxu0 %v8212_v25  ;;  %v5255_v10 = vsel %vm1989_vm5, %v5236_v36, %v5254_v48  ;;  %v4817_v25 = vrot.slane %v9888_v62, 2  ;;  %v4832_v36 = vrot.slane %v10003_v3, 2  ;;  %v8264_v3 = vld [vmem:[%s10546_s3 + $0x8d0] ss:$8 sps:$4 sm:$0xff]  }
 0x1b1   : > { %5030 = vmatprep.subr.bf16.mxu1 %v8215_v20  ;;  %v5245_v20 = vor.u32 %v5244_v40, %v5241_v4  ;;  %v8292_v4 = vld [vmem:[%s10548_s5 + $0x30] sm:$0xff]  }
 0x1b2   : > { %v4818_v6 = vsel %vm1513_vm2, %v4816_v22, %v4817_v25  ;;  %v4823_v33 = vsel %vm1513_vm2, %v4817_v25, %v4822_v55 }
 0x1b3   : > { %5767 = vmatpush1.bf16.msra.mxu0 %v8210_v31  ;;  %v5246_v62 = vsel %vm1989_vm5, %v5227_v38, %v5245_v20  ;;  %v8248_v31 = vld [vmem:[%s10546_s3 + $0x894] ss:$8 sps:$4 sm:$0xff]  }
 0x1b4   : > { %5031 = vmatpush1.bf16.msra.mxu1 %v8213_v9  ;;  %5768 = vmatprep.subr.bf16.mxu0 %v8218_v18  ;;  %v8246_v9 = vld [vmem:[%s10546_s3 + $0x890] ss:$8 sps:$4 sm:$0xff]   ;;  %v4829_v18 = vsel %vm1513_vm2, %v4824_v45, %v4828_v14 }
 0x1b5   : > { %5032 = vmatprep.subr.bf16.mxu1 %v8221_v17  ;;  %v8263_v17 = vld [vmem:[%s10546_s3 + $0x8c4] ss:$8 sps:$4 sm:$0xff]  }
 0x1b6   : > { %5479 = vmatmul.mubr.bf16.gmra.mrb[28].mxu0 %v5210_v61  ;;  %v6968_v61 = vcombine.high %v4737_v51, %v4737_v51 }
 0x1b7   : > { %5769 = vmatpush1.bf16.msra.mxu0 %v8216_v26  ;;  %5488 = vmatprep.mubr.bf16.mxu0 %v5237_v50  ;;  %v4827_v26 = vsel %vm1513_vm2, %v4822_v55, %v4826_v23  ;;  %v4831_v50 = vsel %vm1513_vm2, %v4826_v23, %v4830_v53 }
 0x1b8   : > { %5033 = vmatpush1.bf16.msra.mxu1 %v8219_v42  ;;  %5770 = vmatprep.subr.bf16.mxu0 %v8224_v57  ;;  %v4833_v42 = vsel %vm1513_vm2, %v4828_v14, %v4832_v36  ;;  %v4836_v57 = vrot.slane %v6968_v61, 2 }
 0x1b9   : > { %5034 = vmatprep.subr.bf16.mxu1 %v8227_v44  ;;  %v8269_v44 = vld [vmem:[%s10546_s3 + $0x8e0] ss:$8 sps:$4 sm:$0xff]  }
 0x1ba   : > { %v4837_v56 = vsel %vm1513_vm2, %v4832_v36, %v4836_v57 }
 0x1bb   : > { %5771 = vmatpush1.bf16.msra.mxu0 %v8222_v30  ;;  %v8272_v30 = vld [vmem:[%s10546_s3 + $0x8f0] ss:$8 sps:$4 sm:$0xff]  }
 0x1bc   : > { %5035 = vmatpush1.bf16.msra.mxu1 %v8225_v1  ;;  %5772 = vmatprep.subr.bf16.mxu0 %v8230_v5  ;;  %v4834_v1 = vrot.slane %v6967_v58, 2 }
 0x1bd   : > { %5036 = vmatprep.subr.bf16.mxu1 %v8233_v12  ;;  %v8289_v12 = vld [vmem:[%s10548_s5 + $0x68] sm:$0xff]  }
 0x1be   : > { %5489 = vmatmul.mubr.bf16.gmra.mrb[32].mxu0 %v5228_v15  ;;  %v4835_v38 = vsel %vm1513_vm2, %v4830_v53, %v4834_v1  ;;  %v8291_v15 = vld [vmem:[%s10548_s5 + $0x70] sm:$0xff]  }
 0x1bf   : > { %5773 = vmatpush1.bf16.msra.mxu0 %v8228_v13  ;;  %5498 = vmatprep.mubr.bf16.mxu0 %v5255_v10  ;;  %v8290_v13 = vld [vmem:[%s10548_s5 + $0x28] sm:$0xff]  }
 0x1c0   : > { %5037 = vmatpush1.bf16.msra.mxu1 %v8231_v21  ;;  %5774 = vmatprep.subr.bf16.mxu0 %v8236_v28 }
 0x1c1   : > { %5038 = vmatprep.subr.bf16.mxu1 %v8239_v52  ;;  %v8293_v52 = vld [vmem:[%s10548_s5 + $0x78] sm:$0xff]  }
 0x1c3   : > { %5775 = vmatpush1.bf16.msra.mxu0 %v8234_v59  ;;  %v8294_v59 = vld [vmem:[%s10548_s5 + $0x38] sm:$0xff]  }
 0x1c4   : > { %5039 = vmatpush1.bf16.msra.mxu1 %v8237_v0  ;;  %5776 = vmatprep.subr.bf16.mxu0 %v8245_v43 }
 0x1c6   : > { %5499 = vmatmul.mubr.bf16.gmra.mrb[36].mxu0 %v5246_v62 }
 0x1c7   : > { %5041 = vmatmul.mubr.bf16.vlgmr.msra.gmra.mrb[0].mxu1 %v4818_v6  ;;  %5777 = vmatpush1.bf16.msra.mxu0 %v8243_v32 }
 0x1c8   : > { %5050 = vmatprep.mubr.bf16.mxu1 %v4825_v35  ;;  %5778 = vmatprep.subr.bf16.mxu0 %v8248_v31 }
 0x1c9   : > { %5792 = vmatprep.mubr.bf16.mxu0 %v9914_v24  ;;  %v8255_v24 = vld [vmem:[%s10546_s3 + $0x8b0] ss:$8 sps:$4 sm:$0xff]  }
 0x1cb   : > { %5779 = vmatpush1.bf16.msra.mxu0 %v8246_v9 }
 0x1cc   : > { %5780 = vmatprep.subr.bf16.mxu0 %v8254_v46 }
 0x1cf   : > { %5051 = vmatmul.mubr.bf16.gmra.mrb[4].mxu1 %v4823_v33  ;;  %5781 = vmatpush1.bf16.msra.mxu0 %v8252_v11 }
 0x1d0   : > { %5060 = vmatprep.mubr.bf16.mxu1 %v4829_v18  ;;  %5782 = vmatprep.subr.bf16.mxu0 %v8257_v8 }
 0x1d3   : > { %5783 = vmatpush1.bf16.msra.mxu0 %v8255_v24 }
 0x1d4   : > { %5784 = vmatprep.subr.bf16.mxu0 %v8263_v17 }
 0x1d7   : > { %5061 = vmatmul.mubr.bf16.gmra.mrb[8].mxu1 %v4827_v26  ;;  %5785 = vmatpush1.bf16.msra.mxu0 %v8261_v54 }
 0x1d8   : > { %5070 = vmatprep.mubr.bf16.mxu1 %v4833_v42  ;;  %5786 = vmatprep.subr.bf16.mxu0 %v8266_v19 }
 0x1db   : > { %5787 = vmatpush1.bf16.msra.mxu0 %v8264_v3 }
 0x1dc   : > { %5788 = vmatprep.subr.bf16.mxu0 %v8271_v49 }
 0x1df   : > { %5071 = vmatmul.mubr.bf16.gmra.mrb[12].mxu1 %v4831_v50  ;;  %5789 = vmatpush1.bf16.msra.mxu0 %v8269_v44 }
 0x1e0   : > { %5080 = vmatprep.mubr.bf16.mxu1 %v4837_v56  ;;  %5790 = vmatprep.subr.bf16.mxu0 %v8274_v2  ;;  %v5865_v2 = vlaneseq }
 0x1e3   : > { %5791 = vmatpush1.bf16.msra.mxu0 %v8272_v30  ;;  %v5866_v30 = vshrl.u32 %v5865_v2, 7 }
 0x1e6   : > { %5793 = vmatmul.mubr.bf16.vlgmr.msra.gmra.mrb[20].mxu0 %v9920_v27  ;;  %v8279_v27 = vld [vmem:[%s10548_s5 + $0x40] sm:$0xff]  }
 0x1e7   : > { %5081 = vmatmul.mubr.bf16.gmra.mrb[16].mxu1 %v4835_v38  ;;  %5802 = vmatprep.mubr.bf16.mxu0 %v9941_v60  ;;  %v8280_v60 = vld [vmem:[%s10548_s5] sm:$0xff]  }
 0x1e8   : > { %7152 = vmatprep.subr.bf16.mxu1 %v8279_v27 }
 0x1e9   : > { %7153 = vmatpush3.bf16.msra.mxu1 %v8280_v60 }
 0x1ee   : > { %5803 = vmatmul.mubr.bf16.gmra.mrb[24].mxu0 %v9945_v63  ;;  %v8281_v63 = vld [vmem:[%s10548_s5 + $0x48] sm:$0xff]  }
 0x1ef   : > { %5812 = vmatprep.mubr.bf16.mxu0 %v9981_v16  ;;  %v8282_v16 = vld [vmem:[%s10548_s5 + $0x8] sm:$0xff]   ;;  %7154 = vmatprep.subr.bf16.mxu1 %v8281_v63 }
 0x1f0   : > { %7155 = vmatpush3.bf16.msra.mxu1 %v8282_v16 }
 0x1f6   : > { %5813 = vmatmul.mubr.bf16.gmra.mrb[28].mxu0 %v9985_v41  ;;  %v8283_v41 = vld [vmem:[%s10548_s5 + $0x50] sm:$0xff]  }
 0x1f7   : > { %5822 = vmatprep.mubr.bf16.mxu0 %v10028_v37  ;;  %v8284_v37 = vld [vmem:[%s10548_s5 + $0x10] sm:$0xff]   ;;  %7156 = vmatprep.subr.bf16.mxu1 %v8283_v41 }
 0x1f8   : > { %7157 = vmatpush3.bf16.msra.mxu1 %v8284_v37  ;;  %v5867_v37 = vsub.s32 0, %v5866_v30 }
 0x1fe   : > { %5823 = vmatmul.mubr.bf16.gmra.mrb[32].mxu0 %v10034_v34  ;;  %v8285_v34 = vld [vmem:[%s10548_s5 + $0x58] sm:$0xff]  }
 0x1ff   : > { %5832 = vmatprep.mubr.bf16.mxu0 %v10075_v47  ;;  %v8286_v47 = vld [vmem:[%s10548_s5 + $0x18] sm:$0xff]   ;;  %7158 = vmatprep.subr.bf16.mxu1 %v8285_v34 }
 0x200   : > { %7159 = vmatpush3.bf16.msra.mxu1 %v8286_v47  ;;  %v5863_v47 = vld [vmem:[%s10547_s4] sm:$0x3] }
 0x206   : > { %5833 = vmatmul.mubr.bf16.gmra.mrb[36].mxu0 %v10079_v39  ;;  %v8287_v39 = vld [vmem:[%s10548_s5 + $0x60] sm:$0xff]  }
 0x207   : > { %7160 = vmatprep.subr.bf16.mxu1 %v8287_v39  ;;  %v5871_v39 = vsub.s32 1, %v5866_v30 }
 0x208   : > { %7161 = vmatpush3.bf16.msra.mxu1 %v8288_v7  ;;  %v10477_v7 = vrot.slane %v5863_v47, %v5867_v37 }
 0x209   : > { %7162 = vmatprep.subr.bf16.mxu1 %v8289_v12  ;;  %v10479_v12 = vrot.slane %v5863_v47, %v5871_v39 }
 0x20c   : > { %7163 = vmatpush3.bf16.msra.mxu1 %v8290_v13 }
 0x20d   : > { %7164 = vmatprep.subr.bf16.mxu1 %v8291_v15 }
 0x210   : > { %7165 = vmatpush3.bf16.msra.mxu1 %v8292_v4 }
 0x211   : > { %7166 = vmatprep.subr.bf16.mxu1 %v8293_v52 }
 0x214   : > { %7167 = vmatpush3.bf16.msra.mxu1 %v8294_v59 }
 0x239   : > { %v2383_v29 = vpop.f32.mrb[0].mxu0 }
 0x23a   : > { %v2385_v5 = vpop.f32.mrb[1].mxu0 }
 0x23b   : > { %v2387_v48 = vpop.f32.mrb[2].mxu0 }
 0x23c   : > { %v2389_v21 = vpop.f32.mrb[3].mxu0 }
 0x241   : > { %v2393_v40 = vpop.f32.mrb[4].mxu0 }
 0x242   : > { %v2395_v28 = vpop.f32.mrb[5].mxu0 }
 0x243   : > { %v2397_v10 = vpop.f32.mrb[6].mxu0 }
 0x244   : > { %v2399_v0 = vpop.f32.mrb[7].mxu0 }
 0x249   : > { %v2403_v22 = vpop.f32.mrb[8].mxu0 }
 0x24a   : > { %v2405_v25 = vpop.f32.mrb[9].mxu0 }
 0x24b   : > { %v2407_v20 = vpop.f32.mrb[10].mxu0 }
 0x24c   : > { %v2409_v43 = vpop.f32.mrb[11].mxu0 }
 0x251   : > { %v2413_v45 = vpop.f32.mrb[12].mxu0 }
 0x252   : > { %v2415_v32 = vpop.f32.mrb[13].mxu0 }
 0x253   : > { %v2417_v6 = vpop.f32.mrb[14].mxu0 }
 0x254   : > { %v2419_v62 = vpop.f32.mrb[15].mxu0 }
 0x259   : > { %v2423_v31 = vpop.f32.mrb[16].mxu0 }
 0x25a   : > { %v2425_v35 = vpop.f32.mrb[17].mxu0 }
 0x25b   : > { %v2427_v9 = vpop.f32.mrb[18].mxu0 }
 0x25c   : > { %v2429_v55 = vpop.f32.mrb[19].mxu0 }
 0x29a   : > { %v5042_v46 = vpop.f32.mrb[0].mxu1 }
 0x29b   : > { %v7198_v14 = vadd.f32 %v5042_v46, %v2383_v29  ;;  %v5044_v11 = vpop.f32.mrb[1].mxu1 }
 0x29c   : > { %v7200_v33 = vadd.f32 %v5044_v11, %v2385_v5  ;;  %v5046_v8 = vpop.f32.mrb[2].mxu1 }
 0x29d   : > { %v7202_v18 = vadd.f32 %v5046_v8, %v2387_v48  ;;  %v5048_v24 = vpop.f32.mrb[3].mxu1 }
 0x29e   : > { %v7204_v23 = vadd.f32 %v5048_v24, %v2389_v21 }
 0x2a2   : > { %v5052_v17 = vpop.f32.mrb[4].mxu1 }
 0x2a3   : > { %v7206_v36 = vadd.f32 %v5052_v17, %v2393_v40  ;;  %v5054_v51 = vpop.f32.mrb[5].mxu1 }
 0x2a4   : > { %v7208_v54 = vadd.f32 %v5054_v51, %v2395_v28  ;;  %v5056_v26 = vpop.f32.mrb[6].mxu1 }
 0x2a5   : > { %v7210_v19 = vadd.f32 %v5056_v26, %v2397_v10  ;;  %v5058_v42 = vpop.f32.mrb[7].mxu1 }
 0x2a6   : > { %v7212_v61 = vadd.f32 %v5058_v42, %v2399_v0 }
 0x2aa   : > { %v5062_v3 = vpop.f32.mrb[8].mxu1 }
 0x2ab   : > { %v10458_v53 = vadd.f32 %v5062_v3, %v2403_v22  ;;  %v5064_v49 = vpop.f32.mrb[9].mxu1 }
 0x2ac   : > { %v10460_v57 = vadd.f32 %v5064_v49, %v2405_v25  ;;  %v5066_v44 = vpop.f32.mrb[10].mxu1 }
 0x2ad   : > { %v10462_v50 = vadd.f32 %v5066_v44, %v2407_v20  ;;  %v5068_v58 = vpop.f32.mrb[11].mxu1 }
 0x2ae   : > { %v10464_v56 = vadd.f32 %v5068_v58, %v2409_v43 }
 0x2b2   : > { %v5072_v1 = vpop.f32.mrb[12].mxu1 }
 0x2b3   : > { %v10466_v38 = vadd.f32 %v5072_v1, %v2413_v45  ;;  %v5074_v27 = vpop.f32.mrb[13].mxu1 }
 0x2b4   : > { %v10468_v60 = vadd.f32 %v5074_v27, %v2415_v32  ;;  %v5076_v63 = vpop.f32.mrb[14].mxu1 }
 0x2b5   : > { %v10470_v16 = vadd.f32 %v5076_v63, %v2417_v6  ;;  %v5078_v41 = vpop.f32.mrb[15].mxu1 }
 0x2b6   : > { %v10472_v34 = vadd.f32 %v5078_v41, %v2419_v62 }
 0x2b9   : > { %v5794_v29 = vpop.f32.mrb[20].mxu0 }
 0x2ba   : > { %v5082_v5 = vpop.f32.mrb[16].mxu1  ;;  %v7199_v48 = vadd.f32 %v7198_v14, %v5794_v29  ;;  %v5796_v21 = vpop.f32.mrb[21].mxu0 }
 0x2bb   : > { %v10481_v13 = vadd.f32 %v5082_v5, %v2423_v31  ;;  %v5084_v15 = vpop.f32.mrb[17].mxu1  ;;  %v7201_v4 = vadd.f32 %v7200_v33, %v5796_v21  ;;  %v5798_v28 = vpop.f32.mrb[22].mxu0 }
 0x2bc   : > { %v10483_v40 = vadd.f32 %v5084_v15, %v2425_v35  ;;  %v5086_v52 = vpop.f32.mrb[18].mxu1  ;;  %v5875_v10 = vadd.f32 %v7199_v48, %v10477_v7  ;;  %v7203_v59 = vadd.f32 %v7202_v18, %v5798_v28  ;;  %v5800_v22 = vpop.f32.mrb[23].mxu0 }
 0x2bd   : > { %v10486_v0 = vadd.f32 %v5086_v52, %v2427_v9  ;;  %v5088_v25 = vpop.f32.mrb[19].mxu1  ;;  %v5876_v20 = vadd.f32 %v7201_v4, %v10479_v12  ;;  %v7205_v43 = vadd.f32 %v7204_v23, %v5800_v22 }
 0x2be   : > { %v10489_v45 = vadd.f32 %v5088_v25, %v2429_v55  ;;  %v5895_v32 = vmul.f32 0.1, %v5875_v10  ;;  %v5877_v6 = vadd.f32 %v7203_v59, %v10477_v7 }
 0x2bf   : > { %v5896_v62 = vmul.f32 0.1, %v5876_v20  ;;  %v5878_v31 = vadd.f32 %v7205_v43, %v10479_v12 }
 0x2c0   : > { %v5897_v35 = vmul.f32 0.1, %v5877_v6  ;;  %v5915_v11 = vmax.f32 %v5875_v10, %v5895_v32 }
 0x2c1   : > { %v5898_v46 = vmul.f32 0.1, %v5878_v31  ;;  %v5804_v14 = vpop.f32.mrb[24].mxu0  ;;  %v5916_v18 = vmax.f32 %v5876_v20, %v5896_v62 }
 0x2c2   : > { %v5917_v33 = vmax.f32 %v5877_v6, %v5897_v35  ;;  %v7207_v9 = vadd.f32 %v7206_v36, %v5804_v14  ;;  %v5806_v8 = vpop.f32.mrb[25].mxu0 }
 0x2c3   : > { %v5918_v24 = vmax.f32 %v5878_v31, %v5898_v46  ;;  %v7209_v17 = vadd.f32 %v7208_v54, %v5806_v8  ;;  %v5808_v51 = vpop.f32.mrb[26].mxu0 }
 0x2c4   : > { %v5935_v23 = vpack.c.bf16 %v5917_v33, %v5915_v11  ;;  %v5879_v55 = vadd.f32 %v7207_v9, %v10477_v7  ;;  %v7211_v26 = vadd.f32 %v7210_v19, %v5808_v51  ;;  %v5810_v42 = vpop.f32.mrb[27].mxu0 }
 0x2c5   : > { %v5880_v3 = vadd.f32 %v7209_v17, %v10479_v12  ;;  %v7213_v49 = vadd.f32 %v7212_v61, %v5810_v42  ;;  %v5936_v44 = vpack.c.bf16 %v5918_v24, %v5916_v18 }
 0x2c6   : > { %v5899_v58 = vmul.f32 0.1, %v5879_v55  ;;  %v5881_v2 = vadd.f32 %v7211_v26, %v10477_v7 }
 0x2c7   : > { %v5900_v30 = vmul.f32 0.1, %v5880_v3  ;;  %v5882_v36 = vadd.f32 %v7213_v49, %v10479_v12  ;;  %6112 = vmatprep.mubr.bf16.mxu1 %v5936_v44 }
 0x2c8   : > { %v5901_v1 = vmul.f32 0.1, %v5881_v2  ;;  %6113 = vmatmul.mubr.bf16.vlgmr.msra.gmra.mrb[20].mxu1 %v5935_v23  ;;  %v5919_v63 = vmax.f32 %v5879_v55, %v5899_v58 }
 0x2c9   : > { %v5902_v54 = vmul.f32 0.1, %v5882_v36  ;;  %v5814_v27 = vpop.f32.mrb[28].mxu0  ;;  %v5920_v47 = vmax.f32 %v5880_v3, %v5900_v30 }
 0x2ca   : > { %v5921_v41 = vmax.f32 %v5881_v2, %v5901_v1  ;;  %v7215_v19 = vadd.f32 %v10458_v53, %v5814_v27  ;;  %v5816_v37 = vpop.f32.mrb[29].mxu0 }
 0x2cb   : > { %v5922_v39 = vmax.f32 %v5882_v36, %v5902_v54  ;;  %v7217_v61 = vadd.f32 %v10460_v57, %v5816_v37  ;;  %v5818_v29 = vpop.f32.mrb[30].mxu0 }
 0x2cc   : > { %v5883_v5 = vadd.f32 %v7215_v19, %v10477_v7  ;;  %v7219_v48 = vadd.f32 %v10462_v50, %v5818_v29  ;;  %v5820_v21 = vpop.f32.mrb[31].mxu0  ;;  %v5937_v15 = vpack.c.bf16 %v5921_v41, %v5919_v63 }
 0x2cd   : > { %v5884_v4 = vadd.f32 %v7217_v61, %v10479_v12  ;;  %v7221_v28 = vadd.f32 %v10464_v56, %v5820_v21  ;;  %v5938_v52 = vpack.c.bf16 %v5922_v39, %v5920_v47 }
 0x2ce   : > { %v5903_v10 = vmul.f32 0.1, %v5883_v5  ;;  %v5885_v53 = vadd.f32 %v7219_v48, %v10477_v7 }
 0x2cf   : > { %v5904_v59 = vmul.f32 0.1, %v5884_v4  ;;  %v5886_v22 = vadd.f32 %v7221_v28, %v10479_v12  ;;  %6120 = vmatprep.mubr.bf16.mxu1 %v5938_v52 }
 0x2d0   : > { %v5905_v57 = vmul.f32 0.1, %v5885_v53  ;;  %6121 = vmatmul.mubr.bf16.gmra.mrb[24].mxu1 %v5937_v15  ;;  %v5923_v43 = vmax.f32 %v5883_v5, %v5903_v10 }
 0x2d1   : > { %v5906_v25 = vmul.f32 0.1, %v5886_v22  ;;  %v5824_v20 = vpop.f32.mrb[32].mxu0  ;;  %v5924_v62 = vmax.f32 %v5884_v4, %v5904_v59 }
 0x2d2   : > { %v5925_v50 = vmax.f32 %v5885_v53, %v5905_v57  ;;  %v7223_v32 = vadd.f32 %v10466_v38, %v5824_v20  ;;  %v5826_v6 = vpop.f32.mrb[33].mxu0 }
 0x2d3   : > { %v5926_v31 = vmax.f32 %v5886_v22, %v5906_v25  ;;  %v7225_v56 = vadd.f32 %v10468_v60, %v5826_v6  ;;  %v5828_v35 = vpop.f32.mrb[34].mxu0 }
 0x2d4   : > { %v5887_v46 = vadd.f32 %v7223_v32, %v10477_v7  ;;  %v7227_v14 = vadd.f32 %v10470_v16, %v5828_v35  ;;  %v5830_v11 = vpop.f32.mrb[35].mxu0  ;;  %v5939_v33 = vpack.c.bf16 %v5925_v50, %v5923_v43 }
 0x2d5   : > { %v5888_v9 = vadd.f32 %v7225_v56, %v10479_v12  ;;  %v7229_v8 = vadd.f32 %v10472_v34, %v5830_v11  ;;  %v5940_v18 = vpack.c.bf16 %v5926_v31, %v5924_v62 }
 0x2d6   : > { %v5907_v24 = vmul.f32 0.1, %v5887_v46  ;;  %v5889_v38 = vadd.f32 %v7227_v14, %v10477_v7 }
 0x2d7   : > { %v5908_v17 = vmul.f32 0.1, %v5888_v9  ;;  %v5890_v51 = vadd.f32 %v7229_v8, %v10479_v12  ;;  %6128 = vmatprep.mubr.bf16.mxu1 %v5940_v18 }
 0x2d8   : > { %v5909_v60 = vmul.f32 0.1, %v5889_v38  ;;  %6129 = vmatmul.mubr.bf16.gmra.mrb[28].mxu1 %v5939_v33  ;;  %v5927_v26 = vmax.f32 %v5887_v46, %v5907_v24 }
 0x2d9   : > { %v5910_v23 = vmul.f32 0.1, %v5890_v51  ;;  %v5834_v55 = vpop.f32.mrb[36].mxu0  ;;  %v5928_v49 = vmax.f32 %v5888_v9, %v5908_v17 }
 0x2da   : > { %v5929_v16 = vmax.f32 %v5889_v38, %v5909_v60  ;;  %v7231_v42 = vadd.f32 %v10481_v13, %v5834_v55  ;;  %v5836_v3 = vpop.f32.mrb[37].mxu0 }
 0x2db   : > { %v5930_v44 = vmax.f32 %v5890_v51, %v5910_v23  ;;  %v7233_v34 = vadd.f32 %v10483_v40, %v5836_v3  ;;  %v5838_v58 = vpop.f32.mrb[38].mxu0 }
 0x2dc   : > { %v5891_v2 = vadd.f32 %v7231_v42, %v10477_v7  ;;  %v7235_v30 = vadd.f32 %v10486_v0, %v5838_v58  ;;  %v5840_v36 = vpop.f32.mrb[39].mxu0  ;;  %v5941_v1 = vpack.c.bf16 %v5929_v16, %v5927_v26 }
 0x2dd   : > { %v5892_v54 = vadd.f32 %v7233_v34, %v10479_v12  ;;  %v7237_v27 = vadd.f32 %v10489_v45, %v5840_v36  ;;  %v5942_v63 = vpack.c.bf16 %v5930_v44, %v5928_v49 }
 0x2de   : > { %v5911_v41 = vmul.f32 0.1, %v5891_v2  ;;  %v5893_v13 = vadd.f32 %v7235_v30, %v10477_v7  ;;  %v7133_v7 = vld [vmem:[%s10549_s6] ss:$0 sm:$0xff] }
 0x2df   : > { %v5912_v19 = vmul.f32 0.1, %v5892_v54  ;;  %v5894_v37 = vadd.f32 %v7237_v27, %v10479_v12  ;;  %6136 = vmatprep.mubr.bf16.mxu1 %v5942_v63 }
 0x2e0   : > { %v5913_v40 = vmul.f32 0.1, %v5893_v13  ;;  %6137 = vmatmul.mubr.bf16.gmra.mrb[32].mxu1 %v5941_v1  ;;  %v5931_v39 = vmax.f32 %v5891_v2, %v5911_v41 }
 0x2e1   : > { %v5914_v47 = vmul.f32 0.1, %v5894_v37  ;;  %v5932_v61 = vmax.f32 %v5892_v54, %v5912_v19 }
 0x2e2   : > { %v5933_v0 = vmax.f32 %v5893_v13, %v5913_v40 }
 0x2e3   : > { %v5934_v29 = vmax.f32 %v5894_v37, %v5914_v47 }
 0x2e4   : > { %v5943_v5 = vpack.c.bf16 %v5933_v0, %v5931_v39 }
 0x2e5   : > { %v5944_v48 = vpack.c.bf16 %v5934_v29, %v5932_v61 }
 0x2e7   : > { %6144 = vmatprep.mubr.bf16.mxu1 %v5944_v48 }
 0x2e8   : > { %6145 = vmatmul.mubr.bf16.gmra.mrb[36].mxu1 %v5943_v5 }
 0x39b   : > { %v7168_v45 = vpop.f32.mrb[20].mxu1 }
 0x39c   : > { %v7169_v21 = vpop.f32.mrb[21].mxu1 }
 0x39d   : > { %v7170_v12 = vadd.f32 %v7169_v21, %v7168_v45  ;;  %v7171_v15 = vpop.f32.mrb[22].mxu1 }
 0x39e   : > { %v7172_v4 = vpop.f32.mrb[23].mxu1 }
 0x39f   : > { %v6115_v28 = vadd.f32 %v7170_v12, %v7133_v7  ;;  %v7173_v52 = vadd.f32 %v7172_v4, %v7171_v15 }
 0x3a1   : > { %6153 = vst [vmem:[%s10528_s15] sm:$0xff] %v6115_v28  ;;  %v6118_v10 = vadd.f32 %v7173_v52, %v7133_v7 }
 0x3a3   : > { %6154 = vst [vmem:[%s10528_s15 + $0x8] sm:$0xff] %v6118_v10  ;;  %v7174_v53 = vpop.f32.mrb[24].mxu1 }
 0x3a4   : > { %v7175_v59 = vpop.f32.mrb[25].mxu1 }
 0x3a5   : > { %v7176_v22 = vadd.f32 %v7175_v59, %v7174_v53  ;;  %v7177_v57 = vpop.f32.mrb[26].mxu1 }
 0x3a6   : > { %v7178_v25 = vpop.f32.mrb[27].mxu1 }
 0x3a7   : > { %v6123_v20 = vadd.f32 %v7176_v22, %v7133_v7  ;;  %v7179_v43 = vadd.f32 %v7178_v25, %v7177_v57 }
 0x3a9   : > { %6155 = vst [vmem:[%s10528_s15 + $0x10] sm:$0xff] %v6123_v20  ;;  %v6126_v50 = vadd.f32 %v7179_v43, %v7133_v7 }
 0x3ab   : > { %6156 = vst [vmem:[%s10528_s15 + $0x18] sm:$0xff] %v6126_v50  ;;  %v7180_v32 = vpop.f32.mrb[28].mxu1 }
 0x3ac   : > { %v7181_v6 = vpop.f32.mrb[29].mxu1 }
 0x3ad   : > { %v7182_v62 = vadd.f32 %v7181_v6, %v7180_v32  ;;  %v7183_v31 = vpop.f32.mrb[30].mxu1 }
 0x3ae   : > { %v7184_v56 = vpop.f32.mrb[31].mxu1 }
 0x3af   : > { %v6131_v35 = vadd.f32 %v7182_v62, %v7133_v7  ;;  %v7185_v46 = vadd.f32 %v7184_v56, %v7183_v31 }
 0x3b1   : > { %6157 = vst [vmem:[%s10528_s15 + $0x20] sm:$0xff] %v6131_v35  ;;  %v6134_v14 = vadd.f32 %v7185_v46, %v7133_v7 }
 0x3b3   : > { %6158 = vst [vmem:[%s10528_s15 + $0x28] sm:$0xff] %v6134_v14  ;;  %v7186_v11 = vpop.f32.mrb[32].mxu1 }
 0x3b4   : > { %v7187_v33 = vpop.f32.mrb[33].mxu1 }
 0x3b5   : > { %v7188_v9 = vadd.f32 %v7187_v33, %v7186_v11  ;;  %v7189_v8 = vpop.f32.mrb[34].mxu1 }
 0x3b6   : > { %v7190_v18 = vpop.f32.mrb[35].mxu1 }
 0x3b7   : > { %v6139_v24 = vadd.f32 %v7188_v9, %v7133_v7  ;;  %v7191_v38 = vadd.f32 %v7190_v18, %v7189_v8 }
 0x3b9   : > { %6159 = vst [vmem:[%s10528_s15 + $0x30] sm:$0xff] %v6139_v24  ;;  %v6142_v17 = vadd.f32 %v7191_v38, %v7133_v7 }
 0x3bb   : > { %6160 = vst [vmem:[%s10528_s15 + $0x38] sm:$0xff] %v6142_v17  ;;  %v7192_v51 = vpop.f32.mrb[36].mxu1 }
 0x3bc   : > { %v7193_v60 = vpop.f32.mrb[37].mxu1 }
 0x3bd   : > { %v7194_v23 = vadd.f32 %v7193_v60, %v7192_v51  ;;  %v7195_v55 = vpop.f32.mrb[38].mxu1 }
 0x3be   : > { %v7196_v26 = vpop.f32.mrb[39].mxu1 }
 0x3bf   : > { %v6147_v16 = vadd.f32 %v7194_v23, %v7133_v7  ;;  %v7197_v42 = vadd.f32 %v7196_v26, %v7195_v55 }
 0x3c1   : > { %6161 = vst [vmem:[%s10528_s15 + $0x40] sm:$0xff] %v6147_v16  ;;  %v6150_v3 = vadd.f32 %v7197_v42, %v7133_v7 }
 0x3c3   : > { %6162 = vst [vmem:[%s10528_s15 + $0x48] sm:$0xff] %v6150_v3 }
 0x3c4 PF: > { %s17_s24 = sadd.s32 1, %s8311_s24  }
 0x3c5   : > { %p14_p4 = scmp.ge.s32.totalorder %s17_s24, 4  }
 0x3c7   :  { %16 = sbr.rel (!%p14_p4) target bundleno = 1 (0x1), region = 97 }

</bundles_post_ra>
